<compile_context>
chip_gen: v5e
topology: v5e:2x2
jax: 0.10.0
libtpu: 0.0.40
codegen_flags: <defaults>
</compile_context>

<pallas_src>
import functools

import jax
import jax.numpy as jnp
from jax.experimental import pallas as pl
from jax.experimental.pallas import tpu as pltpu


def _rup(x, m):
    return (x + m - 1) // m * m


# ----------------------------- Pallas kernel ------------------------------ #
def _ocr_l1_kernel(x_ref, w_ref, b_ref, out_ref, xc_ref, acc_ref, *, H, W, C, Bb):
    """One grid step = one block of Bb (SR, HR) image pairs.

    x_ref  : (2, Bb, H+2, (W+2)*C) bf16  -- SR stacked over HR, lane-dense DMA
    w_ref  : (9, C, Fp) f32              -- conv taps, F zero-padded to 128
    b_ref  : (1, Fp) f32
    out_ref: (1, 1, Fp) f32              -- per-block, per-feature |.| partial sums
    xc_ref : (2, Bb, W+2, H+2, C) f32    -- compute-layout image scratch
    acc_ref: (2*Bb*H*W, Fp) f32          -- feature accumulator scratch
    """
    M = 2 * Bb * H * W

    # 1) One-time layout conversion: lane-dense DMA layout ((W+2)*C on lanes)
    #    -> compute layout (..., H+2, C).  Only contiguous lane slices and
    #    integer-indexed stores (both cheap / robustly lowered); done once per
    #    block and reused by all 9 taps.
    for w in range(W + 2):
        xc_ref[:, :, w, :, :] = x_ref[:, :, :, w * C:(w + 1) * C].astype(jnp.float32)

    # 2) 3x3 conv as 9 shifted-slice MXU matmuls accumulated into VMEM scratch
    #    (no concatenate copies; accumulator is a scratch ref, not a value chain).
    for k in range(9):
        dy, dx = divmod(k, 3)
        sl = xc_ref[:, :, dx:dx + W, dy:dy + H, :].reshape(M, C)       # (M, C)
        contrib = jnp.dot(sl, w_ref[k], preferred_element_type=jnp.float32)
        if k == 0:
            acc_ref[...] = contrib
        else:
            acc_ref[...] = acc_ref[...] + contrib

    # 3) bias + ReLU, then per-feature partial L1 sums (SR rows vs HR rows).
    feat = jnp.maximum(acc_ref[...] + b_ref[...], 0.0)                 # (M, Fp)
    half = M // 2
    diff = jnp.abs(feat[:half, :] - feat[half:, :])                    # (half, Fp)
    out_ref[...] = jnp.sum(diff, axis=0, keepdims=True)[None]          # (1,1,Fp)


# ------------------------------ JAX glue ---------------------------------- #
def ocr_extractor_loss(sr_nchw, hr_nchw, w9, bias, *, loss_weight=1.0):
    """loss_weight * mean(|conv3x3_relu(SR) - conv3x3_relu(HR)|)."""
    assert sr_nchw.shape == hr_nchw.shape
    B, C, H, W = sr_nchw.shape
    F = w9.shape[-1]
    assert w9.shape == (9, C, F)
    Fp = max(128, _rup(F, 128))            # lane-dense MXU N dim / output stores
    Lw = (W + 2) * C                       # collapsed (W+2, C) lane dim

    def prep(x):                           # NCHW -> NHWC, bf16, 1px zero pad, collapse
        x = jnp.transpose(x, (0, 2, 3, 1)).astype(jnp.bfloat16)
        x = jnp.pad(x, ((0, 0), (1, 1), (1, 1), (0, 0)))
        return x.reshape(B, H + 2, Lw)

    x = jnp.stack([prep(sr_nchw), prep(hr_nchw)], axis=0)   # (2, B, H+2, Lw)

    # Physical VMEM (fallback = 64 MiB, the v7x per-TensorCore size).
    try:
        phys_vmem = int(pltpu.get_tpu_info().vmem_capacity_bytes)
    except Exception:
        phys_vmem = 64 * 2 ** 20

    # Images per grid step, sized from the (8,128)-padded VMEM footprint.
    in_pair = 2 * 2 * _rup(H + 2, 16) * _rup(Lw, 128) * 2        # bf16, 2x double-buffered
    xc_pair = 2 * _rup(W + 2, 1) * _rup(H + 2, 8) * _rup(C, 128) * 4
    acc_pair = 2 * H * W * Fp * 4
    per_pair = in_pair + xc_pair + 3 * acc_pair                  # acc + feat/diff temps
    budget = min(phys_vmem // 3, 24 * 2 ** 20)                   # v7x-conscious
    Bb = int(max(1, min(B, budget // max(per_pair, 1))))
    nblk = -(-B // Bb)
    Bp = nblk * Bb
    if Bp != B:                                                  # zero images add 0 to the loss
        x = jnp.pad(x, ((0, 0), (0, Bp - B), (0, 0), (0, 0)))

    w_p = jnp.pad(w9.astype(jnp.float32), ((0, 0), (0, 0), (0, Fp - F)))
    b_p = jnp.pad(bias.astype(jnp.float32).reshape(1, F), ((0, 0), (0, Fp - F)))

    need = per_pair * Bb + 9 * _rup(C, 8) * Fp * 4 + 4 * 2 ** 20
    vmem_limit = int(min(max(need, 32 * 2 ** 20), phys_vmem * 7 // 8))

    kernel = functools.partial(_ocr_l1_kernel, H=H, W=W, C=C, Bb=Bb)
    partials = pl.pallas_call(
        kernel,
        out_shape=jax.ShapeDtypeStruct((nblk, 1, Fp), jnp.float32),
        grid_spec=pltpu.PrefetchScalarGridSpec(
            num_scalar_prefetch=0,
            grid=(nblk,),                                        # one image block / step
            in_specs=[
                pl.BlockSpec((2, Bb, H + 2, Lw), lambda i: (0, i, 0, 0)),
                pl.BlockSpec((9, C, Fp), lambda i: (0, 0, 0)),   # conv weights (F padded)
                pl.BlockSpec((1, Fp), lambda i: (0, 0)),         # bias (F padded)
            ],
            out_specs=pl.BlockSpec((1, 1, Fp), lambda i: (i, 0, 0)),
            scratch_shapes=[
                pltpu.VMEM((2, Bb, W + 2, H + 2, C), jnp.float32),   # compute-layout image
                pltpu.VMEM((2 * Bb * H * W, Fp), jnp.float32),       # feature accumulator
            ],
        ),
        compiler_params=pltpu.CompilerParams(
            dimension_semantics=("parallel",),   # independent blocks -> 2 TCs on v7x
            vmem_limit_bytes=vmem_limit),
    )(x, w_p, b_p)

    # Final reduction + mean scaling (original, unpadded element count).
    return (loss_weight / float(B * H * W * F)) * jnp.sum(partials)


# --------------------------- pure-JAX reference ---------------------------- #
def _reference_loss(sr_nchw, hr_nchw, w9, bias, loss_weight):
    """Same math, plain XLA, exact f32 elementwise (inputs cast to bf16 like the kernel)."""
    B, C, H, W = sr_nchw.shape
    F = w9.shape[-1]
    w9f = w9.astype(jnp.float32)

    def feats(x_nchw):
        x = jnp.transpose(x_nchw, (0, 2, 3, 1)).astype(jnp.bfloat16).astype(jnp.float32)
        xp = jnp.pad(x, ((0, 0), (1, 1), (1, 1), (0, 0)))
        acc = jnp.zeros((B, H, W, F), jnp.float32)
        for k in range(9):
            dy, dx = divmod(k, 3)
            sl = xp[:, dy:dy + H, dx:dx + W, :]                   # (B,H,W,C)
            acc = acc + jnp.sum(
                sl[..., :, None] * w9f[k][None, None, None, :, :], axis=-2)
        return jnp.maximum(acc + bias.astype(jnp.float32)[None, None, None, :], 0.0)

    return loss_weight * jnp.mean(jnp.abs(feats(sr_nchw) - feats(hr_nchw)))


# ------------------------------- demo ------------------------------------- #
if __name__ == "__main__":
    B, C, H, W = 2, 3, 16, 16        # images (NCHW, like the PyTorch module)
    FEAT = 32                        # synthetic OCR feature channels
    loss_weight = 1.0

    key = jax.random.PRNGKey(0)
    k_sr, k_hr, k_w, k_b = jax.random.split(key, 4)

    sr = jax.random.uniform(k_sr, (B, C, H, W), dtype=jnp.float32)   # in [0,1]
    hr = jax.random.uniform(k_hr, (B, C, H, W), dtype=jnp.float32)

    # Deterministic synthetic feature-extractor parameters (3x3 conv, F=32).
    # Layout: w9[k, c, f] with k = 3*dy + dx.
    w9 = jax.random.normal(k_w, (9, C, FEAT), dtype=jnp.float32) * 0.1
    b = jax.random.normal(k_b, (FEAT,), dtype=jnp.float32) * 0.01

    loss = ocr_extractor_loss(sr, hr, w9, b, loss_weight=loss_weight)
    loss = jax.block_until_ready(loss)

    ref_loss = jax.block_until_ready(_reference_loss(sr, hr, w9, b, loss_weight))
    assert jnp.allclose(loss, ref_loss, rtol=5e-4, atol=1e-5), (loss, ref_loss)

    print("KERNEL_OK")
</pallas_src>

<mosaic_0001>
module attributes {stable_mosaic.version = 11 : i64} {
  func.func @_ocr_l1_kernel(%arg0: i32, %arg1: memref<2x2x18x54xbf16, #tpu.memory_space<vmem>>, %arg2: memref<9x3x128xf32, #tpu.memory_space<vmem>>, %arg3: memref<1x128xf32, #tpu.memory_space<vmem>>, %arg4: memref<1x1x128xf32, #tpu.memory_space<vmem>>, %arg5: memref<2x2x18x18x3xf32, #tpu.memory_space<vmem>>, %arg6: memref<1024x128xf32, #tpu.memory_space<vmem>>) attributes {dimension_semantics = [#tpu.dimension_semantics<parallel>], iteration_bounds = array<i64: 1>, scalar_prefetch = 0 : i64, scratch_operands = 2 : i64, tpu.core_type = #tpu.core_type<tc>, window_params = [{transform_indices = @transform_0, window_bounds = array<i64: 2, 2, 18, 54>}, {pipeline_mode = #tpu.pipeline_mode<synchronous>, transform_indices = @transform_1, window_bounds = array<i64: 9, 3, 128>}, {pipeline_mode = #tpu.pipeline_mode<synchronous>, transform_indices = @transform_2, window_bounds = array<i64: 1, 128>}, {transform_indices = @transform_3, window_bounds = array<i64: 1, 1, 128>}]} {
    %c0 = arith.constant 0 : index
    %c0_0 = arith.constant 0 : index
    %c0_1 = arith.constant 0 : index
    %c0_2 = arith.constant 0 : index
    %0 = vector.load %arg1[%c0, %c0_0, %c0_1, %c0_2] : memref<2x2x18x54xbf16, #tpu.memory_space<vmem>>, vector<2x2x18x3xbf16>
    %1 = arith.extf %0 : vector<2x2x18x3xbf16> to vector<2x2x18x3xf32>
    %c0_3 = arith.constant 0 : index
    %c0_4 = arith.constant 0 : index
    %c0_5 = arith.constant 0 : index
    %c0_6 = arith.constant 0 : index
    %c0_7 = arith.constant 0 : index
    %2 = vector.load %arg5[%c0_3, %c0_4, %c0_5, %c0_6, %c0_7] : memref<2x2x18x18x3xf32, #tpu.memory_space<vmem>>, vector<2x2x1x18x3xf32>
    %3 = vector.shape_cast %2 : vector<2x2x1x18x3xf32> to vector<2x2x18x3xf32>
    %4 = vector.shape_cast %1 : vector<2x2x18x3xf32> to vector<2x2x1x18x3xf32>
    tpu.vector_store %arg5[%c0_3, %c0_4, %c0_5, %c0_6, %c0_7], %4 {strides = array<i32>} : memref<2x2x18x18x3xf32, #tpu.memory_space<vmem>>, vector<2x2x1x18x3xf32>,
    %c0_8 = arith.constant 0 : index
    %c0_9 = arith.constant 0 : index
    %c0_10 = arith.constant 0 : index
    %c3 = arith.constant 3 : index
    %5 = vector.load %arg1[%c0_8, %c0_9, %c0_10, %c3] : memref<2x2x18x54xbf16, #tpu.memory_space<vmem>>, vector<2x2x18x3xbf16>
    %6 = arith.extf %5 : vector<2x2x18x3xbf16> to vector<2x2x18x3xf32>
    %c0_11 = arith.constant 0 : index
    %c0_12 = arith.constant 0 : index
    %c1 = arith.constant 1 : index
    %c0_13 = arith.constant 0 : index
    %c0_14 = arith.constant 0 : index
    %7 = vector.load %arg5[%c0_11, %c0_12, %c1, %c0_13, %c0_14] : memref<2x2x18x18x3xf32, #tpu.memory_space<vmem>>, vector<2x2x1x18x3xf32>
    %8 = vector.shape_cast %7 : vector<2x2x1x18x3xf32> to vector<2x2x18x3xf32>
    %9 = vector.shape_cast %6 : vector<2x2x18x3xf32> to vector<2x2x1x18x3xf32>
    tpu.vector_store %arg5[%c0_11, %c0_12, %c1, %c0_13, %c0_14], %9 {strides = array<i32>} : memref<2x2x18x18x3xf32, #tpu.memory_space<vmem>>, vector<2x2x1x18x3xf32>,
    %c0_15 = arith.constant 0 : index
    %c0_16 = arith.constant 0 : index
    %c0_17 = arith.constant 0 : index
    %c6 = arith.constant 6 : index
    %10 = vector.load %arg1[%c0_15, %c0_16, %c0_17, %c6] : memref<2x2x18x54xbf16, #tpu.memory_space<vmem>>, vector<2x2x18x3xbf16>
    %11 = arith.extf %10 : vector<2x2x18x3xbf16> to vector<2x2x18x3xf32>
    %c0_18 = arith.constant 0 : index
    %c0_19 = arith.constant 0 : index
    %c2 = arith.constant 2 : index
    %c0_20 = arith.constant 0 : index
    %c0_21 = arith.constant 0 : index
    %12 = vector.load %arg5[%c0_18, %c0_19, %c2, %c0_20, %c0_21] : memref<2x2x18x18x3xf32, #tpu.memory_space<vmem>>, vector<2x2x1x18x3xf32>
    %13 = vector.shape_cast %12 : vector<2x2x1x18x3xf32> to vector<2x2x18x3xf32>
    %14 = vector.shape_cast %11 : vector<2x2x18x3xf32> to vector<2x2x1x18x3xf32>
    tpu.vector_store %arg5[%c0_18, %c0_19, %c2, %c0_20, %c0_21], %14 {strides = array<i32>} : memref<2x2x18x18x3xf32, #tpu.memory_space<vmem>>, vector<2x2x1x18x3xf32>,
    %c0_22 = arith.constant 0 : index
    %c0_23 = arith.constant 0 : index
    %c0_24 = arith.constant 0 : index
    %c9 = arith.constant 9 : index
    %15 = vector.load %arg1[%c0_22, %c0_23, %c0_24, %c9] : memref<2x2x18x54xbf16, #tpu.memory_space<vmem>>, vector<2x2x18x3xbf16>
    %16 = arith.extf %15 : vector<2x2x18x3xbf16> to vector<2x2x18x3xf32>
    %c0_25 = arith.constant 0 : index
    %c0_26 = arith.constant 0 : index
    %c3_27 = arith.constant 3 : index
    %c0_28 = arith.constant 0 : index
    %c0_29 = arith.constant 0 : index
    %17 = vector.load %arg5[%c0_25, %c0_26, %c3_27, %c0_28, %c0_29] : memref<2x2x18x18x3xf32, #tpu.memory_space<vmem>>, vector<2x2x1x18x3xf32>
    %18 = vector.shape_cast %17 : vector<2x2x1x18x3xf32> to vector<2x2x18x3xf32>
    %19 = vector.shape_cast %16 : vector<2x2x18x3xf32> to vector<2x2x1x18x3xf32>
    tpu.vector_store %arg5[%c0_25, %c0_26, %c3_27, %c0_28, %c0_29], %19 {strides = array<i32>} : memref<2x2x18x18x3xf32, #tpu.memory_space<vmem>>, vector<2x2x1x18x3xf32>,
    %c0_30 = arith.constant 0 : index
    %c0_31 = arith.constant 0 : index
    %c0_32 = arith.constant 0 : index
    %c12 = arith.constant 12 : index
    %20 = vector.load %arg1[%c0_30, %c0_31, %c0_32, %c12] : memref<2x2x18x54xbf16, #tpu.memory_space<vmem>>, vector<2x2x18x3xbf16>
    %21 = arith.extf %20 : vector<2x2x18x3xbf16> to vector<2x2x18x3xf32>
    %c0_33 = arith.constant 0 : index
    %c0_34 = arith.constant 0 : index
    %c4 = arith.constant 4 : index
    %c0_35 = arith.constant 0 : index
    %c0_36 = arith.constant 0 : index
    %22 = vector.load %arg5[%c0_33, %c0_34, %c4, %c0_35, %c0_36] : memref<2x2x18x18x3xf32, #tpu.memory_space<vmem>>, vector<2x2x1x18x3xf32>
    %23 = vector.shape_cast %22 : vector<2x2x1x18x3xf32> to vector<2x2x18x3xf32>
    %24 = vector.shape_cast %21 : vector<2x2x18x3xf32> to vector<2x2x1x18x3xf32>
    tpu.vector_store %arg5[%c0_33, %c0_34, %c4, %c0_35, %c0_36], %24 {strides = array<i32>} : memref<2x2x18x18x3xf32, #tpu.memory_space<vmem>>, vector<2x2x1x18x3xf32>,
    %c0_37 = arith.constant 0 : index
    %c0_38 = arith.constant 0 : index
    %c0_39 = arith.constant 0 : index
    %c15 = arith.constant 15 : index
    %25 = vector.load %arg1[%c0_37, %c0_38, %c0_39, %c15] : memref<2x2x18x54xbf16, #tpu.memory_space<vmem>>, vector<2x2x18x3xbf16>
    %26 = arith.extf %25 : vector<2x2x18x3xbf16> to vector<2x2x18x3xf32>
    %c0_40 = arith.constant 0 : index
    %c0_41 = arith.constant 0 : index
    %c5 = arith.constant 5 : index
    %c0_42 = arith.constant 0 : index
    %c0_43 = arith.constant 0 : index
    %27 = vector.load %arg5[%c0_40, %c0_41, %c5, %c0_42, %c0_43] : memref<2x2x18x18x3xf32, #tpu.memory_space<vmem>>, vector<2x2x1x18x3xf32>
    %28 = vector.shape_cast %27 : vector<2x2x1x18x3xf32> to vector<2x2x18x3xf32>
    %29 = vector.shape_cast %26 : vector<2x2x18x3xf32> to vector<2x2x1x18x3xf32>
    tpu.vector_store %arg5[%c0_40, %c0_41, %c5, %c0_42, %c0_43], %29 {strides = array<i32>} : memref<2x2x18x18x3xf32, #tpu.memory_space<vmem>>, vector<2x2x1x18x3xf32>,
    %c0_44 = arith.constant 0 : index
    %c0_45 = arith.constant 0 : index
    %c0_46 = arith.constant 0 : index
    %c18 = arith.constant 18 : index
    %30 = vector.load %arg1[%c0_44, %c0_45, %c0_46, %c18] : memref<2x2x18x54xbf16, #tpu.memory_space<vmem>>, vector<2x2x18x3xbf16>
    %31 = arith.extf %30 : vector<2x2x18x3xbf16> to vector<2x2x18x3xf32>
    %c0_47 = arith.constant 0 : index
    %c0_48 = arith.constant 0 : index
    %c6_49 = arith.constant 6 : index
    %c0_50 = arith.constant 0 : index
    %c0_51 = arith.constant 0 : index
    %32 = vector.load %arg5[%c0_47, %c0_48, %c6_49, %c0_50, %c0_51] : memref<2x2x18x18x3xf32, #tpu.memory_space<vmem>>, vector<2x2x1x18x3xf32>
    %33 = vector.shape_cast %32 : vector<2x2x1x18x3xf32> to vector<2x2x18x3xf32>
    %34 = vector.shape_cast %31 : vector<2x2x18x3xf32> to vector<2x2x1x18x3xf32>
    tpu.vector_store %arg5[%c0_47, %c0_48, %c6_49, %c0_50, %c0_51], %34 {strides = array<i32>} : memref<2x2x18x18x3xf32, #tpu.memory_space<vmem>>, vector<2x2x1x18x3xf32>,
    %c0_52 = arith.constant 0 : index
    %c0_53 = arith.constant 0 : index
    %c0_54 = arith.constant 0 : index
    %c21 = arith.constant 21 : index
    %35 = vector.load %arg1[%c0_52, %c0_53, %c0_54, %c21] : memref<2x2x18x54xbf16, #tpu.memory_space<vmem>>, vector<2x2x18x3xbf16>
    %36 = arith.extf %35 : vector<2x2x18x3xbf16> to vector<2x2x18x3xf32>
    %c0_55 = arith.constant 0 : index
    %c0_56 = arith.constant 0 : index
    %c7 = arith.constant 7 : index
    %c0_57 = arith.constant 0 : index
    %c0_58 = arith.constant 0 : index
    %37 = vector.load %arg5[%c0_55, %c0_56, %c7, %c0_57, %c0_58] : memref<2x2x18x18x3xf32, #tpu.memory_space<vmem>>, vector<2x2x1x18x3xf32>
    %38 = vector.shape_cast %37 : vector<2x2x1x18x3xf32> to vector<2x2x18x3xf32>
    %39 = vector.shape_cast %36 : vector<2x2x18x3xf32> to vector<2x2x1x18x3xf32>
    tpu.vector_store %arg5[%c0_55, %c0_56, %c7, %c0_57, %c0_58], %39 {strides = array<i32>} : memref<2x2x18x18x3xf32, #tpu.memory_space<vmem>>, vector<2x2x1x18x3xf32>,
    %c0_59 = arith.constant 0 : index
    %c0_60 = arith.constant 0 : index
    %c0_61 = arith.constant 0 : index
    %c24 = arith.constant 24 : index
    %40 = vector.load %arg1[%c0_59, %c0_60, %c0_61, %c24] : memref<2x2x18x54xbf16, #tpu.memory_space<vmem>>, vector<2x2x18x3xbf16>
    %41 = arith.extf %40 : vector<2x2x18x3xbf16> to vector<2x2x18x3xf32>
    %c0_62 = arith.constant 0 : index
    %c0_63 = arith.constant 0 : index
    %c8 = arith.constant 8 : index
    %c0_64 = arith.constant 0 : index
    %c0_65 = arith.constant 0 : index
    %42 = vector.load %arg5[%c0_62, %c0_63, %c8, %c0_64, %c0_65] : memref<2x2x18x18x3xf32, #tpu.memory_space<vmem>>, vector<2x2x1x18x3xf32>
    %43 = vector.shape_cast %42 : vector<2x2x1x18x3xf32> to vector<2x2x18x3xf32>
    %44 = vector.shape_cast %41 : vector<2x2x18x3xf32> to vector<2x2x1x18x3xf32>
    tpu.vector_store %arg5[%c0_62, %c0_63, %c8, %c0_64, %c0_65], %44 {strides = array<i32>} : memref<2x2x18x18x3xf32, #tpu.memory_space<vmem>>, vector<2x2x1x18x3xf32>,
    %c0_66 = arith.constant 0 : index
    %c0_67 = arith.constant 0 : index
    %c0_68 = arith.constant 0 : index
    %c27 = arith.constant 27 : index
    %45 = vector.load %arg1[%c0_66, %c0_67, %c0_68, %c27] : memref<2x2x18x54xbf16, #tpu.memory_space<vmem>>, vector<2x2x18x3xbf16>
    %46 = arith.extf %45 : vector<2x2x18x3xbf16> to vector<2x2x18x3xf32>
    %c0_69 = arith.constant 0 : index
    %c0_70 = arith.constant 0 : index
    %c9_71 = arith.constant 9 : index
    %c0_72 = arith.constant 0 : index
    %c0_73 = arith.constant 0 : index
    %47 = vector.load %arg5[%c0_69, %c0_70, %c9_71, %c0_72, %c0_73] : memref<2x2x18x18x3xf32, #tpu.memory_space<vmem>>, vector<2x2x1x18x3xf32>
    %48 = vector.shape_cast %47 : vector<2x2x1x18x3xf32> to vector<2x2x18x3xf32>
    %49 = vector.shape_cast %46 : vector<2x2x18x3xf32> to vector<2x2x1x18x3xf32>
    tpu.vector_store %arg5[%c0_69, %c0_70, %c9_71, %c0_72, %c0_73], %49 {strides = array<i32>} : memref<2x2x18x18x3xf32, #tpu.memory_space<vmem>>, vector<2x2x1x18x3xf32>,
    %c0_74 = arith.constant 0 : index
    %c0_75 = arith.constant 0 : index
    %c0_76 = arith.constant 0 : index
    %c30 = arith.constant 30 : index
    %50 = vector.load %arg1[%c0_74, %c0_75, %c0_76, %c30] : memref<2x2x18x54xbf16, #tpu.memory_space<vmem>>, vector<2x2x18x3xbf16>
    %51 = arith.extf %50 : vector<2x2x18x3xbf16> to vector<2x2x18x3xf32>
    %c0_77 = arith.constant 0 : index
    %c0_78 = arith.constant 0 : index
    %c10 = arith.constant 10 : index
    %c0_79 = arith.constant 0 : index
    %c0_80 = arith.constant 0 : index
    %52 = vector.load %arg5[%c0_77, %c0_78, %c10, %c0_79, %c0_80] : memref<2x2x18x18x3xf32, #tpu.memory_space<vmem>>, vector<2x2x1x18x3xf32>
    %53 = vector.shape_cast %52 : vector<2x2x1x18x3xf32> to vector<2x2x18x3xf32>
    %54 = vector.shape_cast %51 : vector<2x2x18x3xf32> to vector<2x2x1x18x3xf32>
    tpu.vector_store %arg5[%c0_77, %c0_78, %c10, %c0_79, %c0_80], %54 {strides = array<i32>} : memref<2x2x18x18x3xf32, #tpu.memory_space<vmem>>, vector<2x2x1x18x3xf32>,
    %c0_81 = arith.constant 0 : index
    %c0_82 = arith.constant 0 : index
    %c0_83 = arith.constant 0 : index
    %c33 = arith.constant 33 : index
    %55 = vector.load %arg1[%c0_81, %c0_82, %c0_83, %c33] : memref<2x2x18x54xbf16, #tpu.memory_space<vmem>>, vector<2x2x18x3xbf16>
    %56 = arith.extf %55 : vector<2x2x18x3xbf16> to vector<2x2x18x3xf32>
    %c0_84 = arith.constant 0 : index
    %c0_85 = arith.constant 0 : index
    %c11 = arith.constant 11 : index
    %c0_86 = arith.constant 0 : index
    %c0_87 = arith.constant 0 : index
    %57 = vector.load %arg5[%c0_84, %c0_85, %c11, %c0_86, %c0_87] : memref<2x2x18x18x3xf32, #tpu.memory_space<vmem>>, vector<2x2x1x18x3xf32>
    %58 = vector.shape_cast %57 : vector<2x2x1x18x3xf32> to vector<2x2x18x3xf32>
    %59 = vector.shape_cast %56 : vector<2x2x18x3xf32> to vector<2x2x1x18x3xf32>
    tpu.vector_store %arg5[%c0_84, %c0_85, %c11, %c0_86, %c0_87], %59 {strides = array<i32>} : memref<2x2x18x18x3xf32, #tpu.memory_space<vmem>>, vector<2x2x1x18x3xf32>,
    %c0_88 = arith.constant 0 : index
    %c0_89 = arith.constant 0 : index
    %c0_90 = arith.constant 0 : index
    %c36 = arith.constant 36 : index
    %60 = vector.load %arg1[%c0_88, %c0_89, %c0_90, %c36] : memref<2x2x18x54xbf16, #tpu.memory_space<vmem>>, vector<2x2x18x3xbf16>
    %61 = arith.extf %60 : vector<2x2x18x3xbf16> to vector<2x2x18x3xf32>
    %c0_91 = arith.constant 0 : index
    %c0_92 = arith.constant 0 : index
    %c12_93 = arith.constant 12 : index
    %c0_94 = arith.constant 0 : index
    %c0_95 = arith.constant 0 : index
    %62 = vector.load %arg5[%c0_91, %c0_92, %c12_93, %c0_94, %c0_95] : memref<2x2x18x18x3xf32, #tpu.memory_space<vmem>>, vector<2x2x1x18x3xf32>
    %63 = vector.shape_cast %62 : vector<2x2x1x18x3xf32> to vector<2x2x18x3xf32>
    %64 = vector.shape_cast %61 : vector<2x2x18x3xf32> to vector<2x2x1x18x3xf32>
    tpu.vector_store %arg5[%c0_91, %c0_92, %c12_93, %c0_94, %c0_95], %64 {strides = array<i32>} : memref<2x2x18x18x3xf32, #tpu.memory_space<vmem>>, vector<2x2x1x18x3xf32>,
    %c0_96 = arith.constant 0 : index
    %c0_97 = arith.constant 0 : index
    %c0_98 = arith.constant 0 : index
    %c39 = arith.constant 39 : index
    %65 = vector.load %arg1[%c0_96, %c0_97, %c0_98, %c39] : memref<2x2x18x54xbf16, #tpu.memory_space<vmem>>, vector<2x2x18x3xbf16>
    %66 = arith.extf %65 : vector<2x2x18x3xbf16> to vector<2x2x18x3xf32>
    %c0_99 = arith.constant 0 : index
    %c0_100 = arith.constant 0 : index
    %c13 = arith.constant 13 : index
    %c0_101 = arith.constant 0 : index
    %c0_102 = arith.constant 0 : index
    %67 = vector.load %arg5[%c0_99, %c0_100, %c13, %c0_101, %c0_102] : memref<2x2x18x18x3xf32, #tpu.memory_space<vmem>>, vector<2x2x1x18x3xf32>
    %68 = vector.shape_cast %67 : vector<2x2x1x18x3xf32> to vector<2x2x18x3xf32>
    %69 = vector.shape_cast %66 : vector<2x2x18x3xf32> to vector<2x2x1x18x3xf32>
    tpu.vector_store %arg5[%c0_99, %c0_100, %c13, %c0_101, %c0_102], %69 {strides = array<i32>} : memref<2x2x18x18x3xf32, #tpu.memory_space<vmem>>, vector<2x2x1x18x3xf32>,
    %c0_103 = arith.constant 0 : index
    %c0_104 = arith.constant 0 : index
    %c0_105 = arith.constant 0 : index
    %c42 = arith.constant 42 : index
    %70 = vector.load %arg1[%c0_103, %c0_104, %c0_105, %c42] : memref<2x2x18x54xbf16, #tpu.memory_space<vmem>>, vector<2x2x18x3xbf16>
    %71 = arith.extf %70 : vector<2x2x18x3xbf16> to vector<2x2x18x3xf32>
    %c0_106 = arith.constant 0 : index
    %c0_107 = arith.constant 0 : index
    %c14 = arith.constant 14 : index
    %c0_108 = arith.constant 0 : index
    %c0_109 = arith.constant 0 : index
    %72 = vector.load %arg5[%c0_106, %c0_107, %c14, %c0_108, %c0_109] : memref<2x2x18x18x3xf32, #tpu.memory_space<vmem>>, vector<2x2x1x18x3xf32>
    %73 = vector.shape_cast %72 : vector<2x2x1x18x3xf32> to vector<2x2x18x3xf32>
    %74 = vector.shape_cast %71 : vector<2x2x18x3xf32> to vector<2x2x1x18x3xf32>
    tpu.vector_store %arg5[%c0_106, %c0_107, %c14, %c0_108, %c0_109], %74 {strides = array<i32>} : memref<2x2x18x18x3xf32, #tpu.memory_space<vmem>>, vector<2x2x1x18x3xf32>,
    %c0_110 = arith.constant 0 : index
    %c0_111 = arith.constant 0 : index
    %c0_112 = arith.constant 0 : index
    %c45 = arith.constant 45 : index
    %75 = vector.load %arg1[%c0_110, %c0_111, %c0_112, %c45] : memref<2x2x18x54xbf16, #tpu.memory_space<vmem>>, vector<2x2x18x3xbf16>
    %76 = arith.extf %75 : vector<2x2x18x3xbf16> to vector<2x2x18x3xf32>
    %c0_113 = arith.constant 0 : index
    %c0_114 = arith.constant 0 : index
    %c15_115 = arith.constant 15 : index
    %c0_116 = arith.constant 0 : index
    %c0_117 = arith.constant 0 : index
    %77 = vector.load %arg5[%c0_113, %c0_114, %c15_115, %c0_116, %c0_117] : memref<2x2x18x18x3xf32, #tpu.memory_space<vmem>>, vector<2x2x1x18x3xf32>
    %78 = vector.shape_cast %77 : vector<2x2x1x18x3xf32> to vector<2x2x18x3xf32>
    %79 = vector.shape_cast %76 : vector<2x2x18x3xf32> to vector<2x2x1x18x3xf32>
    tpu.vector_store %arg5[%c0_113, %c0_114, %c15_115, %c0_116, %c0_117], %79 {strides = array<i32>} : memref<2x2x18x18x3xf32, #tpu.memory_space<vmem>>, vector<2x2x1x18x3xf32>,
    %c0_118 = arith.constant 0 : index
    %c0_119 = arith.constant 0 : index
    %c0_120 = arith.constant 0 : index
    %c48 = arith.constant 48 : index
    %80 = vector.load %arg1[%c0_118, %c0_119, %c0_120, %c48] : memref<2x2x18x54xbf16, #tpu.memory_space<vmem>>, vector<2x2x18x3xbf16>
    %81 = arith.extf %80 : vector<2x2x18x3xbf16> to vector<2x2x18x3xf32>
    %c0_121 = arith.constant 0 : index
    %c0_122 = arith.constant 0 : index
    %c16 = arith.constant 16 : index
    %c0_123 = arith.constant 0 : index
    %c0_124 = arith.constant 0 : index
    %82 = vector.load %arg5[%c0_121, %c0_122, %c16, %c0_123, %c0_124] : memref<2x2x18x18x3xf32, #tpu.memory_space<vmem>>, vector<2x2x1x18x3xf32>
    %83 = vector.shape_cast %82 : vector<2x2x1x18x3xf32> to vector<2x2x18x3xf32>
    %84 = vector.shape_cast %81 : vector<2x2x18x3xf32> to vector<2x2x1x18x3xf32>
    tpu.vector_store %arg5[%c0_121, %c0_122, %c16, %c0_123, %c0_124], %84 {strides = array<i32>} : memref<2x2x18x18x3xf32, #tpu.memory_space<vmem>>, vector<2x2x1x18x3xf32>,
    %c0_125 = arith.constant 0 : index
    %c0_126 = arith.constant 0 : index
    %c0_127 = arith.constant 0 : index
    %c51 = arith.constant 51 : index
    %85 = vector.load %arg1[%c0_125, %c0_126, %c0_127, %c51] : memref<2x2x18x54xbf16, #tpu.memory_space<vmem>>, vector<2x2x18x3xbf16>
    %86 = arith.extf %85 : vector<2x2x18x3xbf16> to vector<2x2x18x3xf32>
    %c0_128 = arith.constant 0 : index
    %c0_129 = arith.constant 0 : index
    %c17 = arith.constant 17 : index
    %c0_130 = arith.constant 0 : index
    %c0_131 = arith.constant 0 : index
    %87 = vector.load %arg5[%c0_128, %c0_129, %c17, %c0_130, %c0_131] : memref<2x2x18x18x3xf32, #tpu.memory_space<vmem>>, vector<2x2x1x18x3xf32>
    %88 = vector.shape_cast %87 : vector<2x2x1x18x3xf32> to vector<2x2x18x3xf32>
    %89 = vector.shape_cast %86 : vector<2x2x18x3xf32> to vector<2x2x1x18x3xf32>
    tpu.vector_store %arg5[%c0_128, %c0_129, %c17, %c0_130, %c0_131], %89 {strides = array<i32>} : memref<2x2x18x18x3xf32, #tpu.memory_space<vmem>>, vector<2x2x1x18x3xf32>,
    %c0_132 = arith.constant 0 : index
    %c0_133 = arith.constant 0 : index
    %c0_134 = arith.constant 0 : index
    %c0_135 = arith.constant 0 : index
    %c0_136 = arith.constant 0 : index
    %90 = vector.load %arg5[%c0_132, %c0_133, %c0_134, %c0_135, %c0_136] : memref<2x2x18x18x3xf32, #tpu.memory_space<vmem>>, vector<2x2x16x16x3xf32>
    %91 = vector.shape_cast %90 : vector<2x2x16x16x3xf32> to vector<1024x3xf32>
    %c0_137 = arith.constant 0 : index
    %c0_138 = arith.constant 0 : index
    %c0_139 = arith.constant 0 : index
    %92 = vector.load %arg2[%c0_137, %c0_138, %c0_139] : memref<9x3x128xf32, #tpu.memory_space<vmem>>, vector<1x3x128xf32>
    %93 = vector.shape_cast %92 : vector<1x3x128xf32> to vector<3x128xf32>
    %cst = arith.constant dense<0.000000e+00> : vector<1024x128xf32>
    %94 = tpu.matmul %91, %93, %cst {dimension_numbers = #tpu.dot_dimension_numbers<[1], [0], [0], [1], [0, 0, 1, 1], [], []>} : vector<1024x3xf32>, vector<3x128xf32>, vector<1024x128xf32> -> vector<1024x128xf32>
    %c0_140 = arith.constant 0 : index
    %c0_141 = arith.constant 0 : index
    %95 = vector.load %arg6[%c0_140, %c0_141] : memref<1024x128xf32, #tpu.memory_space<vmem>>, vector<1024x128xf32>
    tpu.vector_store %arg6[%c0_140, %c0_141], %94 {strides = array<i32>} : memref<1024x128xf32, #tpu.memory_space<vmem>>, vector<1024x128xf32>,
    %c0_142 = arith.constant 0 : index
    %c0_143 = arith.constant 0 : index
    %c1_144 = arith.constant 1 : index
    %c0_145 = arith.constant 0 : index
    %c0_146 = arith.constant 0 : index
    %96 = vector.load %arg5[%c0_142, %c0_143, %c1_144, %c0_145, %c0_146] : memref<2x2x18x18x3xf32, #tpu.memory_space<vmem>>, vector<2x2x16x16x3xf32>
    %97 = vector.shape_cast %96 : vector<2x2x16x16x3xf32> to vector<1024x3xf32>
    %c1_147 = arith.constant 1 : index
    %c0_148 = arith.constant 0 : index
    %c0_149 = arith.constant 0 : index
    %98 = vector.load %arg2[%c1_147, %c0_148, %c0_149] : memref<9x3x128xf32, #tpu.memory_space<vmem>>, vector<1x3x128xf32>
    %99 = vector.shape_cast %98 : vector<1x3x128xf32> to vector<3x128xf32>
    %cst_150 = arith.constant dense<0.000000e+00> : vector<1024x128xf32>
    %100 = tpu.matmul %97, %99, %cst_150 {dimension_numbers = #tpu.dot_dimension_numbers<[1], [0], [0], [1], [0, 0, 1, 1], [], []>} : vector<1024x3xf32>, vector<3x128xf32>, vector<1024x128xf32> -> vector<1024x128xf32>
    %c0_151 = arith.constant 0 : index
    %c0_152 = arith.constant 0 : index
    %101 = vector.load %arg6[%c0_151, %c0_152] : memref<1024x128xf32, #tpu.memory_space<vmem>>, vector<1024x128xf32>
    %102 = arith.addf %101, %100 : vector<1024x128xf32>
    %c0_153 = arith.constant 0 : index
    %c0_154 = arith.constant 0 : index
    %103 = vector.load %arg6[%c0_153, %c0_154] : memref<1024x128xf32, #tpu.memory_space<vmem>>, vector<1024x128xf32>
    tpu.vector_store %arg6[%c0_153, %c0_154], %102 {strides = array<i32>} : memref<1024x128xf32, #tpu.memory_space<vmem>>, vector<1024x128xf32>,
    %c0_155 = arith.constant 0 : index
    %c0_156 = arith.constant 0 : index
    %c2_157 = arith.constant 2 : index
    %c0_158 = arith.constant 0 : index
    %c0_159 = arith.constant 0 : index
    %104 = vector.load %arg5[%c0_155, %c0_156, %c2_157, %c0_158, %c0_159] : memref<2x2x18x18x3xf32, #tpu.memory_space<vmem>>, vector<2x2x16x16x3xf32>
    %105 = vector.shape_cast %104 : vector<2x2x16x16x3xf32> to vector<1024x3xf32>
    %c2_160 = arith.constant 2 : index
    %c0_161 = arith.constant 0 : index
    %c0_162 = arith.constant 0 : index
    %106 = vector.load %arg2[%c2_160, %c0_161, %c0_162] : memref<9x3x128xf32, #tpu.memory_space<vmem>>, vector<1x3x128xf32>
    %107 = vector.shape_cast %106 : vector<1x3x128xf32> to vector<3x128xf32>
    %cst_163 = arith.constant dense<0.000000e+00> : vector<1024x128xf32>
    %108 = tpu.matmul %105, %107, %cst_163 {dimension_numbers = #tpu.dot_dimension_numbers<[1], [0], [0], [1], [0, 0, 1, 1], [], []>} : vector<1024x3xf32>, vector<3x128xf32>, vector<1024x128xf32> -> vector<1024x128xf32>
    %c0_164 = arith.constant 0 : index
    %c0_165 = arith.constant 0 : index
    %109 = vector.load %arg6[%c0_164, %c0_165] : memref<1024x128xf32, #tpu.memory_space<vmem>>, vector<1024x128xf32>
    %110 = arith.addf %109, %108 : vector<1024x128xf32>
    %c0_166 = arith.constant 0 : index
    %c0_167 = arith.constant 0 : index
    %111 = vector.load %arg6[%c0_166, %c0_167] : memref<1024x128xf32, #tpu.memory_space<vmem>>, vector<1024x128xf32>
    tpu.vector_store %arg6[%c0_166, %c0_167], %110 {strides = array<i32>} : memref<1024x128xf32, #tpu.memory_space<vmem>>, vector<1024x128xf32>,
    %c0_168 = arith.constant 0 : index
    %c0_169 = arith.constant 0 : index
    %c0_170 = arith.constant 0 : index
    %c1_171 = arith.constant 1 : index
    %c0_172 = arith.constant 0 : index
    %112 = vector.load %arg5[%c0_168, %c0_169, %c0_170, %c1_171, %c0_172] : memref<2x2x18x18x3xf32, #tpu.memory_space<vmem>>, vector<2x2x16x16x3xf32>
    %113 = vector.shape_cast %112 : vector<2x2x16x16x3xf32> to vector<1024x3xf32>
    %c3_173 = arith.constant 3 : index
    %c0_174 = arith.constant 0 : index
    %c0_175 = arith.constant 0 : index
    %114 = vector.load %arg2[%c3_173, %c0_174, %c0_175] : memref<9x3x128xf32, #tpu.memory_space<vmem>>, vector<1x3x128xf32>
    %115 = vector.shape_cast %114 : vector<1x3x128xf32> to vector<3x128xf32>
    %cst_176 = arith.constant dense<0.000000e+00> : vector<1024x128xf32>
    %116 = tpu.matmul %113, %115, %cst_176 {dimension_numbers = #tpu.dot_dimension_numbers<[1], [0], [0], [1], [0, 0, 1, 1], [], []>} : vector<1024x3xf32>, vector<3x128xf32>, vector<1024x128xf32> -> vector<1024x128xf32>
    %c0_177 = arith.constant 0 : index
    %c0_178 = arith.constant 0 : index
    %117 = vector.load %arg6[%c0_177, %c0_178] : memref<1024x128xf32, #tpu.memory_space<vmem>>, vector<1024x128xf32>
    %118 = arith.addf %117, %116 : vector<1024x128xf32>
    %c0_179 = arith.constant 0 : index
    %c0_180 = arith.constant 0 : index
    %119 = vector.load %arg6[%c0_179, %c0_180] : memref<1024x128xf32, #tpu.memory_space<vmem>>, vector<1024x128xf32>
    tpu.vector_store %arg6[%c0_179, %c0_180], %118 {strides = array<i32>} : memref<1024x128xf32, #tpu.memory_space<vmem>>, vector<1024x128xf32>,
    %c0_181 = arith.constant 0 : index
    %c0_182 = arith.constant 0 : index
    %c1_183 = arith.constant 1 : index
    %c1_184 = arith.constant 1 : index
    %c0_185 = arith.constant 0 : index
    %120 = vector.load %arg5[%c0_181, %c0_182, %c1_183, %c1_184, %c0_185] : memref<2x2x18x18x3xf32, #tpu.memory_space<vmem>>, vector<2x2x16x16x3xf32>
    %121 = vector.shape_cast %120 : vector<2x2x16x16x3xf32> to vector<1024x3xf32>
    %c4_186 = arith.constant 4 : index
    %c0_187 = arith.constant 0 : index
    %c0_188 = arith.constant 0 : index
    %122 = vector.load %arg2[%c4_186, %c0_187, %c0_188] : memref<9x3x128xf32, #tpu.memory_space<vmem>>, vector<1x3x128xf32>
    %123 = vector.shape_cast %122 : vector<1x3x128xf32> to vector<3x128xf32>
    %cst_189 = arith.constant dense<0.000000e+00> : vector<1024x128xf32>
    %124 = tpu.matmul %121, %123, %cst_189 {dimension_numbers = #tpu.dot_dimension_numbers<[1], [0], [0], [1], [0, 0, 1, 1], [], []>} : vector<1024x3xf32>, vector<3x128xf32>, vector<1024x128xf32> -> vector<1024x128xf32>
    %c0_190 = arith.constant 0 : index
    %c0_191 = arith.constant 0 : index
    %125 = vector.load %arg6[%c0_190, %c0_191] : memref<1024x128xf32, #tpu.memory_space<vmem>>, vector<1024x128xf32>
    %126 = arith.addf %125, %124 : vector<1024x128xf32>
    %c0_192 = arith.constant 0 : index
    %c0_193 = arith.constant 0 : index
    %127 = vector.load %arg6[%c0_192, %c0_193] : memref<1024x128xf32, #tpu.memory_space<vmem>>, vector<1024x128xf32>
    tpu.vector_store %arg6[%c0_192, %c0_193], %126 {strides = array<i32>} : memref<1024x128xf32, #tpu.memory_space<vmem>>, vector<1024x128xf32>,
    %c0_194 = arith.constant 0 : index
    %c0_195 = arith.constant 0 : index
    %c2_196 = arith.constant 2 : index
    %c1_197 = arith.constant 1 : index
    %c0_198 = arith.constant 0 : index
    %128 = vector.load %arg5[%c0_194, %c0_195, %c2_196, %c1_197, %c0_198] : memref<2x2x18x18x3xf32, #tpu.memory_space<vmem>>, vector<2x2x16x16x3xf32>
    %129 = vector.shape_cast %128 : vector<2x2x16x16x3xf32> to vector<1024x3xf32>
    %c5_199 = arith.constant 5 : index
    %c0_200 = arith.constant 0 : index
    %c0_201 = arith.constant 0 : index
    %130 = vector.load %arg2[%c5_199, %c0_200, %c0_201] : memref<9x3x128xf32, #tpu.memory_space<vmem>>, vector<1x3x128xf32>
    %131 = vector.shape_cast %130 : vector<1x3x128xf32> to vector<3x128xf32>
    %cst_202 = arith.constant dense<0.000000e+00> : vector<1024x128xf32>
    %132 = tpu.matmul %129, %131, %cst_202 {dimension_numbers = #tpu.dot_dimension_numbers<[1], [0], [0], [1], [0, 0, 1, 1], [], []>} : vector<1024x3xf32>, vector<3x128xf32>, vector<1024x128xf32> -> vector<1024x128xf32>
    %c0_203 = arith.constant 0 : index
    %c0_204 = arith.constant 0 : index
    %133 = vector.load %arg6[%c0_203, %c0_204] : memref<1024x128xf32, #tpu.memory_space<vmem>>, vector<1024x128xf32>
    %134 = arith.addf %133, %132 : vector<1024x128xf32>
    %c0_205 = arith.constant 0 : index
    %c0_206 = arith.constant 0 : index
    %135 = vector.load %arg6[%c0_205, %c0_206] : memref<1024x128xf32, #tpu.memory_space<vmem>>, vector<1024x128xf32>
    tpu.vector_store %arg6[%c0_205, %c0_206], %134 {strides = array<i32>} : memref<1024x128xf32, #tpu.memory_space<vmem>>, vector<1024x128xf32>,
    %c0_207 = arith.constant 0 : index
    %c0_208 = arith.constant 0 : index
    %c0_209 = arith.constant 0 : index
    %c2_210 = arith.constant 2 : index
    %c0_211 = arith.constant 0 : index
    %136 = vector.load %arg5[%c0_207, %c0_208, %c0_209, %c2_210, %c0_211] : memref<2x2x18x18x3xf32, #tpu.memory_space<vmem>>, vector<2x2x16x16x3xf32>
    %137 = vector.shape_cast %136 : vector<2x2x16x16x3xf32> to vector<1024x3xf32>
    %c6_212 = arith.constant 6 : index
    %c0_213 = arith.constant 0 : index
    %c0_214 = arith.constant 0 : index
    %138 = vector.load %arg2[%c6_212, %c0_213, %c0_214] : memref<9x3x128xf32, #tpu.memory_space<vmem>>, vector<1x3x128xf32>
    %139 = vector.shape_cast %138 : vector<1x3x128xf32> to vector<3x128xf32>
    %cst_215 = arith.constant dense<0.000000e+00> : vector<1024x128xf32>
    %140 = tpu.matmul %137, %139, %cst_215 {dimension_numbers = #tpu.dot_dimension_numbers<[1], [0], [0], [1], [0, 0, 1, 1], [], []>} : vector<1024x3xf32>, vector<3x128xf32>, vector<1024x128xf32> -> vector<1024x128xf32>
    %c0_216 = arith.constant 0 : index
    %c0_217 = arith.constant 0 : index
    %141 = vector.load %arg6[%c0_216, %c0_217] : memref<1024x128xf32, #tpu.memory_space<vmem>>, vector<1024x128xf32>
    %142 = arith.addf %141, %140 : vector<1024x128xf32>
    %c0_218 = arith.constant 0 : index
    %c0_219 = arith.constant 0 : index
    %143 = vector.load %arg6[%c0_218, %c0_219] : memref<1024x128xf32, #tpu.memory_space<vmem>>, vector<1024x128xf32>
    tpu.vector_store %arg6[%c0_218, %c0_219], %142 {strides = array<i32>} : memref<1024x128xf32, #tpu.memory_space<vmem>>, vector<1024x128xf32>,
    %c0_220 = arith.constant 0 : index
    %c0_221 = arith.constant 0 : index
    %c1_222 = arith.constant 1 : index
    %c2_223 = arith.constant 2 : index
    %c0_224 = arith.constant 0 : index
    %144 = vector.load %arg5[%c0_220, %c0_221, %c1_222, %c2_223, %c0_224] : memref<2x2x18x18x3xf32, #tpu.memory_space<vmem>>, vector<2x2x16x16x3xf32>
    %145 = vector.shape_cast %144 : vector<2x2x16x16x3xf32> to vector<1024x3xf32>
    %c7_225 = arith.constant 7 : index
    %c0_226 = arith.constant 0 : index
    %c0_227 = arith.constant 0 : index
    %146 = vector.load %arg2[%c7_225, %c0_226, %c0_227] : memref<9x3x128xf32, #tpu.memory_space<vmem>>, vector<1x3x128xf32>
    %147 = vector.shape_cast %146 : vector<1x3x128xf32> to vector<3x128xf32>
    %cst_228 = arith.constant dense<0.000000e+00> : vector<1024x128xf32>
    %148 = tpu.matmul %145, %147, %cst_228 {dimension_numbers = #tpu.dot_dimension_numbers<[1], [0], [0], [1], [0, 0, 1, 1], [], []>} : vector<1024x3xf32>, vector<3x128xf32>, vector<1024x128xf32> -> vector<1024x128xf32>
    %c0_229 = arith.constant 0 : index
    %c0_230 = arith.constant 0 : index
    %149 = vector.load %arg6[%c0_229, %c0_230] : memref<1024x128xf32, #tpu.memory_space<vmem>>, vector<1024x128xf32>
    %150 = arith.addf %149, %148 : vector<1024x128xf32>
    %c0_231 = arith.constant 0 : index
    %c0_232 = arith.constant 0 : index
    %151 = vector.load %arg6[%c0_231, %c0_232] : memref<1024x128xf32, #tpu.memory_space<vmem>>, vector<1024x128xf32>
    tpu.vector_store %arg6[%c0_231, %c0_232], %150 {strides = array<i32>} : memref<1024x128xf32, #tpu.memory_space<vmem>>, vector<1024x128xf32>,
    %c0_233 = arith.constant 0 : index
    %c0_234 = arith.constant 0 : index
    %c2_235 = arith.constant 2 : index
    %c2_236 = arith.constant 2 : index
    %c0_237 = arith.constant 0 : index
    %152 = vector.load %arg5[%c0_233, %c0_234, %c2_235, %c2_236, %c0_237] : memref<2x2x18x18x3xf32, #tpu.memory_space<vmem>>, vector<2x2x16x16x3xf32>
    %153 = vector.shape_cast %152 : vector<2x2x16x16x3xf32> to vector<1024x3xf32>
    %c8_238 = arith.constant 8 : index
    %c0_239 = arith.constant 0 : index
    %c0_240 = arith.constant 0 : index
    %154 = vector.load %arg2[%c8_238, %c0_239, %c0_240] : memref<9x3x128xf32, #tpu.memory_space<vmem>>, vector<1x3x128xf32>
    %155 = vector.shape_cast %154 : vector<1x3x128xf32> to vector<3x128xf32>
    %cst_241 = arith.constant dense<0.000000e+00> : vector<1024x128xf32>
    %156 = tpu.matmul %153, %155, %cst_241 {dimension_numbers = #tpu.dot_dimension_numbers<[1], [0], [0], [1], [0, 0, 1, 1], [], []>} : vector<1024x3xf32>, vector<3x128xf32>, vector<1024x128xf32> -> vector<1024x128xf32>
    %c0_242 = arith.constant 0 : index
    %c0_243 = arith.constant 0 : index
    %157 = vector.load %arg6[%c0_242, %c0_243] : memref<1024x128xf32, #tpu.memory_space<vmem>>, vector<1024x128xf32>
    %158 = arith.addf %157, %156 : vector<1024x128xf32>
    %c0_244 = arith.constant 0 : index
    %c0_245 = arith.constant 0 : index
    %159 = vector.load %arg6[%c0_244, %c0_245] : memref<1024x128xf32, #tpu.memory_space<vmem>>, vector<1024x128xf32>
    tpu.vector_store %arg6[%c0_244, %c0_245], %158 {strides = array<i32>} : memref<1024x128xf32, #tpu.memory_space<vmem>>, vector<1024x128xf32>,
    %c0_246 = arith.constant 0 : index
    %c0_247 = arith.constant 0 : index
    %160 = vector.load %arg6[%c0_246, %c0_247] : memref<1024x128xf32, #tpu.memory_space<vmem>>, vector<1024x128xf32>
    %c0_248 = arith.constant 0 : index
    %c0_249 = arith.constant 0 : index
    %161 = vector.load %arg3[%c0_248, %c0_249] : memref<1x128xf32, #tpu.memory_space<vmem>>, vector<1x128xf32>
    %162 = vector.broadcast %161 : vector<1x128xf32> to vector<1024x128xf32>
    %163 = arith.addf %160, %162 : vector<1024x128xf32>
    %cst_250 = arith.constant 0.000000e+00 : f32
    %164 = vector.broadcast %cst_250 : f32 to vector<1024x128xf32>
    %165 = arith.maximumf %163, %164 : vector<1024x128xf32>
    %166 = vector.extract_strided_slice %165 {offsets = [0, 0], sizes = [512, 128], strides = [1, 1]} : vector<1024x128xf32> to vector<512x128xf32>
    %167 = vector.extract_strided_slice %165 {offsets = [512, 0], sizes = [512, 128], strides = [1, 1]} : vector<1024x128xf32> to vector<512x128xf32>
    %168 = arith.subf %166, %167 : vector<512x128xf32>
    %169 = math.absf %168 : vector<512x128xf32>
    %cst_251 = arith.constant dense<0.000000e+00> : vector<128xf32>
    %170 = vector.multi_reduction <add>, %169, %cst_251 [0] : vector<512x128xf32> to vector<128xf32>
    %171 = vector.shape_cast %170 : vector<128xf32> to vector<1x128xf32>
    %172 = vector.shape_cast %171 : vector<1x128xf32> to vector<1x1x128xf32>
    %c0_252 = arith.constant 0 : index
    %c0_253 = arith.constant 0 : index
    %c0_254 = arith.constant 0 : index
    %173 = vector.load %arg4[%c0_252, %c0_253, %c0_254] : memref<1x1x128xf32, #tpu.memory_space<vmem>>, vector<1x1x128xf32>
    tpu.vector_store %arg4[%c0_252, %c0_253, %c0_254], %172 {strides = array<i32>} : memref<1x1x128xf32, #tpu.memory_space<vmem>>, vector<1x1x128xf32>,
    return
  }
  func.func @transform_0(%arg0: i32) -> (i32, i32, i32, i32) {
    %c0_i32 = arith.constant 0 : i32
    %c0_i32_0 = arith.constant 0 : i32
    %c0_i32_1 = arith.constant 0 : i32
    %c0_i32_2 = arith.constant 0 : i32
    return %c0_i32, %arg0, %c0_i32_0, %c0_i32_1 : i32, i32, i32, i32
  }
  func.func @transform_1(%arg0: i32) -> (i32, i32, i32) {
    %c0_i32 = arith.constant 0 : i32
    %c0_i32_0 = arith.constant 0 : i32
    %c0_i32_1 = arith.constant 0 : i32
    %c0_i32_2 = arith.constant 0 : i32
    return %c0_i32, %c0_i32_0, %c0_i32_1 : i32, i32, i32
  }
  func.func @transform_2(%arg0: i32) -> (i32, i32) {
    %c0_i32 = arith.constant 0 : i32
    %c0_i32_0 = arith.constant 0 : i32
    %c0_i32_1 = arith.constant 0 : i32
    return %c0_i32, %c0_i32_0 : i32, i32
  }
  func.func @transform_3(%arg0: i32) -> (i32, i32, i32) {
    %c0_i32 = arith.constant 0 : i32
    %c0_i32_0 = arith.constant 0 : i32
    %c0_i32_1 = arith.constant 0 : i32
    return %arg0, %c0_i32, %c0_i32_0 : i32, i32, i32
  }
}

</mosaic_0001>

<bundles_post_ra>
// kernel: tpu_custom_call.1
= control target key start
LH: loop header
LB: loop body
LE: loop exit
PB: predicated region body
PF: predicated region fallthrough
CT: control target
= control target key end

     0   :  { %s18599_s0 = inlined_call_operand.vmem [shape: bf16[2,2,18,54], index: 0, kind: input, shape index: {}]   ;;  %s18600_s1 = inlined_call_operand.vmem [shape: f32[9,3,128], index: 1, kind: input, shape index: {}]   ;;  %s18601_s2 = inlined_call_operand.vmem [shape: f32[1,128], index: 2, kind: input, shape index: {}]   ;;  %s18602_s3 = inlined_call_operand.hbm [shape: f32[1,1,128], index: 3, kind: output, shape index: {}]  }
   0x1   :  { %v14877_v0 = vld [vmem:[%s18599_s0 + $0x18] sm:$0xff]   ;;  %v147_v1 = vld [vmem:[%s18599_s0 + $0x24] sm:$0xff]   ;;  %v141_v9 = vld [vmem:[%s18599_s0 + $0xc] sm:$0xff]  }
   0x2   :  { %v62_v2 = vld [vmem:[%s18599_s0 + $0x24] sm:$0xff]   ;;  %v15285_v3 = vunpack.c.l.bf16 %v14877_v0  ;;  %v159_v4 = vunpack.c.l.bf16 %v147_v1  ;;  %v75_v8 = vunpack.c.h.bf16 %v147_v1  ;;  %v56_v10 = vld [vmem:[%s18599_s0 + $0xc] sm:$0xff]  }
   0x3   :  { %v74_v5 = vunpack.c.l.bf16 %v62_v2  ;;  %v14740_v6 = vld [vmem:[%s18599_s0] sm:$0xff]  }
   0x4   :  { %v15290_v7 = vunpack.c.l.bf16 %v14740_v6  ;;  %v14934_v11 = vpack.i.bf16 %v159_v4, %v15285_v3 }
   0x5   :  { %v14914_v12 = vpack.i.bf16 %v74_v5, %v15285_v3 }
   0x6   :  { %v14924_v13 = vpack.i.bf16 %v75_v8, %v15290_v7 }
   0x7   :  { %8 = vsyncpa [#allocation5], 0  ;;  %v15301_v14 = vunpack.c.h.bf16 %v14877_v0  ;;  %s15238_s24 = smov 122   ;;  %s15239_s25 = smov 125   ;;  %v153_v15 = vunpack.c.l.bf16 %v141_v9  ;;  %v68_v16 = vunpack.c.l.bf16 %v56_v10  ;;  %v15305_v17 = vunpack.c.h.bf16 %v14740_v6  ;;  %v232_v22 = vld [vmem:[%s18599_s0 + $0x24] sm:$0xff]   ;;  %v227_v29 = vld [vmem:[%s18599_s0 + $0xc] sm:$0xff]  }
   0x8   :  { %14935 = vrot.lane.b32.xlu2 %v14934_v11, %s15238_s24  ;;  %14915 = vrot.lane.b32.xlu0 %v14914_v12, %s15239_s25  ;;  %v69_v18 = vunpack.c.h.bf16 %v141_v9  ;;  %v244_v23 = vunpack.c.l.bf16 %v232_v22  ;;  %v160_v24 = vunpack.c.h.bf16 %v62_v2  ;;  %v154_v25 = vunpack.c.h.bf16 %v56_v10  ;;  %s15240_s30 = smov 119   ;;  %v318_v36 = vld [vmem:[%s18599_s0 + $0x24] sm:$0xff]   ;;  %v311_v37 = vld [vmem:[%s18599_s0 + $0xc] sm:$0xff]   ;;  %s15241_s12 = smov 116  }
   0x9   :  { %14925 = vrot.lane.b32.xlu1 %v14924_v13, %s15239_s25  ;;  %v14939_v19 = vpack.i.bf16 %v15301_v14, %v153_v15  ;;  %v14919_v20 = vpack.i.bf16 %v15301_v14, %v68_v16  ;;  %v239_v30 = vunpack.c.h.bf16 %v227_v29  ;;  %v238_v31 = vunpack.c.l.bf16 %v227_v29  ;;  %v396_v44 = vld [vmem:[%s18599_s0 + $0xc] sm:$0xff]   ;;  %v402_v45 = vld [vmem:[%s18599_s0 + $0x24] sm:$0xff]   ;;  %s15242_s15 = smov 113   ;;  %s15243_s18 = smov 110  }
   0xa   :  { %v14929_v21 = vpack.i.bf16 %v15305_v17, %v69_v18  ;;  %v14954_v26 = vpack.i.bf16 %v244_v23, %v15285_v3  ;;  %v14944_v27 = vpack.i.bf16 %v160_v24, %v15290_v7  ;;  %v14949_v28 = vpack.i.bf16 %v15305_v17, %v154_v25  ;;  %v487_v52 = vld [vmem:[%s18599_s0 + $0x24] sm:$0xff]   ;;  %v482_v59 = vld [vmem:[%s18599_s0 + $0xc] sm:$0xff]   ;;  %s15244_s29 = smov 107   ;;  %s15245_s8 = smov 104  }
   0xb   :  { %v245_v32 = vunpack.c.h.bf16 %v232_v22  ;;  %v14969_v33 = vpack.i.bf16 %v15305_v17, %v239_v30  ;;  %v14959_v34 = vpack.i.bf16 %v15301_v14, %v238_v31  ;;  %v330_v38 = vunpack.c.h.bf16 %v318_v36  ;;  %v573_v2 = vld [vmem:[%s18599_s0 + $0x24] sm:$0xff]   ;;  %v566_v4 = vld [vmem:[%s18599_s0 + $0xc] sm:$0xff]   ;;  %v1626_v31 = vld [vmem:[%s18600_s1] sm:$0x7]  ;;  %s15246_s17 = smov 101   ;;  %s15247_s14 = smov 98  }
   0xc   :  { %v329_v39 = vunpack.c.l.bf16 %v318_v36  ;;  %v323_v40 = vunpack.c.l.bf16 %v311_v37  ;;  %v408_v46 = vunpack.c.l.bf16 %v396_v44  ;;  %v324_v47 = vunpack.c.h.bf16 %v311_v37  ;;  %v651_v12 = vld [vmem:[%s18599_s0 + $0xc] sm:$0xff]   ;;  %v657_v13 = vld [vmem:[%s18599_s0 + $0x24] sm:$0xff]   ;;  %s15248_s22 = smov 95   ;;  %s15249_s23 = smov 92  }
   0xd   :  { %v14964_v35 = vpack.i.bf16 %v245_v32, %v15290_v7  ;;  %v14984_v41 = vpack.i.bf16 %v330_v38, %v15290_v7  ;;  %v414_v48 = vunpack.c.l.bf16 %v402_v45  ;;  %v499_v53 = vunpack.c.l.bf16 %v487_v52  ;;  %v742_v24 = vld [vmem:[%s18599_s0 + $0x24] sm:$0xff]   ;;  %v737_v30 = vld [vmem:[%s18599_s0 + $0xc] sm:$0xff]   ;;  %s15250_s10 = smov 89   ;;  %s15251_s16 = smov 86  }
   0xe   :  { %v14974_v42 = vpack.i.bf16 %v329_v39, %v15285_v3  ;;  %v14979_v43 = vpack.i.bf16 %v15301_v14, %v323_v40  ;;  %v14999_v49 = vpack.i.bf16 %v15301_v14, %v408_v46  ;;  %v14989_v50 = vpack.i.bf16 %v15305_v17, %v324_v47  ;;  %v15431_v36 = vld [vmem:[%s18599_s0 + $0xc] sm:$0xff]   ;;  %v828_v46 = vld [vmem:[%s18599_s0 + $0x24] sm:$0xff]   ;;  %s15252_s21 = smov 83   ;;  %s15253_s5 = smov 80  }
   0xf   :  { %v14994_v51 = vpack.i.bf16 %v414_v48, %v15285_v3  ;;  %v415_v54 = vunpack.c.h.bf16 %v402_v45  ;;  %v409_v55 = vunpack.c.h.bf16 %v396_v44  ;;  %v15014_v56 = vpack.i.bf16 %v499_v53, %v15285_v3  ;;  %v821_v47 = vld [vmem:[%s18599_s0 + $0xc] sm:$0xff]   ;;  %s15254_s9 = smov 77  }
  0x10   :  { %14940 = vrot.lane.b32.xlu2 %v14939_v19, %s15238_s24  ;;  %14920 = vrot.lane.b32.xlu0 %v14919_v20, %s15239_s25  ;;  %v494_v60 = vunpack.c.h.bf16 %v482_v59  ;;  %v493_v61 = vunpack.c.l.bf16 %v482_v59  ;;  %v500_v62 = vunpack.c.h.bf16 %v487_v52  ;;  %v585_v5 = vunpack.c.h.bf16 %v573_v2  ;;  %v24_v19 = vld [vmem:[%s18599_s0 + $0x24] sm:$0xff]   ;;  %v15456_v48 = vld [vmem:[%s18599_s0 + $0xc] sm:$0xff]  }
  0x11   :  { %14930 = vrot.lane.b32.xlu1 %v14929_v21, %s15239_s25  ;;  %v15004_v57 = vpack.i.bf16 %v415_v54, %v15290_v7  ;;  %v15009_v58 = vpack.i.bf16 %v15305_v17, %v409_v55  ;;  %v584_v6 = vunpack.c.l.bf16 %v573_v2  ;;  %v578_v8 = vunpack.c.l.bf16 %v566_v4  ;;  %v13691_v59 = vld [vmem:[%s18600_s1 + $0x4] sm:$0x7] }
  0x12   :  { %v15029_v63 = vpack.i.bf16 %v15305_v17, %v494_v60  ;;  %v15019_v0 = vpack.i.bf16 %v15301_v14, %v493_v61  ;;  %v15024_v1 = vpack.i.bf16 %v500_v62, %v15290_v7  ;;  %vm39_vm0 = vcmask 23552   ;;  %v912_v2 = vld [vmem:[%s18599_s0 + $0x24] sm:$0xff]  }
  0x13   :  { %v15044_v9 = vpack.i.bf16 %v585_v5, %v15290_v7  ;;  %v15034_v10 = vpack.i.bf16 %v584_v6, %v15285_v3  ;;  %40 = vst.msk [vmem:[#allocation2] sm:$0xff] %vm39_vm0, %v15290_v7  ;;  %v15039_v11 = vpack.i.bf16 %v15301_v14, %v578_v8  ;;  %v663_v15 = vunpack.c.l.bf16 %v651_v12 }
  0x14   :  { %47 = vst.msk [vmem:[#allocation2 + $0x360] sm:$0xff] %vm39_vm0, %v15285_v3  ;;  %v579_v16 = vunpack.c.h.bf16 %v566_v4  ;;  %v669_v18 = vunpack.c.l.bf16 %v657_v13  ;;  %v36_v22 = vunpack.c.l.bf16 %v24_v19  ;;  %v754_v25 = vunpack.c.l.bf16 %v742_v24 }
  0x15   :  { %41 = vst.msk [vmem:[#allocation2 + $0x8] sm:$0xff] %vm39_vm0, %v15305_v17  ;;  %v15059_v20 = vpack.i.bf16 %v15301_v14, %v663_v15  ;;  %vm2011_vm1 = vcmask 1042432   ;;  %v749_v37 = vunpack.c.h.bf16 %v737_v30  ;;  %v748_v38 = vunpack.c.l.bf16 %v737_v30 }
  0x16   :  { %48 = vst.msk [vmem:[#allocation2 + $0x368] sm:$0xff] %vm39_vm0, %v15301_v14  ;;  %v15049_v21 = vpack.i.bf16 %v15305_v17, %v579_v16  ;;  %v15054_v23 = vpack.i.bf16 %v669_v18, %v15285_v3  ;;  %13562 = vmatpush.msk.msra.mxu0 %vm2011_vm1, %v1626_v31  ;;  %14894 = vmatpush.msk.msra.mxu2 %vm2011_vm1, %v1626_v31  ;;  %v30_v39 = vunpack.c.l.bf16 %v15431_v36  ;;  %v37_v40 = vunpack.c.h.bf16 %v24_v19  ;;  %v997_v18 = vld [vmem:[%s18599_s0 + $0x24] sm:$0xff]  }
  0x17   :  { %50 = vst.msk [vmem:[#allocation2 + $0x510] sm:$0xff] %vm39_vm0, %v36_v22  ;;  %14895 = vmatpush.msk.msra.mxu3 %vm2011_vm1, %v1626_v31  ;;  %14893 = vmatpush.msk.msra.mxu1 %vm2011_vm1, %v1626_v31  ;;  %v15079_v44 = vpack.i.bf16 %v15301_v14, %v748_v38  ;;  %v833_v52 = vunpack.c.l.bf16 %v821_v47  ;;  %v834_v5 = vunpack.c.h.bf16 %v821_v47  ;;  %v924_v6 = vunpack.c.l.bf16 %v912_v2 }
  0x18   :  { %14955 = vrot.lane.b32.xlu2 %v14954_v26, %s15240_s30  ;;  %14945 = vrot.lane.b32.xlu0 %v14944_v27, %s15238_s24  ;;  %v670_v26 = vunpack.c.h.bf16 %v657_v13  ;;  %v664_v27 = vunpack.c.h.bf16 %v651_v12  ;;  %44 = vst.msk [vmem:[#allocation2 + $0x1b0] sm:$0xff] %vm39_vm0, %v30_v39  ;;  %v1009_v19 = vunpack.c.l.bf16 %v997_v18  ;;  %v1010_v30 = vunpack.c.h.bf16 %v997_v18 }
  0x19   :  { %14950 = vrot.lane.b32.xlu1 %v14949_v28, %s15238_s24  ;;  %v15074_v28 = vpack.i.bf16 %v754_v25, %v15285_v3  ;;  %51 = vst.msk [vmem:[#allocation2 + $0x518] sm:$0xff] %vm39_vm0, %v37_v40  ;;  %13692 = vmatpush.msk.msrb.mxu1 %vm2011_vm1, %v13691_v59  ;;  %v15109_v15 = vpack.i.bf16 %v15305_v17, %v834_v5  ;;  %vm42_vm2 = vcmask 17408  }
  0x1a   :  { %v15064_v29 = vpack.i.bf16 %v670_v26, %v15290_v7  ;;  %v15069_v32 = vpack.i.bf16 %v15305_v17, %v664_v27  ;;  %v15114_v16 = vpack.i.bf16 %v924_v6, %v15285_v3  ;;  %v15134_v25 = vpack.i.bf16 %v1009_v19, %v15285_v3 }
  0x1c   :  { %v1499_v53 = vld [vmem:[#allocation2 + $0x8] sm:$0xff] }
  0x1d   :  { %v1563_v55 = vld [vmem:[#allocation2 + $0x368] sm:$0xff] }
  0x1f   :  { %v1530_v54 = vld [vmem:[#allocation2 + $0x1b0] sm:$0xff] }
  0x20   :  { %14970 = vrot.lane.b32.xlu2 %v14969_v33, %s15240_s30  ;;  %14960 = vrot.lane.b32.xlu0 %v14959_v34, %s15240_s30  ;;  %v1498_v33 = vld [vmem:[#allocation2] sm:$0xff] }
  0x21   :  { %14965 = vrot.lane.b32.xlu1 %v14964_v35, %s15240_s30  ;;  %v1562_v34 = vld [vmem:[#allocation2 + $0x360] sm:$0xff]  ;;  %v1594_v35 = vld [vmem:[#allocation2 + $0x510] sm:$0xff]  ;;  %13563 = vmatmul.msk.f32.vlgmr.msra.gmra.mxu0 %vm39_vm0, %v1498_v33 }
  0x22   :  { %13627 = vmatmul.msk.f32.vlgmr.msra.gmra.mxu2 %vm39_vm0, %v1562_v34  ;;  %13659 = vmatmul.msk.f32.vlgmr.msra.gmra.mxu3 %vm39_vm0, %v1594_v35 }
  0x23   :  { %13595 = vmatmul.msk.f32.vlgmr.msra.gmra.mxu1 %vm39_vm0, %v1530_v54 }
  0x28   :  { %14985 = vrot.lane.b32.xlu2 %v14984_v41, %s15241_s12  ;;  %14975 = vrot.lane.b32.xlu0 %v14974_v42, %s15241_s12  ;;  %v755_v41 = vunpack.c.h.bf16 %v742_v24  ;;  %v13821_v42 = vld [vmem:[%s18600_s1 + $0x8] sm:$0x7] }
  0x29   :  { %14980 = vrot.lane.b32.xlu1 %v14979_v43, %s15241_s12  ;;  %13822 = vmatpush.msk.msrb.mxu2 %vm2011_vm1, %v13821_v42  ;;  %v15089_v43 = vpack.i.bf16 %v15305_v17, %v749_v37  ;;  %v1083_v42 = vld [vmem:[%s18599_s0 + $0x24] sm:$0xff]  }
  0x2a   :  { %v15084_v45 = vpack.i.bf16 %v755_v41, %v15290_v7  ;;  %13564 = vmatmul.msk.f32.gmra.mxu0 %vm39_vm0, %v1499_v53  ;;  %13628 = vmatmul.msk.f32.gmra.mxu2 %vm39_vm0, %v1563_v55 }
  0x30   :  { %15000 = vrot.lane.b32.xlu2 %v14999_v49, %s15242_s15  ;;  %14990 = vrot.lane.b32.xlu0 %v14989_v50, %s15241_s12  ;;  %v840_v49 = vunpack.c.h.bf16 %v828_v46  ;;  %v839_v50 = vunpack.c.l.bf16 %v828_v46  ;;  %v1094_v46 = vunpack.c.l.bf16 %v1083_v42 }
  0x31   :  { %14995 = vrot.lane.b32.xlu1 %v14994_v51, %s15242_s15  ;;  %v31_v51 = vunpack.c.h.bf16 %v15456_v48 }
  0x32   :  { %v15104_v62 = vpack.i.bf16 %v840_v49, %v15290_v7 }
  0x33   :  { %45 = vst.msk [vmem:[#allocation2 + $0x1b8] sm:$0xff] %vm39_vm0, %v31_v51 }
  0x38   :  { %15015 = vrot.lane.b32.xlu2 %v15014_v56, %s15243_s18  ;;  %15005 = vrot.lane.b32.xlu0 %v15004_v57, %s15242_s15  ;;  %v13951_v57 = vld [vmem:[%s18600_s1 + $0xc] sm:$0x7] }
  0x39   :  { %15010 = vrot.lane.b32.xlu1 %v15009_v58, %s15242_s15  ;;  %v1595_v58 = vld [vmem:[#allocation2 + $0x518] sm:$0xff]  ;;  %13952 = vmatpush.msk.msrb.mxu3 %vm2011_vm1, %v13951_v57  ;;  %v15154_v57 = vpack.i.bf16 %v1094_v46, %v15285_v3 }
  0x3a   :  { %13660 = vmatmul.msk.f32.gmra.mxu3 %vm39_vm0, %v1595_v58  ;;  %v1531_v8 = vld [vmem:[#allocation2 + $0x1b8] sm:$0xff] }
  0x3b   :  { %13596 = vmatmul.msk.f32.gmra.mxu1 %vm39_vm0, %v1531_v8 }
  0x40   :  { %15030 = vrot.lane.b32.xlu2 %v15029_v63, %s15243_s18  ;;  %15020 = vrot.lane.b32.xlu0 %v15019_v0, %s15243_s18  ;;  %v15094_v63 = vpack.i.bf16 %v839_v50, %v15285_v3  ;;  %v15099_v0 = vpack.i.bf16 %v15301_v14, %v833_v52 }
  0x41   :  { %15025 = vrot.lane.b32.xlu1 %v15024_v1, %s15243_s18  ;;  %v906_v1 = vld [vmem:[%s18599_s0 + $0xc] sm:$0xff]  }
  0x42   :  { %v918_v4 = vunpack.c.l.bf16 %v906_v1 }
  0x44   :  { %v15119_v13 = vpack.i.bf16 %v15301_v14, %v918_v4 }
  0x48   :  { %15045 = vrot.lane.b32.xlu2 %v15044_v9, %s15244_s29  ;;  %15035 = vrot.lane.b32.xlu0 %v15034_v10, %s15244_s29  ;;  %v14081_v10 = vld [vmem:[%s18600_s1 + $0x10] sm:$0x7] }
  0x49   :  { %15040 = vrot.lane.b32.xlu1 %v15039_v11, %s15244_s29  ;;  %14082 = vmatpush.msk.msrb.mxu0 %vm2011_vm1, %v14081_v10 }
  0x50   :  { %15060 = vrot.lane.b32.xlu2 %v15059_v20, %s15245_s8  ;;  %15050 = vrot.lane.b32.xlu0 %v15049_v21, %s15244_s29  ;;  %v925_v20 = vunpack.c.h.bf16 %v912_v2  ;;  %v919_v21 = vunpack.c.h.bf16 %v906_v1 }
  0x51   :  { %15055 = vrot.lane.b32.xlu1 %v15054_v23, %s15245_s8 }
  0x52   :  { %v15124_v26 = vpack.i.bf16 %v925_v20, %v15290_v7  ;;  %v15129_v27 = vpack.i.bf16 %v15305_v17, %v919_v21 }
  0x58   :  { %15075 = vrot.lane.b32.xlu2 %v15074_v28, %s15246_s17  ;;  %15065 = vrot.lane.b32.xlu0 %v15064_v29, %s15245_s8  ;;  %v1004_v28 = vunpack.c.h.bf16 %v15431_v36  ;;  %v1003_v29 = vunpack.c.l.bf16 %v15456_v48  ;;  %v15144_v36 = vpack.i.bf16 %v1010_v30, %v15290_v7 }
  0x59   :  { %15070 = vrot.lane.b32.xlu1 %v15069_v32, %s15245_s8 }
  0x5a   :  { %v15149_v39 = vpack.i.bf16 %v15305_v17, %v1004_v28  ;;  %v15139_v40 = vpack.i.bf16 %v15301_v14, %v1003_v29 }
  0x60   :  { %15090 = vrot.lane.b32.xlu2 %v15089_v43, %s15246_s17  ;;  %15080 = vrot.lane.b32.xlu0 %v15079_v44, %s15246_s17  ;;  %v1076_v44 = vld [vmem:[%s18599_s0 + $0xc] sm:$0xff]  }
  0x61   :  { %15085 = vrot.lane.b32.xlu1 %v15084_v45, %s15246_s17  ;;  %v1095_v45 = vunpack.c.h.bf16 %v1083_v42  ;;  %v1088_v49 = vunpack.c.l.bf16 %v1076_v44  ;;  %v1089_v5 = vunpack.c.h.bf16 %v1076_v44  ;;  %v1247_v44 = vld [vmem:[%s18599_s0 + $0xc] sm:$0xff]  }
  0x62   :  { %v14936_v56 = vpop.permute.xlu2 %14935  ;;  %v1258_v46 = vunpack.c.l.bf16 %v1247_v44 }
  0x63   :  { %v14938_v60 = vunpack.i.h.bf16 %v14936_v56  ;;  %v14937_v61 = vunpack.i.l.bf16 %v14936_v56  ;;  %v15164_v55 = vpack.i.bf16 %v1095_v45, %v15290_v7  ;;  %v15169_v20 = vpack.i.bf16 %v15305_v17, %v1089_v5 }
  0x65   :  { %217 = vst.msk [vmem:[#allocation2 + $0x390] sm:$0xff] %vm39_vm0, %v14937_v61  ;;  %v15541_v61 = vld [vmem:[%s18599_s0 + $0xc] sm:$0xff]  }
  0x66   :  { %220 = vst.msk [vmem:[#allocation2 + $0x540] sm:$0xff] %vm39_vm0, %v14938_v60  ;;  %v15159_v60 = vpack.i.bf16 %v15301_v14, %v1088_v49  ;;  %v1173_v1 = vunpack.c.l.bf16 %v15541_v61  ;;  %v1174_v29 = vunpack.c.h.bf16 %v15541_v61 }
  0x68   :  { %15105 = vrot.lane.b32.xlu2 %v15104_v62, %s15247_s14  ;;  %15095 = vrot.lane.b32.xlu0 %v15094_v63, %s15247_s14  ;;  %v15548_v63 = vld [vmem:[%s18599_s0 + $0x24] sm:$0xff]  }
  0x69   :  { %15100 = vrot.lane.b32.xlu1 %v15099_v0, %s15247_s14  ;;  %v1179_v6 = vunpack.c.l.bf16 %v15548_v63  ;;  %v1180_v28 = vunpack.c.h.bf16 %v15548_v63 }
  0x6a   :  { %v14941_v9 = vpop.permute.xlu2 %14940 }
  0x6b   :  { %v14943_v11 = vunpack.i.h.bf16 %v14941_v9  ;;  %v14942_v12 = vunpack.i.l.bf16 %v14941_v9  ;;  %v15174_v21 = vpack.i.bf16 %v1179_v6, %v15285_v3  ;;  %v15184_v42 = vpack.i.bf16 %v1180_v28, %v15290_v7 }
  0x6d   :  { %214 = vst.msk [vmem:[#allocation2 + $0x1e0] sm:$0xff] %vm39_vm0, %v14942_v12 }
  0x6e   :  { %218 = vst.msk [vmem:[#allocation2 + $0x398] sm:$0xff] %vm39_vm0, %v14943_v11 }
  0x70   :  { %15120 = vrot.lane.b32.xlu2 %v15119_v13, %s15248_s22  ;;  %15110 = vrot.lane.b32.xlu0 %v15109_v15, %s15247_s14 }
  0x71   :  { %15115 = vrot.lane.b32.xlu1 %v15114_v16, %s15248_s22  ;;  %v15179_v16 = vpack.i.bf16 %v15301_v14, %v1173_v1 }
  0x72   :  { %v14956_v22 = vpop.permute.xlu2 %14955 }
  0x73   :  { %v14958_v23 = vunpack.i.h.bf16 %v14956_v22  ;;  %v14957_v24 = vunpack.i.l.bf16 %v14956_v22  ;;  %v15568_v22 = vld [vmem:[%s18599_s0 + $0x24] sm:$0xff]  }
  0x75   :  { %302 = vst.msk [vmem:[#allocation2 + $0x3a8] sm:$0xff] %vm39_vm0, %v14957_v24 }
  0x76   :  { %305 = vst.msk [vmem:[#allocation2 + $0x558] sm:$0xff] %vm39_vm0, %v14958_v23 }
  0x78   :  { %15135 = vrot.lane.b32.xlu2 %v15134_v25, %s15249_s23  ;;  %15125 = vrot.lane.b32.xlu0 %v15124_v26, %s15248_s22  ;;  %v1264_v25 = vunpack.c.l.bf16 %v15568_v22 }
  0x79   :  { %15130 = vrot.lane.b32.xlu1 %v15129_v27, %s15248_s22 }
  0x7a   :  { %v14971_v31 = vpop.permute.xlu2 %14970  ;;  %v14916_v32 = vpop.permute.xlu0 %14915 }
  0x7b   :  { %v14973_v33 = vunpack.i.h.bf16 %v14971_v31  ;;  %v14972_v34 = vunpack.i.l.bf16 %v14971_v31  ;;  %v14917_v35 = vunpack.i.l.bf16 %v14916_v32  ;;  %v14926_v37 = vpop.permute.xlu1 %14925  ;;  %v14918_v38 = vunpack.i.h.bf16 %v14916_v32 }
  0x7c   :  { %v14927_v41 = vunpack.i.l.bf16 %v14926_v37  ;;  %v14928_v43 = vunpack.i.h.bf16 %v14926_v37 }
  0x7d   :  { %297 = vst.msk [vmem:[#allocation2 + $0x50] sm:$0xff] %vm39_vm0, %v14973_v33 }
  0x7e   :  { %300 = vst.msk [vmem:[#allocation2 + $0x200] sm:$0xff] %vm39_vm0, %v14972_v34 }
  0x7f   :  { %132 = vst.msk [vmem:[#allocation2 + $0x378] sm:$0xff] %vm39_vm0, %v14917_v35 }
  0x80   :  { %135 = vst.msk [vmem:[#allocation2 + $0x528] sm:$0xff] %vm39_vm0, %v14918_v38  ;;  %15150 = vrot.lane.b32.xlu2 %v15149_v39, %s15249_s23  ;;  %15140 = vrot.lane.b32.xlu0 %v15139_v40, %s15249_s23  ;;  %v1566_v38 = vld [vmem:[#allocation2 + $0x390] sm:$0xff]  ;;  %v1598_v39 = vld [vmem:[#allocation2 + $0x540] sm:$0xff]  ;;  %v15194_v40 = vpack.i.bf16 %v1264_v25, %v15285_v3 }
  0x81   :  { %126 = vst.msk [vmem:[#allocation2 + $0x18] sm:$0xff] %vm39_vm0, %v14927_v41  ;;  %15145 = vrot.lane.b32.xlu1 %v15144_v36, %s15249_s23 }
  0x82   :  { %136 = vst.msk [vmem:[#allocation2 + $0x530] sm:$0xff] %vm39_vm0, %v14928_v43  ;;  %v14986_v47 = vpop.permute.xlu2 %14985  ;;  %v14921_v48 = vpop.permute.xlu0 %14920  ;;  %v15189_v43 = vpack.i.bf16 %v15305_v17, %v1174_v29 }
  0x83   :  { %v14988_v50 = vunpack.i.h.bf16 %v14986_v47  ;;  %v14987_v51 = vunpack.i.l.bf16 %v14986_v47  ;;  %v14922_v52 = vunpack.i.l.bf16 %v14921_v48  ;;  %v14931_v53 = vpop.permute.xlu1 %14930  ;;  %v14923_v54 = vunpack.i.h.bf16 %v14921_v48 }
  0x84   :  { %v14933_v56 = vunpack.i.h.bf16 %v14931_v53  ;;  %v14932_v58 = vunpack.i.l.bf16 %v14931_v53  ;;  %v1265_v47 = vunpack.c.h.bf16 %v15568_v22  ;;  %v1534_v53 = vld [vmem:[#allocation2 + $0x1e0] sm:$0xff] }
  0x85   :  { %381 = vst.msk [vmem:[#allocation2 + $0x60] sm:$0xff] %vm39_vm0, %v14987_v51 }
  0x86   :  { %391 = vst.msk [vmem:[#allocation2 + $0x578] sm:$0xff] %vm39_vm0, %v14988_v50  ;;  %v1564_v59 = vld [vmem:[#allocation2 + $0x378] sm:$0xff]  ;;  %v15204_v61 = vpack.i.bf16 %v1265_v47, %v15290_v7 }
  0x87   :  { %129 = vst.msk [vmem:[#allocation2 + $0x1c8] sm:$0xff] %vm39_vm0, %v14922_v52  ;;  %13629 = vmatmul.msk.f32.gmra.mxu2 %vm39_vm0, %v1564_v59  ;;  %v1596_v62 = vld [vmem:[#allocation2 + $0x528] sm:$0xff] }
  0x88   :  { %133 = vst.msk [vmem:[#allocation2 + $0x380] sm:$0xff] %vm39_vm0, %v14923_v54  ;;  %v1500_v0 = vld [vmem:[#allocation2 + $0x18] sm:$0xff]  ;;  %13661 = vmatmul.msk.f32.gmra.mxu3 %vm39_vm0, %v1596_v62  ;;  %15165 = vrot.lane.b32.xlu2 %v15164_v55, %s15250_s10  ;;  %v140_v62 = vld [vmem:[%s18599_s0 + $0x8] sm:$0x1] }
  0x89   :  { %127 = vst.msk [vmem:[#allocation2 + $0x20] sm:$0xff] %vm39_vm0, %v14933_v56  ;;  %13565 = vmatmul.msk.f32.gmra.mxu0 %vm39_vm0, %v1500_v0  ;;  %15155 = vrot.lane.b32.xlu0 %v15154_v57, %s15250_s10  ;;  %v1597_v15 = vld [vmem:[#allocation2 + $0x530] sm:$0xff]  ;;  %v1567_v55 = vld [vmem:[#allocation2 + $0x398] sm:$0xff]  ;;  %v1259_v57 = vunpack.c.h.bf16 %v1247_v44 }
  0x8a   :  { %130 = vst.msk [vmem:[#allocation2 + $0x1d0] sm:$0xff] %vm39_vm0, %v14932_v58  ;;  %15160 = vrot.lane.b32.xlu1 %v15159_v60, %s15250_s10  ;;  %v15001_v2 = vpop.permute.xlu2 %15000  ;;  %v14946_v4 = vpop.permute.xlu0 %14945  ;;  %v15199_v60 = vpack.i.bf16 %v15301_v14, %v1258_v46 }
  0x8b   :  { %v15003_v8 = vunpack.i.h.bf16 %v15001_v2  ;;  %v15002_v9 = vunpack.i.l.bf16 %v15001_v2  ;;  %v14947_v10 = vunpack.i.l.bf16 %v14946_v4  ;;  %v14951_v11 = vpop.permute.xlu1 %14950  ;;  %v14948_v12 = vunpack.i.h.bf16 %v14946_v4  ;;  %v55_v4 = vld [vmem:[%s18599_s0 + $0x8] sm:$0x1] }
  0x8c   :  { %v14953_v13 = vunpack.i.h.bf16 %v14951_v11  ;;  %v14952_v18 = vunpack.i.l.bf16 %v14951_v11  ;;  %v152_v11 = vunpack.c.l.bf16 %v140_v62 }
  0x8d   :  { %469 = vst.msk [vmem:[#allocation2 + $0x228] sm:$0xff] %vm39_vm0, %v15002_v9  ;;  %v1568_v9 = vld [vmem:[#allocation2 + $0x3a8] sm:$0xff] }
  0x8e   :  { %473 = vst.msk [vmem:[#allocation2 + $0x3e0] sm:$0xff] %vm39_vm0, %v15003_v8  ;;  %v1532_v19 = vld [vmem:[#allocation2 + $0x1c8] sm:$0xff] }
  0x8f   :  { %211 = vst.msk [vmem:[#allocation2 + $0x30] sm:$0xff] %vm39_vm0, %v14947_v10  ;;  %13597 = vmatmul.msk.f32.gmra.mxu1 %vm39_vm0, %v1532_v19  ;;  %v1565_v23 = vld [vmem:[#allocation2 + $0x380] sm:$0xff]  ;;  %v1600_v10 = vld [vmem:[#allocation2 + $0x558] sm:$0xff]  ;;  %v395_v19 = vld [vmem:[%s18599_s0 + $0x8] sm:$0x1] }
  0x90   :  { %221 = vst.msk [vmem:[#allocation2 + $0x548] sm:$0xff] %vm39_vm0, %v14948_v12  ;;  %v1501_v24 = vld [vmem:[#allocation2 + $0x20] sm:$0xff]  ;;  %13630 = vmatmul.msk.f32.gmra.mxu2 %vm39_vm0, %v1565_v23  ;;  %13662 = vmatmul.msk.f32.gmra.mxu3 %vm39_vm0, %v1597_v15  ;;  %v67_v15 = vunpack.c.l.bf16 %v55_v4 }
  0x91   :  { %212 = vst.msk [vmem:[#allocation2 + $0x38] sm:$0xff] %vm39_vm0, %v14953_v13  ;;  %13566 = vmatmul.msk.f32.gmra.mxu0 %vm39_vm0, %v1501_v24  ;;  %15180 = vrot.lane.b32.xlu2 %v15179_v16, %s15251_s16  ;;  %v1533_v35 = vld [vmem:[#allocation2 + $0x1d0] sm:$0xff]  ;;  %v225_v24 = vld [vmem:[%s18599_s0 + $0x8] sm:$0x1] }
  0x92   :  { %215 = vst.msk [vmem:[#allocation2 + $0x1e8] sm:$0xff] %vm39_vm0, %v14952_v18  ;;  %15170 = vrot.lane.b32.xlu0 %v15169_v20, %s15250_s10  ;;  %15175 = vrot.lane.b32.xlu1 %v15174_v21, %s15251_s16  ;;  %v15016_v26 = vpop.permute.xlu2 %15015  ;;  %v14961_v27 = vpop.permute.xlu0 %14960 }
  0x93   :  { %v15018_v30 = vunpack.i.h.bf16 %v15016_v26  ;;  %v15017_v31 = vunpack.i.l.bf16 %v15016_v26  ;;  %v14962_v32 = vunpack.i.l.bf16 %v14961_v27  ;;  %v14966_v33 = vpop.permute.xlu1 %14965  ;;  %v14963_v34 = vunpack.i.h.bf16 %v14961_v27 }
  0x94   :  { %v14967_v37 = vunpack.i.l.bf16 %v14966_v33  ;;  %v14968_v41 = vunpack.i.h.bf16 %v14966_v33  ;;  %v237_v33 = vunpack.c.l.bf16 %v225_v24 }
  0x95   :  { %557 = vst.msk [vmem:[#allocation2 + $0x3f0] sm:$0xff] %vm39_vm0, %v15017_v31 }
  0x96   :  { %560 = vst.msk [vmem:[#allocation2 + $0x5a0] sm:$0xff] %vm39_vm0, %v15018_v30  ;;  %v1502_v36 = vld [vmem:[#allocation2 + $0x30] sm:$0xff]  ;;  %v407_v30 = vunpack.c.l.bf16 %v395_v19 }
  0x97   :  { %299 = vst.msk [vmem:[#allocation2 + $0x1f8] sm:$0xff] %vm39_vm0, %v14962_v32  ;;  %13598 = vmatmul.msk.f32.gmra.mxu1 %vm39_vm0, %v1533_v35  ;;  %v1599_v56 = vld [vmem:[#allocation2 + $0x548] sm:$0xff]  ;;  %v1505_v32 = vld [vmem:[#allocation2 + $0x50] sm:$0xff] }
  0x98   :  { %303 = vst.msk [vmem:[#allocation2 + $0x3b0] sm:$0xff] %vm39_vm0, %v14963_v34  ;;  %13631 = vmatmul.msk.f32.gmra.mxu2 %vm39_vm0, %v1566_v38  ;;  %13663 = vmatmul.msk.f32.gmra.mxu3 %vm39_vm0, %v1598_v39  ;;  %v1503_v59 = vld [vmem:[#allocation2 + $0x38] sm:$0xff]  ;;  %v650_v38 = vld [vmem:[%s18599_s0 + $0x8] sm:$0x1] }
  0x99   :  { %296 = vst.msk [vmem:[#allocation2 + $0x48] sm:$0xff] %vm39_vm0, %v14967_v37  ;;  %13567 = vmatmul.msk.f32.gmra.mxu0 %vm39_vm0, %v1502_v36  ;;  %15195 = vrot.lane.b32.xlu2 %v15194_v40, %s15252_s21  ;;  %v1535_v6 = vld [vmem:[#allocation2 + $0x1e8] sm:$0xff] }
  0x9a   :  { %306 = vst.msk [vmem:[#allocation2 + $0x560] sm:$0xff] %vm39_vm0, %v14968_v41  ;;  %15185 = vrot.lane.b32.xlu0 %v15184_v42, %s15251_s16  ;;  %15190 = vrot.lane.b32.xlu1 %v15189_v43, %s15251_s16  ;;  %v15031_v3 = vpop.permute.xlu2 %15030  ;;  %v14976_v45 = vpop.permute.xlu0 %14975  ;;  %v480_v42 = vld [vmem:[%s18599_s0 + $0x8] sm:$0x1] }
  0x9b   :  { %v15033_v48 = vunpack.i.h.bf16 %v15031_v3  ;;  %v15032_v49 = vunpack.i.l.bf16 %v15031_v3  ;;  %v14977_v50 = vunpack.i.l.bf16 %v14976_v45  ;;  %v14981_v51 = vpop.permute.xlu1 %14980  ;;  %v14978_v52 = vunpack.i.h.bf16 %v14976_v45  ;;  %v565_v43 = vld [vmem:[%s18599_s0 + $0x8] sm:$0x1]  ;;  %v1537_v3 = vld [vmem:[#allocation2 + $0x200] sm:$0xff] }
  0x9c   :  { %v14982_v54 = vunpack.i.l.bf16 %v14981_v51  ;;  %v14983_v58 = vunpack.i.h.bf16 %v14981_v51  ;;  %v492_v51 = vunpack.c.l.bf16 %v480_v42 }
  0x9d   :  { %552 = vst.msk [vmem:[#allocation2 + $0x98] sm:$0xff] %vm39_vm0, %v15033_v48  ;;  %v662_v48 = vunpack.c.l.bf16 %v650_v38 }
  0x9e   :  { %555 = vst.msk [vmem:[#allocation2 + $0x248] sm:$0xff] %vm39_vm0, %v15032_v49  ;;  %v1536_v26 = vld [vmem:[#allocation2 + $0x1f8] sm:$0xff] }
  0x9f   :  { %387 = vst.msk [vmem:[#allocation2 + $0x3c0] sm:$0xff] %vm39_vm0, %v14977_v50  ;;  %13599 = vmatmul.msk.f32.gmra.mxu1 %vm39_vm0, %v1534_v53  ;;  %v1569_v28 = vld [vmem:[#allocation2 + $0x3b0] sm:$0xff]  ;;  %v1506_v50 = vld [vmem:[#allocation2 + $0x60] sm:$0xff] }
  0xa0   :  { %390 = vst.msk [vmem:[#allocation2 + $0x570] sm:$0xff] %vm39_vm0, %v14978_v52  ;;  %13632 = vmatmul.msk.f32.gmra.mxu2 %vm39_vm0, %v1567_v55  ;;  %13664 = vmatmul.msk.f32.gmra.mxu3 %vm39_vm0, %v1599_v56  ;;  %v1504_v13 = vld [vmem:[#allocation2 + $0x48] sm:$0xff]  ;;  %v577_v52 = vunpack.c.l.bf16 %v565_v43 }
  0xa1   :  { %384 = vst.msk [vmem:[#allocation2 + $0x210] sm:$0xff] %vm39_vm0, %v14982_v54  ;;  %13568 = vmatmul.msk.f32.gmra.mxu0 %vm39_vm0, %v1503_v59  ;;  %1287 = vrot.lane.b32.xlu2 %v1259_v57, %s15252_s21  ;;  %v1601_v29 = vld [vmem:[#allocation2 + $0x560] sm:$0xff]  ;;  %v905_v55 = vld [vmem:[%s18599_s0 + $0x8] sm:$0x1] }
  0xa2   :  { %388 = vst.msk [vmem:[#allocation2 + $0x3c8] sm:$0xff] %vm39_vm0, %v14983_v58  ;;  %15200 = vrot.lane.b32.xlu0 %v15199_v60, %s15252_s21  ;;  %15205 = vrot.lane.b32.xlu1 %v15204_v61, %s15252_s21  ;;  %v15046_v7 = vpop.permute.xlu2 %15045  ;;  %v14991_v14 = vpop.permute.xlu0 %14990  ;;  %v735_v60 = vld [vmem:[%s18599_s0 + $0x8] sm:$0x1] }
  0xa3   :  { %v15048_v63 = vunpack.i.h.bf16 %v15046_v7  ;;  %v15047_v0 = vunpack.i.l.bf16 %v15046_v7  ;;  %v14993_v1 = vunpack.i.h.bf16 %v14991_v14  ;;  %v14996_v2 = vpop.permute.xlu1 %14995  ;;  %v14992_v5 = vunpack.i.l.bf16 %v14991_v14  ;;  %v820_v61 = vld [vmem:[%s18599_s0 + $0x8] sm:$0x1] }
  0xa4   :  { %v14997_v8 = vunpack.i.l.bf16 %v14996_v2  ;;  %v14998_v12 = vunpack.i.h.bf16 %v14996_v2 }
  0xa5   :  { %636 = vst.msk [vmem:[#allocation2 + $0xa8] sm:$0xff] %vm39_vm0, %v15047_v0  ;;  %v1603_v0 = vld [vmem:[#allocation2 + $0x578] sm:$0xff] }
  0xa6   :  { %646 = vst.msk [vmem:[#allocation2 + $0x5c0] sm:$0xff] %vm39_vm0, %v15048_v63  ;;  %v1570_v46 = vld [vmem:[#allocation2 + $0x3c0] sm:$0xff] }
  0xa7   :  { %382 = vst.msk [vmem:[#allocation2 + $0x68] sm:$0xff] %vm39_vm0, %v14993_v1  ;;  %13600 = vmatmul.msk.f32.gmra.mxu1 %vm39_vm0, %v1535_v6  ;;  %v1602_v47 = vld [vmem:[#allocation2 + $0x570] sm:$0xff]  ;;  %v917_v1 = vunpack.c.l.bf16 %v905_v55  ;;  %v832_v6 = vunpack.c.l.bf16 %v820_v61  ;;  %v1606_v55 = vld [vmem:[#allocation2 + $0x5a0] sm:$0xff] }
  0xa8   :  { %385 = vst.msk [vmem:[#allocation2 + $0x218] sm:$0xff] %vm39_vm0, %v14992_v5  ;;  %13633 = vmatmul.msk.f32.gmra.mxu2 %vm39_vm0, %v1568_v9  ;;  %13665 = vmatmul.msk.f32.gmra.mxu3 %vm39_vm0, %v1600_v10  ;;  %v1538_v14 = vld [vmem:[#allocation2 + $0x210] sm:$0xff]  ;;  %v747_v5 = vunpack.c.l.bf16 %v735_v60  ;;  %v15708_v10 = vld [vmem:[%s18599_s0] sm:$0xff]  }
  0xa9   :  { %472 = vst.msk [vmem:[#allocation2 + $0x3d8] sm:$0xff] %vm39_vm0, %v14997_v8  ;;  %13569 = vmatmul.msk.f32.gmra.mxu0 %vm39_vm0, %v1504_v13  ;;  %178 = vrot.lane.b32.xlu2 %v152_v11, %s15238_s24  ;;  %v1571_v63 = vld [vmem:[#allocation2 + $0x3c8] sm:$0xff]  ;;  %v14861_v24 = vunpack.c.l.bf16 %v15708_v10  ;;  %v14862_v43 = vunpack.c.h.bf16 %v15708_v10 }
  0xaa   :  { %475 = vst.msk [vmem:[#allocation2 + $0x588] sm:$0xff] %vm39_vm0, %v14998_v12  ;;  %1281 = vrot.lane.b32.xlu0 %v15305_v17, %s15252_s21  ;;  %93 = vrot.lane.b32.xlu1 %v67_v15, %s15239_s25  ;;  %v15061_v16 = vpop.permute.xlu2 %15060  ;;  %v15006_v18 = vpop.permute.xlu0 %15005  ;;  %v310_v17 = vld [vmem:[%s18599_s0 + $0x8] sm:$0x1] }
  0xab   :  { %v15063_v20 = vunpack.i.h.bf16 %v15061_v16  ;;  %v15062_v21 = vunpack.i.l.bf16 %v15061_v16  ;;  %v15007_v22 = vunpack.i.l.bf16 %v15006_v18  ;;  %v15011_v23 = vpop.permute.xlu1 %15010  ;;  %v15008_v25 = vunpack.i.h.bf16 %v15006_v18  ;;  %v990_v16 = vld [vmem:[%s18599_s0 + $0x8] sm:$0x1] }
  0xac   :  { %v15013_v27 = vunpack.i.h.bf16 %v15011_v23  ;;  %v15012_v31 = vunpack.i.l.bf16 %v15011_v23  ;;  %v322_v34 = vunpack.c.l.bf16 %v310_v17  ;;  %v1075_v18 = vld [vmem:[%s18599_s0 + $0x8] sm:$0x1] }
  0xad   :  { %724 = vst.msk [vmem:[#allocation2 + $0x270] sm:$0xff] %vm39_vm0, %v15062_v21 }
  0xae   :  { %728 = vst.msk [vmem:[#allocation2 + $0x428] sm:$0xff] %vm39_vm0, %v15063_v20  ;;  %v1507_v4 = vld [vmem:[#allocation2 + $0x68] sm:$0xff] }
  0xaf   :  { %466 = vst.msk [vmem:[#allocation2 + $0x78] sm:$0xff] %vm39_vm0, %v15007_v22  ;;  %13601 = vmatmul.msk.f32.gmra.mxu1 %vm39_vm0, %v1536_v26  ;;  %v1539_v20 = vld [vmem:[#allocation2 + $0x218] sm:$0xff]  ;;  %v1002_v26 = vunpack.c.l.bf16 %v990_v16 }
  0xb0   :  { %476 = vst.msk [vmem:[#allocation2 + $0x590] sm:$0xff] %vm39_vm0, %v15008_v25  ;;  %13634 = vmatmul.msk.f32.gmra.mxu2 %vm39_vm0, %v1569_v28  ;;  %13666 = vmatmul.msk.f32.gmra.mxu3 %vm39_vm0, %v1601_v29  ;;  %v1572_v22 = vld [vmem:[#allocation2 + $0x3d8] sm:$0xff] }
  0xb1   :  { %467 = vst.msk [vmem:[#allocation2 + $0x80] sm:$0xff] %vm39_vm0, %v15013_v27  ;;  %13570 = vmatmul.msk.f32.gmra.mxu0 %vm39_vm0, %v1505_v32  ;;  %433 = vrot.lane.b32.xlu2 %v407_v30, %s15242_s15  ;;  %v1604_v23 = vld [vmem:[#allocation2 + $0x588] sm:$0xff]  ;;  %v1087_v27 = vunpack.c.l.bf16 %v1075_v18 }
  0xb2   :  { %470 = vst.msk [vmem:[#allocation2 + $0x230] sm:$0xff] %vm39_vm0, %v15012_v31  ;;  %263 = vrot.lane.b32.xlu0 %v237_v33, %s15240_s30  ;;  %348 = vrot.lane.b32.xlu1 %v322_v34, %s15241_s12  ;;  %v15076_v35 = vpop.permute.xlu2 %15075  ;;  %v15021_v37 = vpop.permute.xlu0 %15020  ;;  %v1160_v34 = vld [vmem:[%s18599_s0 + $0x8] sm:$0x1] }
  0xb3   :  { %v15078_v39 = vunpack.i.h.bf16 %v15076_v35  ;;  %v15077_v40 = vunpack.i.l.bf16 %v15076_v35  ;;  %v15022_v41 = vunpack.i.l.bf16 %v15021_v37  ;;  %v15026_v36 = vpop.permute.xlu1 %15025  ;;  %v15023_v44 = vunpack.i.h.bf16 %v15021_v37  ;;  %v1540_v37 = vld [vmem:[#allocation2 + $0x228] sm:$0xff] }
  0xb4   :  { %v15027_v45 = vunpack.i.l.bf16 %v15026_v36  ;;  %v15028_v49 = vunpack.i.h.bf16 %v15026_v36  ;;  %v1172_v42 = vunpack.c.l.bf16 %v1160_v34 }
  0xb5   :  { %812 = vst.msk [vmem:[#allocation2 + $0x438] sm:$0xff] %vm39_vm0, %v15077_v40 }
  0xb6   :  { %815 = vst.msk [vmem:[#allocation2 + $0x5e8] sm:$0xff] %vm39_vm0, %v15078_v39  ;;  %v1508_v25 = vld [vmem:[#allocation2 + $0x78] sm:$0xff]  ;;  %v1573_v39 = vld [vmem:[#allocation2 + $0x3e0] sm:$0xff] }
  0xb7   :  { %554 = vst.msk [vmem:[#allocation2 + $0x240] sm:$0xff] %vm39_vm0, %v15022_v41  ;;  %13602 = vmatmul.msk.f32.gmra.mxu1 %vm39_vm0, %v1537_v3  ;;  %v1605_v40 = vld [vmem:[#allocation2 + $0x590] sm:$0xff] }
  0xb8   :  { %558 = vst.msk [vmem:[#allocation2 + $0x3f8] sm:$0xff] %vm39_vm0, %v15023_v44  ;;  %13635 = vmatmul.msk.f32.gmra.mxu2 %vm39_vm0, %v1570_v46  ;;  %13667 = vmatmul.msk.f32.gmra.mxu3 %vm39_vm0, %v1602_v47  ;;  %v1509_v36 = vld [vmem:[#allocation2 + $0x80] sm:$0xff] }
  0xb9   :  { %551 = vst.msk [vmem:[#allocation2 + $0x90] sm:$0xff] %vm39_vm0, %v15027_v45  ;;  %13571 = vmatmul.msk.f32.gmra.mxu0 %vm39_vm0, %v1506_v50  ;;  %688 = vrot.lane.b32.xlu2 %v662_v48, %s15245_s8  ;;  %v1330_v45 = vld [vmem:[%s18599_s0 + $0x8] sm:$0x1] }
  0xba   :  { %561 = vst.msk [vmem:[#allocation2 + $0x5a8] sm:$0xff] %vm39_vm0, %v15028_v49  ;;  %518 = vrot.lane.b32.xlu0 %v492_v51, %s15243_s18  ;;  %603 = vrot.lane.b32.xlu1 %v577_v52, %s15244_s29  ;;  %v15091_v53 = vpop.permute.xlu2 %15090  ;;  %v15036_v54 = vpop.permute.xlu0 %15035  ;;  %v1245_v50 = vld [vmem:[%s18599_s0 + $0x8] sm:$0x1]  ;;  %v1541_v52 = vld [vmem:[#allocation2 + $0x230] sm:$0xff] }
  0xbb   :  { %v15093_v56 = vunpack.i.h.bf16 %v15091_v53  ;;  %v15092_v57 = vunpack.i.l.bf16 %v15091_v53  ;;  %v15037_v58 = vunpack.i.l.bf16 %v15036_v54  ;;  %v15041_v59 = vpop.permute.xlu1 %15040  ;;  %v15038_v7 = vunpack.i.h.bf16 %v15036_v54  ;;  %v1574_v54 = vld [vmem:[#allocation2 + $0x3f0] sm:$0xff] }
  0xbc   :  { %v15042_v62 = vunpack.i.l.bf16 %v15041_v59  ;;  %v15043_v2 = vunpack.i.h.bf16 %v15041_v59  ;;  %v1257_v59 = vunpack.c.l.bf16 %v1245_v50 }
  0xbd   :  { %807 = vst.msk [vmem:[#allocation2 + $0xe0] sm:$0xff] %vm39_vm0, %v15093_v56  ;;  %v1342_v56 = vunpack.c.l.bf16 %v1330_v45 }
  0xbe   :  { %810 = vst.msk [vmem:[#allocation2 + $0x290] sm:$0xff] %vm39_vm0, %v15092_v57 }
  0xbf   :  { %642 = vst.msk [vmem:[#allocation2 + $0x408] sm:$0xff] %vm39_vm0, %v15037_v58  ;;  %13603 = vmatmul.msk.f32.gmra.mxu1 %vm39_vm0, %v1538_v14 }
  0xc0   :  { %645 = vst.msk [vmem:[#allocation2 + $0x5b8] sm:$0xff] %vm39_vm0, %v15038_v7  ;;  %13636 = vmatmul.msk.f32.gmra.mxu2 %vm39_vm0, %v1571_v63  ;;  %13668 = vmatmul.msk.f32.gmra.mxu3 %vm39_vm0, %v1603_v0  ;;  %v1510_v58 = vld [vmem:[#allocation2 + $0x90] sm:$0xff] }
  0xc1   :  { %639 = vst.msk [vmem:[#allocation2 + $0x258] sm:$0xff] %vm39_vm0, %v15042_v62  ;;  %13572 = vmatmul.msk.f32.gmra.mxu0 %vm39_vm0, %v1507_v4  ;;  %943 = vrot.lane.b32.xlu2 %v917_v1, %s15248_s22  ;;  %v228_v7 = vld [vmem:[%s18599_s0 + $0x14] sm:$0x1] }
  0xc2   :  { %643 = vst.msk [vmem:[#allocation2 + $0x410] sm:$0xff] %vm39_vm0, %v15043_v2  ;;  %773 = vrot.lane.b32.xlu0 %v747_v5, %s15246_s17  ;;  %858 = vrot.lane.b32.xlu1 %v832_v6, %s15247_s14  ;;  %v15106_v8 = vpop.permute.xlu2 %15105  ;;  %v15051_v9 = vpop.permute.xlu0 %15050  ;;  %v58_v1 = vld [vmem:[%s18599_s0 + $0x14] sm:$0x1]  ;;  %v1542_v5 = vld [vmem:[#allocation2 + $0x240] sm:$0xff]  ;;  %v240_v10 = vunpack.c.l.bf16 %v228_v7 }
  0xc3   :  { %v15108_v11 = vunpack.i.h.bf16 %v15106_v8  ;;  %v15107_v12 = vunpack.i.l.bf16 %v15106_v8  ;;  %v15053_v13 = vunpack.i.h.bf16 %v15051_v9  ;;  %v15056_v15 = vpop.permute.xlu1 %15055  ;;  %v15052_v19 = vunpack.i.l.bf16 %v15051_v9  ;;  %v143_v2 = vld [vmem:[%s18599_s0 + $0x14] sm:$0x1]  ;;  %v1575_v8 = vld [vmem:[#allocation2 + $0x3f8] sm:$0xff]  ;;  %v1607_v9 = vld [vmem:[#allocation2 + $0x5a8] sm:$0xff] }
  0xc4   :  { %v15057_v21 = vunpack.i.l.bf16 %v15056_v15  ;;  %v15058_v17 = vunpack.i.h.bf16 %v15056_v15  ;;  %v155_v15 = vunpack.c.l.bf16 %v143_v2 }
  0xc5   :  { %891 = vst.msk [vmem:[#allocation2 + $0xf0] sm:$0xff] %vm39_vm0, %v15107_v12  ;;  %v1511_v12 = vld [vmem:[#allocation2 + $0x98] sm:$0xff] }
  0xc6   :  { %901 = vst.msk [vmem:[#allocation2 + $0x608] sm:$0xff] %vm39_vm0, %v15108_v11 }
  0xc7   :  { %637 = vst.msk [vmem:[#allocation2 + $0xb0] sm:$0xff] %vm39_vm0, %v15053_v13  ;;  %13604 = vmatmul.msk.f32.gmra.mxu1 %vm39_vm0, %v1539_v20  ;;  %v70_v13 = vunpack.c.l.bf16 %v58_v1 }
  0xc8   :  { %640 = vst.msk [vmem:[#allocation2 + $0x260] sm:$0xff] %vm39_vm0, %v15052_v19  ;;  %13637 = vmatmul.msk.f32.gmra.mxu2 %vm39_vm0, %v1572_v22  ;;  %13669 = vmatmul.msk.f32.gmra.mxu3 %vm39_vm0, %v1604_v23  ;;  %v483_v19 = vld [vmem:[%s18599_s0 + $0x14] sm:$0x1] }
  0xc9   :  { %727 = vst.msk [vmem:[#allocation2 + $0x420] sm:$0xff] %vm39_vm0, %v15057_v21  ;;  %13573 = vmatmul.msk.f32.gmra.mxu0 %vm39_vm0, %v1508_v25  ;;  %1364 = vrot.lane.b32.xlu2 %v14861_v24, %s15253_s5 }
  0xca   :  { %730 = vst.msk [vmem:[#allocation2 + $0x5d0] sm:$0xff] %vm39_vm0, %v15058_v17  ;;  %1028 = vrot.lane.b32.xlu0 %v1002_v26, %s15249_s23  ;;  %1113 = vrot.lane.b32.xlu1 %v1087_v27, %s15250_s10  ;;  %v15121_v28 = vpop.permute.xlu2 %15120  ;;  %v15066_v29 = vpop.permute.xlu0 %15065  ;;  %v398_v17 = vld [vmem:[%s18599_s0 + $0x14] sm:$0x1]  ;;  %v1543_v26 = vld [vmem:[#allocation2 + $0x248] sm:$0xff] }
  0xcb   :  { %v15123_v30 = vunpack.i.h.bf16 %v15121_v28  ;;  %v15122_v31 = vunpack.i.l.bf16 %v15121_v28  ;;  %v15067_v32 = vunpack.i.l.bf16 %v15066_v29  ;;  %v15071_v33 = vpop.permute.xlu1 %15070  ;;  %v15068_v35 = vunpack.i.h.bf16 %v15066_v29  ;;  %v1576_v28 = vld [vmem:[#allocation2 + $0x408] sm:$0xff]  ;;  %v1608_v29 = vld [vmem:[#allocation2 + $0x5b8] sm:$0xff] }
  0xcc   :  { %v15073_v38 = vunpack.i.h.bf16 %v15071_v33  ;;  %v15072_v41 = vunpack.i.l.bf16 %v15071_v33  ;;  %v410_v34 = vunpack.c.l.bf16 %v398_v17 }
  0xcd   :  { %979 = vst.msk [vmem:[#allocation2 + $0x2b8] sm:$0xff] %vm39_vm0, %v15122_v31 }
  0xce   :  { %983 = vst.msk [vmem:[#allocation2 + $0x470] sm:$0xff] %vm39_vm0, %v15123_v30  ;;  %v495_v30 = vunpack.c.l.bf16 %v483_v19  ;;  %v1513_v50 = vld [vmem:[#allocation2 + $0xb0] sm:$0xff] }
  0xcf   :  { %721 = vst.msk [vmem:[#allocation2 + $0xc0] sm:$0xff] %vm39_vm0, %v15067_v32  ;;  %13605 = vmatmul.msk.f32.gmra.mxu1 %vm39_vm0, %v1540_v37  ;;  %v1512_v32 = vld [vmem:[#allocation2 + $0xa8] sm:$0xff]  ;;  %v738_v37 = vld [vmem:[%s18599_s0 + $0x14] sm:$0x1] }
  0xd0   :  { %731 = vst.msk [vmem:[#allocation2 + $0x5d8] sm:$0xff] %vm39_vm0, %v15068_v35  ;;  %13638 = vmatmul.msk.f32.gmra.mxu2 %vm39_vm0, %v1573_v39  ;;  %13670 = vmatmul.msk.f32.gmra.mxu3 %vm39_vm0, %v1605_v40 }
  0xd1   :  { %722 = vst.msk [vmem:[#allocation2 + $0xc8] sm:$0xff] %vm39_vm0, %v15073_v38  ;;  %13574 = vmatmul.msk.f32.gmra.mxu0 %vm39_vm0, %v1509_v36  ;;  %1449 = vrot.lane.b32.xlu2 %v14861_v24, %s15254_s9  ;;  %v313_v24 = vld [vmem:[%s18599_s0 + $0x14] sm:$0x1] }
  0xd2   :  { %725 = vst.msk [vmem:[#allocation2 + $0x278] sm:$0xff] %vm39_vm0, %v15072_v41  ;;  %1198 = vrot.lane.b32.xlu0 %v1172_v42, %s15251_s16  ;;  %1366 = vrot.lane.b32.xlu1 %v14862_v43, %s15253_s5  ;;  %v15136_v44 = vpop.permute.xlu2 %15135  ;;  %v15081_v3 = vpop.permute.xlu0 %15080  ;;  %v325_v33 = vunpack.c.l.bf16 %v313_v24  ;;  %v568_v41 = vld [vmem:[%s18599_s0 + $0x14] sm:$0x1] }
  0xd3   :  { %v15138_v46 = vunpack.i.h.bf16 %v15136_v44  ;;  %v15137_v47 = vunpack.i.l.bf16 %v15136_v44  ;;  %v15082_v48 = vunpack.i.l.bf16 %v15081_v3  ;;  %v15086_v49 = vpop.permute.xlu1 %15085  ;;  %v15083_v51 = vunpack.i.h.bf16 %v15081_v3  ;;  %v653_v36 = vld [vmem:[%s18599_s0 + $0x14] sm:$0x1]  ;;  %v1544_v3 = vld [vmem:[#allocation2 + $0x258] sm:$0xff] }
  0xd4   :  { %v15087_v53 = vunpack.i.l.bf16 %v15086_v49  ;;  %v15088_v57 = vunpack.i.h.bf16 %v15086_v49  ;;  %v1610_v1 = vld [vmem:[#allocation2 + $0x5d0] sm:$0xff] }
  0xd5   :  { %1067 = vst.msk [vmem:[#allocation2 + $0x480] sm:$0xff] %vm39_vm0, %v15137_v47  ;;  %v1609_v47 = vld [vmem:[#allocation2 + $0x5c0] sm:$0xff] }
  0xd6   :  { %1070 = vst.msk [vmem:[#allocation2 + $0x630] sm:$0xff] %vm39_vm0, %v15138_v46  ;;  %v1577_v46 = vld [vmem:[#allocation2 + $0x410] sm:$0xff] }
  0xd7   :  { %809 = vst.msk [vmem:[#allocation2 + $0x288] sm:$0xff] %vm39_vm0, %v15082_v48  ;;  %13606 = vmatmul.msk.f32.gmra.mxu1 %vm39_vm0, %v1541_v52  ;;  %v750_v48 = vunpack.c.l.bf16 %v738_v37  ;;  %v665_v52 = vunpack.c.l.bf16 %v653_v36  ;;  %v1416_v37 = vld [vmem:[%s18599_s0 + $0xc] sm:$0xff]  }
  0xd8   :  { %813 = vst.msk [vmem:[#allocation2 + $0x440] sm:$0xff] %vm39_vm0, %v15083_v51  ;;  %13639 = vmatmul.msk.f32.gmra.mxu2 %vm39_vm0, %v1574_v54  ;;  %13671 = vmatmul.msk.f32.gmra.mxu3 %vm39_vm0, %v1606_v55  ;;  %v580_v51 = vunpack.c.l.bf16 %v568_v41  ;;  %v15832_v54 = vpop.f32.mrf.mxu0  ;;  %v993_v55 = vld [vmem:[%s18599_s0 + $0x14] sm:$0x1] }
  0xd9   :  { %806 = vst.msk [vmem:[#allocation2 + $0xd8] sm:$0xff] %vm39_vm0, %v15087_v53  ;;  %13575 = vmatmul.msk.f32.gmra.mxu0 %vm39_vm0, %v1510_v58  ;;  %1368 = vrot.lane.b32.xlu2 %v1342_v56, %s15253_s5  ;;  %v1005_v2 = vunpack.c.l.bf16 %v993_v55  ;;  %v1333_v55 = vld [vmem:[%s18599_s0 + $0x14] sm:$0x1] }
  0xda   :  { %816 = vst.msk [vmem:[#allocation2 + $0x5f0] sm:$0xff] %vm39_vm0, %v15088_v57  ;;  %1283 = vrot.lane.b32.xlu0 %v1257_v59, %s15252_s21  ;;  %1451 = vrot.lane.b32.xlu1 %v14862_v43, %s15254_s9  ;;  %v15151_v60 = vpop.permute.xlu2 %15150  ;;  %v15096_v61 = vpop.permute.xlu0 %15095  ;;  %v823_v59 = vld [vmem:[%s18599_s0 + $0x14] sm:$0x1] }
  0xdb   :  { %v15153_v14 = vunpack.i.h.bf16 %v15151_v60  ;;  %v15152_v62 = vunpack.i.l.bf16 %v15151_v60  ;;  %v15097_v63 = vunpack.i.l.bf16 %v15096_v61  ;;  %v15101_v0 = vpop.permute.xlu1 %15100  ;;  %v15098_v4 = vunpack.i.h.bf16 %v15096_v61  ;;  %v908_v60 = vld [vmem:[%s18599_s0 + $0x14] sm:$0x1] }
  0xdc   :  { %v15102_v6 = vunpack.i.l.bf16 %v15101_v0  ;;  %v15103_v11 = vunpack.i.h.bf16 %v15101_v0  ;;  %v1578_v0 = vld [vmem:[#allocation2 + $0x420] sm:$0xff] }
  0xdd   :  { %1062 = vst.msk [vmem:[#allocation2 + $0x128] sm:$0xff] %vm39_vm0, %v15153_v14 }
  0xde   :  { %1065 = vst.msk [vmem:[#allocation2 + $0x2d8] sm:$0xff] %vm39_vm0, %v15152_v62  ;;  %v1545_v62 = vld [vmem:[#allocation2 + $0x260] sm:$0xff] }
  0xdf   :  { %897 = vst.msk [vmem:[#allocation2 + $0x450] sm:$0xff] %vm39_vm0, %v15097_v63  ;;  %13607 = vmatmul.msk.f32.gmra.mxu1 %vm39_vm0, %v1542_v5  ;;  %v1514_v5 = vld [vmem:[#allocation2 + $0xc0] sm:$0xff] }
  0xe0   :  { %900 = vst.msk [vmem:[#allocation2 + $0x600] sm:$0xff] %vm39_vm0, %v15098_v4  ;;  %13640 = vmatmul.msk.f32.gmra.mxu2 %vm39_vm0, %v1575_v8  ;;  %13672 = vmatmul.msk.f32.gmra.mxu3 %vm39_vm0, %v1607_v9  ;;  %v920_v8 = vunpack.c.l.bf16 %v908_v60  ;;  %v15845_v9 = vpop.f32.mrf.mxu2 }
  0xe1   :  { %894 = vst.msk [vmem:[#allocation2 + $0x2a0] sm:$0xff] %vm39_vm0, %v15102_v6  ;;  %13576 = vmatmul.msk.f32.gmra.mxu0 %vm39_vm0, %v1511_v12  ;;  %269 = vrot.lane.b32.xlu2 %v240_v10, %s15240_s30  ;;  %v835_v6 = vunpack.c.l.bf16 %v823_v59  ;;  %v15849_v10 = vpop.f32.mrf.mxu3  ;;  %v1163_v12 = vld [vmem:[%s18599_s0 + $0x14] sm:$0x1] }
  0xe2   :  { %898 = vst.msk [vmem:[#allocation2 + $0x458] sm:$0xff] %vm39_vm0, %v15103_v11  ;;  %99 = vrot.lane.b32.xlu0 %v70_v13, %s15239_s25  ;;  %184 = vrot.lane.b32.xlu1 %v155_v15, %s15238_s24  ;;  %v15166_v16 = vpop.permute.xlu2 %15165  ;;  %v15111_v18 = vpop.permute.xlu0 %15110 }
  0xe3   :  { %v15168_v20 = vunpack.i.h.bf16 %v15166_v16  ;;  %v15167_v21 = vunpack.i.l.bf16 %v15166_v16  ;;  %v15113_v22 = vunpack.i.h.bf16 %v15111_v18  ;;  %v15116_v23 = vpop.permute.xlu1 %15115  ;;  %v15112_v25 = vunpack.i.l.bf16 %v15111_v18  ;;  %18603 = vst [vmem:[#allocation7_spill] sm:$0xff] %v15845_v9  ;;  %v15857_v11 = vpop.f32.mrf.mxu1  ;;  %v1078_v16 = vld [vmem:[%s18599_s0 + $0x14] sm:$0x1]  ;;  %v1331_v18 = vld [vmem:[%s18599_s0 + $0xc] sm:$0xff]  }
  0xe4   :  { %v15117_v27 = vunpack.i.l.bf16 %v15116_v23  ;;  %v15118_v31 = vunpack.i.h.bf16 %v15116_v23  ;;  %18604 = vst [vmem:[#allocation8_spill] sm:$0xff] %v15849_v10  ;;  %v1546_v23 = vld [vmem:[#allocation2 + $0x270] sm:$0xff] }
  0xe5   :  { %1146 = vst.msk [vmem:[#allocation2 + $0x138] sm:$0xff] %vm39_vm0, %v15167_v21 }
  0xe6   :  { %1156 = vst.msk [vmem:[#allocation2 + $0x650] sm:$0xff] %vm39_vm0, %v15168_v20 }
  0xe7   :  { %892 = vst.msk [vmem:[#allocation2 + $0xf8] sm:$0xff] %vm39_vm0, %v15113_v22  ;;  %13608 = vmatmul.msk.f32.gmra.mxu1 %vm39_vm0, %v1543_v26  ;;  %v15872_v22 = vpop.f32.mrf.mxu0  ;;  %v1611_v26 = vld [vmem:[#allocation2 + $0x5d8] sm:$0xff] }
  0xe8   :  { %895 = vst.msk [vmem:[#allocation2 + $0x2a8] sm:$0xff] %vm39_vm0, %v15112_v25  ;;  %13641 = vmatmul.msk.f32.gmra.mxu2 %vm39_vm0, %v1576_v28  ;;  %13673 = vmatmul.msk.f32.gmra.mxu3 %vm39_vm0, %v1608_v29  ;;  %v1579_v25 = vld [vmem:[#allocation2 + $0x428] sm:$0xff]  ;;  %v1090_v29 = vunpack.c.l.bf16 %v1078_v16 }
  0xe9   :  { %982 = vst.msk [vmem:[#allocation2 + $0x468] sm:$0xff] %vm39_vm0, %v15117_v27  ;;  %13577 = vmatmul.msk.f32.gmra.mxu0 %vm39_vm0, %v1512_v32  ;;  %524 = vrot.lane.b32.xlu2 %v495_v30, %s15243_s18  ;;  %v1175_v27 = vunpack.c.l.bf16 %v1163_v12  ;;  %v1515_v28 = vld [vmem:[#allocation2 + $0xc8] sm:$0xff]  ;;  %v1343_v30 = vunpack.c.l.bf16 %v1331_v18  ;;  %v15885_v32 = vpop.f32.mrf.mxu3 }
  0xea   :  { %985 = vst.msk [vmem:[#allocation2 + $0x618] sm:$0xff] %vm39_vm0, %v15118_v31  ;;  %354 = vrot.lane.b32.xlu0 %v325_v33, %s15241_s12  ;;  %439 = vrot.lane.b32.xlu1 %v410_v34, %s15242_s15  ;;  %v15126_v35 = vpop.permute.xlu0 %15125  ;;  %v15880_v31 = vpop.f32.mrf.mxu2  ;;  %v1248_v33 = vld [vmem:[%s18599_s0 + $0x14] sm:$0x1] }
  0xeb   :  { %v15181_v38 = vpop.permute.xlu2 %15180  ;;  %v15127_v39 = vunpack.i.l.bf16 %v15126_v35  ;;  %v15131_v40 = vpop.permute.xlu1 %15130  ;;  %v15128_v44 = vunpack.i.h.bf16 %v15126_v35  ;;  %18605 = vst [vmem:[#allocation9_spill] sm:$0xff] %v15880_v31 }
  0xec   :  { %v15183_v42 = vunpack.i.h.bf16 %v15181_v38  ;;  %v15182_v43 = vunpack.i.l.bf16 %v15181_v38  ;;  %v15133_v45 = vunpack.i.h.bf16 %v15131_v40  ;;  %v15132_v49 = vunpack.i.l.bf16 %v15131_v40  ;;  %18606 = vst [vmem:[#allocation10_spill] sm:$0xff] %v15885_v32  ;;  %v15892_v35 = vpop.f32.mrf.mxu1  ;;  %v1547_v40 = vld [vmem:[#allocation2 + $0x278] sm:$0xff] }
  0xed   :  { %976 = vst.msk [vmem:[#allocation2 + $0x108] sm:$0xff] %vm39_vm0, %v15127_v39  ;;  %v6450_v32 = vld [vmem:[#allocation2 + $0x19] sm:$0xff] }
  0xee   :  { %1234 = vst.msk [vmem:[#allocation2 + $0x300] sm:$0xff] %vm39_vm0, %v15182_v43  ;;  %v1580_v43 = vld [vmem:[#allocation2 + $0x438] sm:$0xff] }
  0xef   :  { %1238 = vst.msk [vmem:[#allocation2 + $0x4b8] sm:$0xff] %vm39_vm0, %v15183_v42  ;;  %13609 = vmatmul.msk.f32.gmra.mxu1 %vm39_vm0, %v1544_v3  ;;  %v1260_v3 = vunpack.c.l.bf16 %v1248_v33 }
  0xf0   :  { %986 = vst.msk [vmem:[#allocation2 + $0x620] sm:$0xff] %vm39_vm0, %v15128_v44  ;;  %13642 = vmatmul.msk.f32.gmra.mxu2 %vm39_vm0, %v1577_v46  ;;  %13674 = vmatmul.msk.f32.gmra.mxu3 %vm39_vm0, %v1609_v47  ;;  %v1612_v44 = vld [vmem:[#allocation2 + $0x5e8] sm:$0xff]  ;;  %v1516_v47 = vld [vmem:[#allocation2 + $0xd8] sm:$0xff] }
  0xf1   :  { %977 = vst.msk [vmem:[#allocation2 + $0x110] sm:$0xff] %vm39_vm0, %v15133_v45  ;;  %13578 = vmatmul.msk.f32.gmra.mxu0 %vm39_vm0, %v1513_v50  ;;  %779 = vrot.lane.b32.xlu2 %v750_v48, %s15246_s17  ;;  %v1344_v48 = vunpack.c.h.bf16 %v1331_v18 }
  0xf2   :  { %980 = vst.msk [vmem:[#allocation2 + $0x2c0] sm:$0xff] %vm39_vm0, %v15132_v49  ;;  %609 = vrot.lane.b32.xlu0 %v580_v51, %s15244_s29  ;;  %694 = vrot.lane.b32.xlu1 %v665_v52, %s15245_s8  ;;  %v15141_v53 = vpop.permute.xlu0 %15140  ;;  %v1428_v49 = vunpack.c.l.bf16 %v1416_v37  ;;  %v61_v51 = vld [vmem:[%s18599_s0 + $0x20] sm:$0x1] }
  0xf3   :  { %v15196_v56 = vpop.permute.xlu2 %15195  ;;  %v15142_v57 = vunpack.i.l.bf16 %v15141_v53  ;;  %v15146_v58 = vpop.permute.xlu1 %15145  ;;  %v15143_v14 = vunpack.i.h.bf16 %v15141_v53 }
  0xf4   :  { %v15198_v61 = vunpack.i.h.bf16 %v15196_v56  ;;  %v15197_v7 = vunpack.i.l.bf16 %v15196_v56  ;;  %v15147_v63 = vunpack.i.l.bf16 %v15146_v58  ;;  %v15148_v4 = vunpack.i.h.bf16 %v15146_v58  ;;  %v1548_v58 = vld [vmem:[#allocation2 + $0x288] sm:$0xff] }
  0xf5   :  { %1064 = vst.msk [vmem:[#allocation2 + $0x2d0] sm:$0xff] %vm39_vm0, %v15142_v57 }
  0xf6   :  { %1322 = vst.msk [vmem:[#allocation2 + $0x4c8] sm:$0xff] %vm39_vm0, %v15197_v7 }
  0xf7   :  { %1325 = vst.msk [vmem:[#allocation2 + $0x678] sm:$0xff] %vm39_vm0, %v15198_v61  ;;  %13610 = vmatmul.msk.f32.gmra.mxu1 %vm39_vm0, %v1545_v62  ;;  %v1613_v62 = vld [vmem:[#allocation2 + $0x5f0] sm:$0xff] }
  0xf8   :  { %1068 = vst.msk [vmem:[#allocation2 + $0x488] sm:$0xff] %vm39_vm0, %v15143_v14  ;;  %13643 = vmatmul.msk.f32.gmra.mxu2 %vm39_vm0, %v1578_v0  ;;  %13675 = vmatmul.msk.f32.gmra.mxu3 %vm39_vm0, %v1610_v1  ;;  %v1581_v14 = vld [vmem:[#allocation2 + $0x440] sm:$0xff] }
  0xf9   :  { %1061 = vst.msk [vmem:[#allocation2 + $0x120] sm:$0xff] %vm39_vm0, %v15147_v63  ;;  %13579 = vmatmul.msk.f32.gmra.mxu0 %vm39_vm0, %v1514_v5  ;;  %1034 = vrot.lane.b32.xlu2 %v1005_v2, %s15249_s23  ;;  %v73_v63 = vunpack.c.l.bf16 %v61_v51  ;;  %v1517_v2 = vld [vmem:[#allocation2 + $0xe0] sm:$0xff]  ;;  %v1345_v5 = vunpack.c.l.bf16 %v1333_v55  ;;  %v1519_v51 = vld [vmem:[#allocation2 + $0xf8] sm:$0xff] }
  0xfa   :  { %1071 = vst.msk [vmem:[#allocation2 + $0x638] sm:$0xff] %vm39_vm0, %v15148_v4  ;;  %864 = vrot.lane.b32.xlu0 %v835_v6, %s15247_s14  ;;  %949 = vrot.lane.b32.xlu1 %v920_v8, %s15248_s22  ;;  %v1429_v4 = vunpack.c.h.bf16 %v1416_v37  ;;  %v316_v6 = vld [vmem:[%s18599_s0 + $0x20] sm:$0x1] }
  0xfb   :  { %v1288_v13 = vpop.permute.xlu2 %1287  ;;  %v15156_v15 = vpop.permute.xlu0 %15155  ;;  %v571_v37 = vld [vmem:[%s18599_s0 + $0x20] sm:$0x1] }
  0xfc   :  { %1320 = vst.msk [vmem:[#allocation2 + $0x320] sm:$0xff] %vm39_vm0, %v1288_v13  ;;  %v15158_v19 = vunpack.i.h.bf16 %v15156_v15  ;;  %v15157_v20 = vunpack.i.l.bf16 %v15156_v15  ;;  %v15161_v21 = vpop.permute.xlu1 %15160  ;;  %v146_v13 = vld [vmem:[%s18599_s0 + $0x20] sm:$0x1] }
  0xfd   :  { %v15163_v24 = vunpack.i.h.bf16 %v15161_v21  ;;  %v15162_v17 = vunpack.i.l.bf16 %v15161_v21  ;;  %v231_v15 = vld [vmem:[%s18599_s0 + $0x20] sm:$0x1]  ;;  %v158_v33 = vunpack.c.l.bf16 %v146_v13  ;;  %v1520_v13 = vld [vmem:[#allocation2 + $0x108] sm:$0xff] }
  0xfe   :  { %1152 = vst.msk [vmem:[#allocation2 + $0x498] sm:$0xff] %vm39_vm0, %v15157_v20 }
  0xff   :  { %1155 = vst.msk [vmem:[#allocation2 + $0x648] sm:$0xff] %vm39_vm0, %v15158_v19  ;;  %13611 = vmatmul.msk.f32.gmra.mxu1 %vm39_vm0, %v1546_v23  ;;  %v1549_v19 = vld [vmem:[#allocation2 + $0x290] sm:$0xff] }
 0x100   :  { %1149 = vst.msk [vmem:[#allocation2 + $0x2e8] sm:$0xff] %vm39_vm0, %v15162_v17  ;;  %13644 = vmatmul.msk.f32.gmra.mxu2 %vm39_vm0, %v1579_v25  ;;  %13676 = vmatmul.msk.f32.gmra.mxu3 %vm39_vm0, %v1611_v26  ;;  %v1582_v17 = vld [vmem:[#allocation2 + $0x450] sm:$0xff]  ;;  %v1614_v25 = vld [vmem:[#allocation2 + $0x600] sm:$0xff]  ;;  %v328_v26 = vunpack.c.l.bf16 %v316_v6 }
 0x101   :  { %1153 = vst.msk [vmem:[#allocation2 + $0x4a0] sm:$0xff] %vm39_vm0, %v15163_v24  ;;  %13580 = vmatmul.msk.f32.gmra.mxu0 %vm39_vm0, %v1515_v28  ;;  %1204 = vrot.lane.b32.xlu2 %v1175_v27, %s15251_s16 }
 0x102   :  { %1119 = vrot.lane.b32.xlu0 %v1090_v29, %s15250_s10  ;;  %1370 = vrot.lane.b32.xlu1 %v1343_v30, %s15253_s5  ;;  %v1518_v30 = vld [vmem:[#allocation2 + $0xf0] sm:$0xff] }
 0x103   :  { %v179_v34 = vpop.permute.xlu2 %178 }
 0x104   :  { %213 = vst.msk [vmem:[#allocation2 + $0x40] sm:$0x3] %vm42_vm2, %v179_v34  ;;  %v15171_v38 = vpop.permute.xlu0 %15170  ;;  %v15176_v39 = vpop.permute.xlu1 %15175  ;;  %v243_v34 = vunpack.c.l.bf16 %v231_v15 }
 0x105   :  { %v15173_v41 = vunpack.i.h.bf16 %v15171_v38  ;;  %v15172_v36 = vunpack.i.l.bf16 %v15171_v38  ;;  %v15177_v42 = vunpack.i.l.bf16 %v15176_v39  ;;  %v15178_v45 = vunpack.i.h.bf16 %v15176_v39 }
 0x106   :  { %v15898_v46 = vpop.f32.mrf.mxu0 }
 0x107   :  { %1147 = vst.msk [vmem:[#allocation2 + $0x140] sm:$0xff] %vm39_vm0, %v15173_v41  ;;  %13612 = vmatmul.msk.f32.gmra.mxu1 %vm39_vm0, %v1547_v40  ;;  %v401_v40 = vld [vmem:[%s18599_s0 + $0x20] sm:$0x1] }
 0x108   :  { %1150 = vst.msk [vmem:[#allocation2 + $0x2f0] sm:$0xff] %vm39_vm0, %v15172_v36  ;;  %13645 = vmatmul.msk.f32.gmra.mxu2 %vm39_vm0, %v1580_v43  ;;  %13677 = vmatmul.msk.f32.gmra.mxu3 %vm39_vm0, %v1612_v44  ;;  %v486_v41 = vld [vmem:[%s18599_s0 + $0x20] sm:$0x1] }
 0x109   :  { %1237 = vst.msk [vmem:[#allocation2 + $0x4b0] sm:$0xff] %vm39_vm0, %v15177_v42  ;;  %13581 = vmatmul.msk.f32.gmra.mxu0 %vm39_vm0, %v1516_v47  ;;  %1289 = vrot.lane.b32.xlu2 %v1260_v3, %s15252_s21  ;;  %v1550_v43 = vld [vmem:[#allocation2 + $0x2a0] sm:$0xff]  ;;  %v1615_v47 = vld [vmem:[#allocation2 + $0x608] sm:$0xff]  ;;  %v498_v55 = vunpack.c.l.bf16 %v486_v41 }
 0x10a   :  { %1240 = vst.msk [vmem:[#allocation2 + $0x660] sm:$0xff] %vm39_vm0, %v15178_v45  ;;  %1372 = vrot.lane.b32.xlu0 %v1344_v48, %s15253_s5  ;;  %1455 = vrot.lane.b32.xlu1 %v1428_v49, %s15254_s9  ;;  %v15911_v50 = vpop.f32.mrf.mxu2  ;;  %v1583_v45 = vld [vmem:[#allocation2 + $0x458] sm:$0xff]  ;;  %v583_v48 = vunpack.c.l.bf16 %v571_v37 }
 0x10b   :  { %18607 = vst [vmem:[#allocation11_spill] sm:$0xff] %v15911_v50  ;;  %v15916_v52 = vpop.f32.mrf.mxu3  ;;  %v434_v53 = vpop.permute.xlu2 %433 }
 0x10c   :  { %18608 = vst [vmem:[#allocation12_spill] sm:$0xff] %v15916_v52  ;;  %v15186_v56 = vpop.permute.xlu0 %15185  ;;  %v15191_v57 = vpop.permute.xlu1 %15190 }
 0x10d   :  { %468 = vst.msk [vmem:[#allocation2 + $0x88] sm:$0x3] %vm42_vm2, %v434_v53  ;;  %v15188_v59 = vunpack.i.h.bf16 %v15186_v56  ;;  %v15187_v60 = vunpack.i.l.bf16 %v15186_v56  ;;  %v15193_v61 = vunpack.i.h.bf16 %v15191_v57  ;;  %v15922_v7 = vpop.f32.mrf.mxu1  ;;  %v15192_v0 = vunpack.i.l.bf16 %v15191_v57  ;;  %v826_v56 = vld [vmem:[%s18599_s0 + $0x20] sm:$0x1] }
 0x10e   :  { %v15924_v1 = vpop.f32.mrf.mxu0  ;;  %v413_v53 = vunpack.c.l.bf16 %v401_v40  ;;  %v1521_v40 = vld [vmem:[#allocation2 + $0x110] sm:$0xff] }
 0x10f   :  { %1231 = vst.msk [vmem:[#allocation2 + $0x150] sm:$0xff] %vm39_vm0, %v15187_v60  ;;  %13613 = vmatmul.msk.f32.gmra.mxu1 %vm39_vm0, %v1548_v58  ;;  %v741_v60 = vld [vmem:[%s18599_s0 + $0x20] sm:$0x1] }
 0x110   :  { %1241 = vst.msk [vmem:[#allocation2 + $0x668] sm:$0xff] %vm39_vm0, %v15188_v59  ;;  %13646 = vmatmul.msk.f32.gmra.mxu2 %vm39_vm0, %v1581_v14  ;;  %13678 = vmatmul.msk.f32.gmra.mxu3 %vm39_vm0, %v1613_v62  ;;  %v656_v59 = vld [vmem:[%s18599_s0 + $0x20] sm:$0x1]  ;;  %v1551_v62 = vld [vmem:[#allocation2 + $0x2a8] sm:$0xff] }
 0x111   :  { %1232 = vst.msk [vmem:[#allocation2 + $0x158] sm:$0xff] %vm39_vm0, %v15193_v61  ;;  %13582 = vmatmul.msk.f32.gmra.mxu0 %vm39_vm0, %v1517_v2  ;;  %105 = vrot.lane.b32.xlu2 %v73_v63, %s15239_s25  ;;  %v1584_v2 = vld [vmem:[#allocation2 + $0x468] sm:$0xff]  ;;  %v668_v15 = vunpack.c.l.bf16 %v656_v59  ;;  %v1618_v59 = vld [vmem:[#allocation2 + $0x630] sm:$0xff] }
 0x112   :  { %1235 = vst.msk [vmem:[#allocation2 + $0x308] sm:$0xff] %vm39_vm0, %v15192_v0  ;;  %1457 = vrot.lane.b32.xlu0 %v1429_v4, %s15254_s9  ;;  %1374 = vrot.lane.b32.xlu1 %v1345_v5, %s15253_s5  ;;  %v1616_v4 = vld [vmem:[#allocation2 + $0x618] sm:$0xff]  ;;  %v838_v5 = vunpack.c.l.bf16 %v826_v56  ;;  %v1586_v56 = vld [vmem:[#allocation2 + $0x480] sm:$0xff] }
 0x113   :  { %v15940_v8 = vpop.f32.mrf.mxu2  ;;  %v15942_v12 = vpop.f32.mrf.mxu3 }
 0x114   :  { %18609 = vst [vmem:[#allocation13_spill] sm:$0xff] %v15940_v8  ;;  %v689_v16 = vpop.permute.xlu2 %688  ;;  %v15201_v18 = vpop.permute.xlu0 %15200 }
 0x115   :  { %18610 = vst [vmem:[#allocation14_spill] sm:$0xff] %v15942_v12  ;;  %v15203_v20 = vunpack.i.h.bf16 %v15201_v18  ;;  %v15202_v21 = vunpack.i.l.bf16 %v15201_v18  ;;  %v15206_v23 = vpop.permute.xlu1 %15205  ;;  %v15951_v24 = vpop.f32.mrf.mxu1  ;;  %v1081_v18 = vld [vmem:[%s18599_s0 + $0x20] sm:$0x1]  ;;  %v5148_v12 = vld [vmem:[#allocation2 + $0x1] sm:$0xff] }
 0x116   :  { %723 = vst.msk [vmem:[#allocation2 + $0xd0] sm:$0x3] %vm42_vm2, %v689_v16  ;;  %v15208_v27 = vunpack.i.h.bf16 %v15206_v23  ;;  %v15207_v28 = vunpack.i.l.bf16 %v15206_v23  ;;  %v15953_v29 = vpop.f32.mrf.mxu0  ;;  %v753_v16 = vunpack.c.l.bf16 %v741_v60  ;;  %v996_v23 = vld [vmem:[%s18599_s0 + $0x20] sm:$0x1] }
 0x117   :  { %1319 = vst.msk [vmem:[#allocation2 + $0x318] sm:$0xff] %vm39_vm0, %v15202_v21  ;;  %13614 = vmatmul.msk.f32.gmra.mxu1 %vm39_vm0, %v1549_v19  ;;  %v911_v21 = vld [vmem:[%s18599_s0 + $0x20] sm:$0x1] }
 0x118   :  { %1323 = vst.msk [vmem:[#allocation2 + $0x4d0] sm:$0xff] %vm39_vm0, %v15203_v20  ;;  %13647 = vmatmul.msk.f32.gmra.mxu2 %vm39_vm0, %v1582_v17  ;;  %13679 = vmatmul.msk.f32.gmra.mxu3 %vm39_vm0, %v1614_v25  ;;  %v923_v41 = vunpack.c.l.bf16 %v911_v21 }
 0x119   :  { %1316 = vst.msk [vmem:[#allocation2 + $0x168] sm:$0xff] %vm39_vm0, %v15207_v28  ;;  %13583 = vmatmul.msk.f32.gmra.mxu0 %vm39_vm0, %v1518_v30  ;;  %360 = vrot.lane.b32.xlu2 %v328_v26, %s15241_s12  ;;  %v1552_v26 = vld [vmem:[#allocation2 + $0x2b8] sm:$0xff]  ;;  %v1585_v30 = vld [vmem:[#allocation2 + $0x470] sm:$0xff] }
 0x11a   :  { %1326 = vst.msk [vmem:[#allocation2 + $0x680] sm:$0xff] %vm39_vm0, %v15208_v27  ;;  %190 = vrot.lane.b32.xlu0 %v158_v33, %s15238_s24  ;;  %275 = vrot.lane.b32.xlu1 %v243_v34, %s15240_s30  ;;  %v1617_v33 = vld [vmem:[#allocation2 + $0x620] sm:$0xff]  ;;  %v1093_v34 = vunpack.c.l.bf16 %v1081_v18 }
 0x11b   :  { %v15969_v38 = vpop.f32.mrf.mxu2  ;;  %v15971_v39 = vpop.f32.mrf.mxu3 }
 0x11c   :  { %18611 = vst [vmem:[#allocation15_spill] sm:$0xff] %v15969_v38  ;;  %v944_v36 = vpop.permute.xlu2 %943  ;;  %v1282_v42 = vpop.permute.xlu0 %1281 }
 0x11d   :  { %18612 = vst [vmem:[#allocation16_spill] sm:$0xff] %v15971_v39  ;;  %v94_v44 = vpop.permute.xlu1 %93  ;;  %v15980_v3 = vpop.f32.mrf.mxu1 }
 0x11e   :  { %978 = vst.msk [vmem:[#allocation2 + $0x118] sm:$0x3] %vm42_vm2, %v944_v36  ;;  %v15983_v49 = vpop.f32.mrf.mxu0  ;;  %v1008_v36 = vunpack.c.l.bf16 %v996_v23  ;;  %v1587_v23 = vld [vmem:[#allocation2 + $0x488] sm:$0xff] }
 0x11f   :  { %1317 = vst.msk [vmem:[#allocation2 + $0x170] sm:$0xff] %vm39_vm0, %v1282_v42  ;;  %13615 = vmatmul.msk.f32.gmra.mxu1 %vm39_vm0, %v1550_v43  ;;  %v14891_v42 = vld [vmem:[%s18599_s0 + $0x18] sm:$0xff]  }
 0x120   :  { %128 = vst.msk [vmem:[#allocation2 + $0x28] sm:$0x3] %vm42_vm2, %v94_v44  ;;  %13648 = vmatmul.msk.f32.gmra.mxu2 %vm39_vm0, %v1583_v45  ;;  %13680 = vmatmul.msk.f32.gmra.mxu3 %vm39_vm0, %v1615_v47  ;;  %v1166_v45 = vld [vmem:[%s18599_s0 + $0x20] sm:$0x1]  ;;  %v14866_v60 = vunpack.c.h.bf16 %v14891_v42 }
 0x121   :  { %13584 = vmatmul.msk.f32.gmra.mxu0 %vm39_vm0, %v1519_v51  ;;  %615 = vrot.lane.b32.xlu2 %v583_v48, %s15244_s29  ;;  %v1553_v51 = vld [vmem:[#allocation2 + $0x2c0] sm:$0xff] }
 0x122   :  { %445 = vrot.lane.b32.xlu0 %v413_v53, %s15242_s15  ;;  %530 = vrot.lane.b32.xlu1 %v498_v55, %s15243_s18 }
 0x123   :  { %v15996_v57 = vpop.f32.mrf.mxu2  ;;  %v15998_v58 = vpop.f32.mrf.mxu3 }
 0x124   :  { %18613 = vst [vmem:[#allocation17_spill] sm:$0xff] %v15996_v57  ;;  %v1365_v61 = vpop.permute.xlu2 %1364  ;;  %v264_v14 = vpop.permute.xlu0 %263 }
 0x125   :  { %18614 = vst [vmem:[#allocation18_spill] sm:$0xff] %v15998_v58  ;;  %v349_v63 = vpop.permute.xlu1 %348  ;;  %v16007_v0 = vpop.f32.mrf.mxu1 }
 0x126   :  { %1401 = vst.msk [vmem:[#allocation2 + $0x180] sm:$0xff] %vm39_vm0, %v1365_v61  ;;  %v16010_v6 = vpop.f32.mrf.mxu0 }
 0x127   :  { %298 = vst.msk [vmem:[#allocation2 + $0x58] sm:$0x3] %vm42_vm2, %v264_v14  ;;  %13616 = vmatmul.msk.f32.gmra.mxu1 %vm39_vm0, %v1551_v62  ;;  %v1522_v14 = vld [vmem:[#allocation2 + $0x120] sm:$0xff]  ;;  %v14865_v62 = vunpack.c.l.bf16 %v14891_v42 }
 0x128   :  { %383 = vst.msk [vmem:[#allocation2 + $0x70] sm:$0x3] %vm42_vm2, %v349_v63  ;;  %13649 = vmatmul.msk.f32.gmra.mxu2 %vm39_vm0, %v1584_v2  ;;  %13681 = vmatmul.msk.f32.gmra.mxu3 %vm39_vm0, %v1616_v4  ;;  %v1178_v63 = vunpack.c.l.bf16 %v1166_v45  ;;  %v1555_v45 = vld [vmem:[#allocation2 + $0x2d8] sm:$0xff] }
 0x129   :  { %13585 = vmatmul.msk.f32.gmra.mxu0 %vm39_vm0, %v1520_v13  ;;  %870 = vrot.lane.b32.xlu2 %v838_v5, %s15247_s14  ;;  %v1251_v5 = vld [vmem:[%s18599_s0 + $0x20] sm:$0x1] }
 0x12a   :  { %700 = vrot.lane.b32.xlu0 %v668_v15, %s15245_s8  ;;  %785 = vrot.lane.b32.xlu1 %v753_v16, %s15246_s17  ;;  %v1554_v16 = vld [vmem:[#allocation2 + $0x2d0] sm:$0xff] }
 0x12b   :  { %v16023_v19 = vpop.f32.mrf.mxu2  ;;  %v16025_v20 = vpop.f32.mrf.mxu3 }
 0x12c   :  { %18615 = vst [vmem:[#allocation19_spill] sm:$0xff] %v16023_v19  ;;  %v1450_v17 = vpop.permute.xlu2 %1449  ;;  %v519_v25 = vpop.permute.xlu0 %518 }
 0x12d   :  { %18616 = vst [vmem:[#allocation20_spill] sm:$0xff] %v16025_v20  ;;  %v604_v27 = vpop.permute.xlu1 %603  ;;  %v16034_v28 = vpop.f32.mrf.mxu1 }
 0x12e   :  { %1486 = vst.msk [vmem:[#allocation2 + $0x198] sm:$0xff] %vm39_vm0, %v1450_v17  ;;  %v16037_v37 = vpop.f32.mrf.mxu0  ;;  %v1619_v17 = vld [vmem:[#allocation2 + $0x638] sm:$0xff] }
 0x12f   :  { %553 = vst.msk [vmem:[#allocation2 + $0xa0] sm:$0x3] %vm42_vm2, %v519_v25  ;;  %13617 = vmatmul.msk.f32.gmra.mxu1 %vm39_vm0, %v1552_v26  ;;  %v1523_v26 = vld [vmem:[#allocation2 + $0x128] sm:$0xff] }
 0x130   :  { %638 = vst.msk [vmem:[#allocation2 + $0xb8] sm:$0x3] %vm42_vm2, %v604_v27  ;;  %13650 = vmatmul.msk.f32.gmra.mxu2 %vm39_vm0, %v1585_v30  ;;  %13682 = vmatmul.msk.f32.gmra.mxu3 %vm39_vm0, %v1617_v33  ;;  %v1263_v27 = vunpack.c.l.bf16 %v1251_v5  ;;  %v149_v30 = vld [vmem:[%s18599_s0 + $0x2c] sm:$0x1] }
 0x131   :  { %13586 = vmatmul.msk.f32.gmra.mxu0 %vm39_vm0, %v1521_v40  ;;  %1125 = vrot.lane.b32.xlu2 %v1093_v34, %s15250_s10  ;;  %v1336_v40 = vld [vmem:[%s18599_s0 + $0x20] sm:$0x1] }
 0x132   :  { %955 = vrot.lane.b32.xlu0 %v923_v41, %s15248_s22  ;;  %1040 = vrot.lane.b32.xlu1 %v1008_v36, %s15249_s23  ;;  %v64_v41 = vld [vmem:[%s18599_s0 + $0x2c] sm:$0x1] }
 0x133   :  { %v16050_v43 = vpop.f32.mrf.mxu2  ;;  %v16052_v44 = vpop.f32.mrf.mxu3 }
 0x134   :  { %18617 = vst [vmem:[#allocation21_spill] sm:$0xff] %v16050_v43  ;;  %v1369_v47 = vpop.permute.xlu2 %1368  ;;  %v774_v48 = vpop.permute.xlu0 %773 }
 0x135   :  { %18618 = vst [vmem:[#allocation22_spill] sm:$0xff] %v16052_v44  ;;  %v859_v53 = vpop.permute.xlu1 %858  ;;  %v16058_v55 = vpop.f32.mrf.mxu1  ;;  %v16241_v44 = vld [vmem:[#allocation2 + $0x168] sm:$0xff] }
 0x136   :  { %1403 = vst.msk [vmem:[#allocation2 + $0x190] sm:$0x3] %vm42_vm2, %v1369_v47  ;;  %v16061_v61 = vpop.f32.mrf.mxu0 }
 0x137   :  { %808 = vst.msk [vmem:[#allocation2 + $0xe8] sm:$0x3] %vm42_vm2, %v774_v48  ;;  %13618 = vmatmul.msk.f32.gmra.mxu1 %vm39_vm0, %v1553_v51  ;;  %v1588_v51 = vld [vmem:[#allocation2 + $0x498] sm:$0xff] }
 0x138   :  { %893 = vst.msk [vmem:[#allocation2 + $0x100] sm:$0x3] %vm42_vm2, %v859_v53  ;;  %13651 = vmatmul.msk.f32.gmra.mxu2 %vm39_vm0, %v1586_v56  ;;  %13683 = vmatmul.msk.f32.gmra.mxu3 %vm39_vm0, %v1618_v59  ;;  %v1620_v53 = vld [vmem:[#allocation2 + $0x648] sm:$0xff]  ;;  %v161_v56 = vunpack.c.l.bf16 %v149_v30  ;;  %v1589_v30 = vld [vmem:[#allocation2 + $0x4a0] sm:$0xff] }
 0x139   :  { %13587 = vmatmul.msk.f32.gmra.mxu0 %vm39_vm0, %v1522_v14  ;;  %1378 = vrot.lane.b32.xlu2 %v14866_v60, %s15253_s5  ;;  %v1348_v14 = vunpack.c.l.bf16 %v1336_v40  ;;  %v1621_v40 = vld [vmem:[#allocation2 + $0x650] sm:$0xff] }
 0x13a   :  { %1376 = vrot.lane.b32.xlu0 %v14865_v62, %s15253_s5  ;;  %1210 = vrot.lane.b32.xlu1 %v1178_v63, %s15251_s16  ;;  %v404_v63 = vld [vmem:[%s18599_s0 + $0x2c] sm:$0x1] }
 0x13b   :  { %v16071_v2 = vpop.f32.mrf.mxu2  ;;  %v16073_v4 = vpop.f32.mrf.mxu3 }
 0x13c   :  { %18619 = vst [vmem:[#allocation23_spill] sm:$0xff] %v16071_v2  ;;  %v270_v13 = vpop.permute.xlu2 %269  ;;  %v1029_v15 = vpop.permute.xlu0 %1028 }
 0x13d   :  { %18620 = vst [vmem:[#allocation24_spill] sm:$0xff] %v16073_v4  ;;  %v1114_v18 = vpop.permute.xlu1 %1113  ;;  %v16079_v21 = vpop.f32.mrf.mxu1 }
 0x13e   :  { %301 = vst.msk [vmem:[#allocation2 + $0x208] sm:$0x3] %vm42_vm2, %v270_v13  ;;  %v16082_v25 = vpop.f32.mrf.mxu0 }
 0x13f   :  { %18621 = vst [vmem:[#allocation25_spill] sm:$0xff] %v16079_v21  ;;  %13619 = vmatmul.msk.f32.gmra.mxu1 %vm39_vm0, %v1554_v16  ;;  %v319_v16 = vld [vmem:[%s18599_s0 + $0x2c] sm:$0x1] }
 0x140   :  { %1063 = vst.msk [vmem:[#allocation2 + $0x130] sm:$0x3] %vm42_vm2, %v1029_v15  ;;  %13652 = vmatmul.msk.f32.gmra.mxu2 %vm39_vm0, %v1587_v23  ;;  %13684 = vmatmul.msk.f32.gmra.mxu3 %vm39_vm0, %v1619_v17  ;;  %v234_v15 = vld [vmem:[%s18599_s0 + $0x2c] sm:$0x1] }
 0x141   :  { %1148 = vst.msk [vmem:[#allocation2 + $0x148] sm:$0x3] %vm42_vm2, %v1114_v18  ;;  %13588 = vmatmul.msk.f32.gmra.mxu0 %vm39_vm0, %v1523_v26  ;;  %1463 = vrot.lane.b32.xlu2 %v14866_v60, %s15254_s9  ;;  %v1524_v60 = vld [vmem:[#allocation2 + $0x138] sm:$0xff]  ;;  %v1556_v17 = vld [vmem:[#allocation2 + $0x2e8] sm:$0xff] }
 0x142   :  { %1461 = vrot.lane.b32.xlu0 %v14865_v62, %s15254_s9  ;;  %1295 = vrot.lane.b32.xlu1 %v1263_v27, %s15252_s21  ;;  %v76_v62 = vunpack.c.l.bf16 %v64_v41  ;;  %v416_v41 = vunpack.c.l.bf16 %v404_v63 }
 0x143   :  { %v16095_v33 = vpop.f32.mrf.mxu2  ;;  %v16097_v34 = vpop.f32.mrf.mxu3 }
 0x144   :  { %18622 = vst [vmem:[#allocation26_spill] sm:$0xff] %v16095_v33  ;;  %v525_v36 = vpop.permute.xlu2 %524  ;;  %v1199_v42 = vpop.permute.xlu0 %1198 }
 0x145   :  { %18623 = vst [vmem:[#allocation27_spill] sm:$0xff] %v16097_v34  ;;  %v1367_v47 = vpop.permute.xlu1 %1366  ;;  %v16106_v48 = vpop.f32.mrf.mxu1 }
 0x146   :  { %556 = vst.msk [vmem:[#allocation2 + $0x250] sm:$0x3] %vm42_vm2, %v525_v36  ;;  %v16109_v59 = vpop.f32.mrf.mxu0 }
 0x147   :  { %18624 = vst [vmem:[#allocation28_spill] sm:$0xff] %v16106_v48  ;;  %13620 = vmatmul.msk.f32.gmra.mxu1 %vm39_vm0, %v1555_v45  ;;  %v246_v45 = vunpack.c.l.bf16 %v234_v15  ;;  %v1557_v15 = vld [vmem:[#allocation2 + $0x2f0] sm:$0xff] }
 0x148   :  { %1233 = vst.msk [vmem:[#allocation2 + $0x160] sm:$0x3] %vm42_vm2, %v1199_v42  ;;  %13653 = vmatmul.msk.f32.gmra.mxu2 %vm39_vm0, %v1588_v51  ;;  %13685 = vmatmul.msk.f32.gmra.mxu3 %vm39_vm0, %v1620_v53  ;;  %v16138_v42 = vld [vmem:[#allocation2 + $0x140] sm:$0xff]  ;;  %v659_v51 = vld [vmem:[%s18599_s0 + $0x2c] sm:$0x1] }
 0x149   :  { %1402 = vst.msk [vmem:[#allocation2 + $0x188] sm:$0xff] %vm39_vm0, %v1367_v47  ;;  %13589 = vmatmul.msk.f32.gmra.mxu0 %vm39_vm0, %v1524_v60  ;;  %196 = vrot.lane.b32.xlu2 %v161_v56, %s15238_s24  ;;  %v331_v47 = vunpack.c.l.bf16 %v319_v16  ;;  %v489_v60 = vld [vmem:[%s18599_s0 + $0x2c] sm:$0x1] }
 0x14a   :  { %1380 = vrot.lane.b32.xlu0 %v1348_v14, %s15253_s5  ;;  %111 = vrot.lane.b32.xlu1 %v76_v62, %s15239_s25  ;;  %v574_v14 = vld [vmem:[%s18599_s0 + $0x2c] sm:$0x1] }
 0x14b   :  { %v16122_v5 = vpop.f32.mrf.mxu2  ;;  %v16124_v13 = vpop.f32.mrf.mxu3 }
 0x14c   :  { %18625 = vst [vmem:[#allocation29_spill] sm:$0xff] %v16122_v5  ;;  %v780_v18 = vpop.permute.xlu2 %779  ;;  %v1284_v23 = vpop.permute.xlu0 %1283 }
 0x14d   :  { %18626 = vst [vmem:[#allocation30_spill] sm:$0xff] %v16124_v13  ;;  %v1452_v26 = vpop.permute.xlu1 %1451  ;;  %v16133_v27 = vpop.f32.mrf.mxu1  ;;  %v16206_v13 = vld [vmem:[#allocation2 + $0x158] sm:$0xff] }
 0x14e   :  { %811 = vst.msk [vmem:[#allocation2 + $0x298] sm:$0x3] %vm42_vm2, %v780_v18  ;;  %v16136_v36 = vpop.f32.mrf.mxu0 }
 0x14f   :  { %18627 = vst [vmem:[#allocation31_spill] sm:$0xff] %v16133_v27  ;;  %13621 = vmatmul.msk.f32.gmra.mxu1 %vm39_vm0, %v1556_v17  ;;  %v1622_v17 = vld [vmem:[#allocation2 + $0x660] sm:$0xff] }
 0x150   :  { %1318 = vst.msk [vmem:[#allocation2 + $0x178] sm:$0x3] %vm42_vm2, %v1284_v23  ;;  %13654 = vmatmul.msk.f32.gmra.mxu2 %vm39_vm0, %v1589_v30  ;;  %13686 = vmatmul.msk.f32.gmra.mxu3 %vm39_vm0, %v1621_v40  ;;  %v1590_v23 = vld [vmem:[#allocation2 + $0x4b0] sm:$0xff] }
 0x151   :  { %1487 = vst.msk [vmem:[#allocation2 + $0x1a0] sm:$0xff] %vm39_vm0, %v1452_v26  ;;  %13590 = vmatmul.msk.f32.gmra.mxu0 %vm39_vm0, %v16138_v42  ;;  %451 = vrot.lane.b32.xlu2 %v416_v41, %s15242_s15  ;;  %v671_v26 = vunpack.c.l.bf16 %v659_v51  ;;  %v16168_v40 = vld [vmem:[#allocation2 + $0x150] sm:$0xff]  ;;  %v501_v41 = vunpack.c.l.bf16 %v489_v60  ;;  %v914_v60 = vld [vmem:[%s18599_s0 + $0x2c] sm:$0x1]  ;;  %s13553_s15 = sshll.u32 %s18602_s3, 4  ;;  %s13554_s15 = int_to_ptr.hbm [resolvable:$true] %s13553_s15 }
 0x152   :  { %281 = vrot.lane.b32.xlu0 %v246_v45, %s15240_s30  ;;  %366 = vrot.lane.b32.xlu1 %v331_v47, %s15241_s12  ;;  %v586_v45 = vunpack.c.l.bf16 %v574_v14  ;;  %v17_v47 = vld [vmem:[%s18599_s0 + $0x8] sm:$0x1] }
 0x153   :  { %v16152_v53 = vpop.f32.mrf.mxu2  ;;  %v16154_v56 = vpop.f32.mrf.mxu3  ;;  %v29_v51 = vunpack.c.l.bf16 %v17_v47  ;;  %v1591_v47 = vld [vmem:[#allocation2 + $0x4b8] sm:$0xff] }
 0x154   :  { %18628 = vst [vmem:[#allocation32_spill] sm:$0xff] %v16152_v53  ;;  %v1035_v62 = vpop.permute.xlu2 %1034  ;;  %v100_v63 = vpop.permute.xlu0 %99  ;;  %v2545_v53 = vld [vmem:[#allocation2 + $0x20] sm:$0xff] }
 0x155   :  { %18629 = vst [vmem:[#allocation33_spill] sm:$0xff] %v16154_v56  ;;  %v185_v16 = vpop.permute.xlu1 %184  ;;  %v16163_v18 = vpop.f32.mrf.mxu1 }
 0x156   :  { %1066 = vst.msk [vmem:[#allocation2 + $0x2e0] sm:$0x3] %vm42_vm2, %v1035_v62  ;;  %v16166_v30 = vpop.f32.mrf.mxu0 }
 0x157   :  { %18630 = vst [vmem:[#allocation34_spill] sm:$0xff] %v16163_v18  ;;  %13622 = vmatmul.msk.f32.gmra.mxu1 %vm39_vm0, %v1557_v15  ;;  %v829_v15 = vld [vmem:[%s18599_s0 + $0x2c] sm:$0x1] }
 0x158   :  { %131 = vst.msk [vmem:[#allocation2 + $0x1d8] sm:$0x3] %vm42_vm2, %v100_v63  ;;  %13655 = vmatmul.msk.f32.gmra.mxu2 %vm39_vm0, %v1590_v23  ;;  %13687 = vmatmul.msk.f32.gmra.mxu3 %vm39_vm0, %v1622_v17  ;;  %v744_v63 = vld [vmem:[%s18599_s0 + $0x2c] sm:$0x1]  ;;  %v841_v4 = vunpack.c.l.bf16 %v829_v15 }
 0x159   :  { %216 = vst.msk [vmem:[#allocation2 + $0x1f0] sm:$0x3] %vm42_vm2, %v185_v16  ;;  %13591 = vmatmul.msk.f32.gmra.mxu0 %vm39_vm0, %v16168_v40  ;;  %706 = vrot.lane.b32.xlu2 %v671_v26, %s15245_s8  ;;  %v14341_v16 = vld [vmem:[%s18600_s1 + $0x18] sm:$0x7]  ;;  %v1558_v26 = vld [vmem:[#allocation2 + $0x300] sm:$0xff]  ;;  %v756_v34 = vunpack.c.l.bf16 %v744_v63 }
 0x15a   :  { %536 = vrot.lane.b32.xlu0 %v501_v41, %s15243_s18  ;;  %621 = vrot.lane.b32.xlu1 %v586_v45, %s15244_s29  ;;  %43 = vst.msk [vmem:[#allocation2 + $0x10] sm:$0x3] %vm42_vm2, %v29_v51  ;;  %v1623_v51 = vld [vmem:[#allocation2 + $0x668] sm:$0xff]  ;;  %v14211_v63 = vld [vmem:[%s18600_s1 + $0x14] sm:$0x7] }
 0x15b   :  { %v16186_v14 = vpop.f32.mrf.mxu2  ;;  %v16188_v62 = vpop.f32.mrf.mxu3  ;;  %14342 = vmatpush.msk.msra.mxu2 %vm2011_vm1, %v14341_v16  ;;  %14212 = vmatpush.msk.msra.mxu1 %vm2011_vm1, %v14211_v63  ;;  %v14601_v63 = vld [vmem:[%s18600_s1 + $0x20] sm:$0x7] }
 0x15c   :  { %18631 = vst [vmem:[#allocation35_spill] sm:$0xff] %v16186_v14  ;;  %v1205_v23 = vpop.permute.xlu2 %1204  ;;  %v355_v17 = vpop.permute.xlu0 %354  ;;  %14602 = vmatpush.msk.msra.mxu0 %vm2011_vm1, %v14601_v63 }
 0x15d   :  { %18632 = vst [vmem:[#allocation36_spill] sm:$0xff] %v16188_v62  ;;  %v440_v41 = vpop.permute.xlu1 %439  ;;  %v16201_v45 = vpop.f32.mrf.mxu1  ;;  %v926_v62 = vunpack.c.l.bf16 %v914_v60  ;;  %v14471_v60 = vld [vmem:[%s18600_s1 + $0x1c] sm:$0x7] }
 0x15e   :  { %1236 = vst.msk [vmem:[#allocation2 + $0x310] sm:$0x3] %vm42_vm2, %v1205_v23  ;;  %v16204_v56 = vpop.f32.mrf.mxu0  ;;  %v999_v23 = vld [vmem:[%s18599_s0 + $0x2c] sm:$0x1]  ;;  %14472 = vmatpush.msk.msra.mxu3 %vm2011_vm1, %v14471_v60 }
 0x15f   :  { %18633 = vst [vmem:[#allocation37_spill] sm:$0xff] %v16201_v45  ;;  %13623 = vmatmul.msk.f32.gmra.mxu1 %vm39_vm0, %v1558_v26  ;;  %v1559_v26 = vld [vmem:[#allocation2 + $0x308] sm:$0xff]  ;;  %v1011_v20 = vunpack.c.l.bf16 %v999_v23 }
 0x160   :  { %386 = vst.msk [vmem:[#allocation2 + $0x220] sm:$0x3] %vm42_vm2, %v355_v17  ;;  %13656 = vmatmul.msk.f32.gmra.mxu2 %vm39_vm0, %v1591_v47  ;;  %13688 = vmatmul.msk.f32.gmra.mxu3 %vm39_vm0, %v1623_v51  ;;  %v1592_v47 = vld [vmem:[#allocation2 + $0x4c8] sm:$0xff]  ;;  %v1624_v51 = vld [vmem:[#allocation2 + $0x678] sm:$0xff] }
 0x161   :  { %471 = vst.msk [vmem:[#allocation2 + $0x238] sm:$0x3] %vm42_vm2, %v440_v41  ;;  %13592 = vmatmul.msk.f32.gmra.mxu0 %vm39_vm0, %v16206_v13  ;;  %961 = vrot.lane.b32.xlu2 %v926_v62, %s15248_s22  ;;  %v1084_v62 = vld [vmem:[%s18599_s0 + $0x2c] sm:$0x1] }
 0x162   :  { %791 = vrot.lane.b32.xlu0 %v756_v34, %s15246_s17  ;;  %876 = vrot.lane.b32.xlu1 %v841_v4, %s15247_s14  ;;  %v1096_v60 = vunpack.c.l.bf16 %v1084_v62 }
 0x163   :  { %v16223_v15 = vpop.f32.mrf.mxu2  ;;  %v16225_v16 = vpop.f32.mrf.mxu3 }
 0x164   :  { %18634 = vst [vmem:[#allocation38_spill] sm:$0xff] %v16223_v15  ;;  %v1290_v17 = vpop.permute.xlu2 %1289  ;;  %v610_v34 = vpop.permute.xlu0 %609 }
 0x165   :  { %18635 = vst [vmem:[#allocation39_spill] sm:$0xff] %v16225_v16  ;;  %v695_v4 = vpop.permute.xlu1 %694  ;;  %v16236_v41 = vpop.f32.mrf.mxu1 }
 0x166   :  { %1321 = vst.msk [vmem:[#allocation2 + $0x328] sm:$0x3] %vm42_vm2, %v1290_v17  ;;  %v16239_v16 = vpop.f32.mrf.mxu0  ;;  %v1169_v17 = vld [vmem:[%s18599_s0 + $0x2c] sm:$0x1] }
 0x167   :  { %18636 = vst [vmem:[#allocation40_spill] sm:$0xff] %v16236_v41  ;;  %13624 = vmatmul.msk.f32.gmra.mxu1 %vm39_vm0, %v1559_v26  ;;  %v1181_v39 = vunpack.c.l.bf16 %v1169_v17  ;;  %v1254_v17 = vld [vmem:[%s18599_s0 + $0x2c] sm:$0x1] }
 0x168   :  { %641 = vst.msk [vmem:[#allocation2 + $0x268] sm:$0x3] %vm42_vm2, %v610_v34  ;;  %13657 = vmatmul.msk.f32.gmra.mxu2 %vm39_vm0, %v1592_v47  ;;  %13689 = vmatmul.msk.f32.gmra.mxu3 %vm39_vm0, %v1624_v51  ;;  %v1266_v52 = vunpack.c.l.bf16 %v1254_v17 }
 0x169   :  { %726 = vst.msk [vmem:[#allocation2 + $0x280] sm:$0x3] %vm42_vm2, %v695_v4  ;;  %13593 = vmatmul.msk.f32.gmra.mxu0 %vm39_vm0, %v16241_v44  ;;  %v1560_v4 = vld [vmem:[#allocation2 + $0x318] sm:$0xff] }
 0x16a   :  { %1046 = vrot.lane.b32.xlu0 %v1011_v20, %s15249_s23  ;;  %1131 = vrot.lane.b32.xlu1 %v1096_v60, %s15250_s10  ;;  %v1593_v20 = vld [vmem:[#allocation2 + $0x4d0] sm:$0xff]  ;;  %v1625_v60 = vld [vmem:[#allocation2 + $0x680] sm:$0xff] }
 0x16b   :  { %v16254_v23 = vpop.f32.mrf.mxu2  ;;  %v16256_v62 = vpop.f32.mrf.mxu3 }
 0x16c   :  { %18637 = vst [vmem:[#allocation41_spill] sm:$0xff] %v16254_v23  ;;  %v106_v34 = vpop.permute.xlu2 %105  ;;  %v865_v26 = vpop.permute.xlu0 %864  ;;  %v2544_v23 = vld [vmem:[#allocation2 + $0x18] sm:$0xff] }
 0x16d   :  { %18638 = vst [vmem:[#allocation42_spill] sm:$0xff] %v16256_v62  ;;  %v950_v47 = vpop.permute.xlu1 %949  ;;  %v16263_v51 = vpop.f32.mrf.mxu1  ;;  %v16268_v62 = vld [vmem:[#allocation2 + $0x170] sm:$0xff] }
 0x16e   :  { %134 = vst.msk [vmem:[#allocation2 + $0x388] sm:$0x3] %vm42_vm2, %v106_v34  ;;  %v16266_v58 = vpop.f32.mrf.mxu0 }
 0x16f   :  { %18639 = vst [vmem:[#allocation43_spill] sm:$0xff] %v16263_v51  ;;  %13625 = vmatmul.msk.f32.gmra.mxu1 %vm39_vm0, %v1560_v4  ;;  %v1561_v4 = vld [vmem:[#allocation2 + $0x320] sm:$0xff] }
 0x170   :  { %896 = vst.msk [vmem:[#allocation2 + $0x2b0] sm:$0x3] %vm42_vm2, %v865_v26  ;;  %13658 = vmatmul.msk.f32.gmra.mxu2 %vm39_vm0, %v1593_v20  ;;  %13690 = vmatmul.msk.f32.gmra.mxu3 %vm39_vm0, %v1625_v60 }
 0x171   :  { %981 = vst.msk [vmem:[#allocation2 + $0x2c8] sm:$0x3] %vm42_vm2, %v950_v47  ;;  %13594 = vmatmul.msk.f32.gmra.mxu0 %vm39_vm0, %v16268_v62 }
 0x172   :  { %1216 = vrot.lane.b32.xlu0 %v1181_v39, %s15251_s16 }
 0x173   :  { %v16277_v63 = vpop.f32.mrf.mxu2  ;;  %v16279_v34 = vpop.f32.mrf.mxu3 }
 0x174   :  { %18640 = vst [vmem:[#allocation44_spill] sm:$0xff] %v16277_v63  ;;  %v361_v26 = vpop.permute.xlu2 %360  ;;  %v1120_v47 = vpop.permute.xlu0 %1119  ;;  %v5149_v63 = vld [vmem:[#allocation2 + $0x9] sm:$0xff] }
 0x175   :  { %18641 = vst [vmem:[#allocation45_spill] sm:$0xff] %v16279_v34  ;;  %v1371_v20 = vpop.permute.xlu1 %1370  ;;  %v16285_v60 = vpop.f32.mrf.mxu1  ;;  %v3846_v34 = vld [vmem:[#allocation2 + $0x30] sm:$0xff] }
 0x176   :  { %389 = vst.msk [vmem:[#allocation2 + $0x3d0] sm:$0x3] %vm42_vm2, %v361_v26  ;;  %v16288_v39 = vpop.f32.mrf.mxu0 }
 0x177   :  { %18642 = vst [vmem:[#allocation46_spill] sm:$0xff] %v16285_v60  ;;  %13626 = vmatmul.msk.f32.gmra.mxu1 %vm39_vm0, %v1561_v4 }
 0x178   :  { %1151 = vst.msk [vmem:[#allocation2 + $0x2f8] sm:$0x3] %vm42_vm2, %v1120_v47  ;;  %13823 = vmatmul.msk.f32.vlgmr.msrb.gmra.mxu2 %vm39_vm0, %v3846_v34  ;;  %13953 = vmatmul.msk.f32.vlgmr.msrb.gmra.mxu3 %vm39_vm0, %v5148_v12 }
 0x179   :  { %1404 = vst.msk [vmem:[#allocation2 + $0x330] sm:$0xff] %vm39_vm0, %v1371_v20  ;;  %14083 = vmatmul.msk.f32.vlgmr.msrb.gmra.mxu0 %vm39_vm0, %v6450_v32 }
 0x17a   :  { %1301 = vrot.lane.b32.xlu0 %v1266_v52, %s15252_s21  ;;  %v3847_v52 = vld [vmem:[#allocation2 + $0x38] sm:$0xff] }
 0x17b   :  { %v16296_v26 = vpop.f32.mrf.mxu2  ;;  %v16298_v47 = vpop.f32.mrf.mxu3 }
 0x17c   :  { %18643 = vst [vmem:[#allocation47_spill] sm:$0xff] %v16296_v26  ;;  %v616_v10 = vpop.permute.xlu2 %615  ;;  %v1373_v17 = vpop.permute.xlu0 %1372 }
 0x17d   :  { %18644 = vst [vmem:[#allocation48_spill] sm:$0xff] %v16298_v47  ;;  %v1456_v20 = vpop.permute.xlu1 %1455  ;;  %v16301_v4 = vpop.f32.mrf.mxu1  ;;  %v6451_v47 = vld [vmem:[#allocation2 + $0x21] sm:$0xff] }
 0x17e   :  { %644 = vst.msk [vmem:[#allocation2 + $0x418] sm:$0x3] %vm42_vm2, %v616_v10  ;;  %v16304_v12 = vpop.f32.mrf.mxu0 }
 0x17f   :  { %18645 = vst [vmem:[#allocation49_spill] sm:$0xff] %v16301_v4  ;;  %13693 = vmatmul.msk.f32.vlgmr.msrb.gmra.mxu1 %vm39_vm0, %v2544_v23  ;;  %v3859_v4 = vld [vmem:[#allocation2 + $0xc8] sm:$0xff] }
 0x180   :  { %1405 = vst.msk [vmem:[#allocation2 + $0x338] sm:$0xff] %vm39_vm0, %v1373_v17  ;;  %13824 = vmatmul.msk.f32.gmra.mxu2 %vm39_vm0, %v3847_v52  ;;  %13954 = vmatmul.msk.f32.gmra.mxu3 %vm39_vm0, %v5149_v63  ;;  %v3848_v63 = vld [vmem:[#allocation2 + $0x48] sm:$0xff] }
 0x181   :  { %1489 = vst.msk [vmem:[#allocation2 + $0x348] sm:$0xff] %vm39_vm0, %v1456_v20  ;;  %14084 = vmatmul.msk.f32.gmra.mxu0 %vm39_vm0, %v6451_v47 }
 0x183   :  { %v16311_v10 = vpop.f32.mrf.mxu2  ;;  %v16313_v26 = vpop.f32.mrf.mxu3 }
 0x184   :  { %18646 = vst [vmem:[#allocation50_spill] sm:$0xff] %v16311_v10  ;;  %v871_v17 = vpop.permute.xlu2 %870  ;;  %v1458_v15 = vpop.permute.xlu0 %1457 }
 0x185   :  { %18647 = vst [vmem:[#allocation51_spill] sm:$0xff] %v16313_v26  ;;  %v1375_v14 = vpop.permute.xlu1 %1374  ;;  %v16316_v20 = vpop.f32.mrf.mxu1  ;;  %v6452_v26 = vld [vmem:[#allocation2 + $0x31] sm:$0xff] }
 0x186   :  { %899 = vst.msk [vmem:[#allocation2 + $0x460] sm:$0x3] %vm42_vm2, %v871_v17  ;;  %v16319_v23 = vpop.f32.mrf.mxu0 }
 0x187   :  { %18648 = vst [vmem:[#allocation52_spill] sm:$0xff] %v16316_v20  ;;  %13694 = vmatmul.msk.f32.gmra.mxu1 %vm39_vm0, %v2545_v53 }
 0x188   :  { %1490 = vst.msk [vmem:[#allocation2 + $0x350] sm:$0xff] %vm39_vm0, %v1458_v15  ;;  %13825 = vmatmul.msk.f32.gmra.mxu2 %vm39_vm0, %v3848_v63  ;;  %13955 = vmatmul.msk.f32.gmra.mxu3 %vm39_vm0, %v6450_v32  ;;  %v3849_v32 = vld [vmem:[#allocation2 + $0x50] sm:$0xff] }
 0x189   :  { %1406 = vst.msk [vmem:[#allocation2 + $0x340] sm:$0x3] %vm42_vm2, %v1375_v14  ;;  %14085 = vmatmul.msk.f32.gmra.mxu0 %vm39_vm0, %v6452_v26 }
 0x18b   :  { %v16326_v17 = vpop.f32.mrf.mxu2  ;;  %v16328_v10 = vpop.f32.mrf.mxu3 }
 0x18c   :  { %18649 = vst [vmem:[#allocation53_spill] sm:$0xff] %v16326_v17  ;;  %v1126_v15 = vpop.permute.xlu2 %1125  ;;  %v191_v5 = vpop.permute.xlu0 %190 }
 0x18d   :  { %18650 = vst [vmem:[#allocation54_spill] sm:$0xff] %v16328_v10  ;;  %v276_v33 = vpop.permute.xlu1 %275  ;;  %v16331_v14 = vpop.f32.mrf.mxu1  ;;  %v6453_v10 = vld [vmem:[#allocation2 + $0x39] sm:$0xff] }
 0x18e   :  { %1154 = vst.msk [vmem:[#allocation2 + $0x4a8] sm:$0x3] %vm42_vm2, %v1126_v15  ;;  %v16334_v53 = vpop.f32.mrf.mxu0 }
 0x18f   :  { %18651 = vst [vmem:[#allocation55_spill] sm:$0xff] %v16331_v14  ;;  %13695 = vmatmul.msk.f32.gmra.mxu1 %vm39_vm0, %v3846_v34 }
 0x190   :  { %219 = vst.msk [vmem:[#allocation2 + $0x3a0] sm:$0x3] %vm42_vm2, %v191_v5  ;;  %13826 = vmatmul.msk.f32.gmra.mxu2 %vm39_vm0, %v3849_v32  ;;  %13956 = vmatmul.msk.f32.gmra.mxu3 %vm39_vm0, %v6451_v47  ;;  %v3850_v47 = vld [vmem:[#allocation2 + $0x60] sm:$0xff] }
 0x191   :  { %304 = vst.msk [vmem:[#allocation2 + $0x3b8] sm:$0x3] %vm42_vm2, %v276_v33  ;;  %14086 = vmatmul.msk.f32.gmra.mxu0 %vm39_vm0, %v6453_v10 }
 0x193   :  { %v16341_v15 = vpop.f32.mrf.mxu2  ;;  %v16343_v17 = vpop.f32.mrf.mxu3 }
 0x194   :  { %18652 = vst [vmem:[#allocation56_spill] sm:$0xff] %v16341_v15  ;;  %v1379_v2 = vpop.permute.xlu2 %1378  ;;  %v446_v5 = vpop.permute.xlu0 %445 }
 0x195   :  { %18653 = vst [vmem:[#allocation57_spill] sm:$0xff] %v16343_v17  ;;  %v531_v43 = vpop.permute.xlu1 %530  ;;  %v16346_v33 = vpop.f32.mrf.mxu1  ;;  %v6454_v17 = vld [vmem:[#allocation2 + $0x49] sm:$0xff] }
 0x196   :  { %1408 = vst.msk [vmem:[#allocation2 + $0x4e8] sm:$0xff] %vm39_vm0, %v1379_v2  ;;  %v16349_v34 = vpop.f32.mrf.mxu0 }
 0x197   :  { %18654 = vst [vmem:[#allocation58_spill] sm:$0xff] %v16346_v33  ;;  %13696 = vmatmul.msk.f32.gmra.mxu1 %vm39_vm0, %v3847_v52 }
 0x198   :  { %474 = vst.msk [vmem:[#allocation2 + $0x3e8] sm:$0x3] %vm42_vm2, %v446_v5  ;;  %13827 = vmatmul.msk.f32.gmra.mxu2 %vm39_vm0, %v3850_v47  ;;  %13957 = vmatmul.msk.f32.gmra.mxu3 %vm39_vm0, %v6452_v26  ;;  %v3851_v26 = vld [vmem:[#allocation2 + $0x68] sm:$0xff] }
 0x199   :  { %559 = vst.msk [vmem:[#allocation2 + $0x400] sm:$0x3] %vm42_vm2, %v531_v43  ;;  %14087 = vmatmul.msk.f32.gmra.mxu0 %vm39_vm0, %v6454_v17 }
 0x19b   :  { %v16356_v2 = vpop.f32.mrf.mxu2  ;;  %v16358_v15 = vpop.f32.mrf.mxu3 }
 0x19c   :  { %18655 = vst [vmem:[#allocation59_spill] sm:$0xff] %v16356_v2  ;;  %v1464_v19 = vpop.permute.xlu2 %1463  ;;  %v701_v5 = vpop.permute.xlu0 %700 }
 0x19d   :  { %18656 = vst [vmem:[#allocation60_spill] sm:$0xff] %v16358_v15  ;;  %v786_v57 = vpop.permute.xlu1 %785  ;;  %v16361_v43 = vpop.f32.mrf.mxu1  ;;  %v6455_v15 = vld [vmem:[#allocation2 + $0x51] sm:$0xff] }
 0x19e   :  { %1493 = vst.msk [vmem:[#allocation2 + $0x500] sm:$0xff] %vm39_vm0, %v1464_v19  ;;  %v16364_v52 = vpop.f32.mrf.mxu0 }
 0x19f   :  { %18657 = vst [vmem:[#allocation61_spill] sm:$0xff] %v16361_v43  ;;  %13697 = vmatmul.msk.f32.gmra.mxu1 %vm39_vm0, %v3848_v63 }
 0x1a0   :  { %729 = vst.msk [vmem:[#allocation2 + $0x430] sm:$0x3] %vm42_vm2, %v701_v5  ;;  %13828 = vmatmul.msk.f32.gmra.mxu2 %vm39_vm0, %v3851_v26  ;;  %13958 = vmatmul.msk.f32.gmra.mxu3 %vm39_vm0, %v6453_v10  ;;  %v3852_v10 = vld [vmem:[#allocation2 + $0x78] sm:$0xff] }
 0x1a1   :  { %814 = vst.msk [vmem:[#allocation2 + $0x448] sm:$0x3] %vm42_vm2, %v786_v57  ;;  %14088 = vmatmul.msk.f32.gmra.mxu0 %vm39_vm0, %v6455_v15 }
 0x1a3   :  { %v16371_v19 = vpop.f32.mrf.mxu2  ;;  %v16373_v2 = vpop.f32.mrf.mxu3 }
 0x1a4   :  { %18658 = vst [vmem:[#allocation62_spill] sm:$0xff] %v16371_v19  ;;  %v197_v38 = vpop.permute.xlu2 %196  ;;  %v956_v5 = vpop.permute.xlu0 %955 }
 0x1a5   :  { %18659 = vst [vmem:[#allocation63_spill] sm:$0xff] %v16373_v2  ;;  %v1041_v8 = vpop.permute.xlu1 %1040  ;;  %v16376_v57 = vpop.f32.mrf.mxu1  ;;  %v6456_v2 = vld [vmem:[#allocation2 + $0x61] sm:$0xff] }
 0x1a6   :  { %222 = vst.msk [vmem:[#allocation2 + $0x550] sm:$0x3] %vm42_vm2, %v197_v38  ;;  %v16379_v63 = vpop.f32.mrf.mxu0 }
 0x1a7   :  { %18660 = vst [vmem:[#allocation64_spill] sm:$0xff] %v16376_v57  ;;  %13698 = vmatmul.msk.f32.gmra.mxu1 %vm39_vm0, %v3849_v32 }
 0x1a8   :  { %984 = vst.msk [vmem:[#allocation2 + $0x478] sm:$0x3] %vm42_vm2, %v956_v5  ;;  %13829 = vmatmul.msk.f32.gmra.mxu2 %vm39_vm0, %v3852_v10  ;;  %13959 = vmatmul.msk.f32.gmra.mxu3 %vm39_vm0, %v6454_v17  ;;  %v3853_v17 = vld [vmem:[#allocation2 + $0x80] sm:$0xff] }
 0x1a9   :  { %1069 = vst.msk [vmem:[#allocation2 + $0x490] sm:$0x3] %vm42_vm2, %v1041_v8  ;;  %14089 = vmatmul.msk.f32.gmra.mxu0 %vm39_vm0, %v6456_v2 }
 0x1ab   :  { %v16386_v38 = vpop.f32.mrf.mxu2  ;;  %v16388_v19 = vpop.f32.mrf.mxu3 }
 0x1ac   :  { %18661 = vst [vmem:[#allocation65_spill] sm:$0xff] %v16386_v38  ;;  %v452_v50 = vpop.permute.xlu2 %451  ;;  %v1377_v5 = vpop.permute.xlu0 %1376 }
 0x1ad   :  { %18662 = vst [vmem:[#allocation66_spill] sm:$0xff] %v16388_v19  ;;  %v1211_v31 = vpop.permute.xlu1 %1210  ;;  %v16391_v8 = vpop.f32.mrf.mxu1  ;;  %v6457_v19 = vld [vmem:[#allocation2 + $0x69] sm:$0xff] }
 0x1ae   :  { %477 = vst.msk [vmem:[#allocation2 + $0x598] sm:$0x3] %vm42_vm2, %v452_v50  ;;  %v16394_v32 = vpop.f32.mrf.mxu0 }
 0x1af   :  { %18663 = vst [vmem:[#allocation67_spill] sm:$0xff] %v16391_v8  ;;  %13699 = vmatmul.msk.f32.gmra.mxu1 %vm39_vm0, %v3850_v47 }
 0x1b0   :  { %1407 = vst.msk [vmem:[#allocation2 + $0x4e0] sm:$0xff] %vm39_vm0, %v1377_v5  ;;  %13830 = vmatmul.msk.f32.gmra.mxu2 %vm39_vm0, %v3853_v17  ;;  %13960 = vmatmul.msk.f32.gmra.mxu3 %vm39_vm0, %v6455_v15  ;;  %v3854_v15 = vld [vmem:[#allocation2 + $0x90] sm:$0xff] }
 0x1b1   :  { %1239 = vst.msk [vmem:[#allocation2 + $0x4c0] sm:$0x3] %vm42_vm2, %v1211_v31  ;;  %14090 = vmatmul.msk.f32.gmra.mxu0 %vm39_vm0, %v6457_v19 }
 0x1b3   :  { %v16401_v50 = vpop.f32.mrf.mxu2  ;;  %v16403_v38 = vpop.f32.mrf.mxu3 }
 0x1b4   :  { %18664 = vst [vmem:[#allocation68_spill] sm:$0xff] %v16401_v50  ;;  %v707_v9 = vpop.permute.xlu2 %706  ;;  %v1462_v5 = vpop.permute.xlu0 %1461 }
 0x1b5   :  { %18665 = vst [vmem:[#allocation69_spill] sm:$0xff] %v16403_v38  ;;  %v1296_v8 = vpop.permute.xlu1 %1295  ;;  %v16406_v31 = vpop.f32.mrf.mxu1  ;;  %v6458_v38 = vld [vmem:[#allocation2 + $0x79] sm:$0xff] }
 0x1b6   :  { %732 = vst.msk [vmem:[#allocation2 + $0x5e0] sm:$0x3] %vm42_vm2, %v707_v9  ;;  %v16409_v47 = vpop.f32.mrf.mxu0 }
 0x1b7   :  { %18666 = vst [vmem:[#allocation70_spill] sm:$0xff] %v16406_v31  ;;  %13700 = vmatmul.msk.f32.gmra.mxu1 %vm39_vm0, %v3851_v26 }
 0x1b8   :  { %1492 = vst.msk [vmem:[#allocation2 + $0x4f8] sm:$0xff] %vm39_vm0, %v1462_v5  ;;  %13831 = vmatmul.msk.f32.gmra.mxu2 %vm39_vm0, %v3854_v15  ;;  %13961 = vmatmul.msk.f32.gmra.mxu3 %vm39_vm0, %v6456_v2  ;;  %v3855_v2 = vld [vmem:[#allocation2 + $0x98] sm:$0xff] }
 0x1b9   :  { %1324 = vst.msk [vmem:[#allocation2 + $0x4d8] sm:$0x3] %vm42_vm2, %v1296_v8  ;;  %14091 = vmatmul.msk.f32.gmra.mxu0 %vm39_vm0, %v6458_v38 }
 0x1bb   :  { %v16416_v9 = vpop.f32.mrf.mxu2  ;;  %v16418_v50 = vpop.f32.mrf.mxu3 }
 0x1bc   :  { %18667 = vst [vmem:[#allocation71_spill] sm:$0xff] %v16416_v9  ;;  %v962_v31 = vpop.permute.xlu2 %961  ;;  %v1381_v5 = vpop.permute.xlu0 %1380 }
 0x1bd   :  { %18668 = vst [vmem:[#allocation72_spill] sm:$0xff] %v16418_v50  ;;  %v112_v57 = vpop.permute.xlu1 %111  ;;  %v16421_v8 = vpop.f32.mrf.mxu1  ;;  %v6459_v50 = vld [vmem:[#allocation2 + $0x81] sm:$0xff] }
 0x1be   :  { %987 = vst.msk [vmem:[#allocation2 + $0x628] sm:$0x3] %vm42_vm2, %v962_v31  ;;  %v16424_v26 = vpop.f32.mrf.mxu0 }
 0x1bf   :  { %18669 = vst [vmem:[#allocation73_spill] sm:$0xff] %v16421_v8  ;;  %13701 = vmatmul.msk.f32.gmra.mxu1 %vm39_vm0, %v3852_v10  ;;  %v6460_v10 = vld [vmem:[#allocation2 + $0x91] sm:$0xff] }
 0x1c0   :  { %1409 = vst.msk [vmem:[#allocation2 + $0x4f0] sm:$0x3] %vm42_vm2, %v1381_v5  ;;  %13832 = vmatmul.msk.f32.gmra.mxu2 %vm39_vm0, %v3855_v2  ;;  %13962 = vmatmul.msk.f32.gmra.mxu3 %vm39_vm0, %v6457_v19  ;;  %v3856_v19 = vld [vmem:[#allocation2 + $0xa8] sm:$0xff] }
 0x1c1   :  { %137 = vst.msk [vmem:[#allocation2 + $0x538] sm:$0x3] %vm42_vm2, %v112_v57  ;;  %14092 = vmatmul.msk.f32.gmra.mxu0 %vm39_vm0, %v6459_v50 }
 0x1c3   :  { %v16431_v31 = vpop.f32.mrf.mxu2  ;;  %v16433_v9 = vpop.f32.mrf.mxu3 }
 0x1c4   :  { %18670 = vst [vmem:[#allocation74_spill] sm:$0xff] %v16431_v31  ;;  %v282_v8 = vpop.permute.xlu0 %281 }
 0x1c5   :  { %18671 = vst [vmem:[#allocation75_spill] sm:$0xff] %v16433_v9  ;;  %v367_v5 = vpop.permute.xlu1 %366  ;;  %v16436_v43 = vpop.f32.mrf.mxu1 }
 0x1c6   :  { %307 = vst.msk [vmem:[#allocation2 + $0x568] sm:$0x3] %vm42_vm2, %v282_v8  ;;  %v16439_v57 = vpop.f32.mrf.mxu0 }
 0x1c7   :  { %18672 = vst [vmem:[#allocation76_spill] sm:$0xff] %v16436_v43  ;;  %13702 = vmatmul.msk.f32.gmra.mxu1 %vm39_vm0, %v3853_v17 }
 0x1c8   :  { %392 = vst.msk [vmem:[#allocation2 + $0x580] sm:$0x3] %vm42_vm2, %v367_v5  ;;  %13833 = vmatmul.msk.f32.gmra.mxu2 %vm39_vm0, %v3856_v19  ;;  %13963 = vmatmul.msk.f32.gmra.mxu3 %vm39_vm0, %v6458_v38  ;;  %v3857_v38 = vld [vmem:[#allocation2 + $0xb0] sm:$0xff] }
 0x1c9   :  { %14093 = vmatmul.msk.f32.gmra.mxu0 %vm39_vm0, %v6460_v10 }
 0x1cb   :  { %v16445_v9 = vpop.f32.mrf.mxu2  ;;  %v16447_v8 = vpop.f32.mrf.mxu3 }
 0x1cc   :  { %18673 = vst [vmem:[#allocation77_spill] sm:$0xff] %v16445_v9  ;;  %v537_v31 = vpop.permute.xlu0 %536  ;;  %v6461_v9 = vld [vmem:[#allocation2 + $0x99] sm:$0xff] }
 0x1cd   :  { %18674 = vst [vmem:[#allocation78_spill] sm:$0xff] %v16447_v8  ;;  %v622_v5 = vpop.permute.xlu1 %621  ;;  %v16450_v43 = vpop.f32.mrf.mxu1 }
 0x1ce   :  { %562 = vst.msk [vmem:[#allocation2 + $0x5b0] sm:$0x3] %vm42_vm2, %v537_v31  ;;  %v16453_v17 = vpop.f32.mrf.mxu0 }
 0x1cf   :  { %18675 = vst [vmem:[#allocation79_spill] sm:$0xff] %v16450_v43  ;;  %13703 = vmatmul.msk.f32.gmra.mxu1 %vm39_vm0, %v3854_v15 }
 0x1d0   :  { %647 = vst.msk [vmem:[#allocation2 + $0x5c8] sm:$0x3] %vm42_vm2, %v622_v5  ;;  %13834 = vmatmul.msk.f32.gmra.mxu2 %vm39_vm0, %v3857_v38  ;;  %13964 = vmatmul.msk.f32.gmra.mxu3 %vm39_vm0, %v6459_v50  ;;  %v3858_v50 = vld [vmem:[#allocation2 + $0xc0] sm:$0xff] }
 0x1d1   :  { %14094 = vmatmul.msk.f32.gmra.mxu0 %vm39_vm0, %v6461_v9 }
 0x1d3   :  { %v16459_v8 = vpop.f32.mrf.mxu2  ;;  %v16461_v31 = vpop.f32.mrf.mxu3 }
 0x1d4   :  { %18676 = vst [vmem:[#allocation80_spill] sm:$0xff] %v16459_v8  ;;  %v792_v33 = vpop.permute.xlu0 %791  ;;  %v6462_v8 = vld [vmem:[#allocation2 + $0xa9] sm:$0xff] }
 0x1d5   :  { %18677 = vst [vmem:[#allocation81_spill] sm:$0xff] %v16461_v31  ;;  %v877_v5 = vpop.permute.xlu1 %876  ;;  %v16464_v43 = vpop.f32.mrf.mxu1  ;;  %v1415_v31 = vld [vmem:[%s18599_s0 + $0x8] sm:$0x1] }
 0x1d6   :  { %817 = vst.msk [vmem:[#allocation2 + $0x5f8] sm:$0x3] %vm42_vm2, %v792_v33  ;;  %v16467_v15 = vpop.f32.mrf.mxu0  ;;  %v1427_v33 = vunpack.c.l.bf16 %v1415_v31  ;;  %v6463_v31 = vld [vmem:[#allocation2 + $0xb1] sm:$0xff] }
 0x1d7   :  { %18678 = vst [vmem:[#allocation82_spill] sm:$0xff] %v16464_v43  ;;  %13704 = vmatmul.msk.f32.gmra.mxu1 %vm39_vm0, %v3855_v2 }
 0x1d8   :  { %902 = vst.msk [vmem:[#allocation2 + $0x610] sm:$0x3] %vm42_vm2, %v877_v5  ;;  %13835 = vmatmul.msk.f32.gmra.mxu2 %vm39_vm0, %v3858_v50  ;;  %13965 = vmatmul.msk.f32.gmra.mxu3 %vm39_vm0, %v6460_v10 }
 0x1d9   :  { %14095 = vmatmul.msk.f32.gmra.mxu0 %vm39_vm0, %v6462_v8  ;;  %1453 = vrot.lane.b32.xlu0 %v1427_v33, %s15254_s9 }
 0x1db   :  { %v16476_v43 = vpop.f32.mrf.mxu2  ;;  %v16478_v5 = vpop.f32.mrf.mxu3 }
 0x1dc   :  { %18679 = vst [vmem:[#allocation83_spill] sm:$0xff] %v16476_v43  ;;  %v1047_v2 = vpop.permute.xlu0 %1046 }
 0x1dd   :  { %18680 = vst [vmem:[#allocation84_spill] sm:$0xff] %v16478_v5  ;;  %v1132_v14 = vpop.permute.xlu1 %1131  ;;  %v16482_v20 = vpop.f32.mrf.mxu1 }
 0x1de   :  { %1072 = vst.msk [vmem:[#allocation2 + $0x640] sm:$0x3] %vm42_vm2, %v1047_v2  ;;  %v16485_v10 = vpop.f32.mrf.mxu0 }
 0x1df   :  { %18681 = vst [vmem:[#allocation85_spill] sm:$0xff] %v16482_v20  ;;  %13705 = vmatmul.msk.f32.gmra.mxu1 %vm39_vm0, %v3856_v19  ;;  %v3860_v19 = vld [vmem:[#allocation2 + $0xd8] sm:$0xff] }
 0x1e0   :  { %1157 = vst.msk [vmem:[#allocation2 + $0x658] sm:$0x3] %vm42_vm2, %v1132_v14  ;;  %13836 = vmatmul.msk.f32.gmra.mxu2 %vm39_vm0, %v3859_v4  ;;  %13966 = vmatmul.msk.f32.gmra.mxu3 %vm39_vm0, %v6461_v9  ;;  %v6464_v9 = vld [vmem:[#allocation2 + $0xc1] sm:$0xff] }
 0x1e1   :  { %14096 = vmatmul.msk.f32.gmra.mxu0 %vm39_vm0, %v6463_v31 }
 0x1e3   :  { %v16491_v33 = vpop.f32.mrf.mxu2  ;;  %v16493_v2 = vpop.f32.mrf.mxu3 }
 0x1e4   :  { %18682 = vst [vmem:[#allocation86_spill] sm:$0xff] %v16491_v33  ;;  %v1217_v5 = vpop.permute.xlu0 %1216 }
 0x1e5   :  { %18683 = vst [vmem:[#allocation87_spill] sm:$0xff] %v16493_v2  ;;  %v16496_v14 = vpop.f32.mrf.mxu1 }
 0x1e6   :  { %1242 = vst.msk [vmem:[#allocation2 + $0x670] sm:$0x3] %vm42_vm2, %v1217_v5  ;;  %v16498_v43 = vpop.f32.mrf.mxu0 }
 0x1e7   :  { %18684 = vst [vmem:[#allocation88_spill] sm:$0xff] %v16496_v14  ;;  %13706 = vmatmul.msk.f32.gmra.mxu1 %vm39_vm0, %v3857_v38  ;;  %v3861_v38 = vld [vmem:[#allocation2 + $0xe0] sm:$0xff] }
 0x1e8   :  { %13837 = vmatmul.msk.f32.gmra.mxu2 %vm39_vm0, %v3860_v19  ;;  %13967 = vmatmul.msk.f32.gmra.mxu3 %vm39_vm0, %v6462_v8  ;;  %v6465_v8 = vld [vmem:[#allocation2 + $0xc9] sm:$0xff] }
 0x1e9   :  { %14097 = vmatmul.msk.f32.gmra.mxu0 %vm39_vm0, %v6464_v9 }
 0x1eb   :  { %v16504_v33 = vpop.f32.mrf.mxu2  ;;  %v16506_v2 = vpop.f32.mrf.mxu3 }
 0x1ec   :  { %18685 = vst [vmem:[#allocation89_spill] sm:$0xff] %v16504_v33  ;;  %v1302_v20 = vpop.permute.xlu0 %1301 }
 0x1ed   :  { %18686 = vst [vmem:[#allocation90_spill] sm:$0xff] %v16506_v2  ;;  %v16509_v5 = vpop.f32.mrf.mxu1 }
 0x1ee   :  { %1327 = vst.msk [vmem:[#allocation2 + $0x688] sm:$0x3] %vm42_vm2, %v1302_v20  ;;  %v16511_v14 = vpop.f32.mrf.mxu0 }
 0x1ef   :  { %18687 = vst [vmem:[#allocation91_spill] sm:$0xff] %v16509_v5  ;;  %13707 = vmatmul.msk.f32.gmra.mxu1 %vm39_vm0, %v3858_v50  ;;  %v3862_v5 = vld [vmem:[#allocation2 + $0xf0] sm:$0xff]  ;;  %v6466_v50 = vld [vmem:[#allocation2 + $0xd9] sm:$0xff] }
 0x1f0   :  { %13838 = vmatmul.msk.f32.gmra.mxu2 %vm39_vm0, %v3861_v38  ;;  %13968 = vmatmul.msk.f32.gmra.mxu3 %vm39_vm0, %v6463_v31 }
 0x1f1   :  { %14098 = vmatmul.msk.f32.gmra.mxu0 %vm39_vm0, %v6465_v8 }
 0x1f3   :  { %v16517_v33 = vpop.f32.mrf.mxu2  ;;  %v16519_v2 = vpop.f32.mrf.mxu3 }
 0x1f4   :  { %18688 = vst [vmem:[#allocation92_spill] sm:$0xff] %v16517_v33 }
 0x1f5   :  { %18689 = vst [vmem:[#allocation93_spill] sm:$0xff] %v16519_v2  ;;  %v16521_v60 = vpop.f32.mrf.mxu1  ;;  %v3863_v2 = vld [vmem:[#allocation2 + $0xf8] sm:$0xff] }
 0x1f6   :  { %18690 = vst [vmem:[#allocation94_spill] sm:$0xff] %v16521_v60  ;;  %v6984_v20 = vpop.f32.mrf.mxu0 }
 0x1f7   :  { %13708 = vmatmul.msk.f32.gmra.mxu1 %vm39_vm0, %v3859_v4  ;;  %v6467_v4 = vld [vmem:[#allocation2 + $0xe1] sm:$0xff] }
 0x1f8   :  { %13839 = vmatmul.msk.f32.gmra.mxu2 %vm39_vm0, %v3862_v5  ;;  %13969 = vmatmul.msk.f32.gmra.mxu3 %vm39_vm0, %v6464_v9 }
 0x1f9   :  { %14099 = vmatmul.msk.f32.gmra.mxu0 %vm39_vm0, %v6466_v50 }
 0x1fb   :  { %v4380_v31 = vpop.f32.mrf.mxu2  ;;  %v5682_v51 = vpop.f32.mrf.mxu3 }
 0x1fd   :  { %v3078_v41 = vpop.f32.mrf.mxu1 }
 0x1fe   :  { %v3590_v33 = vadd.f32 %v3078_v41, %v15832_v54  ;;  %v6987_v45 = vpop.f32.mrf.mxu0 }
 0x1ff   :  { %13709 = vmatmul.msk.f32.gmra.mxu1 %vm39_vm0, %v3860_v19  ;;  %v3864_v19 = vld [vmem:[#allocation2 + $0x108] sm:$0xff] }
 0x200   :  { %v4892_v60 = vadd.f32 %v4380_v31, %v3590_v33  ;;  %13840 = vmatmul.msk.f32.gmra.mxu2 %vm39_vm0, %v3863_v2  ;;  %13970 = vmatmul.msk.f32.gmra.mxu3 %vm39_vm0, %v6465_v8  ;;  %v6468_v8 = vld [vmem:[#allocation2 + $0xf1] sm:$0xff] }
 0x201   :  { %14100 = vmatmul.msk.f32.gmra.mxu0 %vm39_vm0, %v6467_v4 }
 0x202   :  { %v6194_v9 = vadd.f32 %v5682_v51, %v4892_v60 }
 0x203   :  { %v4383_v18 = vpop.f32.mrf.mxu2  ;;  %v5685_v27 = vpop.f32.mrf.mxu3 }
 0x204   :  { %v16532_v48 = vadd.f32 %v6984_v20, %v6194_v9 }
 0x205   :  { %v3081_v21 = vpop.f32.mrf.mxu1 }
 0x206   :  { %v3591_v54 = vadd.f32 %v3081_v21, %v15872_v22  ;;  %v6990_v41 = vpop.f32.mrf.mxu0 }
 0x207   :  { %13710 = vmatmul.msk.f32.gmra.mxu1 %vm39_vm0, %v3861_v38  ;;  %v3865_v38 = vld [vmem:[#allocation2 + $0x110] sm:$0xff] }
 0x208   :  { %v4893_v33 = vadd.f32 %v4383_v18, %v3591_v54  ;;  %13841 = vmatmul.msk.f32.gmra.mxu2 %vm39_vm0, %v3864_v19  ;;  %13971 = vmatmul.msk.f32.gmra.mxu3 %vm39_vm0, %v6466_v50  ;;  %v6469_v50 = vld [vmem:[#allocation2 + $0xf9] sm:$0xff] }
 0x209   :  { %14101 = vmatmul.msk.f32.gmra.mxu0 %vm39_vm0, %v6468_v8 }
 0x20a   :  { %v6195_v51 = vadd.f32 %v5685_v27, %v4893_v33 }
 0x20b   :  { %v4386_v60 = vpop.f32.mrf.mxu2  ;;  %v5688_v31 = vpop.f32.mrf.mxu3 }
 0x20c   :  { %v16539_v20 = vadd.f32 %v6987_v45, %v6195_v51 }
 0x20d   :  { %v3084_v9 = vpop.f32.mrf.mxu1 }
 0x20e   :  { %v3592_v22 = vadd.f32 %v3084_v9, %v15898_v46  ;;  %v6993_v21 = vpop.f32.mrf.mxu0 }
 0x20f   :  { %13711 = vmatmul.msk.f32.gmra.mxu1 %vm39_vm0, %v3862_v5  ;;  %v3866_v5 = vld [vmem:[#allocation2 + $0x120] sm:$0xff] }
 0x210   :  { %v4894_v18 = vadd.f32 %v4386_v60, %v3592_v22  ;;  %13842 = vmatmul.msk.f32.gmra.mxu2 %vm39_vm0, %v3865_v38  ;;  %13972 = vmatmul.msk.f32.gmra.mxu3 %vm39_vm0, %v6467_v4  ;;  %v6470_v4 = vld [vmem:[#allocation2 + $0x109] sm:$0xff] }
 0x211   :  { %14102 = vmatmul.msk.f32.gmra.mxu0 %vm39_vm0, %v6469_v50 }
 0x212   :  { %v6196_v27 = vadd.f32 %v5688_v31, %v4894_v18 }
 0x213   :  { %v4389_v54 = vpop.f32.mrf.mxu2  ;;  %v5691_v33 = vpop.f32.mrf.mxu3 }
 0x214   :  { %v16546_v45 = vadd.f32 %v6990_v41, %v6196_v27 }
 0x215   :  { %v3087_v51 = vpop.f32.mrf.mxu1 }
 0x216   :  { %v3593_v46 = vadd.f32 %v3087_v51, %v15924_v1  ;;  %v6996_v9 = vpop.f32.mrf.mxu0 }
 0x217   :  { %13712 = vmatmul.msk.f32.gmra.mxu1 %vm39_vm0, %v3863_v2  ;;  %v3867_v2 = vld [vmem:[#allocation2 + $0x128] sm:$0xff] }
 0x218   :  { %v4895_v60 = vadd.f32 %v4389_v54, %v3593_v46  ;;  %13843 = vmatmul.msk.f32.gmra.mxu2 %vm39_vm0, %v3866_v5  ;;  %13973 = vmatmul.msk.f32.gmra.mxu3 %vm39_vm0, %v6468_v8  ;;  %v6471_v8 = vld [vmem:[#allocation2 + $0x111] sm:$0xff] }
 0x219   :  { %14103 = vmatmul.msk.f32.gmra.mxu0 %vm39_vm0, %v6470_v4 }
 0x21a   :  { %v6197_v31 = vadd.f32 %v5691_v33, %v4895_v60 }
 0x21b   :  { %v4392_v22 = vpop.f32.mrf.mxu2  ;;  %v5694_v18 = vpop.f32.mrf.mxu3 }
 0x21c   :  { %v16553_v41 = vadd.f32 %v6993_v21, %v6197_v31 }
 0x21d   :  { %v3090_v27 = vpop.f32.mrf.mxu1 }
 0x21e   :  { %v3594_v1 = vadd.f32 %v3090_v27, %v15953_v29  ;;  %v6999_v51 = vpop.f32.mrf.mxu0 }
 0x21f   :  { %13713 = vmatmul.msk.f32.gmra.mxu1 %vm39_vm0, %v3864_v19  ;;  %v3868_v19 = vld [vmem:[#allocation2 + $0x138] sm:$0xff] }
 0x220   :  { %v4896_v54 = vadd.f32 %v4392_v22, %v3594_v1  ;;  %13844 = vmatmul.msk.f32.gmra.mxu2 %vm39_vm0, %v3867_v2  ;;  %13974 = vmatmul.msk.f32.gmra.mxu3 %vm39_vm0, %v6469_v50  ;;  %v6472_v50 = vld [vmem:[#allocation2 + $0x121] sm:$0xff] }
 0x221   :  { %14104 = vmatmul.msk.f32.gmra.mxu0 %vm39_vm0, %v6471_v8 }
 0x222   :  { %v6198_v33 = vadd.f32 %v5694_v18, %v4896_v54 }
 0x223   :  { %v4395_v46 = vpop.f32.mrf.mxu2  ;;  %v5697_v60 = vpop.f32.mrf.mxu3 }
 0x224   :  { %v16560_v21 = vadd.f32 %v6996_v9, %v6198_v33 }
 0x225   :  { %v3093_v31 = vpop.f32.mrf.mxu1 }
 0x226   :  { %v3595_v29 = vadd.f32 %v3093_v31, %v15983_v49  ;;  %v7002_v27 = vpop.f32.mrf.mxu0 }
 0x227   :  { %13714 = vmatmul.msk.f32.gmra.mxu1 %vm39_vm0, %v3865_v38 }
 0x228   :  { %v4897_v22 = vadd.f32 %v4395_v46, %v3595_v29  ;;  %13845 = vmatmul.msk.f32.gmra.mxu2 %vm39_vm0, %v3868_v19  ;;  %13975 = vmatmul.msk.f32.gmra.mxu3 %vm39_vm0, %v6470_v4  ;;  %v6473_v4 = vld [vmem:[#allocation2 + $0x129] sm:$0xff] }
 0x229   :  { %14105 = vmatmul.msk.f32.gmra.mxu0 %vm39_vm0, %v6472_v50 }
 0x22a   :  { %v6199_v18 = vadd.f32 %v5697_v60, %v4897_v22 }
 0x22b   :  { %v4398_v1 = vpop.f32.mrf.mxu2  ;;  %v5700_v54 = vpop.f32.mrf.mxu3 }
 0x22c   :  { %v16567_v9 = vadd.f32 %v6999_v51, %v6199_v18 }
 0x22d   :  { %v3096_v33 = vpop.f32.mrf.mxu1 }
 0x22e   :  { %v3596_v49 = vadd.f32 %v3096_v33, %v16010_v6  ;;  %v7005_v31 = vpop.f32.mrf.mxu0 }
 0x22f   :  { %13715 = vmatmul.msk.f32.gmra.mxu1 %vm39_vm0, %v3866_v5 }
 0x230   :  { %v4898_v38 = vadd.f32 %v4398_v1, %v3596_v49  ;;  %13846 = vmatmul.msk.f32.gmra.mxu2 %vm39_vm0, %v16138_v42  ;;  %13976 = vmatmul.msk.f32.gmra.mxu3 %vm39_vm0, %v6471_v8  ;;  %v6474_v42 = vld [vmem:[#allocation2 + $0x139] sm:$0xff] }
 0x231   :  { %14106 = vmatmul.msk.f32.gmra.mxu0 %vm39_vm0, %v6473_v4 }
 0x232   :  { %v6200_v46 = vadd.f32 %v5700_v54, %v4898_v38 }
 0x233   :  { %v4401_v60 = vpop.f32.mrf.mxu2  ;;  %v5703_v29 = vpop.f32.mrf.mxu3 }
 0x234   :  { %v16575_v51 = vadd.f32 %v7002_v27, %v6200_v46 }
 0x235   :  { %v3099_v22 = vpop.f32.mrf.mxu1 }
 0x236   :  { %v3597_v6 = vadd.f32 %v3099_v22, %v16037_v37  ;;  %v7008_v18 = vpop.f32.mrf.mxu0  ;;  %v2569_v22 = vld [vmem:[#allocation2 + $0x140] sm:$0xff] }
 0x237   :  { %13716 = vmatmul.msk.f32.gmra.mxu1 %vm39_vm0, %v3867_v2 }
 0x238   :  { %v4899_v5 = vadd.f32 %v4401_v60, %v3597_v6  ;;  %13847 = vmatmul.msk.f32.gmra.mxu2 %vm39_vm0, %v16168_v40  ;;  %13977 = vmatmul.msk.f32.gmra.mxu3 %vm39_vm0, %v6472_v50  ;;  %v6475_v40 = vld [vmem:[#allocation2 + $0x141] sm:$0xff] }
 0x239   :  { %14107 = vmatmul.msk.f32.gmra.mxu0 %vm39_vm0, %v6474_v42 }
 0x23a   :  { %v6201_v8 = vadd.f32 %v5703_v29, %v4899_v5 }
 0x23b   :  { %v4404_v1 = vpop.f32.mrf.mxu2  ;;  %v5706_v54 = vpop.f32.mrf.mxu3 }
 0x23c   :  { %v16583_v27 = vadd.f32 %v7005_v31, %v6201_v8 }
 0x23d   :  { %v3102_v33 = vpop.f32.mrf.mxu1 }
 0x23e   :  { %v3598_v37 = vadd.f32 %v3102_v33, %v16061_v61  ;;  %v7011_v49 = vpop.f32.mrf.mxu0  ;;  %v2570_v33 = vld [vmem:[#allocation2 + $0x150] sm:$0xff] }
 0x23f   :  { %13717 = vmatmul.msk.f32.gmra.mxu1 %vm39_vm0, %v3868_v19 }
 0x240   :  { %v4900_v2 = vadd.f32 %v4404_v1, %v3598_v37  ;;  %13848 = vmatmul.msk.f32.gmra.mxu2 %vm39_vm0, %v16206_v13  ;;  %13978 = vmatmul.msk.f32.gmra.mxu3 %vm39_vm0, %v6473_v4  ;;  %v6476_v13 = vld [vmem:[#allocation2 + $0x151] sm:$0xff] }
 0x241   :  { %14108 = vmatmul.msk.f32.gmra.mxu0 %vm39_vm0, %v6475_v40 }
 0x242   :  { %v6202_v50 = vadd.f32 %v5706_v54, %v4900_v2 }
 0x243   :  { %v4407_v38 = vpop.f32.mrf.mxu2  ;;  %v5709_v46 = vpop.f32.mrf.mxu3 }
 0x244   :  { %v16591_v31 = vadd.f32 %v7008_v18, %v6202_v50 }
 0x245   :  { %v3105_v60 = vpop.f32.mrf.mxu1 }
 0x246   :  { %v3599_v61 = vadd.f32 %v3105_v60, %v16082_v25  ;;  %v7014_v29 = vpop.f32.mrf.mxu0 }
 0x247   :  { %13718 = vmatmul.msk.f32.gmra.mxu1 %vm39_vm0, %v2569_v22  ;;  %v2571_v22 = vld [vmem:[#allocation2 + $0x158] sm:$0xff] }
 0x248   :  { %v4901_v19 = vadd.f32 %v4407_v38, %v3599_v61  ;;  %13849 = vmatmul.msk.f32.gmra.mxu2 %vm39_vm0, %v16241_v44  ;;  %13979 = vmatmul.msk.f32.gmra.mxu3 %vm39_vm0, %v6474_v42  ;;  %v6477_v42 = vld [vmem:[#allocation2 + $0x159] sm:$0xff] }
 0x249   :  { %14109 = vmatmul.msk.f32.gmra.mxu0 %vm39_vm0, %v6476_v13 }
 0x24a   :  { %v6203_v4 = vadd.f32 %v5709_v46, %v4901_v19  ;;  %v3874_v46 = vld [vmem:[#allocation2 + $0x180] sm:$0xff] }
 0x24b   :  { %v4410_v6 = vpop.f32.mrf.mxu2  ;;  %v5712_v18 = vpop.f32.mrf.mxu3 }
 0x24c   :  { %v16599_v5 = vadd.f32 %v7011_v49, %v6203_v4  ;;  %v1454_v25 = vpop.permute.xlu0 %1453  ;;  %v6478_v4 = vld [vmem:[#allocation2 + $0x169] sm:$0xff] }
 0x24d   :  { %v3108_v8 = vpop.f32.mrf.mxu1  ;;  %1488 = vst.msk [vmem:[#allocation2 + $0x1a8] sm:$0x3] %vm42_vm2, %v1454_v25 }
 0x24e   :  { %v3600_v1 = vadd.f32 %v3108_v8, %v16109_v59  ;;  %v7017_v54 = vpop.f32.mrf.mxu0 }
 0x24f   :  { %13719 = vmatmul.msk.f32.gmra.mxu1 %vm39_vm0, %v2570_v33 }
 0x250   :  { %v4902_v37 = vadd.f32 %v4410_v6, %v3600_v1  ;;  %13850 = vmatmul.msk.f32.gmra.mxu2 %vm39_vm0, %v16268_v62  ;;  %13980 = vmatmul.msk.f32.gmra.mxu3 %vm39_vm0, %v6475_v40  ;;  %v20_v40 = vld [vmem:[%s18599_s0 + $0x14] sm:$0x1]  ;;  %v3875_v1 = vld [vmem:[#allocation2 + $0x188] sm:$0xff] }
 0x251   :  { %14110 = vmatmul.msk.f32.gmra.mxu0 %vm39_vm0, %v6477_v42 }
 0x252   :  { %v6204_v49 = vadd.f32 %v5712_v18, %v4902_v37 }
 0x253   :  { %v4413_v2 = vpop.f32.mrf.mxu2  ;;  %v5715_v50 = vpop.f32.mrf.mxu3 }
 0x254   :  { %v16608_v38 = vadd.f32 %v7014_v29, %v6204_v49  ;;  %v32_v29 = vunpack.c.l.bf16 %v20_v40  ;;  %v6479_v49 = vld [vmem:[#allocation2 + $0x171] sm:$0xff] }
 0x255   :  { %v3111_v59 = vpop.f32.mrf.mxu1 }
 0x256   :  { %v3601_v60 = vadd.f32 %v3111_v59, %v16136_v36  ;;  %v7020_v61 = vpop.f32.mrf.mxu0  ;;  %46 = vst.msk [vmem:[#allocation2 + $0x1c0] sm:$0x3] %vm42_vm2, %v32_v29 }
 0x257   :  { %13720 = vmatmul.msk.f32.gmra.mxu1 %vm39_vm0, %v2571_v22  ;;  %v3876_v22 = vld [vmem:[#allocation2 + $0x198] sm:$0xff] }
 0x258   :  { %v4903_v19 = vadd.f32 %v4413_v2, %v3601_v60  ;;  %13851 = vmatmul.msk.f32.gmra.mxu2 %vm39_vm0, %v3874_v46  ;;  %13981 = vmatmul.msk.f32.gmra.mxu3 %vm39_vm0, %v6476_v13 }
 0x259   :  { %14111 = vmatmul.msk.f32.gmra.mxu0 %vm39_vm0, %v6478_v4 }
 0x25a   :  { %v6205_v36 = vadd.f32 %v5715_v50, %v4903_v19 }
 0x25b   :  { %v4416_v6 = vpop.f32.mrf.mxu2  ;;  %v5718_v18 = vpop.f32.mrf.mxu3 }
 0x25c   :  { %v16619_v8 = vadd.f32 %v7017_v54, %v6205_v36 }
 0x25d   :  { %v3114_v25 = vpop.f32.mrf.mxu1 }
 0x25e   :  { %v3602_v33 = vadd.f32 %v3114_v25, %v16166_v30  ;;  %v7023_v37 = vpop.f32.mrf.mxu0 }
 0x25f   :  { %13721 = vmatmul.msk.f32.gmra.mxu1 %vm39_vm0, %v16241_v44 }
 0x260   :  { %v4904_v13 = vadd.f32 %v4416_v6, %v3602_v33  ;;  %13852 = vmatmul.msk.f32.gmra.mxu2 %vm39_vm0, %v3875_v1  ;;  %13982 = vmatmul.msk.f32.gmra.mxu3 %vm39_vm0, %v6477_v42  ;;  %v6480_v42 = vld [vmem:[#allocation2 + $0x181] sm:$0xff] }
 0x261   :  { %14112 = vmatmul.msk.f32.gmra.mxu0 %vm39_vm0, %v6479_v49 }
 0x262   :  { %v6206_v2 = vadd.f32 %v5718_v18, %v4904_v13  ;;  %v3877_v18 = vld [vmem:[#allocation2 + $0x1a0] sm:$0xff] }
 0x263   :  { %v4419_v50 = vpop.f32.mrf.mxu2  ;;  %v5721_v54 = vpop.f32.mrf.mxu3 }
 0x264   :  { %v16627_v59 = vadd.f32 %v7020_v61, %v6206_v2 }
 0x265   :  { %v3117_v60 = vpop.f32.mrf.mxu1 }
 0x266   :  { %v3603_v30 = vadd.f32 %v3117_v60, %v16204_v56  ;;  %v7026_v40 = vpop.f32.mrf.mxu0 }
 0x267   :  { %13722 = vmatmul.msk.f32.gmra.mxu1 %vm39_vm0, %v16268_v62 }
 0x268   :  { %v4905_v44 = vadd.f32 %v4419_v50, %v3603_v30  ;;  %13853 = vmatmul.msk.f32.gmra.mxu2 %vm39_vm0, %v3876_v22  ;;  %13983 = vmatmul.msk.f32.gmra.mxu3 %vm39_vm0, %v6478_v4  ;;  %v6481_v4 = vld [vmem:[#allocation2 + $0x189] sm:$0xff] }
 0x269   :  { %14113 = vmatmul.msk.f32.gmra.mxu0 %vm39_vm0, %v6480_v42 }
 0x26a   :  { %v6207_v19 = vadd.f32 %v5721_v54, %v4905_v44  ;;  %v5180_v54 = vld [vmem:[#allocation2 + $0x1b1] sm:$0xff] }
 0x26b   :  { %v4422_v29 = vpop.f32.mrf.mxu2  ;;  %v5724_v61 = vpop.f32.mrf.mxu3 }
 0x26c   :  { %v16635_v36 = vadd.f32 %v7023_v37, %v6207_v19 }
 0x26d   :  { %v3120_v6 = vpop.f32.mrf.mxu1 }
 0x26e   :  { %v3604_v56 = vadd.f32 %v3120_v6, %v16239_v16  ;;  %v7029_v25 = vpop.f32.mrf.mxu0  ;;  %v3879_v6 = vld [vmem:[#allocation2 + $0x1e8] sm:$0xff] }
 0x26f   :  { %13723 = vmatmul.msk.f32.gmra.mxu1 %vm39_vm0, %v3874_v46  ;;  %v3878_v46 = vld [vmem:[#allocation2 + $0x1e0] sm:$0xff] }
 0x270   :  { %v4906_v62 = vadd.f32 %v4422_v29, %v3604_v56  ;;  %13854 = vmatmul.msk.f32.gmra.mxu2 %vm39_vm0, %v3877_v18  ;;  %13984 = vmatmul.msk.f32.gmra.mxu3 %vm39_vm0, %v6479_v49  ;;  %v6482_v49 = vld [vmem:[#allocation2 + $0x1c9] sm:$0xff]  ;;  %v5181_v29 = vld [vmem:[#allocation2 + $0x1b9] sm:$0xff]  ;;  %v6483_v56 = vld [vmem:[#allocation2 + $0x1d1] sm:$0xff] }
 0x271   :  { %14114 = vmatmul.msk.f32.gmra.mxu0 %vm39_vm0, %v6481_v4 }
 0x272   :  { %v6208_v33 = vadd.f32 %v5724_v61, %v4906_v62 }
 0x273   :  { %v4425_v13 = vpop.f32.mrf.mxu2  ;;  %v5727_v2 = vpop.f32.mrf.mxu3 }
 0x274   :  { %v16642_v37 = vadd.f32 %v7026_v40, %v6208_v33 }
 0x275   :  { %v3123_v50 = vpop.f32.mrf.mxu1 }
 0x276   :  { %v3605_v16 = vadd.f32 %v3123_v50, %v16266_v58  ;;  %v7032_v60 = vpop.f32.mrf.mxu0  ;;  %v2577_v50 = vld [vmem:[#allocation2 + $0x1d0] sm:$0xff] }
 0x277   :  { %13724 = vmatmul.msk.f32.gmra.mxu1 %vm39_vm0, %v3875_v1  ;;  %v2576_v1 = vld [vmem:[#allocation2 + $0x1c8] sm:$0xff] }
 0x278   :  { %v4907_v22 = vadd.f32 %v4425_v13, %v3605_v16  ;;  %13855 = vmatmul.msk.f32.gmra.mxu2 %vm39_vm0, %v3878_v46  ;;  %13985 = vmatmul.msk.f32.gmra.mxu3 %vm39_vm0, %v5180_v54  ;;  %v3880_v54 = vld [vmem:[#allocation2 + $0x1f8] sm:$0xff] }
 0x279   :  { %14115 = vmatmul.msk.f32.gmra.mxu0 %vm39_vm0, %v6482_v49 }
 0x27a   :  { %v6209_v30 = vadd.f32 %v5727_v2, %v4907_v22  ;;  %v6484_v22 = vld [vmem:[#allocation2 + $0x1e1] sm:$0xff] }
 0x27b   :  { %v4428_v44 = vpop.f32.mrf.mxu2  ;;  %v5730_v40 = vpop.f32.mrf.mxu3 }
 0x27c   :  { %v16649_v42 = vadd.f32 %v7029_v25, %v6209_v30 }
 0x27d   :  { %v3126_v19 = vpop.f32.mrf.mxu1 }
 0x27e   :  { %v3606_v58 = vadd.f32 %v3126_v19, %v16288_v39  ;;  %v7035_v61 = vpop.f32.mrf.mxu0 }
 0x27f   :  { %13725 = vmatmul.msk.f32.gmra.mxu1 %vm39_vm0, %v2576_v1 }
 0x280   :  { %v4908_v18 = vadd.f32 %v4428_v44, %v3606_v58  ;;  %13856 = vmatmul.msk.f32.gmra.mxu2 %vm39_vm0, %v3879_v6  ;;  %13986 = vmatmul.msk.f32.gmra.mxu3 %vm39_vm0, %v5181_v29  ;;  %v3881_v58 = vld [vmem:[#allocation2 + $0x200] sm:$0xff] }
 0x281   :  { %14116 = vmatmul.msk.f32.gmra.mxu0 %vm39_vm0, %v6483_v56 }
 0x282   :  { %v6210_v62 = vadd.f32 %v5730_v40, %v4908_v18 }
 0x283   :  { %v4431_v25 = vpop.f32.mrf.mxu2  ;;  %v5733_v4 = vpop.f32.mrf.mxu3 }
 0x284   :  { %v16656_v33 = vadd.f32 %v7032_v60, %v6210_v62 }
 0x285   :  { %v3129_v13 = vpop.f32.mrf.mxu1 }
 0x286   :  { %v3607_v39 = vadd.f32 %v3129_v13, %v16304_v12  ;;  %v7038_v2 = vpop.f32.mrf.mxu0 }
 0x287   :  { %13726 = vmatmul.msk.f32.gmra.mxu1 %vm39_vm0, %v2577_v50 }
 0x288   :  { %v4909_v16 = vadd.f32 %v4431_v25, %v3607_v39  ;;  %13857 = vmatmul.msk.f32.gmra.mxu2 %vm39_vm0, %v3880_v54  ;;  %13987 = vmatmul.msk.f32.gmra.mxu3 %vm39_vm0, %v6482_v49  ;;  %v6485_v49 = vld [vmem:[#allocation2 + $0x1e9] sm:$0xff] }
 0x289   :  { %14117 = vmatmul.msk.f32.gmra.mxu0 %vm39_vm0, %v6484_v22 }
 0x28a   :  { %v6211_v30 = vadd.f32 %v5733_v4, %v4909_v16 }
 0x28b   :  { %v4434_v44 = vpop.f32.mrf.mxu2  ;;  %v5736_v60 = vpop.f32.mrf.mxu3 }
 0x28c   :  { %v16663_v40 = vadd.f32 %v7035_v61, %v6211_v30 }
 0x28d   :  { %v3132_v19 = vpop.f32.mrf.mxu1 }
 0x28e   :  { %v3608_v12 = vadd.f32 %v3132_v19, %v16319_v23  ;;  %v7041_v29 = vpop.f32.mrf.mxu0 }
 0x28f   :  { %13727 = vmatmul.msk.f32.gmra.mxu1 %vm39_vm0, %v3878_v46  ;;  %v3882_v46 = vld [vmem:[#allocation2 + $0x210] sm:$0xff] }
 0x290   :  { %v4910_v1 = vadd.f32 %v4434_v44, %v3608_v12  ;;  %13858 = vmatmul.msk.f32.gmra.mxu2 %vm39_vm0, %v3881_v58  ;;  %13988 = vmatmul.msk.f32.gmra.mxu3 %vm39_vm0, %v6483_v56  ;;  %v6486_v56 = vld [vmem:[#allocation2 + $0x1f9] sm:$0xff] }
 0x291   :  { %14118 = vmatmul.msk.f32.gmra.mxu0 %vm39_vm0, %v6485_v49 }
 0x292   :  { %v6212_v18 = vadd.f32 %v5736_v60, %v4910_v1 }
 0x293   :  { %v4437_v62 = vpop.f32.mrf.mxu2  ;;  %v5739_v25 = vpop.f32.mrf.mxu3 }
 0x294   :  { %v16670_v61 = vadd.f32 %v7038_v2, %v6212_v18 }
 0x295   :  { %v3135_v4 = vpop.f32.mrf.mxu1 }
 0x296   :  { %v3609_v23 = vadd.f32 %v3135_v4, %v16334_v53  ;;  %v7044_v13 = vpop.f32.mrf.mxu0 }
 0x297   :  { %13728 = vmatmul.msk.f32.gmra.mxu1 %vm39_vm0, %v3879_v6  ;;  %v3883_v6 = vld [vmem:[#allocation2 + $0x218] sm:$0xff] }
 0x298   :  { %v4911_v39 = vadd.f32 %v4437_v62, %v3609_v23  ;;  %13859 = vmatmul.msk.f32.gmra.mxu2 %vm39_vm0, %v3882_v46  ;;  %13989 = vmatmul.msk.f32.gmra.mxu3 %vm39_vm0, %v6484_v22  ;;  %v6487_v22 = vld [vmem:[#allocation2 + $0x201] sm:$0xff] }
 0x299   :  { %14119 = vmatmul.msk.f32.gmra.mxu0 %vm39_vm0, %v6486_v56 }
 0x29a   :  { %v6213_v50 = vadd.f32 %v5739_v25, %v4911_v39 }
 0x29b   :  { %v4440_v16 = vpop.f32.mrf.mxu2  ;;  %v5742_v30 = vpop.f32.mrf.mxu3 }
 0x29c   :  { %v16677_v2 = vadd.f32 %v7041_v29, %v6213_v50 }
 0x29d   :  { %v3138_v44 = vpop.f32.mrf.mxu1 }
 0x29e   :  { %v3610_v53 = vadd.f32 %v3138_v44, %v16349_v34  ;;  %v7047_v60 = vpop.f32.mrf.mxu0 }
 0x29f   :  { %13729 = vmatmul.msk.f32.gmra.mxu1 %vm39_vm0, %v3880_v54  ;;  %v3884_v54 = vld [vmem:[#allocation2 + $0x228] sm:$0xff] }
 0x2a0   :  { %v4912_v19 = vadd.f32 %v4440_v16, %v3610_v53  ;;  %13860 = vmatmul.msk.f32.gmra.mxu2 %vm39_vm0, %v3883_v6  ;;  %13990 = vmatmul.msk.f32.gmra.mxu3 %vm39_vm0, %v6485_v49  ;;  %v6488_v49 = vld [vmem:[#allocation2 + $0x211] sm:$0xff] }
 0x2a1   :  { %14120 = vmatmul.msk.f32.gmra.mxu0 %vm39_vm0, %v6487_v22 }
 0x2a2   :  { %v6214_v12 = vadd.f32 %v5742_v30, %v4912_v19 }
 0x2a3   :  { %v4443_v1 = vpop.f32.mrf.mxu2  ;;  %v5745_v18 = vpop.f32.mrf.mxu3 }
 0x2a4   :  { %v16684_v29 = vadd.f32 %v7044_v13, %v6214_v12 }
 0x2a5   :  { %v3141_v62 = vpop.f32.mrf.mxu1 }
 0x2a6   :  { %v3611_v34 = vadd.f32 %v3141_v62, %v16364_v52  ;;  %v7050_v25 = vpop.f32.mrf.mxu0 }
 0x2a7   :  { %13730 = vmatmul.msk.f32.gmra.mxu1 %vm39_vm0, %v3881_v58  ;;  %v3885_v58 = vld [vmem:[#allocation2 + $0x230] sm:$0xff] }
 0x2a8   :  { %v4913_v4 = vadd.f32 %v4443_v1, %v3611_v34  ;;  %13861 = vmatmul.msk.f32.gmra.mxu2 %vm39_vm0, %v3884_v54  ;;  %13991 = vmatmul.msk.f32.gmra.mxu3 %vm39_vm0, %v6486_v56  ;;  %v6489_v56 = vld [vmem:[#allocation2 + $0x219] sm:$0xff] }
 0x2a9   :  { %14121 = vmatmul.msk.f32.gmra.mxu0 %vm39_vm0, %v6488_v49 }
 0x2aa   :  { %v6215_v23 = vadd.f32 %v5745_v18, %v4913_v4 }
 0x2ab   :  { %v4446_v39 = vpop.f32.mrf.mxu2  ;;  %v5748_v50 = vpop.f32.mrf.mxu3 }
 0x2ac   :  { %v16691_v13 = vadd.f32 %v7047_v60, %v6215_v23 }
 0x2ad   :  { %v3144_v16 = vpop.f32.mrf.mxu1 }
 0x2ae   :  { %v3612_v52 = vadd.f32 %v3144_v16, %v16379_v63  ;;  %v7053_v30 = vpop.f32.mrf.mxu0 }
 0x2af   :  { %13731 = vmatmul.msk.f32.gmra.mxu1 %vm39_vm0, %v3882_v46  ;;  %v3886_v46 = vld [vmem:[#allocation2 + $0x240] sm:$0xff] }
 0x2b0   :  { %v4914_v44 = vadd.f32 %v4446_v39, %v3612_v52  ;;  %13862 = vmatmul.msk.f32.gmra.mxu2 %vm39_vm0, %v3885_v58  ;;  %13992 = vmatmul.msk.f32.gmra.mxu3 %vm39_vm0, %v6487_v22  ;;  %v6490_v22 = vld [vmem:[#allocation2 + $0x229] sm:$0xff] }
 0x2b1   :  { %14122 = vmatmul.msk.f32.gmra.mxu0 %vm39_vm0, %v6489_v56 }
 0x2b2   :  { %v6216_v53 = vadd.f32 %v5748_v50, %v4914_v44 }
 0x2b3   :  { %v4449_v19 = vpop.f32.mrf.mxu2  ;;  %v5751_v12 = vpop.f32.mrf.mxu3 }
 0x2b4   :  { %v16698_v60 = vadd.f32 %v7050_v25, %v6216_v53 }
 0x2b5   :  { %v3147_v1 = vpop.f32.mrf.mxu1 }
 0x2b6   :  { %v3613_v63 = vadd.f32 %v3147_v1, %v16394_v32  ;;  %v7056_v18 = vpop.f32.mrf.mxu0 }
 0x2b7   :  { %13732 = vmatmul.msk.f32.gmra.mxu1 %vm39_vm0, %v3883_v6  ;;  %v3887_v6 = vld [vmem:[#allocation2 + $0x248] sm:$0xff] }
 0x2b8   :  { %v4915_v62 = vadd.f32 %v4449_v19, %v3613_v63  ;;  %13863 = vmatmul.msk.f32.gmra.mxu2 %vm39_vm0, %v3886_v46  ;;  %13993 = vmatmul.msk.f32.gmra.mxu3 %vm39_vm0, %v6488_v49  ;;  %v6491_v49 = vld [vmem:[#allocation2 + $0x231] sm:$0xff]  ;;  %v1338_v63 = vld [vmem:[%s18599_s0 + $0x28] sm:$0xf] }
 0x2b9   :  { %14123 = vmatmul.msk.f32.gmra.mxu0 %vm39_vm0, %v6490_v22 }
 0x2ba   :  { %v6217_v34 = vadd.f32 %v5751_v12, %v4915_v62 }
 0x2bb   :  { %v4452_v4 = vpop.f32.mrf.mxu2  ;;  %v5754_v23 = vpop.f32.mrf.mxu3 }
 0x2bc   :  { %v16705_v25 = vadd.f32 %v7053_v30, %v6217_v34 }
 0x2bd   :  { %v3150_v39 = vpop.f32.mrf.mxu1 }
 0x2be   :  { %v3614_v32 = vadd.f32 %v3150_v39, %v16409_v47  ;;  %v7059_v50 = vpop.f32.mrf.mxu0 }
 0x2bf   :  { %13733 = vmatmul.msk.f32.gmra.mxu1 %vm39_vm0, %v3884_v54  ;;  %v3888_v54 = vld [vmem:[#allocation2 + $0x258] sm:$0xff] }
 0x2c0   :  { %v4916_v16 = vadd.f32 %v4452_v4, %v3614_v32  ;;  %13864 = vmatmul.msk.f32.gmra.mxu2 %vm39_vm0, %v3887_v6  ;;  %13994 = vmatmul.msk.f32.gmra.mxu3 %vm39_vm0, %v6489_v56  ;;  %v6492_v56 = vld [vmem:[#allocation2 + $0x241] sm:$0xff] }
 0x2c1   :  { %14124 = vmatmul.msk.f32.gmra.mxu0 %vm39_vm0, %v6491_v49 }
 0x2c2   :  { %v6218_v52 = vadd.f32 %v5754_v23, %v4916_v16  ;;  %v6493_v16 = vld [vmem:[#allocation2 + $0x249] sm:$0xff] }
 0x2c3   :  { %v4455_v44 = vpop.f32.mrf.mxu2  ;;  %v5757_v53 = vpop.f32.mrf.mxu3 }
 0x2c4   :  { %v16712_v30 = vadd.f32 %v7056_v18, %v6218_v52  ;;  %v1350_v18 = vunpack.c.l.bf16 %v1338_v63  ;;  %v1423_v52 = vld [vmem:[%s18599_s0 + $0x28] sm:$0xf] }
 0x2c5   :  { %v3153_v19 = vpop.f32.mrf.mxu1 }
 0x2c6   :  { %v3615_v47 = vadd.f32 %v3153_v19, %v16424_v26  ;;  %v7062_v12 = vpop.f32.mrf.mxu0  ;;  %1384 = vrot.lane.b32.xlu1 %v1350_v18, %s15253_s5  ;;  %v6494_v18 = vld [vmem:[#allocation2 + $0x259] sm:$0xff] }
 0x2c7   :  { %13734 = vmatmul.msk.f32.gmra.mxu1 %vm39_vm0, %v3885_v58 }
 0x2c8   :  { %v4917_v1 = vadd.f32 %v4455_v44, %v3615_v47  ;;  %13865 = vmatmul.msk.f32.gmra.mxu2 %vm39_vm0, %v3888_v54  ;;  %13995 = vmatmul.msk.f32.gmra.mxu3 %vm39_vm0, %v6490_v22  ;;  %v3889_v22 = vld [vmem:[#allocation2 + $0x260] sm:$0xff] }
 0x2c9   :  { %14125 = vmatmul.msk.f32.gmra.mxu0 %vm39_vm0, %v6492_v56 }
 0x2ca   :  { %v6219_v62 = vadd.f32 %v5757_v53, %v4917_v1 }
 0x2cb   :  { %v4458_v34 = vpop.f32.mrf.mxu2  ;;  %v5760_v26 = vpop.f32.mrf.mxu3 }
 0x2cc   :  { %v16723_v58 = vadd.f32 %v7059_v50, %v6219_v62  ;;  %v1435_v50 = vunpack.c.l.bf16 %v1423_v52  ;;  %v1418_v62 = vld [vmem:[%s18599_s0 + $0x14] sm:$0x1] }
 0x2cd   :  { %v3156_v4 = vpop.f32.mrf.mxu1 }
 0x2ce   :  { %v3616_v23 = vadd.f32 %v3156_v4, %v16439_v57  ;;  %v7065_v39 = vpop.f32.mrf.mxu0  ;;  %1469 = vrot.lane.b32.xlu1 %v1435_v50, %s15254_s9  ;;  %v6495_v50 = vld [vmem:[#allocation2 + $0x261] sm:$0xff] }
 0x2cf   :  { %13735 = vmatmul.msk.f32.gmra.mxu1 %vm39_vm0, %v3886_v46 }
 0x2d0   :  { %v4918_v32 = vadd.f32 %v4458_v34, %v3616_v23  ;;  %13866 = vmatmul.msk.f32.gmra.mxu2 %vm39_vm0, %v3889_v22  ;;  %13996 = vmatmul.msk.f32.gmra.mxu3 %vm39_vm0, %v6491_v49  ;;  %v3890_v49 = vld [vmem:[#allocation2 + $0x270] sm:$0xff] }
 0x2d1   :  { %14126 = vmatmul.msk.f32.gmra.mxu0 %vm39_vm0, %v6493_v16 }
 0x2d2   :  { %v6220_v44 = vadd.f32 %v5760_v26, %v4918_v32 }
 0x2d3   :  { %v4461_v53 = vpop.f32.mrf.mxu2  ;;  %v5763_v57 = vpop.f32.mrf.mxu3 }
 0x2d4   :  { %v16734_v46 = vadd.f32 %v7062_v12, %v6220_v44  ;;  %v1430_v12 = vunpack.c.l.bf16 %v1418_v62 }
 0x2d5   :  { %v3159_v19 = vpop.f32.mrf.mxu1 }
 0x2d6   :  { %v3617_v47 = vadd.f32 %v3159_v19, %v16453_v17  ;;  %v7068_v1 = vpop.f32.mrf.mxu0  ;;  %1459 = vrot.lane.b32.xlu1 %v1430_v12, %s15254_s9 }
 0x2d7   :  { %13736 = vmatmul.msk.f32.gmra.mxu1 %vm39_vm0, %v3887_v6 }
 0x2d8   :  { %v4919_v63 = vadd.f32 %v4461_v53, %v3617_v47  ;;  %13867 = vmatmul.msk.f32.gmra.mxu2 %vm39_vm0, %v3890_v49  ;;  %13997 = vmatmul.msk.f32.gmra.mxu3 %vm39_vm0, %v6492_v56  ;;  %v3891_v56 = vld [vmem:[#allocation2 + $0x278] sm:$0xff] }
 0x2d9   :  { %14127 = vmatmul.msk.f32.gmra.mxu0 %vm39_vm0, %v6494_v18 }
 0x2da   :  { %v6221_v34 = vadd.f32 %v5763_v57, %v4919_v63 }
 0x2db   :  { %v4464_v26 = vpop.f32.mrf.mxu2  ;;  %v5766_v17 = vpop.f32.mrf.mxu3 }
 0x2dc   :  { %v16745_v6 = vadd.f32 %v7065_v39, %v6221_v34 }
 0x2dd   :  { %v3162_v4 = vpop.f32.mrf.mxu1 }
 0x2de   :  { %v3618_v23 = vadd.f32 %v3162_v4, %v16467_v15  ;;  %v7071_v32 = vpop.f32.mrf.mxu0 }
 0x2df   :  { %13737 = vmatmul.msk.f32.gmra.mxu1 %vm39_vm0, %v3888_v54  ;;  %v3892_v54 = vld [vmem:[#allocation2 + $0x288] sm:$0xff] }
 0x2e0   :  { %v4920_v52 = vadd.f32 %v4464_v26, %v3618_v23  ;;  %13868 = vmatmul.msk.f32.gmra.mxu2 %vm39_vm0, %v3891_v56  ;;  %13998 = vmatmul.msk.f32.gmra.mxu3 %vm39_vm0, %v6493_v16  ;;  %v6496_v16 = vld [vmem:[#allocation2 + $0x271] sm:$0xff] }
 0x2e1   :  { %14128 = vmatmul.msk.f32.gmra.mxu0 %vm39_vm0, %v6495_v50 }
 0x2e2   :  { %v6222_v44 = vadd.f32 %v5766_v17, %v4920_v52 }
 0x2e3   :  { %v4467_v53 = vpop.f32.mrf.mxu2  ;;  %v5769_v57 = vpop.f32.mrf.mxu3 }
 0x2e4   :  { %v16752_v39 = vadd.f32 %v7068_v1, %v6222_v44 }
 0x2e5   :  { %v3165_v19 = vpop.f32.mrf.mxu1 }
 0x2e6   :  { %v3619_v15 = vadd.f32 %v3165_v19, %v16485_v10  ;;  %v7074_v47 = vpop.f32.mrf.mxu0 }
 0x2e7   :  { %13738 = vmatmul.msk.f32.gmra.mxu1 %vm39_vm0, %v3889_v22  ;;  %v3893_v22 = vld [vmem:[#allocation2 + $0x290] sm:$0xff] }
 0x2e8   :  { %v4921_v63 = vadd.f32 %v4467_v53, %v3619_v15  ;;  %13869 = vmatmul.msk.f32.gmra.mxu2 %vm39_vm0, %v3892_v54  ;;  %13999 = vmatmul.msk.f32.gmra.mxu3 %vm39_vm0, %v6494_v18  ;;  %v6497_v18 = vld [vmem:[#allocation2 + $0x279] sm:$0xff] }
 0x2e9   :  { %14129 = vmatmul.msk.f32.gmra.mxu0 %vm39_vm0, %v6496_v16 }
 0x2ea   :  { %v6223_v62 = vadd.f32 %v5769_v57, %v4921_v63 }
 0x2eb   :  { %v4470_v12 = vpop.f32.mrf.mxu2  ;;  %v5772_v34 = vpop.f32.mrf.mxu3 }
 0x2ec   :  { %v16759_v1 = vadd.f32 %v7071_v32, %v6223_v62 }
 0x2ed   :  { %v3168_v26 = vpop.f32.mrf.mxu1 }
 0x2ee   :  { %v3620_v10 = vadd.f32 %v3168_v26, %v16498_v43  ;;  %v7077_v17 = vpop.f32.mrf.mxu0 }
 0x2ef   :  { %13739 = vmatmul.msk.f32.gmra.mxu1 %vm39_vm0, %v3890_v49  ;;  %v3894_v49 = vld [vmem:[#allocation2 + $0x2a0] sm:$0xff] }
 0x2f0   :  { %v4922_v4 = vadd.f32 %v4470_v12, %v3620_v10  ;;  %13870 = vmatmul.msk.f32.gmra.mxu2 %vm39_vm0, %v3893_v22  ;;  %14000 = vmatmul.msk.f32.gmra.mxu3 %vm39_vm0, %v6495_v50  ;;  %v6498_v50 = vld [vmem:[#allocation2 + $0x289] sm:$0xff] }
 0x2f1   :  { %14130 = vmatmul.msk.f32.gmra.mxu0 %vm39_vm0, %v6497_v18 }
 0x2f2   :  { %v6224_v23 = vadd.f32 %v5772_v34, %v4922_v4 }
 0x2f3   :  { %v4473_v52 = vpop.f32.mrf.mxu2  ;;  %v5775_v44 = vpop.f32.mrf.mxu3 }
 0x2f4   :  { %v16766_v32 = vadd.f32 %v7074_v47, %v6224_v23 }
 0x2f5   :  { %v3171_v53 = vpop.f32.mrf.mxu1 }
 0x2f6   :  { %v3621_v43 = vadd.f32 %v3171_v53, %v16511_v14  ;;  %v7080_v57 = vpop.f32.mrf.mxu0 }
 0x2f7   :  { %13740 = vmatmul.msk.f32.gmra.mxu1 %vm39_vm0, %v3891_v56  ;;  %v3895_v56 = vld [vmem:[#allocation2 + $0x2a8] sm:$0xff] }
 0x2f8   :  { %v4923_v19 = vadd.f32 %v4473_v52, %v3621_v43  ;;  %13871 = vmatmul.msk.f32.gmra.mxu2 %vm39_vm0, %v3894_v49  ;;  %14001 = vmatmul.msk.f32.gmra.mxu3 %vm39_vm0, %v6496_v16  ;;  %v6499_v16 = vld [vmem:[#allocation2 + $0x291] sm:$0xff] }
 0x2f9   :  { %14131 = vmatmul.msk.f32.gmra.mxu0 %vm39_vm0, %v6498_v50 }
 0x2fa   :  { %v6225_v15 = vadd.f32 %v5775_v44, %v4923_v19 }
 0x2fb   :  { %v4476_v63 = vpop.f32.mrf.mxu2  ;;  %v5778_v62 = vpop.f32.mrf.mxu3 }
 0x2fc   :  { %v16773_v47 = vadd.f32 %v7077_v17, %v6225_v15 }
 0x2fd   :  { %v3174_v12 = vpop.f32.mrf.mxu1 }
 0x2fe   :  { %v3622_v14 = vadd.f32 %v3174_v12, %v15857_v11  ;;  %v7083_v34 = vpop.f32.mrf.mxu0 }
 0x2ff   :  { %13741 = vmatmul.msk.f32.gmra.mxu1 %vm39_vm0, %v3892_v54  ;;  %v3896_v54 = vld [vmem:[#allocation2 + $0x2b8] sm:$0xff] }
 0x300   :  { %v4924_v26 = vadd.f32 %v4476_v63, %v3622_v14  ;;  %13872 = vmatmul.msk.f32.gmra.mxu2 %vm39_vm0, %v3895_v56  ;;  %14002 = vmatmul.msk.f32.gmra.mxu3 %vm39_vm0, %v6497_v18  ;;  %v6500_v18 = vld [vmem:[#allocation2 + $0x2a1] sm:$0xff] }
 0x301   :  { %14132 = vmatmul.msk.f32.gmra.mxu0 %vm39_vm0, %v6499_v16 }
 0x302   :  { %v6226_v10 = vadd.f32 %v5778_v62, %v4924_v26 }
 0x303   :  { %v4479_v4 = vpop.f32.mrf.mxu2  ;;  %v5781_v23 = vpop.f32.mrf.mxu3 }
 0x304   :  { %v16780_v17 = vadd.f32 %v7080_v57, %v6226_v10 }
 0x305   :  { %v3177_v52 = vpop.f32.mrf.mxu1 }
 0x306   :  { %v3623_v11 = vadd.f32 %v3177_v52, %v15892_v35  ;;  %v7086_v44 = vpop.f32.mrf.mxu0 }
 0x307   :  { %13742 = vmatmul.msk.f32.gmra.mxu1 %vm39_vm0, %v3893_v22  ;;  %v3897_v22 = vld [vmem:[#allocation2 + $0x2c0] sm:$0xff] }
 0x308   :  { %v4925_v53 = vadd.f32 %v4479_v4, %v3623_v11  ;;  %13873 = vmatmul.msk.f32.gmra.mxu2 %vm39_vm0, %v3896_v54  ;;  %14003 = vmatmul.msk.f32.gmra.mxu3 %vm39_vm0, %v6498_v50  ;;  %v6501_v50 = vld [vmem:[#allocation2 + $0x2a9] sm:$0xff] }
 0x309   :  { %14133 = vmatmul.msk.f32.gmra.mxu0 %vm39_vm0, %v6500_v18 }
 0x30a   :  { %v6227_v43 = vadd.f32 %v5781_v23, %v4925_v53 }
 0x30b   :  { %v4482_v19 = vpop.f32.mrf.mxu2  ;;  %v5784_v15 = vpop.f32.mrf.mxu3 }
 0x30c   :  { %v16787_v57 = vadd.f32 %v7083_v34, %v6227_v43 }
 0x30d   :  { %v3180_v63 = vpop.f32.mrf.mxu1 }
 0x30e   :  { %v3624_v35 = vadd.f32 %v3180_v63, %v15922_v7  ;;  %v7089_v62 = vpop.f32.mrf.mxu0 }
 0x30f   :  { %13743 = vmatmul.msk.f32.gmra.mxu1 %vm39_vm0, %v3894_v49  ;;  %v3898_v49 = vld [vmem:[#allocation2 + $0x2d0] sm:$0xff] }
 0x310   :  { %v4926_v12 = vadd.f32 %v4482_v19, %v3624_v35  ;;  %13874 = vmatmul.msk.f32.gmra.mxu2 %vm39_vm0, %v3897_v22  ;;  %14004 = vmatmul.msk.f32.gmra.mxu3 %vm39_vm0, %v6499_v16  ;;  %v6502_v16 = vld [vmem:[#allocation2 + $0x2b9] sm:$0xff] }
 0x311   :  { %14134 = vmatmul.msk.f32.gmra.mxu0 %vm39_vm0, %v6501_v50 }
 0x312   :  { %v6228_v14 = vadd.f32 %v5784_v15, %v4926_v12 }
 0x313   :  { %v4485_v26 = vpop.f32.mrf.mxu2  ;;  %v5787_v10 = vpop.f32.mrf.mxu3 }
 0x314   :  { %v16794_v34 = vadd.f32 %v7086_v44, %v6228_v14 }
 0x315   :  { %v3183_v4 = vpop.f32.mrf.mxu1 }
 0x316   :  { %v3625_v7 = vadd.f32 %v3183_v4, %v15951_v24  ;;  %v7092_v23 = vpop.f32.mrf.mxu0 }
 0x317   :  { %13744 = vmatmul.msk.f32.gmra.mxu1 %vm39_vm0, %v3895_v56  ;;  %v3899_v56 = vld [vmem:[#allocation2 + $0x2d8] sm:$0xff] }
 0x318   :  { %v4927_v52 = vadd.f32 %v4485_v26, %v3625_v7  ;;  %13875 = vmatmul.msk.f32.gmra.mxu2 %vm39_vm0, %v3898_v49  ;;  %14005 = vmatmul.msk.f32.gmra.mxu3 %vm39_vm0, %v6500_v18  ;;  %v6503_v18 = vld [vmem:[#allocation2 + $0x2c1] sm:$0xff] }
 0x319   :  { %14135 = vmatmul.msk.f32.gmra.mxu0 %vm39_vm0, %v6502_v16 }
 0x31a   :  { %v6229_v11 = vadd.f32 %v5787_v10, %v4927_v52 }
 0x31b   :  { %v4488_v53 = vpop.f32.mrf.mxu2  ;;  %v5790_v43 = vpop.f32.mrf.mxu3 }
 0x31c   :  { %v16801_v44 = vadd.f32 %v7089_v62, %v6229_v11 }
 0x31d   :  { %v3186_v19 = vpop.f32.mrf.mxu1 }
 0x31e   :  { %v3626_v24 = vadd.f32 %v3186_v19, %v15980_v3  ;;  %v7095_v15 = vpop.f32.mrf.mxu0 }
 0x31f   :  { %13745 = vmatmul.msk.f32.gmra.mxu1 %vm39_vm0, %v3896_v54  ;;  %v3900_v54 = vld [vmem:[#allocation2 + $0x2e8] sm:$0xff] }
 0x320   :  { %v4928_v63 = vadd.f32 %v4488_v53, %v3626_v24  ;;  %13876 = vmatmul.msk.f32.gmra.mxu2 %vm39_vm0, %v3899_v56  ;;  %14006 = vmatmul.msk.f32.gmra.mxu3 %vm39_vm0, %v6501_v50  ;;  %v6504_v50 = vld [vmem:[#allocation2 + $0x2d1] sm:$0xff] }
 0x321   :  { %14136 = vmatmul.msk.f32.gmra.mxu0 %vm39_vm0, %v6503_v18 }
 0x322   :  { %v6230_v35 = vadd.f32 %v5790_v43, %v4928_v63 }
 0x323   :  { %v4491_v12 = vpop.f32.mrf.mxu2  ;;  %v5793_v14 = vpop.f32.mrf.mxu3 }
 0x324   :  { %v16808_v62 = vadd.f32 %v7092_v23, %v6230_v35 }
 0x325   :  { %v3189_v26 = vpop.f32.mrf.mxu1 }
 0x326   :  { %v3627_v3 = vadd.f32 %v3189_v26, %v16007_v0  ;;  %v7098_v10 = vpop.f32.mrf.mxu0 }
 0x327   :  { %13746 = vmatmul.msk.f32.gmra.mxu1 %vm39_vm0, %v3897_v22  ;;  %v3901_v22 = vld [vmem:[#allocation2 + $0x2f0] sm:$0xff] }
 0x328   :  { %v4929_v4 = vadd.f32 %v4491_v12, %v3627_v3  ;;  %13877 = vmatmul.msk.f32.gmra.mxu2 %vm39_vm0, %v3900_v54  ;;  %14007 = vmatmul.msk.f32.gmra.mxu3 %vm39_vm0, %v6502_v16  ;;  %v6505_v16 = vld [vmem:[#allocation2 + $0x2d9] sm:$0xff] }
 0x329   :  { %14137 = vmatmul.msk.f32.gmra.mxu0 %vm39_vm0, %v6504_v50 }
 0x32a   :  { %v6231_v7 = vadd.f32 %v5793_v14, %v4929_v4 }
 0x32b   :  { %v4494_v52 = vpop.f32.mrf.mxu2  ;;  %v5796_v11 = vpop.f32.mrf.mxu3 }
 0x32c   :  { %v16815_v23 = vadd.f32 %v7095_v15, %v6231_v7 }
 0x32d   :  { %v3192_v53 = vpop.f32.mrf.mxu1 }
 0x32e   :  { %v3628_v0 = vadd.f32 %v3192_v53, %v16034_v28  ;;  %v7101_v43 = vpop.f32.mrf.mxu0 }
 0x32f   :  { %13747 = vmatmul.msk.f32.gmra.mxu1 %vm39_vm0, %v3898_v49  ;;  %v3902_v49 = vld [vmem:[#allocation2 + $0x300] sm:$0xff] }
 0x330   :  { %v4930_v19 = vadd.f32 %v4494_v52, %v3628_v0  ;;  %13878 = vmatmul.msk.f32.gmra.mxu2 %vm39_vm0, %v3901_v22  ;;  %14008 = vmatmul.msk.f32.gmra.mxu3 %vm39_vm0, %v6503_v18  ;;  %v6506_v18 = vld [vmem:[#allocation2 + $0x2e9] sm:$0xff] }
 0x331   :  { %14138 = vmatmul.msk.f32.gmra.mxu0 %vm39_vm0, %v6505_v16 }
 0x332   :  { %v6232_v24 = vadd.f32 %v5796_v11, %v4930_v19 }
 0x333   :  { %v4497_v63 = vpop.f32.mrf.mxu2  ;;  %v5799_v35 = vpop.f32.mrf.mxu3 }
 0x334   :  { %v16822_v15 = vadd.f32 %v7098_v10, %v6232_v24 }
 0x335   :  { %v3195_v12 = vpop.f32.mrf.mxu1 }
 0x336   :  { %v3629_v28 = vadd.f32 %v3195_v12, %v16058_v55  ;;  %v7104_v14 = vpop.f32.mrf.mxu0  ;;  %v18691_v55 = vld [vmem:[#allocation25_spill] sm:$0xff] }
 0x337   :  { %13748 = vmatmul.msk.f32.gmra.mxu1 %vm39_vm0, %v3899_v56  ;;  %v3903_v56 = vld [vmem:[#allocation2 + $0x308] sm:$0xff] }
 0x338   :  { %v4931_v26 = vadd.f32 %v4497_v63, %v3629_v28  ;;  %13879 = vmatmul.msk.f32.gmra.mxu2 %vm39_vm0, %v3902_v49  ;;  %14009 = vmatmul.msk.f32.gmra.mxu3 %vm39_vm0, %v6504_v50  ;;  %v1385_v11 = vpop.permute.xlu1 %1384  ;;  %v6507_v50 = vld [vmem:[#allocation2 + $0x2f1] sm:$0xff] }
 0x339   :  { %14139 = vmatmul.msk.f32.gmra.mxu0 %vm39_vm0, %v6506_v18  ;;  %1411 = vst.msk [vmem:[#allocation2 + $0x698] sm:$0xff] %vm39_vm0, %v1385_v11 }
 0x33a   :  { %v6233_v3 = vadd.f32 %v5799_v35, %v4931_v26  ;;  %v18692_v26 = vld [vmem:[#allocation28_spill] sm:$0xff] }
 0x33b   :  { %v4500_v4 = vpop.f32.mrf.mxu2  ;;  %v5802_v7 = vpop.f32.mrf.mxu3 }
 0x33c   :  { %v16829_v10 = vadd.f32 %v7101_v43, %v6233_v3 }
 0x33d   :  { %v3198_v52 = vpop.f32.mrf.mxu1 }
 0x33e   :  { %v3630_v53 = vadd.f32 %v3198_v52, %v18691_v55  ;;  %v7107_v0 = vpop.f32.mrf.mxu0 }
 0x33f   :  { %13749 = vmatmul.msk.f32.gmra.mxu1 %vm39_vm0, %v3900_v54  ;;  %v3904_v54 = vld [vmem:[#allocation2 + $0x318] sm:$0xff] }
 0x340   :  { %v4932_v19 = vadd.f32 %v4500_v4, %v3630_v53  ;;  %13880 = vmatmul.msk.f32.gmra.mxu2 %vm39_vm0, %v3903_v56  ;;  %14010 = vmatmul.msk.f32.gmra.mxu3 %vm39_vm0, %v6505_v16  ;;  %v1470_v28 = vpop.permute.xlu1 %1469  ;;  %v6508_v16 = vld [vmem:[#allocation2 + $0x301] sm:$0xff] }
 0x341   :  { %14140 = vmatmul.msk.f32.gmra.mxu0 %vm39_vm0, %v6507_v50  ;;  %1496 = vst.msk [vmem:[#allocation2 + $0x6b0] sm:$0xff] %vm39_vm0, %v1470_v28 }
 0x342   :  { %v6234_v43 = vadd.f32 %v5802_v7, %v4932_v19 }
 0x343   :  { %v4503_v24 = vpop.f32.mrf.mxu2  ;;  %v5805_v63 = vpop.f32.mrf.mxu3 }
 0x344   :  { %v16837_v35 = vadd.f32 %v7104_v14, %v6234_v43  ;;  %v18693_v43 = vld [vmem:[#allocation31_spill] sm:$0xff] }
 0x345   :  { %v3201_v12 = vpop.f32.mrf.mxu1 }
 0x346   :  { %v3631_v3 = vadd.f32 %v3201_v12, %v18692_v26  ;;  %v7110_v52 = vpop.f32.mrf.mxu0 }
 0x347   :  { %13750 = vmatmul.msk.f32.gmra.mxu1 %vm39_vm0, %v3901_v22  ;;  %v3905_v22 = vld [vmem:[#allocation2 + $0x320] sm:$0xff] }
 0x348   :  { %v4933_v4 = vadd.f32 %v4503_v24, %v3631_v3  ;;  %13881 = vmatmul.msk.f32.gmra.mxu2 %vm39_vm0, %v3904_v54  ;;  %14011 = vmatmul.msk.f32.gmra.mxu3 %vm39_vm0, %v6506_v18  ;;  %v1460_v19 = vpop.permute.xlu1 %1459  ;;  %v6509_v18 = vld [vmem:[#allocation2 + $0x309] sm:$0xff] }
 0x349   :  { %14141 = vmatmul.msk.f32.gmra.mxu0 %vm39_vm0, %v6508_v16  ;;  %1491 = vst.msk [vmem:[#allocation2 + $0x358] sm:$0x3] %vm42_vm2, %v1460_v19 }
 0x34a   :  { %v6235_v14 = vadd.f32 %v5805_v63, %v4933_v4 }
 0x34b   :  { %v4506_v7 = vpop.f32.mrf.mxu2  ;;  %v5808_v11 = vpop.f32.mrf.mxu3 }
 0x34c   :  { %v16845_v55 = vadd.f32 %v7107_v0, %v6235_v14  ;;  %v3906_v14 = vld [vmem:[#allocation2 + $0x330] sm:$0xff] }
 0x34d   :  { %v3204_v53 = vpop.f32.mrf.mxu1 }
 0x34e   :  { %v3632_v12 = vadd.f32 %v3204_v53, %v18693_v43  ;;  %v7113_v28 = vpop.f32.mrf.mxu0  ;;  %v18695_v53 = vld [vmem:[#allocation34_spill] sm:$0xff] }
 0x34f   :  { %13751 = vmatmul.msk.f32.gmra.mxu1 %vm39_vm0, %v3902_v49  ;;  %v23_v49 = vld [vmem:[%s18599_s0 + $0x20] sm:$0x1] }
 0x350   :  { %v4934_v24 = vadd.f32 %v4506_v7, %v3632_v12  ;;  %13882 = vmatmul.msk.f32.gmra.mxu2 %vm39_vm0, %v3905_v22  ;;  %14012 = vmatmul.msk.f32.gmra.mxu3 %vm39_vm0, %v6507_v50  ;;  %v6510_v7 = vld [vmem:[#allocation2 + $0x319] sm:$0xff] }
 0x351   :  { %14142 = vmatmul.msk.f32.gmra.mxu0 %vm39_vm0, %v6509_v18 }
 0x352   :  { %v6236_v0 = vadd.f32 %v5808_v11, %v4934_v24  ;;  %v35_v11 = vunpack.c.l.bf16 %v23_v49 }
 0x353   :  { %v4509_v63 = vpop.f32.mrf.mxu2  ;;  %v5811_v26 = vpop.f32.mrf.mxu3 }
 0x354   :  { %v16853_v3 = vadd.f32 %v7110_v52, %v6236_v0  ;;  %49 = vst.msk [vmem:[#allocation2 + $0x370] sm:$0x3] %vm42_vm2, %v35_v11 }
 0x355   :  { %v3207_v4 = vpop.f32.mrf.mxu1 }
 0x356   :  { %18694 = vst [vmem:[#allocation25_spill] sm:$0xff] %v16853_v3  ;;  %v3633_v19 = vadd.f32 %v3207_v4, %v18695_v53  ;;  %v7116_v43 = vpop.f32.mrf.mxu0  ;;  %v3907_v4 = vld [vmem:[#allocation2 + $0x338] sm:$0xff] }
 0x357   :  { %13752 = vmatmul.msk.f32.gmra.mxu1 %vm39_vm0, %v3903_v56  ;;  %v18697_v53 = vld [vmem:[#allocation37_spill] sm:$0xff] }
 0x358   :  { %v4935_v50 = vadd.f32 %v4509_v63, %v3633_v19  ;;  %13883 = vmatmul.msk.f32.gmra.mxu2 %vm39_vm0, %v3906_v14  ;;  %14013 = vmatmul.msk.f32.gmra.mxu3 %vm39_vm0, %v6508_v16  ;;  %v6511_v16 = vld [vmem:[#allocation2 + $0x321] sm:$0xff] }
 0x359   :  { %14143 = vmatmul.msk.f32.gmra.mxu0 %vm39_vm0, %v6510_v7 }
 0x35a   :  { %v6237_v52 = vadd.f32 %v5811_v26, %v4935_v50 }
 0x35b   :  { %v4512_v12 = vpop.f32.mrf.mxu2  ;;  %v5814_v24 = vpop.f32.mrf.mxu3 }
 0x35c   :  { %v16864_v0 = vadd.f32 %v7113_v28, %v6237_v52  ;;  %v3908_v52 = vld [vmem:[#allocation2 + $0x348] sm:$0xff] }
 0x35d   :  { %v3210_v56 = vpop.f32.mrf.mxu1 }
 0x35e   :  { %18696 = vst [vmem:[#allocation28_spill] sm:$0xff] %v16864_v0  ;;  %v3634_v3 = vadd.f32 %v3210_v56, %v18697_v53  ;;  %v7119_v63 = vpop.f32.mrf.mxu0  ;;  %v18699_v0 = vld [vmem:[#allocation40_spill] sm:$0xff] }
 0x35f   :  { %13753 = vmatmul.msk.f32.gmra.mxu1 %vm39_vm0, %v3904_v54 }
 0x360   :  { %v4936_v19 = vadd.f32 %v4512_v12, %v3634_v3  ;;  %13884 = vmatmul.msk.f32.gmra.mxu2 %vm39_vm0, %v3907_v4  ;;  %14014 = vmatmul.msk.f32.gmra.mxu3 %vm39_vm0, %v6509_v18  ;;  %v6512_v18 = vld [vmem:[#allocation2 + $0x331] sm:$0xff] }
 0x361   :  { %14144 = vmatmul.msk.f32.gmra.mxu0 %vm39_vm0, %v6511_v16 }
 0x362   :  { %v6238_v26 = vadd.f32 %v5814_v24, %v4936_v19 }
 0x363   :  { %v4515_v49 = vpop.f32.mrf.mxu2  ;;  %v5817_v50 = vpop.f32.mrf.mxu3 }
 0x364   :  { %v16871_v28 = vadd.f32 %v7116_v43, %v6238_v26  ;;  %v3909_v26 = vld [vmem:[#allocation2 + $0x350] sm:$0xff] }
 0x365   :  { %v3213_v11 = vpop.f32.mrf.mxu1 }
 0x366   :  { %18698 = vst [vmem:[#allocation31_spill] sm:$0xff] %v16871_v28  ;;  %v3635_v56 = vadd.f32 %v3213_v11, %v18699_v0  ;;  %v7122_v53 = vpop.f32.mrf.mxu0  ;;  %v18701_v28 = vld [vmem:[#allocation43_spill] sm:$0xff] }
 0x367   :  { %13754 = vmatmul.msk.f32.gmra.mxu1 %vm39_vm0, %v3905_v22 }
 0x368   :  { %v4937_v54 = vadd.f32 %v4515_v49, %v3635_v56  ;;  %13885 = vmatmul.msk.f32.gmra.mxu2 %vm39_vm0, %v3908_v52  ;;  %14015 = vmatmul.msk.f32.gmra.mxu3 %vm39_vm0, %v6510_v7  ;;  %v6513_v7 = vld [vmem:[#allocation2 + $0x339] sm:$0xff] }
 0x369   :  { %14145 = vmatmul.msk.f32.gmra.mxu0 %vm39_vm0, %v6512_v18  ;;  %v18703_v18 = vld [vmem:[#allocation46_spill] sm:$0xff] }
 0x36a   :  { %v6239_v3 = vadd.f32 %v5817_v50, %v4937_v54  ;;  %v5212_v54 = vld [vmem:[#allocation2 + $0x361] sm:$0xff] }
 0x36b   :  { %v4518_v12 = vpop.f32.mrf.mxu2  ;;  %v5820_v24 = vpop.f32.mrf.mxu3 }
 0x36c   :  { %v16878_v43 = vadd.f32 %v7119_v63, %v6239_v3 }
 0x36d   :  { %v3216_v19 = vpop.f32.mrf.mxu1 }
 0x36e   :  { %18700 = vst [vmem:[#allocation34_spill] sm:$0xff] %v16878_v43  ;;  %v3636_v0 = vadd.f32 %v3216_v19, %v18701_v28  ;;  %v7125_v11 = vpop.f32.mrf.mxu0 }
 0x36f   :  { %13755 = vmatmul.msk.f32.gmra.mxu1 %vm39_vm0, %v3906_v14  ;;  %v3910_v14 = vld [vmem:[#allocation2 + $0x390] sm:$0xff] }
 0x370   :  { %v4938_v22 = vadd.f32 %v4518_v12, %v3636_v0  ;;  %13886 = vmatmul.msk.f32.gmra.mxu2 %vm39_vm0, %v3909_v26  ;;  %14016 = vmatmul.msk.f32.gmra.mxu3 %vm39_vm0, %v6511_v16  ;;  %v6514_v16 = vld [vmem:[#allocation2 + $0x379] sm:$0xff] }
 0x371   :  { %14146 = vmatmul.msk.f32.gmra.mxu0 %vm39_vm0, %v6513_v7  ;;  %v18705_v7 = vld [vmem:[#allocation49_spill] sm:$0xff] }
 0x372   :  { %v6240_v49 = vadd.f32 %v5820_v24, %v4938_v22  ;;  %v5213_v22 = vld [vmem:[#allocation2 + $0x369] sm:$0xff] }
 0x373   :  { %v4521_v50 = vpop.f32.mrf.mxu2  ;;  %v5823_v52 = vpop.f32.mrf.mxu3 }
 0x374   :  { %v16885_v63 = vadd.f32 %v7122_v53, %v6240_v49 }
 0x375   :  { %v3219_v56 = vpop.f32.mrf.mxu1 }
 0x376   :  { %18702 = vst [vmem:[#allocation37_spill] sm:$0xff] %v16885_v63  ;;  %v3637_v28 = vadd.f32 %v3219_v56, %v18703_v18  ;;  %v7128_v3 = vpop.f32.mrf.mxu0  ;;  %v2609_v63 = vld [vmem:[#allocation2 + $0x380] sm:$0xff] }
 0x377   :  { %13756 = vmatmul.msk.f32.gmra.mxu1 %vm39_vm0, %v3907_v4  ;;  %v2608_v4 = vld [vmem:[#allocation2 + $0x378] sm:$0xff] }
 0x378   :  { %v4939_v12 = vadd.f32 %v4521_v50, %v3637_v28  ;;  %13887 = vmatmul.msk.f32.gmra.mxu2 %vm39_vm0, %v3910_v14  ;;  %14017 = vmatmul.msk.f32.gmra.mxu3 %vm39_vm0, %v5212_v54  ;;  %v3911_v50 = vld [vmem:[#allocation2 + $0x398] sm:$0xff]  ;;  %v6515_v54 = vld [vmem:[#allocation2 + $0x381] sm:$0xff] }
 0x379   :  { %14147 = vmatmul.msk.f32.gmra.mxu0 %vm39_vm0, %v6514_v16 }
 0x37a   :  { %v6241_v24 = vadd.f32 %v5823_v52, %v4939_v12 }
 0x37b   :  { %v4524_v19 = vpop.f32.mrf.mxu2  ;;  %v5826_v53 = vpop.f32.mrf.mxu3 }
 0x37c   :  { %v16892_v26 = vadd.f32 %v7125_v11, %v6241_v24 }
 0x37d   :  { %v3222_v0 = vpop.f32.mrf.mxu1 }
 0x37e   :  { %18704 = vst [vmem:[#allocation40_spill] sm:$0xff] %v16892_v26  ;;  %v3638_v49 = vadd.f32 %v3222_v0, %v18705_v7  ;;  %v7131_v56 = vpop.f32.mrf.mxu0  ;;  %v18707_v0 = vld [vmem:[#allocation52_spill] sm:$0xff] }
 0x37f   :  { %13757 = vmatmul.msk.f32.gmra.mxu1 %vm39_vm0, %v2608_v4 }
 0x380   :  { %v4940_v18 = vadd.f32 %v4524_v19, %v3638_v49  ;;  %13888 = vmatmul.msk.f32.gmra.mxu2 %vm39_vm0, %v3911_v50  ;;  %14018 = vmatmul.msk.f32.gmra.mxu3 %vm39_vm0, %v5213_v22  ;;  %v3912_v19 = vld [vmem:[#allocation2 + $0x3a8] sm:$0xff]  ;;  %v6516_v22 = vld [vmem:[#allocation2 + $0x391] sm:$0xff] }
 0x381   :  { %14148 = vmatmul.msk.f32.gmra.mxu0 %vm39_vm0, %v6515_v54 }
 0x382   :  { %v6242_v52 = vadd.f32 %v5826_v53, %v4940_v18 }
 0x383   :  { %v4527_v11 = vpop.f32.mrf.mxu2  ;;  %v5829_v28 = vpop.f32.mrf.mxu3 }
 0x384   :  { %v16899_v12 = vadd.f32 %v7128_v3, %v6242_v52 }
 0x385   :  { %v3225_v24 = vpop.f32.mrf.mxu1 }
 0x386   :  { %18706 = vst [vmem:[#allocation43_spill] sm:$0xff] %v16899_v12  ;;  %v3639_v7 = vadd.f32 %v3225_v24, %v18707_v0  ;;  %v7134_v26 = vpop.f32.mrf.mxu0  ;;  %v18709_v24 = vld [vmem:[#allocation55_spill] sm:$0xff] }
 0x387   :  { %13758 = vmatmul.msk.f32.gmra.mxu1 %vm39_vm0, %v2609_v63  ;;  %v3913_v63 = vld [vmem:[#allocation2 + $0x3b0] sm:$0xff] }
 0x388   :  { %v4941_v49 = vadd.f32 %v4527_v11, %v3639_v7  ;;  %13889 = vmatmul.msk.f32.gmra.mxu2 %vm39_vm0, %v3912_v19  ;;  %14019 = vmatmul.msk.f32.gmra.mxu3 %vm39_vm0, %v6514_v16  ;;  %v6517_v16 = vld [vmem:[#allocation2 + $0x399] sm:$0xff] }
 0x389   :  { %14149 = vmatmul.msk.f32.gmra.mxu0 %vm39_vm0, %v6516_v22 }
 0x38a   :  { %v6243_v53 = vadd.f32 %v5829_v28, %v4941_v49 }
 0x38b   :  { %v4530_v4 = vpop.f32.mrf.mxu2  ;;  %v5832_v3 = vpop.f32.mrf.mxu3 }
 0x38c   :  { %v16906_v18 = vadd.f32 %v7131_v56, %v6243_v53 }
 0x38d   :  { %v3228_v52 = vpop.f32.mrf.mxu1 }
 0x38e   :  { %18708 = vst [vmem:[#allocation46_spill] sm:$0xff] %v16906_v18  ;;  %v3640_v0 = vadd.f32 %v3228_v52, %v18709_v24  ;;  %v7137_v12 = vpop.f32.mrf.mxu0  ;;  %v18711_v18 = vld [vmem:[#allocation58_spill] sm:$0xff] }
 0x38f   :  { %13759 = vmatmul.msk.f32.gmra.mxu1 %vm39_vm0, %v3910_v14  ;;  %v3914_v14 = vld [vmem:[#allocation2 + $0x3c0] sm:$0xff] }
 0x390   :  { %v4942_v11 = vadd.f32 %v4530_v4, %v3640_v0  ;;  %13890 = vmatmul.msk.f32.gmra.mxu2 %vm39_vm0, %v3913_v63  ;;  %14020 = vmatmul.msk.f32.gmra.mxu3 %vm39_vm0, %v6515_v54  ;;  %v6518_v54 = vld [vmem:[#allocation2 + $0x3a9] sm:$0xff] }
 0x391   :  { %14150 = vmatmul.msk.f32.gmra.mxu0 %vm39_vm0, %v6517_v16 }
 0x392   :  { %v6244_v28 = vadd.f32 %v5832_v3, %v4942_v11 }
 0x393   :  { %v4533_v7 = vpop.f32.mrf.mxu2  ;;  %v5835_v49 = vpop.f32.mrf.mxu3 }
 0x394   :  { %v16913_v56 = vadd.f32 %v7134_v26, %v6244_v28 }
 0x395   :  { %v3231_v53 = vpop.f32.mrf.mxu1 }
 0x396   :  { %18710 = vst [vmem:[#allocation49_spill] sm:$0xff] %v16913_v56  ;;  %v3641_v52 = vadd.f32 %v3231_v53, %v18711_v18  ;;  %v7140_v24 = vpop.f32.mrf.mxu0  ;;  %v18713_v56 = vld [vmem:[#allocation61_spill] sm:$0xff] }
 0x397   :  { %13760 = vmatmul.msk.f32.gmra.mxu1 %vm39_vm0, %v3911_v50  ;;  %v3915_v50 = vld [vmem:[#allocation2 + $0x3c8] sm:$0xff] }
 0x398   :  { %v4943_v4 = vadd.f32 %v4533_v7, %v3641_v52  ;;  %13891 = vmatmul.msk.f32.gmra.mxu2 %vm39_vm0, %v3914_v14  ;;  %14021 = vmatmul.msk.f32.gmra.mxu3 %vm39_vm0, %v6516_v22  ;;  %v6519_v22 = vld [vmem:[#allocation2 + $0x3b1] sm:$0xff] }
 0x399   :  { %14151 = vmatmul.msk.f32.gmra.mxu0 %vm39_vm0, %v6518_v54 }
 0x39a   :  { %v6245_v3 = vadd.f32 %v5835_v49, %v4943_v4 }
 0x39b   :  { %v4536_v0 = vpop.f32.mrf.mxu2  ;;  %v5838_v11 = vpop.f32.mrf.mxu3 }
 0x39c   :  { %v16920_v26 = vadd.f32 %v7137_v12, %v6245_v3 }
 0x39d   :  { %v3234_v28 = vpop.f32.mrf.mxu1 }
 0x39e   :  { %18712 = vst [vmem:[#allocation52_spill] sm:$0xff] %v16920_v26  ;;  %v3642_v18 = vadd.f32 %v3234_v28, %v18713_v56  ;;  %v7143_v53 = vpop.f32.mrf.mxu0  ;;  %v18715_v26 = vld [vmem:[#allocation64_spill] sm:$0xff] }
 0x39f   :  { %13761 = vmatmul.msk.f32.gmra.mxu1 %vm39_vm0, %v3912_v19  ;;  %v3916_v19 = vld [vmem:[#allocation2 + $0x3d8] sm:$0xff] }
 0x3a0   :  { %v4944_v7 = vadd.f32 %v4536_v0, %v3642_v18  ;;  %13892 = vmatmul.msk.f32.gmra.mxu2 %vm39_vm0, %v3915_v50  ;;  %14022 = vmatmul.msk.f32.gmra.mxu3 %vm39_vm0, %v6517_v16  ;;  %v6520_v16 = vld [vmem:[#allocation2 + $0x3c1] sm:$0xff] }
 0x3a1   :  { %14152 = vmatmul.msk.f32.gmra.mxu0 %vm39_vm0, %v6519_v22 }
 0x3a2   :  { %v6246_v49 = vadd.f32 %v5838_v11, %v4944_v7 }
 0x3a3   :  { %v4539_v52 = vpop.f32.mrf.mxu2  ;;  %v5841_v4 = vpop.f32.mrf.mxu3 }
 0x3a4   :  { %v16927_v12 = vadd.f32 %v7140_v24, %v6246_v49 }
 0x3a5   :  { %v3237_v3 = vpop.f32.mrf.mxu1 }
 0x3a6   :  { %18714 = vst [vmem:[#allocation55_spill] sm:$0xff] %v16927_v12  ;;  %v3643_v56 = vadd.f32 %v3237_v3, %v18715_v26  ;;  %v7146_v28 = vpop.f32.mrf.mxu0  ;;  %v18717_v12 = vld [vmem:[#allocation67_spill] sm:$0xff] }
 0x3a7   :  { %13762 = vmatmul.msk.f32.gmra.mxu1 %vm39_vm0, %v3913_v63  ;;  %v3917_v63 = vld [vmem:[#allocation2 + $0x3e0] sm:$0xff] }
 0x3a8   :  { %v4945_v0 = vadd.f32 %v4539_v52, %v3643_v56  ;;  %13893 = vmatmul.msk.f32.gmra.mxu2 %vm39_vm0, %v3916_v19  ;;  %14023 = vmatmul.msk.f32.gmra.mxu3 %vm39_vm0, %v6518_v54  ;;  %v6521_v54 = vld [vmem:[#allocation2 + $0x3c9] sm:$0xff] }
 0x3a9   :  { %14153 = vmatmul.msk.f32.gmra.mxu0 %vm39_vm0, %v6520_v16 }
 0x3aa   :  { %v6247_v11 = vadd.f32 %v5841_v4, %v4945_v0 }
 0x3ab   :  { %v4542_v18 = vpop.f32.mrf.mxu2  ;;  %v5844_v7 = vpop.f32.mrf.mxu3 }
 0x3ac   :  { %v16934_v24 = vadd.f32 %v7143_v53, %v6247_v11 }
 0x3ad   :  { %v3240_v49 = vpop.f32.mrf.mxu1 }
 0x3ae   :  { %18716 = vst [vmem:[#allocation58_spill] sm:$0xff] %v16934_v24  ;;  %v3644_v26 = vadd.f32 %v3240_v49, %v18717_v12  ;;  %v7149_v3 = vpop.f32.mrf.mxu0  ;;  %v18719_v24 = vld [vmem:[#allocation70_spill] sm:$0xff] }
 0x3af   :  { %13763 = vmatmul.msk.f32.gmra.mxu1 %vm39_vm0, %v3914_v14  ;;  %v3918_v14 = vld [vmem:[#allocation2 + $0x3f0] sm:$0xff] }
 0x3b0   :  { %v4946_v52 = vadd.f32 %v4542_v18, %v3644_v26  ;;  %13894 = vmatmul.msk.f32.gmra.mxu2 %vm39_vm0, %v3917_v63  ;;  %14024 = vmatmul.msk.f32.gmra.mxu3 %vm39_vm0, %v6519_v22  ;;  %v6522_v22 = vld [vmem:[#allocation2 + $0x3d9] sm:$0xff] }
 0x3b1   :  { %14154 = vmatmul.msk.f32.gmra.mxu0 %vm39_vm0, %v6521_v54 }
 0x3b2   :  { %v6248_v4 = vadd.f32 %v5844_v7, %v4946_v52 }
 0x3b3   :  { %v4545_v56 = vpop.f32.mrf.mxu2  ;;  %v5847_v0 = vpop.f32.mrf.mxu3 }
 0x3b4   :  { %v16941_v53 = vadd.f32 %v7146_v28, %v6248_v4 }
 0x3b5   :  { %v3243_v11 = vpop.f32.mrf.mxu1 }
 0x3b6   :  { %18718 = vst [vmem:[#allocation61_spill] sm:$0xff] %v16941_v53  ;;  %v3645_v12 = vadd.f32 %v3243_v11, %v18719_v24  ;;  %v7152_v49 = vpop.f32.mrf.mxu0  ;;  %v18721_v53 = vld [vmem:[#allocation73_spill] sm:$0xff] }
 0x3b7   :  { %13764 = vmatmul.msk.f32.gmra.mxu1 %vm39_vm0, %v3915_v50  ;;  %v3919_v50 = vld [vmem:[#allocation2 + $0x3f8] sm:$0xff] }
 0x3b8   :  { %v4947_v18 = vadd.f32 %v4545_v56, %v3645_v12  ;;  %13895 = vmatmul.msk.f32.gmra.mxu2 %vm39_vm0, %v3918_v14  ;;  %14025 = vmatmul.msk.f32.gmra.mxu3 %vm39_vm0, %v6520_v16  ;;  %v6523_v16 = vld [vmem:[#allocation2 + $0x3e1] sm:$0xff] }
 0x3b9   :  { %14155 = vmatmul.msk.f32.gmra.mxu0 %vm39_vm0, %v6522_v22 }
 0x3ba   :  { %v6249_v7 = vadd.f32 %v5847_v0, %v4947_v18 }
 0x3bb   :  { %v4548_v26 = vpop.f32.mrf.mxu2  ;;  %v5850_v52 = vpop.f32.mrf.mxu3 }
 0x3bc   :  { %v16948_v28 = vadd.f32 %v7149_v3, %v6249_v7 }
 0x3bd   :  { %v3246_v4 = vpop.f32.mrf.mxu1 }
 0x3be   :  { %18720 = vst [vmem:[#allocation64_spill] sm:$0xff] %v16948_v28  ;;  %v3646_v24 = vadd.f32 %v3246_v4, %v18721_v53  ;;  %v7155_v11 = vpop.f32.mrf.mxu0  ;;  %v18723_v28 = vld [vmem:[#allocation76_spill] sm:$0xff] }
 0x3bf   :  { %13765 = vmatmul.msk.f32.gmra.mxu1 %vm39_vm0, %v3916_v19  ;;  %v3920_v19 = vld [vmem:[#allocation2 + $0x408] sm:$0xff] }
 0x3c0   :  { %v4948_v56 = vadd.f32 %v4548_v26, %v3646_v24  ;;  %13896 = vmatmul.msk.f32.gmra.mxu2 %vm39_vm0, %v3919_v50  ;;  %14026 = vmatmul.msk.f32.gmra.mxu3 %vm39_vm0, %v6521_v54  ;;  %v6524_v54 = vld [vmem:[#allocation2 + $0x3f1] sm:$0xff] }
 0x3c1   :  { %14156 = vmatmul.msk.f32.gmra.mxu0 %vm39_vm0, %v6523_v16 }
 0x3c2   :  { %v6250_v0 = vadd.f32 %v5850_v52, %v4948_v56 }
 0x3c3   :  { %v4551_v12 = vpop.f32.mrf.mxu2  ;;  %v5853_v18 = vpop.f32.mrf.mxu3 }
 0x3c4   :  { %v16955_v3 = vadd.f32 %v7152_v49, %v6250_v0 }
 0x3c5   :  { %v3249_v7 = vpop.f32.mrf.mxu1 }
 0x3c6   :  { %18722 = vst [vmem:[#allocation67_spill] sm:$0xff] %v16955_v3  ;;  %v3647_v53 = vadd.f32 %v3249_v7, %v18723_v28  ;;  %v7158_v4 = vpop.f32.mrf.mxu0  ;;  %v18725_v3 = vld [vmem:[#allocation79_spill] sm:$0xff] }
 0x3c7   :  { %13766 = vmatmul.msk.f32.gmra.mxu1 %vm39_vm0, %v3917_v63  ;;  %v3921_v63 = vld [vmem:[#allocation2 + $0x410] sm:$0xff] }
 0x3c8   :  { %v4949_v26 = vadd.f32 %v4551_v12, %v3647_v53  ;;  %13897 = vmatmul.msk.f32.gmra.mxu2 %vm39_vm0, %v3920_v19  ;;  %14027 = vmatmul.msk.f32.gmra.mxu3 %vm39_vm0, %v6522_v22  ;;  %v6525_v22 = vld [vmem:[#allocation2 + $0x3f9] sm:$0xff] }
 0x3c9   :  { %14157 = vmatmul.msk.f32.gmra.mxu0 %vm39_vm0, %v6524_v54 }
 0x3ca   :  { %v6251_v52 = vadd.f32 %v5853_v18, %v4949_v26 }
 0x3cb   :  { %v4554_v24 = vpop.f32.mrf.mxu2  ;;  %v5856_v56 = vpop.f32.mrf.mxu3 }
 0x3cc   :  { %v16962_v49 = vadd.f32 %v7155_v11, %v6251_v52 }
 0x3cd   :  { %v3252_v0 = vpop.f32.mrf.mxu1 }
 0x3ce   :  { %18724 = vst [vmem:[#allocation70_spill] sm:$0xff] %v16962_v49  ;;  %v3648_v28 = vadd.f32 %v3252_v0, %v18725_v3  ;;  %v7161_v7 = vpop.f32.mrf.mxu0  ;;  %v18727_v49 = vld [vmem:[#allocation82_spill] sm:$0xff] }
 0x3cf   :  { %13767 = vmatmul.msk.f32.gmra.mxu1 %vm39_vm0, %v3918_v14  ;;  %v3922_v14 = vld [vmem:[#allocation2 + $0x420] sm:$0xff] }
 0x3d0   :  { %v4950_v12 = vadd.f32 %v4554_v24, %v3648_v28  ;;  %13898 = vmatmul.msk.f32.gmra.mxu2 %vm39_vm0, %v3921_v63  ;;  %14028 = vmatmul.msk.f32.gmra.mxu3 %vm39_vm0, %v6523_v16  ;;  %v6526_v16 = vld [vmem:[#allocation2 + $0x409] sm:$0xff] }
 0x3d1   :  { %14158 = vmatmul.msk.f32.gmra.mxu0 %vm39_vm0, %v6525_v22 }
 0x3d2   :  { %v6252_v18 = vadd.f32 %v5856_v56, %v4950_v12  ;;  %v1337_v56 = vld [vmem:[%s18599_s0 + $0x24] sm:$0xf] }
 0x3d3   :  { %v4557_v53 = vpop.f32.mrf.mxu2  ;;  %v5859_v26 = vpop.f32.mrf.mxu3 }
 0x3d4   :  { %v16969_v11 = vadd.f32 %v7158_v4, %v6252_v18  ;;  %v1349_v4 = vunpack.c.l.bf16 %v1337_v56  ;;  %v6527_v56 = vld [vmem:[#allocation2 + $0x411] sm:$0xff] }
 0x3d5   :  { %v3255_v52 = vpop.f32.mrf.mxu1 }
 0x3d6   :  { %18726 = vst [vmem:[#allocation73_spill] sm:$0xff] %v16969_v11  ;;  %v3649_v3 = vadd.f32 %v3255_v52, %v18727_v49  ;;  %v7164_v0 = vpop.f32.mrf.mxu0  ;;  %1382 = vrot.lane.b32.xlu2 %v1349_v4, %s15253_s5 }
 0x3d7   :  { %13768 = vmatmul.msk.f32.gmra.mxu1 %vm39_vm0, %v3919_v50 }
 0x3d8   :  { %v4951_v24 = vadd.f32 %v4557_v53, %v3649_v3  ;;  %13899 = vmatmul.msk.f32.gmra.mxu2 %vm39_vm0, %v3922_v14  ;;  %14029 = vmatmul.msk.f32.gmra.mxu3 %vm39_vm0, %v6524_v54  ;;  %v18729_v53 = vld [vmem:[#allocation85_spill] sm:$0xff]  ;;  %v3923_v54 = vld [vmem:[#allocation2 + $0x428] sm:$0xff] }
 0x3d9   :  { %14159 = vmatmul.msk.f32.gmra.mxu0 %vm39_vm0, %v6526_v16 }
 0x3da   :  { %v6253_v28 = vadd.f32 %v5859_v26, %v4951_v24  ;;  %v1422_v26 = vld [vmem:[%s18599_s0 + $0x24] sm:$0xf] }
 0x3db   :  { %v4560_v12 = vpop.f32.mrf.mxu2  ;;  %v5862_v49 = vpop.f32.mrf.mxu3 }
 0x3dc   :  { %v16980_v50 = vadd.f32 %v7161_v7, %v6253_v28  ;;  %v1434_v7 = vunpack.c.l.bf16 %v1422_v26  ;;  %v6528_v26 = vld [vmem:[#allocation2 + $0x421] sm:$0xff] }
 0x3dd   :  { %v3258_v18 = vpop.f32.mrf.mxu1 }
 0x3de   :  { %18728 = vst [vmem:[#allocation76_spill] sm:$0xff] %v16980_v50  ;;  %v3650_v52 = vadd.f32 %v3258_v18, %v18729_v53  ;;  %v7167_v3 = vpop.f32.mrf.mxu0  ;;  %1467 = vrot.lane.b32.xlu2 %v1434_v7, %s15254_s9  ;;  %v18731_v18 = vld [vmem:[#allocation88_spill] sm:$0xff] }
 0x3df   :  { %13769 = vmatmul.msk.f32.gmra.mxu1 %vm39_vm0, %v3920_v19 }
 0x3e0   :  { %v4952_v11 = vadd.f32 %v4560_v12, %v3650_v52  ;;  %13900 = vmatmul.msk.f32.gmra.mxu2 %vm39_vm0, %v3923_v54  ;;  %14030 = vmatmul.msk.f32.gmra.mxu3 %vm39_vm0, %v6525_v22  ;;  %v3924_v22 = vld [vmem:[#allocation2 + $0x438] sm:$0xff] }
 0x3e1   :  { %14160 = vmatmul.msk.f32.gmra.mxu0 %vm39_vm0, %v6527_v56 }
 0x3e2   :  { %v6254_v24 = vadd.f32 %v5862_v49, %v4952_v11  ;;  %v1339_v11 = vld [vmem:[%s18599_s0 + $0x2c] sm:$0x1] }
 0x3e3   :  { %v4563_v4 = vpop.f32.mrf.mxu2  ;;  %v5865_v28 = vpop.f32.mrf.mxu3 }
 0x3e4   :  { %v16991_v19 = vadd.f32 %v7164_v0, %v6254_v24  ;;  %v1351_v0 = vunpack.c.l.bf16 %v1339_v11  ;;  %v6529_v11 = vld [vmem:[#allocation2 + $0x429] sm:$0xff] }
 0x3e5   :  { %v3261_v12 = vpop.f32.mrf.mxu1 }
 0x3e6   :  { %18730 = vst [vmem:[#allocation79_spill] sm:$0xff] %v16991_v19  ;;  %v3651_v53 = vadd.f32 %v3261_v12, %v18731_v18  ;;  %v7170_v52 = vpop.f32.mrf.mxu0  ;;  %1386 = vrot.lane.b32.xlu2 %v1351_v0, %s15253_s5  ;;  %v18733_v12 = vld [vmem:[#allocation91_spill] sm:$0xff] }
 0x3e7   :  { %13770 = vmatmul.msk.f32.gmra.mxu1 %vm39_vm0, %v3921_v63 }
 0x3e8   :  { %v4953_v50 = vadd.f32 %v4563_v4, %v3651_v53  ;;  %13901 = vmatmul.msk.f32.gmra.mxu2 %vm39_vm0, %v3924_v22  ;;  %14031 = vmatmul.msk.f32.gmra.mxu3 %vm39_vm0, %v6526_v16  ;;  %v3925_v16 = vld [vmem:[#allocation2 + $0x440] sm:$0xff] }
 0x3e9   :  { %14161 = vmatmul.msk.f32.gmra.mxu0 %vm39_vm0, %v6528_v26 }
 0x3ea   :  { %v6255_v49 = vadd.f32 %v5865_v28, %v4953_v50  ;;  %v1421_v50 = vld [vmem:[%s18599_s0 + $0x20] sm:$0x1] }
 0x3eb   :  { %v4566_v7 = vpop.f32.mrf.mxu2  ;;  %v5868_v24 = vpop.f32.mrf.mxu3 }
 0x3ec   :  { %v17002_v63 = vadd.f32 %v7167_v3, %v6255_v49  ;;  %v1433_v3 = vunpack.c.l.bf16 %v1421_v50  ;;  %v6530_v50 = vld [vmem:[#allocation2 + $0x439] sm:$0xff] }
 0x3ed   :  { %v3264_v4 = vpop.f32.mrf.mxu1 }
 0x3ee   :  { %18732 = vst [vmem:[#allocation82_spill] sm:$0xff] %v17002_v63  ;;  %v3652_v18 = vadd.f32 %v3264_v4, %v18733_v12  ;;  %v7173_v53 = vpop.f32.mrf.mxu0  ;;  %1465 = vrot.lane.b32.xlu2 %v1433_v3, %s15254_s9  ;;  %v18735_v4 = vld [vmem:[#allocation94_spill] sm:$0xff] }
 0x3ef   :  { %13771 = vmatmul.msk.f32.gmra.mxu1 %vm39_vm0, %v3922_v14 }
 0x3f0   :  { %v4954_v19 = vadd.f32 %v4566_v7, %v3652_v18  ;;  %13902 = vmatmul.msk.f32.gmra.mxu2 %vm39_vm0, %v3925_v16  ;;  %14032 = vmatmul.msk.f32.gmra.mxu3 %vm39_vm0, %v6527_v56  ;;  %v3926_v56 = vld [vmem:[#allocation2 + $0x450] sm:$0xff] }
 0x3f1   :  { %14162 = vmatmul.msk.f32.gmra.mxu0 %vm39_vm0, %v6529_v11 }
 0x3f2   :  { %v6256_v28 = vadd.f32 %v5868_v24, %v4954_v19 }
 0x3f3   :  { %v4569_v0 = vpop.f32.mrf.mxu2  ;;  %v5871_v49 = vpop.f32.mrf.mxu3 }
 0x3f4   :  { %v17013_v14 = vadd.f32 %v7170_v52, %v6256_v28 }
 0x3f5   :  { %v3267_v7 = vpop.f32.mrf.mxu1 }
 0x3f6   :  { %18734 = vst [vmem:[#allocation85_spill] sm:$0xff] %v17013_v14  ;;  %v3653_v12 = vadd.f32 %v3267_v7, %v18735_v4  ;;  %v7176_v18 = vpop.f32.mrf.mxu0  ;;  %v18737_v14 = vld [vmem:[#allocation7_spill] sm:$0xff] }
 0x3f7   :  { %13772 = vmatmul.msk.f32.gmra.mxu1 %vm39_vm0, %v3923_v54  ;;  %v3927_v54 = vld [vmem:[#allocation2 + $0x458] sm:$0xff] }
 0x3f8   :  { %v4955_v63 = vadd.f32 %v4569_v0, %v3653_v12  ;;  %13903 = vmatmul.msk.f32.gmra.mxu2 %vm39_vm0, %v3926_v56  ;;  %14033 = vmatmul.msk.f32.gmra.mxu3 %vm39_vm0, %v6528_v26  ;;  %v6531_v26 = vld [vmem:[#allocation2 + $0x441] sm:$0xff] }
 0x3f9   :  { %14163 = vmatmul.msk.f32.gmra.mxu0 %vm39_vm0, %v6530_v50 }
 0x3fa   :  { %v6257_v19 = vadd.f32 %v5871_v49, %v4955_v63 }
 0x3fb   :  { %v4572_v24 = vpop.f32.mrf.mxu2  ;;  %v5874_v3 = vpop.f32.mrf.mxu3 }
 0x3fc   :  { %v17020_v52 = vadd.f32 %v7173_v53, %v6257_v19 }
 0x3fd   :  { %v3270_v28 = vpop.f32.mrf.mxu1 }
 0x3fe   :  { %18736 = vst [vmem:[#allocation88_spill] sm:$0xff] %v17020_v52  ;;  %v3654_v7 = vadd.f32 %v3270_v28, %v18737_v14  ;;  %v7179_v4 = vpop.f32.mrf.mxu0  ;;  %v18739_v52 = vld [vmem:[#allocation9_spill] sm:$0xff] }
 0x3ff   :  { %13773 = vmatmul.msk.f32.gmra.mxu1 %vm39_vm0, %v3924_v22  ;;  %v3928_v22 = vld [vmem:[#allocation2 + $0x468] sm:$0xff] }
 0x400   :  { %v4956_v0 = vadd.f32 %v4572_v24, %v3654_v7  ;;  %13904 = vmatmul.msk.f32.gmra.mxu2 %vm39_vm0, %v3927_v54  ;;  %14034 = vmatmul.msk.f32.gmra.mxu3 %vm39_vm0, %v6529_v11  ;;  %v6532_v11 = vld [vmem:[#allocation2 + $0x451] sm:$0xff] }
 0x401   :  { %14164 = vmatmul.msk.f32.gmra.mxu0 %vm39_vm0, %v6531_v26 }
 0x402   :  { %v6258_v63 = vadd.f32 %v5874_v3, %v4956_v0 }
 0x403   :  { %v4575_v49 = vpop.f32.mrf.mxu2  ;;  %v5877_v12 = vpop.f32.mrf.mxu3 }
 0x404   :  { %v17027_v53 = vadd.f32 %v7176_v18, %v6258_v63 }
 0x405   :  { %v3273_v19 = vpop.f32.mrf.mxu1 }
 0x406   :  { %18738 = vst [vmem:[#allocation91_spill] sm:$0xff] %v17027_v53  ;;  %v3655_v14 = vadd.f32 %v3273_v19, %v18739_v52  ;;  %v7182_v28 = vpop.f32.mrf.mxu0  ;;  %v18741_v53 = vld [vmem:[#allocation11_spill] sm:$0xff] }
 0x407   :  { %13774 = vmatmul.msk.f32.gmra.mxu1 %vm39_vm0, %v3925_v16  ;;  %v3929_v16 = vld [vmem:[#allocation2 + $0x470] sm:$0xff] }
 0x408   :  { %v4957_v24 = vadd.f32 %v4575_v49, %v3655_v14  ;;  %13905 = vmatmul.msk.f32.gmra.mxu2 %vm39_vm0, %v3928_v22  ;;  %14035 = vmatmul.msk.f32.gmra.mxu3 %vm39_vm0, %v6530_v50  ;;  %v6533_v50 = vld [vmem:[#allocation2 + $0x459] sm:$0xff] }
 0x409   :  { %14165 = vmatmul.msk.f32.gmra.mxu0 %vm39_vm0, %v6532_v11 }
 0x40a   :  { %v6259_v3 = vadd.f32 %v5877_v12, %v4957_v24 }
 0x40b   :  { %v4578_v7 = vpop.f32.mrf.mxu2  ;;  %v5880_v0 = vpop.f32.mrf.mxu3 }
 0x40c   :  { %v17034_v18 = vadd.f32 %v7179_v4, %v6259_v3 }
 0x40d   :  { %v3276_v63 = vpop.f32.mrf.mxu1 }
 0x40e   :  { %18740 = vst [vmem:[#allocation94_spill] sm:$0xff] %v17034_v18  ;;  %v3656_v52 = vadd.f32 %v3276_v63, %v18741_v53  ;;  %v7185_v19 = vpop.f32.mrf.mxu0  ;;  %v18743_v18 = vld [vmem:[#allocation13_spill] sm:$0xff] }
 0x40f   :  { %13775 = vmatmul.msk.f32.gmra.mxu1 %vm39_vm0, %v3926_v56  ;;  %v3930_v56 = vld [vmem:[#allocation2 + $0x480] sm:$0xff] }
 0x410   :  { %v4958_v49 = vadd.f32 %v4578_v7, %v3656_v52  ;;  %13906 = vmatmul.msk.f32.gmra.mxu2 %vm39_vm0, %v3929_v16  ;;  %14036 = vmatmul.msk.f32.gmra.mxu3 %vm39_vm0, %v6531_v26  ;;  %v6534_v26 = vld [vmem:[#allocation2 + $0x469] sm:$0xff] }
 0x411   :  { %14166 = vmatmul.msk.f32.gmra.mxu0 %vm39_vm0, %v6533_v50 }
 0x412   :  { %v6260_v12 = vadd.f32 %v5880_v0, %v4958_v49 }
 0x413   :  { %v4581_v14 = vpop.f32.mrf.mxu2  ;;  %v5883_v24 = vpop.f32.mrf.mxu3 }
 0x414   :  { %v17041_v4 = vadd.f32 %v7182_v28, %v6260_v12 }
 0x415   :  { %v3279_v3 = vpop.f32.mrf.mxu1 }
 0x416   :  { %18742 = vst [vmem:[#allocation7_spill] sm:$0xff] %v17041_v4  ;;  %v3657_v53 = vadd.f32 %v3279_v3, %v18743_v18  ;;  %v7188_v63 = vpop.f32.mrf.mxu0  ;;  %v18745_v4 = vld [vmem:[#allocation15_spill] sm:$0xff] }
 0x417   :  { %13776 = vmatmul.msk.f32.gmra.mxu1 %vm39_vm0, %v3927_v54  ;;  %v3931_v54 = vld [vmem:[#allocation2 + $0x488] sm:$0xff] }
 0x418   :  { %v4959_v7 = vadd.f32 %v4581_v14, %v3657_v53  ;;  %13907 = vmatmul.msk.f32.gmra.mxu2 %vm39_vm0, %v3930_v56  ;;  %14037 = vmatmul.msk.f32.gmra.mxu3 %vm39_vm0, %v6532_v11  ;;  %v6535_v11 = vld [vmem:[#allocation2 + $0x471] sm:$0xff] }
 0x419   :  { %14167 = vmatmul.msk.f32.gmra.mxu0 %vm39_vm0, %v6534_v26 }
 0x41a   :  { %v6261_v0 = vadd.f32 %v5883_v24, %v4959_v7 }
 0x41b   :  { %v4584_v52 = vpop.f32.mrf.mxu2  ;;  %v5886_v49 = vpop.f32.mrf.mxu3 }
 0x41c   :  { %v17048_v28 = vadd.f32 %v7185_v19, %v6261_v0 }
 0x41d   :  { %v3282_v12 = vpop.f32.mrf.mxu1 }
 0x41e   :  { %18744 = vst [vmem:[#allocation9_spill] sm:$0xff] %v17048_v28  ;;  %v3658_v18 = vadd.f32 %v3282_v12, %v18745_v4  ;;  %v7191_v3 = vpop.f32.mrf.mxu0  ;;  %v18747_v28 = vld [vmem:[#allocation17_spill] sm:$0xff] }
 0x41f   :  { %13777 = vmatmul.msk.f32.gmra.mxu1 %vm39_vm0, %v3928_v22  ;;  %v3932_v22 = vld [vmem:[#allocation2 + $0x498] sm:$0xff] }
 0x420   :  { %v4960_v14 = vadd.f32 %v4584_v52, %v3658_v18  ;;  %13908 = vmatmul.msk.f32.gmra.mxu2 %vm39_vm0, %v3931_v54  ;;  %14038 = vmatmul.msk.f32.gmra.mxu3 %vm39_vm0, %v6533_v50  ;;  %v6536_v50 = vld [vmem:[#allocation2 + $0x481] sm:$0xff] }
 0x421   :  { %14168 = vmatmul.msk.f32.gmra.mxu0 %vm39_vm0, %v6535_v11 }
 0x422   :  { %v6262_v24 = vadd.f32 %v5886_v49, %v4960_v14 }
 0x423   :  { %v4587_v53 = vpop.f32.mrf.mxu2  ;;  %v5889_v7 = vpop.f32.mrf.mxu3 }
 0x424   :  { %v17055_v19 = vadd.f32 %v7188_v63, %v6262_v24 }
 0x425   :  { %v3285_v0 = vpop.f32.mrf.mxu1 }
 0x426   :  { %18746 = vst [vmem:[#allocation11_spill] sm:$0xff] %v17055_v19  ;;  %v3659_v4 = vadd.f32 %v3285_v0, %v18747_v28  ;;  %v7194_v12 = vpop.f32.mrf.mxu0  ;;  %v18749_v19 = vld [vmem:[#allocation19_spill] sm:$0xff] }
 0x427   :  { %13778 = vmatmul.msk.f32.gmra.mxu1 %vm39_vm0, %v3929_v16  ;;  %v3933_v16 = vld [vmem:[#allocation2 + $0x4a0] sm:$0xff] }
 0x428   :  { %v4961_v52 = vadd.f32 %v4587_v53, %v3659_v4  ;;  %13909 = vmatmul.msk.f32.gmra.mxu2 %vm39_vm0, %v3932_v22  ;;  %14039 = vmatmul.msk.f32.gmra.mxu3 %vm39_vm0, %v6534_v26  ;;  %v6537_v26 = vld [vmem:[#allocation2 + $0x489] sm:$0xff] }
 0x429   :  { %14169 = vmatmul.msk.f32.gmra.mxu0 %vm39_vm0, %v6536_v50 }
 0x42a   :  { %v6263_v49 = vadd.f32 %v5889_v7, %v4961_v52 }
 0x42b   :  { %v4590_v18 = vpop.f32.mrf.mxu2  ;;  %v5892_v14 = vpop.f32.mrf.mxu3 }
 0x42c   :  { %v17062_v63 = vadd.f32 %v7191_v3, %v6263_v49 }
 0x42d   :  { %v3288_v24 = vpop.f32.mrf.mxu1 }
 0x42e   :  { %18748 = vst [vmem:[#allocation13_spill] sm:$0xff] %v17062_v63  ;;  %v3660_v28 = vadd.f32 %v3288_v24, %v18749_v19  ;;  %v7197_v0 = vpop.f32.mrf.mxu0  ;;  %v18751_v19 = vld [vmem:[#allocation21_spill] sm:$0xff] }
 0x42f   :  { %13779 = vmatmul.msk.f32.gmra.mxu1 %vm39_vm0, %v3930_v56  ;;  %v3934_v56 = vld [vmem:[#allocation2 + $0x4b0] sm:$0xff] }
 0x430   :  { %v4962_v53 = vadd.f32 %v4590_v18, %v3660_v28  ;;  %13910 = vmatmul.msk.f32.gmra.mxu2 %vm39_vm0, %v3933_v16  ;;  %14040 = vmatmul.msk.f32.gmra.mxu3 %vm39_vm0, %v6535_v11  ;;  %v1383_v63 = vpop.permute.xlu2 %1382  ;;  %v6538_v11 = vld [vmem:[#allocation2 + $0x499] sm:$0xff] }
 0x431   :  { %14170 = vmatmul.msk.f32.gmra.mxu0 %vm39_vm0, %v6537_v26  ;;  %1410 = vst.msk [vmem:[#allocation2 + $0x690] sm:$0xff] %vm39_vm0, %v1383_v63 }
 0x432   :  { %v6264_v7 = vadd.f32 %v5892_v14, %v4962_v53 }
 0x433   :  { %v4593_v4 = vpop.f32.mrf.mxu2  ;;  %v5895_v52 = vpop.f32.mrf.mxu3 }
 0x434   :  { %v17069_v3 = vadd.f32 %v7194_v12, %v6264_v7 }
 0x435   :  { %v3291_v49 = vpop.f32.mrf.mxu1 }
 0x436   :  { %18750 = vst [vmem:[#allocation15_spill] sm:$0xff] %v17069_v3  ;;  %v3661_v24 = vadd.f32 %v3291_v49, %v18751_v19  ;;  %v7200_v43 = vpop.f32.mrf.mxu0  ;;  %v18753_v19 = vld [vmem:[#allocation23_spill] sm:$0xff] }
 0x437   :  { %13780 = vmatmul.msk.f32.gmra.mxu1 %vm39_vm0, %v3931_v54  ;;  %v3935_v54 = vld [vmem:[#allocation2 + $0x4b8] sm:$0xff] }
 0x438   :  { %v4963_v18 = vadd.f32 %v4593_v4, %v3661_v24  ;;  %13911 = vmatmul.msk.f32.gmra.mxu2 %vm39_vm0, %v3934_v56  ;;  %14041 = vmatmul.msk.f32.gmra.mxu3 %vm39_vm0, %v6536_v50  ;;  %v1468_v49 = vpop.permute.xlu2 %1467  ;;  %v6539_v50 = vld [vmem:[#allocation2 + $0x4a1] sm:$0xff] }
 0x439   :  { %14171 = vmatmul.msk.f32.gmra.mxu0 %vm39_vm0, %v6538_v11  ;;  %1495 = vst.msk [vmem:[#allocation2 + $0x6a8] sm:$0xff] %vm39_vm0, %v1468_v49 }
 0x43a   :  { %v6265_v12 = vadd.f32 %v5895_v52, %v4963_v18 }
 0x43b   :  { %v4596_v14 = vpop.f32.mrf.mxu2  ;;  %v5898_v28 = vpop.f32.mrf.mxu3 }
 0x43c   :  { %v17077_v53 = vadd.f32 %v7197_v0, %v6265_v12 }
 0x43d   :  { %v3294_v7 = vpop.f32.mrf.mxu1 }
 0x43e   :  { %18752 = vst [vmem:[#allocation17_spill] sm:$0xff] %v17077_v53  ;;  %v3662_v63 = vadd.f32 %v3294_v7, %v18753_v19  ;;  %v7203_v3 = vpop.f32.mrf.mxu0  ;;  %v18755_v19 = vld [vmem:[#allocation26_spill] sm:$0xff] }
 0x43f   :  { %13781 = vmatmul.msk.f32.gmra.mxu1 %vm39_vm0, %v3932_v22  ;;  %v3936_v22 = vld [vmem:[#allocation2 + $0x4c8] sm:$0xff] }
 0x440   :  { %v4964_v4 = vadd.f32 %v4596_v14, %v3662_v63  ;;  %13912 = vmatmul.msk.f32.gmra.mxu2 %vm39_vm0, %v3935_v54  ;;  %14042 = vmatmul.msk.f32.gmra.mxu3 %vm39_vm0, %v6537_v26  ;;  %v1387_v7 = vpop.permute.xlu2 %1386  ;;  %v6540_v26 = vld [vmem:[#allocation2 + $0x4b1] sm:$0xff] }
 0x441   :  { %14172 = vmatmul.msk.f32.gmra.mxu0 %vm39_vm0, %v6539_v50  ;;  %1412 = vst.msk [vmem:[#allocation2 + $0x6a0] sm:$0x3] %vm42_vm2, %v1387_v7 }
 0x442   :  { %v6266_v0 = vadd.f32 %v5898_v28, %v4964_v4 }
 0x443   :  { %v4599_v52 = vpop.f32.mrf.mxu2  ;;  %v5901_v24 = vpop.f32.mrf.mxu3 }
 0x444   :  { %v17085_v18 = vadd.f32 %v7200_v43, %v6266_v0 }
 0x445   :  { %v3297_v12 = vpop.f32.mrf.mxu1 }
 0x446   :  { %18754 = vst [vmem:[#allocation19_spill] sm:$0xff] %v17085_v18  ;;  %v3663_v49 = vadd.f32 %v3297_v12, %v18755_v19  ;;  %v7206_v53 = vpop.f32.mrf.mxu0  ;;  %v18757_v19 = vld [vmem:[#allocation29_spill] sm:$0xff] }
 0x447   :  { %13782 = vmatmul.msk.f32.gmra.mxu1 %vm39_vm0, %v3933_v16  ;;  %v3937_v16 = vld [vmem:[#allocation2 + $0x4d0] sm:$0xff] }
 0x448   :  { %v4965_v14 = vadd.f32 %v4599_v52, %v3663_v49  ;;  %13913 = vmatmul.msk.f32.gmra.mxu2 %vm39_vm0, %v3936_v22  ;;  %14043 = vmatmul.msk.f32.gmra.mxu3 %vm39_vm0, %v6538_v11  ;;  %v1466_v12 = vpop.permute.xlu2 %1465  ;;  %v6541_v11 = vld [vmem:[#allocation2 + $0x4b9] sm:$0xff] }
 0x449   :  { %14173 = vmatmul.msk.f32.gmra.mxu0 %vm39_vm0, %v6540_v26  ;;  %1494 = vst.msk [vmem:[#allocation2 + $0x508] sm:$0x3] %vm42_vm2, %v1466_v12 }
 0x44a   :  { %v6267_v43 = vadd.f32 %v5901_v24, %v4965_v14 }
 0x44b   :  { %v4602_v28 = vpop.f32.mrf.mxu2  ;;  %v5904_v63 = vpop.f32.mrf.mxu3 }
 0x44c   :  { %v17093_v4 = vadd.f32 %v7203_v3, %v6267_v43 }
 0x44d   :  { %v3300_v0 = vpop.f32.mrf.mxu1 }
 0x44e   :  { %18756 = vst [vmem:[#allocation21_spill] sm:$0xff] %v17093_v4  ;;  %v3664_v7 = vadd.f32 %v3300_v0, %v18757_v19  ;;  %v7209_v18 = vpop.f32.mrf.mxu0  ;;  %v3938_v0 = vld [vmem:[#allocation2 + $0x4e0] sm:$0xff]  ;;  %v18759_v19 = vld [vmem:[#allocation32_spill] sm:$0xff] }
 0x44f   :  { %13783 = vmatmul.msk.f32.gmra.mxu1 %vm39_vm0, %v3934_v56 }
 0x450   :  { %v4966_v52 = vadd.f32 %v4602_v28, %v3664_v7  ;;  %13914 = vmatmul.msk.f32.gmra.mxu2 %vm39_vm0, %v3937_v16  ;;  %14044 = vmatmul.msk.f32.gmra.mxu3 %vm39_vm0, %v6539_v50  ;;  %v6542_v50 = vld [vmem:[#allocation2 + $0x4c9] sm:$0xff] }
 0x451   :  { %14174 = vmatmul.msk.f32.gmra.mxu0 %vm39_vm0, %v6541_v11  ;;  %v26_v28 = vld [vmem:[%s18599_s0 + $0x2c] sm:$0x1] }
 0x452   :  { %v6268_v3 = vadd.f32 %v5904_v63, %v4966_v52 }
 0x453   :  { %v4605_v24 = vpop.f32.mrf.mxu2  ;;  %v5907_v49 = vpop.f32.mrf.mxu3 }
 0x454   :  { %v17101_v14 = vadd.f32 %v7206_v53, %v6268_v3  ;;  %v38_v53 = vunpack.c.l.bf16 %v26_v28  ;;  %v6543_v28 = vld [vmem:[#allocation2 + $0x4d1] sm:$0xff] }
 0x455   :  { %v3303_v43 = vpop.f32.mrf.mxu1 }
 0x456   :  { %18758 = vst [vmem:[#allocation23_spill] sm:$0xff] %v17101_v14  ;;  %v3665_v12 = vadd.f32 %v3303_v43, %v18759_v19  ;;  %v7212_v4 = vpop.f32.mrf.mxu0  ;;  %v18761_v43 = vld [vmem:[#allocation35_spill] sm:$0xff]  ;;  %v18763_v14 = vld [vmem:[#allocation38_spill] sm:$0xff] }
 0x457   :  { %13784 = vmatmul.msk.f32.gmra.mxu1 %vm39_vm0, %v3935_v54  ;;  %52 = vst.msk [vmem:[#allocation2 + $0x520] sm:$0x3] %vm42_vm2, %v38_v53 }
 0x458   :  { %v4967_v56 = vadd.f32 %v4605_v24, %v3665_v12  ;;  %13915 = vmatmul.msk.f32.gmra.mxu2 %vm39_vm0, %v3938_v0  ;;  %14045 = vmatmul.msk.f32.gmra.mxu3 %vm39_vm0, %v6540_v26  ;;  %v3939_v24 = vld [vmem:[#allocation2 + $0x4e8] sm:$0xff] }
 0x459   :  { %14175 = vmatmul.msk.f32.gmra.mxu0 %vm39_vm0, %v6542_v50 }
 0x45a   :  { %v6269_v63 = vadd.f32 %v5907_v49, %v4967_v56 }
 0x45b   :  { %v4608_v7 = vpop.f32.mrf.mxu2  ;;  %v5910_v52 = vpop.f32.mrf.mxu3 }
 0x45c   :  { %v17112_v3 = vadd.f32 %v7209_v18, %v6269_v63 }
 0x45d   :  { %v3306_v54 = vpop.f32.mrf.mxu1 }
 0x45e   :  { %18760 = vst [vmem:[#allocation26_spill] sm:$0xff] %v17112_v3  ;;  %v3666_v19 = vadd.f32 %v3306_v54, %v18761_v43  ;;  %v7215_v26 = vpop.f32.mrf.mxu0  ;;  %v3940_v3 = vld [vmem:[#allocation2 + $0x4f8] sm:$0xff] }
 0x45f   :  { %13785 = vmatmul.msk.f32.gmra.mxu1 %vm39_vm0, %v3936_v22 }
 0x460   :  { %v4968_v12 = vadd.f32 %v4608_v7, %v3666_v19  ;;  %13916 = vmatmul.msk.f32.gmra.mxu2 %vm39_vm0, %v3939_v24  ;;  %14046 = vmatmul.msk.f32.gmra.mxu3 %vm39_vm0, %v6541_v11  ;;  %v6544_v11 = vld [vmem:[#allocation2 + $0x4e1] sm:$0xff] }
 0x461   :  { %14176 = vmatmul.msk.f32.gmra.mxu0 %vm39_vm0, %v6543_v28 }
 0x462   :  { %v6270_v49 = vadd.f32 %v5910_v52, %v4968_v12 }
 0x463   :  { %v4611_v56 = vpop.f32.mrf.mxu2  ;;  %v5913_v53 = vpop.f32.mrf.mxu3 }
 0x464   :  { %v17119_v18 = vadd.f32 %v7212_v4, %v6270_v49  ;;  %v3941_v49 = vld [vmem:[#allocation2 + $0x500] sm:$0xff] }
 0x465   :  { %v3309_v63 = vpop.f32.mrf.mxu1 }
 0x466   :  { %18762 = vst [vmem:[#allocation29_spill] sm:$0xff] %v17119_v18  ;;  %v3667_v54 = vadd.f32 %v3309_v63, %v18763_v14  ;;  %v7218_v43 = vpop.f32.mrf.mxu0  ;;  %v18765_v18 = vld [vmem:[#allocation41_spill] sm:$0xff] }
 0x467   :  { %13786 = vmatmul.msk.f32.gmra.mxu1 %vm39_vm0, %v3937_v16 }
 0x468   :  { %v4969_v22 = vadd.f32 %v4611_v56, %v3667_v54  ;;  %13917 = vmatmul.msk.f32.gmra.mxu2 %vm39_vm0, %v3940_v3  ;;  %14047 = vmatmul.msk.f32.gmra.mxu3 %vm39_vm0, %v6542_v50  ;;  %v6545_v50 = vld [vmem:[#allocation2 + $0x4e9] sm:$0xff] }
 0x469   :  { %14177 = vmatmul.msk.f32.gmra.mxu0 %vm39_vm0, %v6544_v11  ;;  %v18767_v11 = vld [vmem:[#allocation44_spill] sm:$0xff] }
 0x46a   :  { %v6271_v7 = vadd.f32 %v5913_v53, %v4969_v22  ;;  %v5244_v22 = vld [vmem:[#allocation2 + $0x511] sm:$0xff] }
 0x46b   :  { %v4614_v52 = vpop.f32.mrf.mxu2  ;;  %v5916_v19 = vpop.f32.mrf.mxu3 }
 0x46c   :  { %v17126_v4 = vadd.f32 %v7215_v26, %v6271_v7 }
 0x46d   :  { %v3312_v12 = vpop.f32.mrf.mxu1 }
 0x46e   :  { %18764 = vst [vmem:[#allocation32_spill] sm:$0xff] %v17126_v4  ;;  %v3668_v14 = vadd.f32 %v3312_v12, %v18765_v18  ;;  %v7221_v63 = vpop.f32.mrf.mxu0 }
 0x46f   :  { %13787 = vmatmul.msk.f32.gmra.mxu1 %vm39_vm0, %v3938_v0  ;;  %v3942_v0 = vld [vmem:[#allocation2 + $0x540] sm:$0xff] }
 0x470   :  { %v4970_v16 = vadd.f32 %v4614_v52, %v3668_v14  ;;  %13918 = vmatmul.msk.f32.gmra.mxu2 %vm39_vm0, %v3941_v49  ;;  %14048 = vmatmul.msk.f32.gmra.mxu3 %vm39_vm0, %v6543_v28  ;;  %v6546_v28 = vld [vmem:[#allocation2 + $0x529] sm:$0xff] }
 0x471   :  { %14178 = vmatmul.msk.f32.gmra.mxu0 %vm39_vm0, %v6545_v50  ;;  %v18769_v50 = vld [vmem:[#allocation47_spill] sm:$0xff] }
 0x472   :  { %v6272_v3 = vadd.f32 %v5916_v19, %v4970_v16  ;;  %v5245_v16 = vld [vmem:[#allocation2 + $0x519] sm:$0xff] }
 0x473   :  { %v4617_v56 = vpop.f32.mrf.mxu2  ;;  %v5919_v53 = vpop.f32.mrf.mxu3 }
 0x474   :  { %v17133_v26 = vadd.f32 %v7218_v43, %v6272_v3 }
 0x475   :  { %v3315_v54 = vpop.f32.mrf.mxu1 }
 0x476   :  { %18766 = vst [vmem:[#allocation35_spill] sm:$0xff] %v17133_v26  ;;  %v3669_v18 = vadd.f32 %v3315_v54, %v18767_v11  ;;  %v7224_v7 = vpop.f32.mrf.mxu0  ;;  %v2641_v26 = vld [vmem:[#allocation2 + $0x530] sm:$0xff] }
 0x477   :  { %13788 = vmatmul.msk.f32.gmra.mxu1 %vm39_vm0, %v3939_v24  ;;  %v2640_v24 = vld [vmem:[#allocation2 + $0x528] sm:$0xff] }
 0x478   :  { %v4971_v52 = vadd.f32 %v4617_v56, %v3669_v18  ;;  %13919 = vmatmul.msk.f32.gmra.mxu2 %vm39_vm0, %v3942_v0  ;;  %14049 = vmatmul.msk.f32.gmra.mxu3 %vm39_vm0, %v5244_v22  ;;  %v3943_v56 = vld [vmem:[#allocation2 + $0x548] sm:$0xff]  ;;  %v6547_v22 = vld [vmem:[#allocation2 + $0x531] sm:$0xff] }
 0x479   :  { %14179 = vmatmul.msk.f32.gmra.mxu0 %vm39_vm0, %v6546_v28 }
 0x47a   :  { %v6273_v19 = vadd.f32 %v5919_v53, %v4971_v52 }
 0x47b   :  { %v4620_v12 = vpop.f32.mrf.mxu2  ;;  %v5922_v43 = vpop.f32.mrf.mxu3 }
 0x47c   :  { %v17140_v49 = vadd.f32 %v7221_v63, %v6273_v19 }
 0x47d   :  { %v3318_v14 = vpop.f32.mrf.mxu1 }
 0x47e   :  { %18768 = vst [vmem:[#allocation38_spill] sm:$0xff] %v17140_v49  ;;  %v3670_v3 = vadd.f32 %v3318_v14, %v18769_v50  ;;  %v7227_v54 = vpop.f32.mrf.mxu0  ;;  %v18771_v14 = vld [vmem:[#allocation50_spill] sm:$0xff] }
 0x47f   :  { %13789 = vmatmul.msk.f32.gmra.mxu1 %vm39_vm0, %v2640_v24 }
 0x480   :  { %v4972_v11 = vadd.f32 %v4620_v12, %v3670_v3  ;;  %13920 = vmatmul.msk.f32.gmra.mxu2 %vm39_vm0, %v3943_v56  ;;  %14050 = vmatmul.msk.f32.gmra.mxu3 %vm39_vm0, %v5245_v16  ;;  %v3944_v12 = vld [vmem:[#allocation2 + $0x558] sm:$0xff]  ;;  %v6548_v16 = vld [vmem:[#allocation2 + $0x541] sm:$0xff] }
 0x481   :  { %14180 = vmatmul.msk.f32.gmra.mxu0 %vm39_vm0, %v6547_v22 }
 0x482   :  { %v6274_v53 = vadd.f32 %v5922_v43, %v4972_v11 }
 0x483   :  { %v4623_v63 = vpop.f32.mrf.mxu2  ;;  %v5925_v18 = vpop.f32.mrf.mxu3 }
 0x484   :  { %v17147_v52 = vadd.f32 %v7224_v7, %v6274_v53 }
 0x485   :  { %v3321_v19 = vpop.f32.mrf.mxu1 }
 0x486   :  { %18770 = vst [vmem:[#allocation41_spill] sm:$0xff] %v17147_v52  ;;  %v3671_v50 = vadd.f32 %v3321_v19, %v18771_v14  ;;  %v7230_v49 = vpop.f32.mrf.mxu0  ;;  %v18773_v19 = vld [vmem:[#allocation53_spill] sm:$0xff] }
 0x487   :  { %13790 = vmatmul.msk.f32.gmra.mxu1 %vm39_vm0, %v2641_v26  ;;  %v3945_v26 = vld [vmem:[#allocation2 + $0x560] sm:$0xff] }
 0x488   :  { %v4973_v3 = vadd.f32 %v4623_v63, %v3671_v50  ;;  %13921 = vmatmul.msk.f32.gmra.mxu2 %vm39_vm0, %v3944_v12  ;;  %14051 = vmatmul.msk.f32.gmra.mxu3 %vm39_vm0, %v6546_v28  ;;  %v6549_v28 = vld [vmem:[#allocation2 + $0x549] sm:$0xff] }
 0x489   :  { %14181 = vmatmul.msk.f32.gmra.mxu0 %vm39_vm0, %v6548_v16 }
 0x48a   :  { %v6275_v43 = vadd.f32 %v5925_v18, %v4973_v3 }
 0x48b   :  { %v4626_v24 = vpop.f32.mrf.mxu2  ;;  %v5928_v7 = vpop.f32.mrf.mxu3 }
 0x48c   :  { %v17154_v11 = vadd.f32 %v7227_v54, %v6275_v43 }
 0x48d   :  { %v3324_v53 = vpop.f32.mrf.mxu1 }
 0x48e   :  { %18772 = vst [vmem:[#allocation44_spill] sm:$0xff] %v17154_v11  ;;  %v3672_v14 = vadd.f32 %v3324_v53, %v18773_v19  ;;  %v7233_v52 = vpop.f32.mrf.mxu0  ;;  %v18775_v11 = vld [vmem:[#allocation56_spill] sm:$0xff] }
 0x48f   :  { %13791 = vmatmul.msk.f32.gmra.mxu1 %vm39_vm0, %v3942_v0  ;;  %v3946_v0 = vld [vmem:[#allocation2 + $0x570] sm:$0xff] }
 0x490   :  { %v4974_v63 = vadd.f32 %v4626_v24, %v3672_v14  ;;  %13922 = vmatmul.msk.f32.gmra.mxu2 %vm39_vm0, %v3945_v26  ;;  %14052 = vmatmul.msk.f32.gmra.mxu3 %vm39_vm0, %v6547_v22  ;;  %v6550_v22 = vld [vmem:[#allocation2 + $0x559] sm:$0xff] }
 0x491   :  { %14182 = vmatmul.msk.f32.gmra.mxu0 %vm39_vm0, %v6549_v28 }
 0x492   :  { %v6276_v18 = vadd.f32 %v5928_v7, %v4974_v63 }
 0x493   :  { %v4629_v50 = vpop.f32.mrf.mxu2  ;;  %v5931_v3 = vpop.f32.mrf.mxu3 }
 0x494   :  { %v17161_v54 = vadd.f32 %v7230_v49, %v6276_v18 }
 0x495   :  { %v3327_v43 = vpop.f32.mrf.mxu1 }
 0x496   :  { %18774 = vst [vmem:[#allocation47_spill] sm:$0xff] %v17161_v54  ;;  %v3673_v53 = vadd.f32 %v3327_v43, %v18775_v11  ;;  %v7236_v19 = vpop.f32.mrf.mxu0  ;;  %v18777_v54 = vld [vmem:[#allocation59_spill] sm:$0xff] }
 0x497   :  { %13792 = vmatmul.msk.f32.gmra.mxu1 %vm39_vm0, %v3943_v56  ;;  %v3947_v56 = vld [vmem:[#allocation2 + $0x578] sm:$0xff] }
 0x498   :  { %v4975_v24 = vadd.f32 %v4629_v50, %v3673_v53  ;;  %13923 = vmatmul.msk.f32.gmra.mxu2 %vm39_vm0, %v3946_v0  ;;  %14053 = vmatmul.msk.f32.gmra.mxu3 %vm39_vm0, %v6548_v16  ;;  %v6551_v16 = vld [vmem:[#allocation2 + $0x561] sm:$0xff] }
 0x499   :  { %14183 = vmatmul.msk.f32.gmra.mxu0 %vm39_vm0, %v6550_v22 }
 0x49a   :  { %v6277_v7 = vadd.f32 %v5931_v3, %v4975_v24 }
 0x49b   :  { %v4632_v14 = vpop.f32.mrf.mxu2  ;;  %v5934_v63 = vpop.f32.mrf.mxu3 }
 0x49c   :  { %v17168_v49 = vadd.f32 %v7233_v52, %v6277_v7 }
 0x49d   :  { %v3330_v18 = vpop.f32.mrf.mxu1 }
 0x49e   :  { %18776 = vst [vmem:[#allocation50_spill] sm:$0xff] %v17168_v49  ;;  %v3674_v11 = vadd.f32 %v3330_v18, %v18777_v54  ;;  %v7239_v43 = vpop.f32.mrf.mxu0  ;;  %v18779_v49 = vld [vmem:[#allocation62_spill] sm:$0xff] }
 0x49f   :  { %13793 = vmatmul.msk.f32.gmra.mxu1 %vm39_vm0, %v3944_v12  ;;  %v3948_v12 = vld [vmem:[#allocation2 + $0x588] sm:$0xff] }
 0x4a0   :  { %v4976_v50 = vadd.f32 %v4632_v14, %v3674_v11  ;;  %13924 = vmatmul.msk.f32.gmra.mxu2 %vm39_vm0, %v3947_v56  ;;  %14054 = vmatmul.msk.f32.gmra.mxu3 %vm39_vm0, %v6549_v28  ;;  %v6552_v28 = vld [vmem:[#allocation2 + $0x571] sm:$0xff] }
 0x4a1   :  { %14184 = vmatmul.msk.f32.gmra.mxu0 %vm39_vm0, %v6551_v16 }
 0x4a2   :  { %v6278_v3 = vadd.f32 %v5934_v63, %v4976_v50 }
 0x4a3   :  { %v4635_v53 = vpop.f32.mrf.mxu2  ;;  %v5937_v24 = vpop.f32.mrf.mxu3 }
 0x4a4   :  { %v17175_v52 = vadd.f32 %v7236_v19, %v6278_v3 }
 0x4a5   :  { %v3333_v7 = vpop.f32.mrf.mxu1 }
 0x4a6   :  { %18778 = vst [vmem:[#allocation53_spill] sm:$0xff] %v17175_v52  ;;  %v3675_v54 = vadd.f32 %v3333_v7, %v18779_v49  ;;  %v7242_v18 = vpop.f32.mrf.mxu0  ;;  %v18781_v52 = vld [vmem:[#allocation65_spill] sm:$0xff] }
 0x4a7   :  { %13794 = vmatmul.msk.f32.gmra.mxu1 %vm39_vm0, %v3945_v26  ;;  %v3949_v26 = vld [vmem:[#allocation2 + $0x590] sm:$0xff] }
 0x4a8   :  { %v4977_v14 = vadd.f32 %v4635_v53, %v3675_v54  ;;  %13925 = vmatmul.msk.f32.gmra.mxu2 %vm39_vm0, %v3948_v12  ;;  %14055 = vmatmul.msk.f32.gmra.mxu3 %vm39_vm0, %v6550_v22  ;;  %v6553_v22 = vld [vmem:[#allocation2 + $0x579] sm:$0xff] }
 0x4a9   :  { %14185 = vmatmul.msk.f32.gmra.mxu0 %vm39_vm0, %v6552_v28 }
 0x4aa   :  { %v6279_v63 = vadd.f32 %v5937_v24, %v4977_v14 }
 0x4ab   :  { %v4638_v11 = vpop.f32.mrf.mxu2  ;;  %v5940_v50 = vpop.f32.mrf.mxu3 }
 0x4ac   :  { %v17182_v19 = vadd.f32 %v7239_v43, %v6279_v63 }
 0x4ad   :  { %v3336_v3 = vpop.f32.mrf.mxu1 }
 0x4ae   :  { %18780 = vst [vmem:[#allocation56_spill] sm:$0xff] %v17182_v19  ;;  %v3676_v49 = vadd.f32 %v3336_v3, %v18781_v52  ;;  %v7245_v7 = vpop.f32.mrf.mxu0  ;;  %v18783_v19 = vld [vmem:[#allocation68_spill] sm:$0xff] }
 0x4af   :  { %13795 = vmatmul.msk.f32.gmra.mxu1 %vm39_vm0, %v3946_v0  ;;  %v3950_v0 = vld [vmem:[#allocation2 + $0x5a0] sm:$0xff] }
 0x4b0   :  { %v4978_v53 = vadd.f32 %v4638_v11, %v3676_v49  ;;  %13926 = vmatmul.msk.f32.gmra.mxu2 %vm39_vm0, %v3949_v26  ;;  %14056 = vmatmul.msk.f32.gmra.mxu3 %vm39_vm0, %v6551_v16  ;;  %v6554_v16 = vld [vmem:[#allocation2 + $0x589] sm:$0xff] }
 0x4b1   :  { %14186 = vmatmul.msk.f32.gmra.mxu0 %vm39_vm0, %v6553_v22 }
 0x4b2   :  { %v6280_v24 = vadd.f32 %v5940_v50, %v4978_v53 }
 0x4b3   :  { %v4641_v54 = vpop.f32.mrf.mxu2  ;;  %v5943_v14 = vpop.f32.mrf.mxu3 }
 0x4b4   :  { %v17189_v43 = vadd.f32 %v7242_v18, %v6280_v24 }
 0x4b5   :  { %v3339_v63 = vpop.f32.mrf.mxu1 }
 0x4b6   :  { %18782 = vst [vmem:[#allocation59_spill] sm:$0xff] %v17189_v43  ;;  %v3677_v52 = vadd.f32 %v3339_v63, %v18783_v19  ;;  %v7248_v3 = vpop.f32.mrf.mxu0  ;;  %v18785_v43 = vld [vmem:[#allocation71_spill] sm:$0xff] }
 0x4b7   :  { %13796 = vmatmul.msk.f32.gmra.mxu1 %vm39_vm0, %v3947_v56  ;;  %v3951_v56 = vld [vmem:[#allocation2 + $0x5a8] sm:$0xff] }
 0x4b8   :  { %v4979_v11 = vadd.f32 %v4641_v54, %v3677_v52  ;;  %13927 = vmatmul.msk.f32.gmra.mxu2 %vm39_vm0, %v3950_v0  ;;  %14057 = vmatmul.msk.f32.gmra.mxu3 %vm39_vm0, %v6552_v28  ;;  %v6555_v28 = vld [vmem:[#allocation2 + $0x591] sm:$0xff] }
 0x4b9   :  { %14187 = vmatmul.msk.f32.gmra.mxu0 %vm39_vm0, %v6554_v16 }
 0x4ba   :  { %v6281_v50 = vadd.f32 %v5943_v14, %v4979_v11 }
 0x4bb   :  { %v4644_v49 = vpop.f32.mrf.mxu2  ;;  %v5946_v53 = vpop.f32.mrf.mxu3 }
 0x4bc   :  { %v17196_v18 = vadd.f32 %v7245_v7, %v6281_v50 }
 0x4bd   :  { %v3342_v24 = vpop.f32.mrf.mxu1 }
 0x4be   :  { %18784 = vst [vmem:[#allocation62_spill] sm:$0xff] %v17196_v18  ;;  %v3678_v19 = vadd.f32 %v3342_v24, %v18785_v43  ;;  %v7251_v63 = vpop.f32.mrf.mxu0  ;;  %v18787_v18 = vld [vmem:[#allocation74_spill] sm:$0xff] }
 0x4bf   :  { %13797 = vmatmul.msk.f32.gmra.mxu1 %vm39_vm0, %v3948_v12  ;;  %v3952_v12 = vld [vmem:[#allocation2 + $0x5b8] sm:$0xff] }
 0x4c0   :  { %v4980_v54 = vadd.f32 %v4644_v49, %v3678_v19  ;;  %13928 = vmatmul.msk.f32.gmra.mxu2 %vm39_vm0, %v3951_v56  ;;  %14058 = vmatmul.msk.f32.gmra.mxu3 %vm39_vm0, %v6553_v22  ;;  %v6556_v22 = vld [vmem:[#allocation2 + $0x5a1] sm:$0xff] }
 0x4c1   :  { %14188 = vmatmul.msk.f32.gmra.mxu0 %vm39_vm0, %v6555_v28 }
 0x4c2   :  { %v6282_v14 = vadd.f32 %v5946_v53, %v4980_v54 }
 0x4c3   :  { %v4647_v52 = vpop.f32.mrf.mxu2  ;;  %v5949_v11 = vpop.f32.mrf.mxu3 }
 0x4c4   :  { %v17203_v7 = vadd.f32 %v7248_v3, %v6282_v14 }
 0x4c5   :  { %v3345_v50 = vpop.f32.mrf.mxu1 }
 0x4c6   :  { %18786 = vst [vmem:[#allocation65_spill] sm:$0xff] %v17203_v7  ;;  %v3679_v43 = vadd.f32 %v3345_v50, %v18787_v18  ;;  %v7254_v24 = vpop.f32.mrf.mxu0  ;;  %v18789_v7 = vld [vmem:[#allocation77_spill] sm:$0xff] }
 0x4c7   :  { %13798 = vmatmul.msk.f32.gmra.mxu1 %vm39_vm0, %v3949_v26  ;;  %v3953_v26 = vld [vmem:[#allocation2 + $0x5c0] sm:$0xff] }
 0x4c8   :  { %v4981_v49 = vadd.f32 %v4647_v52, %v3679_v43  ;;  %13929 = vmatmul.msk.f32.gmra.mxu2 %vm39_vm0, %v3952_v12  ;;  %14059 = vmatmul.msk.f32.gmra.mxu3 %vm39_vm0, %v6554_v16  ;;  %v6557_v16 = vld [vmem:[#allocation2 + $0x5a9] sm:$0xff] }
 0x4c9   :  { %14189 = vmatmul.msk.f32.gmra.mxu0 %vm39_vm0, %v6556_v22 }
 0x4ca   :  { %v6283_v53 = vadd.f32 %v5949_v11, %v4981_v49 }
 0x4cb   :  { %v4650_v19 = vpop.f32.mrf.mxu2  ;;  %v5952_v54 = vpop.f32.mrf.mxu3 }
 0x4cc   :  { %v17210_v3 = vadd.f32 %v7251_v63, %v6283_v53 }
 0x4cd   :  { %v3348_v14 = vpop.f32.mrf.mxu1 }
 0x4ce   :  { %18788 = vst [vmem:[#allocation68_spill] sm:$0xff] %v17210_v3  ;;  %v3680_v18 = vadd.f32 %v3348_v14, %v18789_v7  ;;  %v7257_v50 = vpop.f32.mrf.mxu0  ;;  %v18791_v3 = vld [vmem:[#allocation80_spill] sm:$0xff] }
 0x4cf   :  { %13799 = vmatmul.msk.f32.gmra.mxu1 %vm39_vm0, %v3950_v0  ;;  %v3954_v0 = vld [vmem:[#allocation2 + $0x5d0] sm:$0xff] }
 0x4d0   :  { %v4982_v52 = vadd.f32 %v4650_v19, %v3680_v18  ;;  %13930 = vmatmul.msk.f32.gmra.mxu2 %vm39_vm0, %v3953_v26  ;;  %14060 = vmatmul.msk.f32.gmra.mxu3 %vm39_vm0, %v6555_v28  ;;  %v6558_v28 = vld [vmem:[#allocation2 + $0x5b9] sm:$0xff] }
 0x4d1   :  { %14190 = vmatmul.msk.f32.gmra.mxu0 %vm39_vm0, %v6557_v16 }
 0x4d2   :  { %v6284_v11 = vadd.f32 %v5952_v54, %v4982_v52 }
 0x4d3   :  { %v4653_v43 = vpop.f32.mrf.mxu2  ;;  %v5955_v49 = vpop.f32.mrf.mxu3 }
 0x4d4   :  { %v17217_v63 = vadd.f32 %v7254_v24, %v6284_v11  ;;  %v1424_v24 = vld [vmem:[%s18599_s0 + $0x2c] sm:$0x1] }
 0x4d5   :  { %v3351_v53 = vpop.f32.mrf.mxu1  ;;  %v1436_v54 = vunpack.c.l.bf16 %v1424_v24  ;;  %v6559_v24 = vld [vmem:[#allocation2 + $0x5c1] sm:$0xff] }
 0x4d6   :  { %18790 = vst [vmem:[#allocation71_spill] sm:$0xff] %v17217_v63  ;;  %v3681_v7 = vadd.f32 %v3351_v53, %v18791_v3  ;;  %v7260_v14 = vpop.f32.mrf.mxu0 }
 0x4d7   :  { %13800 = vmatmul.msk.f32.gmra.mxu1 %vm39_vm0, %v3951_v56  ;;  %1471 = vrot.lane.b32.xlu0 %v1436_v54, %s15254_s9 }
 0x4d8   :  { %v4983_v19 = vadd.f32 %v4653_v43, %v3681_v7  ;;  %13931 = vmatmul.msk.f32.gmra.mxu2 %vm39_vm0, %v3954_v0  ;;  %14061 = vmatmul.msk.f32.gmra.mxu3 %vm39_vm0, %v6556_v22  ;;  %v18793_v43 = vld [vmem:[#allocation83_spill] sm:$0xff]  ;;  %v3955_v22 = vld [vmem:[#allocation2 + $0x5d8] sm:$0xff] }
 0x4d9   :  { %14191 = vmatmul.msk.f32.gmra.mxu0 %vm39_vm0, %v6558_v28 }
 0x4da   :  { %v6285_v18 = vadd.f32 %v5955_v49, %v4983_v19 }
 0x4db   :  { %v4656_v52 = vpop.f32.mrf.mxu2  ;;  %v5958_v3 = vpop.f32.mrf.mxu3 }
 0x4dc   :  { %v17228_v56 = vadd.f32 %v7257_v50, %v6285_v18 }
 0x4dd   :  { %v3354_v11 = vpop.f32.mrf.mxu1 }
 0x4de   :  { %18792 = vst [vmem:[#allocation74_spill] sm:$0xff] %v17228_v56  ;;  %v3682_v53 = vadd.f32 %v3354_v11, %v18793_v43  ;;  %v7263_v7 = vpop.f32.mrf.mxu0  ;;  %v18795_v56 = vld [vmem:[#allocation86_spill] sm:$0xff] }
 0x4df   :  { %13801 = vmatmul.msk.f32.gmra.mxu1 %vm39_vm0, %v3952_v12  ;;  %v3956_v12 = vld [vmem:[#allocation2 + $0x5e8] sm:$0xff] }
 0x4e0   :  { %v4984_v63 = vadd.f32 %v4656_v52, %v3682_v53  ;;  %13932 = vmatmul.msk.f32.gmra.mxu2 %vm39_vm0, %v3955_v22  ;;  %14062 = vmatmul.msk.f32.gmra.mxu3 %vm39_vm0, %v6557_v16  ;;  %v6560_v16 = vld [vmem:[#allocation2 + $0x5d1] sm:$0xff] }
 0x4e1   :  { %14192 = vmatmul.msk.f32.gmra.mxu0 %vm39_vm0, %v6559_v24 }
 0x4e2   :  { %v6286_v49 = vadd.f32 %v5958_v3, %v4984_v63 }
 0x4e3   :  { %v4659_v19 = vpop.f32.mrf.mxu2  ;;  %v5961_v54 = vpop.f32.mrf.mxu3 }
 0x4e4   :  { %v17235_v50 = vadd.f32 %v7260_v14, %v6286_v49 }
 0x4e5   :  { %v3357_v18 = vpop.f32.mrf.mxu1 }
 0x4e6   :  { %18794 = vst [vmem:[#allocation77_spill] sm:$0xff] %v17235_v50  ;;  %v3683_v11 = vadd.f32 %v3357_v18, %v18795_v56  ;;  %v7266_v43 = vpop.f32.mrf.mxu0  ;;  %v18797_v50 = vld [vmem:[#allocation89_spill] sm:$0xff] }
 0x4e7   :  { %13802 = vmatmul.msk.f32.gmra.mxu1 %vm39_vm0, %v3953_v26  ;;  %v3957_v26 = vld [vmem:[#allocation2 + $0x5f0] sm:$0xff] }
 0x4e8   :  { %v4985_v52 = vadd.f32 %v4659_v19, %v3683_v11  ;;  %13933 = vmatmul.msk.f32.gmra.mxu2 %vm39_vm0, %v3956_v12  ;;  %14063 = vmatmul.msk.f32.gmra.mxu3 %vm39_vm0, %v6558_v28  ;;  %v6561_v28 = vld [vmem:[#allocation2 + $0x5d9] sm:$0xff] }
 0x4e9   :  { %14193 = vmatmul.msk.f32.gmra.mxu0 %vm39_vm0, %v6560_v16 }
 0x4ea   :  { %v6287_v63 = vadd.f32 %v5961_v54, %v4985_v52 }
 0x4eb   :  { %v4662_v3 = vpop.f32.mrf.mxu2  ;;  %v5964_v53 = vpop.f32.mrf.mxu3 }
 0x4ec   :  { %v17242_v14 = vadd.f32 %v7263_v7, %v6287_v63 }
 0x4ed   :  { %v3360_v49 = vpop.f32.mrf.mxu1 }
 0x4ee   :  { %18796 = vst [vmem:[#allocation80_spill] sm:$0xff] %v17242_v14  ;;  %v3684_v56 = vadd.f32 %v3360_v49, %v18797_v50  ;;  %v7269_v18 = vpop.f32.mrf.mxu0  ;;  %v18799_v14 = vld [vmem:[#allocation92_spill] sm:$0xff] }
 0x4ef   :  { %13803 = vmatmul.msk.f32.gmra.mxu1 %vm39_vm0, %v3954_v0  ;;  %v3958_v0 = vld [vmem:[#allocation2 + $0x600] sm:$0xff] }
 0x4f0   :  { %v4986_v19 = vadd.f32 %v4662_v3, %v3684_v56  ;;  %13934 = vmatmul.msk.f32.gmra.mxu2 %vm39_vm0, %v3957_v26  ;;  %14064 = vmatmul.msk.f32.gmra.mxu3 %vm39_vm0, %v6559_v24  ;;  %v6562_v24 = vld [vmem:[#allocation2 + $0x5e9] sm:$0xff] }
 0x4f1   :  { %14194 = vmatmul.msk.f32.gmra.mxu0 %vm39_vm0, %v6561_v28 }
 0x4f2   :  { %v6288_v54 = vadd.f32 %v5964_v53, %v4986_v19 }
 0x4f3   :  { %v4665_v11 = vpop.f32.mrf.mxu2  ;;  %v5967_v52 = vpop.f32.mrf.mxu3 }
 0x4f4   :  { %v17249_v7 = vadd.f32 %v7266_v43, %v6288_v54 }
 0x4f5   :  { %v3363_v63 = vpop.f32.mrf.mxu1 }
 0x4f6   :  { %18798 = vst [vmem:[#allocation83_spill] sm:$0xff] %v17249_v7  ;;  %v3685_v50 = vadd.f32 %v3363_v63, %v18799_v14  ;;  %v7272_v49 = vpop.f32.mrf.mxu0  ;;  %v18801_v7 = vld [vmem:[#allocation8_spill] sm:$0xff] }
 0x4f7   :  { %13804 = vmatmul.msk.f32.gmra.mxu1 %vm39_vm0, %v3955_v22  ;;  %v3959_v22 = vld [vmem:[#allocation2 + $0x608] sm:$0xff] }
 0x4f8   :  { %v4987_v3 = vadd.f32 %v4665_v11, %v3685_v50  ;;  %13935 = vmatmul.msk.f32.gmra.mxu2 %vm39_vm0, %v3958_v0  ;;  %14065 = vmatmul.msk.f32.gmra.mxu3 %vm39_vm0, %v6560_v16  ;;  %v6563_v16 = vld [vmem:[#allocation2 + $0x5f1] sm:$0xff] }
 0x4f9   :  { %14195 = vmatmul.msk.f32.gmra.mxu0 %vm39_vm0, %v6562_v24 }
 0x4fa   :  { %v6289_v53 = vadd.f32 %v5967_v52, %v4987_v3 }
 0x4fb   :  { %v4668_v56 = vpop.f32.mrf.mxu2  ;;  %v5970_v19 = vpop.f32.mrf.mxu3 }
 0x4fc   :  { %v17256_v43 = vadd.f32 %v7269_v18, %v6289_v53 }
 0x4fd   :  { %v3366_v54 = vpop.f32.mrf.mxu1 }
 0x4fe   :  { %18800 = vst [vmem:[#allocation86_spill] sm:$0xff] %v17256_v43  ;;  %v3686_v14 = vadd.f32 %v3366_v54, %v18801_v7  ;;  %v7275_v63 = vpop.f32.mrf.mxu0  ;;  %v18803_v43 = vld [vmem:[#allocation10_spill] sm:$0xff] }
 0x4ff   :  { %13805 = vmatmul.msk.f32.gmra.mxu1 %vm39_vm0, %v3956_v12  ;;  %v3960_v12 = vld [vmem:[#allocation2 + $0x618] sm:$0xff] }
 0x500   :  { %v4988_v11 = vadd.f32 %v4668_v56, %v3686_v14  ;;  %13936 = vmatmul.msk.f32.gmra.mxu2 %vm39_vm0, %v3959_v22  ;;  %14066 = vmatmul.msk.f32.gmra.mxu3 %vm39_vm0, %v6561_v28  ;;  %v6564_v28 = vld [vmem:[#allocation2 + $0x601] sm:$0xff] }
 0x501   :  { %14196 = vmatmul.msk.f32.gmra.mxu0 %vm39_vm0, %v6563_v16 }
 0x502   :  { %v6290_v52 = vadd.f32 %v5970_v19, %v4988_v11 }
 0x503   :  { %v4671_v50 = vpop.f32.mrf.mxu2  ;;  %v5973_v3 = vpop.f32.mrf.mxu3 }
 0x504   :  { %v17263_v18 = vadd.f32 %v7272_v49, %v6290_v52 }
 0x505   :  { %v3369_v53 = vpop.f32.mrf.mxu1 }
 0x506   :  { %18802 = vst [vmem:[#allocation89_spill] sm:$0xff] %v17263_v18  ;;  %v3687_v7 = vadd.f32 %v3369_v53, %v18803_v43  ;;  %v7278_v54 = vpop.f32.mrf.mxu0  ;;  %v18805_v18 = vld [vmem:[#allocation12_spill] sm:$0xff] }
 0x507   :  { %13806 = vmatmul.msk.f32.gmra.mxu1 %vm39_vm0, %v3957_v26  ;;  %v3961_v26 = vld [vmem:[#allocation2 + $0x620] sm:$0xff] }
 0x508   :  { %v4989_v56 = vadd.f32 %v4671_v50, %v3687_v7  ;;  %13937 = vmatmul.msk.f32.gmra.mxu2 %vm39_vm0, %v3960_v12  ;;  %14067 = vmatmul.msk.f32.gmra.mxu3 %vm39_vm0, %v6562_v24  ;;  %v6565_v24 = vld [vmem:[#allocation2 + $0x609] sm:$0xff] }
 0x509   :  { %14197 = vmatmul.msk.f32.gmra.mxu0 %vm39_vm0, %v6564_v28 }
 0x50a   :  { %v6291_v19 = vadd.f32 %v5973_v3, %v4989_v56 }
 0x50b   :  { %v4674_v14 = vpop.f32.mrf.mxu2  ;;  %v5976_v11 = vpop.f32.mrf.mxu3 }
 0x50c   :  { %v17270_v49 = vadd.f32 %v7275_v63, %v6291_v19 }
 0x50d   :  { %v3372_v52 = vpop.f32.mrf.mxu1 }
 0x50e   :  { %18804 = vst [vmem:[#allocation92_spill] sm:$0xff] %v17270_v49  ;;  %v3688_v43 = vadd.f32 %v3372_v52, %v18805_v18  ;;  %v7281_v53 = vpop.f32.mrf.mxu0  ;;  %v18807_v49 = vld [vmem:[#allocation14_spill] sm:$0xff] }
 0x50f   :  { %13807 = vmatmul.msk.f32.gmra.mxu1 %vm39_vm0, %v3958_v0  ;;  %v3962_v0 = vld [vmem:[#allocation2 + $0x630] sm:$0xff] }
 0x510   :  { %v4990_v50 = vadd.f32 %v4674_v14, %v3688_v43  ;;  %13938 = vmatmul.msk.f32.gmra.mxu2 %vm39_vm0, %v3961_v26  ;;  %14068 = vmatmul.msk.f32.gmra.mxu3 %vm39_vm0, %v6563_v16  ;;  %v6566_v16 = vld [vmem:[#allocation2 + $0x619] sm:$0xff] }
 0x511   :  { %14198 = vmatmul.msk.f32.gmra.mxu0 %vm39_vm0, %v6565_v24 }
 0x512   :  { %v6292_v3 = vadd.f32 %v5976_v11, %v4990_v50 }
 0x513   :  { %v4677_v7 = vpop.f32.mrf.mxu2  ;;  %v5979_v56 = vpop.f32.mrf.mxu3 }
 0x514   :  { %v17277_v63 = vadd.f32 %v7278_v54, %v6292_v3 }
 0x515   :  { %v3375_v19 = vpop.f32.mrf.mxu1 }
 0x516   :  { %18806 = vst [vmem:[#allocation8_spill] sm:$0xff] %v17277_v63  ;;  %v3689_v18 = vadd.f32 %v3375_v19, %v18807_v49  ;;  %v7284_v52 = vpop.f32.mrf.mxu0  ;;  %v18809_v63 = vld [vmem:[#allocation16_spill] sm:$0xff] }
 0x517   :  { %13808 = vmatmul.msk.f32.gmra.mxu1 %vm39_vm0, %v3959_v22  ;;  %v3963_v22 = vld [vmem:[#allocation2 + $0x638] sm:$0xff] }
 0x518   :  { %v4991_v14 = vadd.f32 %v4677_v7, %v3689_v18  ;;  %13939 = vmatmul.msk.f32.gmra.mxu2 %vm39_vm0, %v3962_v0  ;;  %14069 = vmatmul.msk.f32.gmra.mxu3 %vm39_vm0, %v6564_v28  ;;  %v6567_v28 = vld [vmem:[#allocation2 + $0x621] sm:$0xff] }
 0x519   :  { %14199 = vmatmul.msk.f32.gmra.mxu0 %vm39_vm0, %v6566_v16 }
 0x51a   :  { %v6293_v11 = vadd.f32 %v5979_v56, %v4991_v14 }
 0x51b   :  { %v4680_v43 = vpop.f32.mrf.mxu2  ;;  %v5982_v50 = vpop.f32.mrf.mxu3 }
 0x51c   :  { %v17284_v54 = vadd.f32 %v7281_v53, %v6293_v11 }
 0x51d   :  { %v3378_v3 = vpop.f32.mrf.mxu1 }
 0x51e   :  { %18808 = vst [vmem:[#allocation10_spill] sm:$0xff] %v17284_v54  ;;  %v3690_v49 = vadd.f32 %v3378_v3, %v18809_v63  ;;  %v7287_v19 = vpop.f32.mrf.mxu0  ;;  %v18811_v54 = vld [vmem:[#allocation18_spill] sm:$0xff] }
 0x51f   :  { %13809 = vmatmul.msk.f32.gmra.mxu1 %vm39_vm0, %v3960_v12  ;;  %v3964_v12 = vld [vmem:[#allocation2 + $0x648] sm:$0xff] }
 0x520   :  { %v4992_v7 = vadd.f32 %v4680_v43, %v3690_v49  ;;  %13940 = vmatmul.msk.f32.gmra.mxu2 %vm39_vm0, %v3963_v22  ;;  %14070 = vmatmul.msk.f32.gmra.mxu3 %vm39_vm0, %v6565_v24  ;;  %v6568_v24 = vld [vmem:[#allocation2 + $0x631] sm:$0xff] }
 0x521   :  { %14200 = vmatmul.msk.f32.gmra.mxu0 %vm39_vm0, %v6567_v28 }
 0x522   :  { %v6294_v56 = vadd.f32 %v5982_v50, %v4992_v7 }
 0x523   :  { %v4683_v18 = vpop.f32.mrf.mxu2  ;;  %v5985_v14 = vpop.f32.mrf.mxu3 }
 0x524   :  { %v17291_v53 = vadd.f32 %v7284_v52, %v6294_v56 }
 0x525   :  { %v3381_v11 = vpop.f32.mrf.mxu1 }
 0x526   :  { %18810 = vst [vmem:[#allocation12_spill] sm:$0xff] %v17291_v53  ;;  %v3691_v63 = vadd.f32 %v3381_v11, %v18811_v54  ;;  %v7290_v3 = vpop.f32.mrf.mxu0  ;;  %v18813_v53 = vld [vmem:[#allocation20_spill] sm:$0xff] }
 0x527   :  { %13810 = vmatmul.msk.f32.gmra.mxu1 %vm39_vm0, %v3961_v26  ;;  %v3965_v26 = vld [vmem:[#allocation2 + $0x650] sm:$0xff] }
 0x528   :  { %v4993_v43 = vadd.f32 %v4683_v18, %v3691_v63  ;;  %13941 = vmatmul.msk.f32.gmra.mxu2 %vm39_vm0, %v3964_v12  ;;  %14071 = vmatmul.msk.f32.gmra.mxu3 %vm39_vm0, %v6566_v16  ;;  %v6569_v16 = vld [vmem:[#allocation2 + $0x639] sm:$0xff] }
 0x529   :  { %14201 = vmatmul.msk.f32.gmra.mxu0 %vm39_vm0, %v6568_v24 }
 0x52a   :  { %v6295_v50 = vadd.f32 %v5985_v14, %v4993_v43 }
 0x52b   :  { %v4686_v49 = vpop.f32.mrf.mxu2  ;;  %v5988_v7 = vpop.f32.mrf.mxu3 }
 0x52c   :  { %v17298_v52 = vadd.f32 %v7287_v19, %v6295_v50 }
 0x52d   :  { %v3384_v56 = vpop.f32.mrf.mxu1 }
 0x52e   :  { %18812 = vst [vmem:[#allocation14_spill] sm:$0xff] %v17298_v52  ;;  %v3692_v54 = vadd.f32 %v3384_v56, %v18813_v53  ;;  %v7293_v11 = vpop.f32.mrf.mxu0  ;;  %v18815_v52 = vld [vmem:[#allocation22_spill] sm:$0xff] }
 0x52f   :  { %13811 = vmatmul.msk.f32.gmra.mxu1 %vm39_vm0, %v3962_v0  ;;  %v3966_v0 = vld [vmem:[#allocation2 + $0x660] sm:$0xff] }
 0x530   :  { %v4994_v18 = vadd.f32 %v4686_v49, %v3692_v54  ;;  %13942 = vmatmul.msk.f32.gmra.mxu2 %vm39_vm0, %v3965_v26  ;;  %14072 = vmatmul.msk.f32.gmra.mxu3 %vm39_vm0, %v6567_v28  ;;  %v6570_v28 = vld [vmem:[#allocation2 + $0x649] sm:$0xff] }
 0x531   :  { %14202 = vmatmul.msk.f32.gmra.mxu0 %vm39_vm0, %v6569_v16 }
 0x532   :  { %v6296_v14 = vadd.f32 %v5988_v7, %v4994_v18 }
 0x533   :  { %v4689_v63 = vpop.f32.mrf.mxu2  ;;  %v5991_v43 = vpop.f32.mrf.mxu3 }
 0x534   :  { %v17305_v19 = vadd.f32 %v7290_v3, %v6296_v14 }
 0x535   :  { %v3387_v50 = vpop.f32.mrf.mxu1 }
 0x536   :  { %18814 = vst [vmem:[#allocation16_spill] sm:$0xff] %v17305_v19  ;;  %v3693_v53 = vadd.f32 %v3387_v50, %v18815_v52  ;;  %v7296_v56 = vpop.f32.mrf.mxu0  ;;  %v18817_v19 = vld [vmem:[#allocation24_spill] sm:$0xff] }
 0x537   :  { %13812 = vmatmul.msk.f32.gmra.mxu1 %vm39_vm0, %v3963_v22  ;;  %v3967_v22 = vld [vmem:[#allocation2 + $0x668] sm:$0xff] }
 0x538   :  { %v4995_v49 = vadd.f32 %v4689_v63, %v3693_v53  ;;  %13943 = vmatmul.msk.f32.gmra.mxu2 %vm39_vm0, %v3966_v0  ;;  %14073 = vmatmul.msk.f32.gmra.mxu3 %vm39_vm0, %v6568_v24  ;;  %v6571_v24 = vld [vmem:[#allocation2 + $0x651] sm:$0xff] }
 0x539   :  { %14203 = vmatmul.msk.f32.gmra.mxu0 %vm39_vm0, %v6570_v28 }
 0x53a   :  { %v6297_v7 = vadd.f32 %v5991_v43, %v4995_v49 }
 0x53b   :  { %v4692_v54 = vpop.f32.mrf.mxu2  ;;  %v5994_v18 = vpop.f32.mrf.mxu3 }
 0x53c   :  { %v17312_v3 = vadd.f32 %v7293_v11, %v6297_v7 }
 0x53d   :  { %v3390_v14 = vpop.f32.mrf.mxu1 }
 0x53e   :  { %18816 = vst [vmem:[#allocation18_spill] sm:$0xff] %v17312_v3  ;;  %v3694_v52 = vadd.f32 %v3390_v14, %v18817_v19  ;;  %v7299_v50 = vpop.f32.mrf.mxu0  ;;  %v18819_v3 = vld [vmem:[#allocation27_spill] sm:$0xff] }
 0x53f   :  { %13813 = vmatmul.msk.f32.gmra.mxu1 %vm39_vm0, %v3964_v12  ;;  %v3968_v12 = vld [vmem:[#allocation2 + $0x678] sm:$0xff] }
 0x540   :  { %v4996_v63 = vadd.f32 %v4692_v54, %v3694_v52  ;;  %13944 = vmatmul.msk.f32.gmra.mxu2 %vm39_vm0, %v3967_v22  ;;  %14074 = vmatmul.msk.f32.gmra.mxu3 %vm39_vm0, %v6569_v16  ;;  %v6572_v16 = vld [vmem:[#allocation2 + $0x661] sm:$0xff] }
 0x541   :  { %14204 = vmatmul.msk.f32.gmra.mxu0 %vm39_vm0, %v6571_v24 }
 0x542   :  { %v6298_v43 = vadd.f32 %v5994_v18, %v4996_v63 }
 0x543   :  { %v4695_v53 = vpop.f32.mrf.mxu2  ;;  %v5997_v49 = vpop.f32.mrf.mxu3 }
 0x544   :  { %v17319_v11 = vadd.f32 %v7296_v56, %v6298_v43 }
 0x545   :  { %v3393_v7 = vpop.f32.mrf.mxu1 }
 0x546   :  { %18818 = vst [vmem:[#allocation20_spill] sm:$0xff] %v17319_v11  ;;  %v3695_v19 = vadd.f32 %v3393_v7, %v18819_v3  ;;  %v7302_v14 = vpop.f32.mrf.mxu0  ;;  %v18821_v11 = vld [vmem:[#allocation30_spill] sm:$0xff] }
 0x547   :  { %13814 = vmatmul.msk.f32.gmra.mxu1 %vm39_vm0, %v3965_v26  ;;  %v3969_v26 = vld [vmem:[#allocation2 + $0x680] sm:$0xff] }
 0x548   :  { %v4997_v54 = vadd.f32 %v4695_v53, %v3695_v19  ;;  %13945 = vmatmul.msk.f32.gmra.mxu2 %vm39_vm0, %v3968_v12  ;;  %14075 = vmatmul.msk.f32.gmra.mxu3 %vm39_vm0, %v6570_v28  ;;  %v6573_v28 = vld [vmem:[#allocation2 + $0x669] sm:$0xff] }
 0x549   :  { %14205 = vmatmul.msk.f32.gmra.mxu0 %vm39_vm0, %v6572_v16  ;;  %v1472_v4 = vpop.permute.xlu0 %1471 }
 0x54a   :  { %v6299_v18 = vadd.f32 %v5997_v49, %v4997_v54  ;;  %1497 = vst.msk [vmem:[#allocation2 + $0x6b8] sm:$0x3] %vm42_vm2, %v1472_v4 }
 0x54b   :  { %v4698_v52 = vpop.f32.mrf.mxu2  ;;  %v6000_v63 = vpop.f32.mrf.mxu3 }
 0x54c   :  { %v17326_v56 = vadd.f32 %v7299_v50, %v6299_v18  ;;  %v3970_v18 = vld [vmem:[#allocation2 + $0x690] sm:$0xff] }
 0x54d   :  { %v3396_v43 = vpop.f32.mrf.mxu1 }
 0x54e   :  { %18820 = vst [vmem:[#allocation22_spill] sm:$0xff] %v17326_v56  ;;  %v3696_v3 = vadd.f32 %v3396_v43, %v18821_v11  ;;  %v7305_v7 = vpop.f32.mrf.mxu0  ;;  %v18823_v43 = vld [vmem:[#allocation33_spill] sm:$0xff] }
 0x54f   :  { %13815 = vmatmul.msk.f32.gmra.mxu1 %vm39_vm0, %v3966_v0 }
 0x550   :  { %v4998_v53 = vadd.f32 %v4698_v52, %v3696_v3  ;;  %13946 = vmatmul.msk.f32.gmra.mxu2 %vm39_vm0, %v3969_v26  ;;  %14076 = vmatmul.msk.f32.gmra.mxu3 %vm39_vm0, %v6571_v24  ;;  %v6574_v24 = vld [vmem:[#allocation2 + $0x679] sm:$0xff] }
 0x551   :  { %14206 = vmatmul.msk.f32.gmra.mxu0 %vm39_vm0, %v6573_v28 }
 0x552   :  { %v6300_v50 = vadd.f32 %v6000_v63, %v4998_v53 }
 0x553   :  { %v4701_v49 = vpop.f32.mrf.mxu2  ;;  %v6003_v19 = vpop.f32.mrf.mxu3 }
 0x554   :  { %v17334_v54 = vadd.f32 %v7302_v14, %v6300_v50  ;;  %v3971_v50 = vld [vmem:[#allocation2 + $0x698] sm:$0xff] }
 0x555   :  { %v3399_v11 = vpop.f32.mrf.mxu1 }
 0x556   :  { %18822 = vst [vmem:[#allocation24_spill] sm:$0xff] %v17334_v54  ;;  %v3697_v0 = vadd.f32 %v3399_v11, %v18823_v43  ;;  %v7308_v56 = vpop.f32.mrf.mxu0  ;;  %v18825_v54 = vld [vmem:[#allocation36_spill] sm:$0xff] }
 0x557   :  { %13816 = vmatmul.msk.f32.gmra.mxu1 %vm39_vm0, %v3967_v22 }
 0x558   :  { %v4999_v4 = vadd.f32 %v4701_v49, %v3697_v0  ;;  %13947 = vmatmul.msk.f32.gmra.mxu2 %vm39_vm0, %v3970_v18  ;;  %14077 = vmatmul.msk.f32.gmra.mxu3 %vm39_vm0, %v6572_v16  ;;  %v6575_v16 = vld [vmem:[#allocation2 + $0x681] sm:$0xff] }
 0x559   :  { %14207 = vmatmul.msk.f32.gmra.mxu0 %vm39_vm0, %v6574_v24 }
 0x55a   :  { %v6301_v52 = vadd.f32 %v6003_v19, %v4999_v4 }
 0x55b   :  { %v4704_v63 = vpop.f32.mrf.mxu2  ;;  %v6006_v3 = vpop.f32.mrf.mxu3 }
 0x55c   :  { %v17341_v14 = vadd.f32 %v7305_v7, %v6301_v52  ;;  %v3972_v52 = vld [vmem:[#allocation2 + $0x6a8] sm:$0xff] }
 0x55d   :  { %v3402_v53 = vpop.f32.mrf.mxu1 }
 0x55e   :  { %18824 = vst [vmem:[#allocation27_spill] sm:$0xff] %v17341_v14  ;;  %v3698_v11 = vadd.f32 %v3402_v53, %v18825_v54  ;;  %v7311_v43 = vpop.f32.mrf.mxu0  ;;  %v18827_v14 = vld [vmem:[#allocation39_spill] sm:$0xff] }
 0x55f   :  { %13817 = vmatmul.msk.f32.gmra.mxu1 %vm39_vm0, %v3968_v12 }
 0x560   :  { %v5000_v22 = vadd.f32 %v4704_v63, %v3698_v11  ;;  %13948 = vmatmul.msk.f32.gmra.mxu2 %vm39_vm0, %v3971_v50  ;;  %14078 = vmatmul.msk.f32.gmra.mxu3 %vm39_vm0, %v6573_v28  ;;  %v6576_v28 = vld [vmem:[#allocation2 + $0x691] sm:$0xff] }
 0x561   :  { %14208 = vmatmul.msk.f32.gmra.mxu0 %vm39_vm0, %v6575_v16 }
 0x562   :  { %v6302_v49 = vadd.f32 %v6006_v3, %v5000_v22 }
 0x563   :  { %v4707_v19 = vpop.f32.mrf.mxu2  ;;  %v6009_v0 = vpop.f32.mrf.mxu3 }
 0x564   :  { %v17348_v7 = vadd.f32 %v7308_v56, %v6302_v49  ;;  %v3973_v49 = vld [vmem:[#allocation2 + $0x6b0] sm:$0xff] }
 0x565   :  { %v3405_v4 = vpop.f32.mrf.mxu1 }
 0x566   :  { %18826 = vst [vmem:[#allocation30_spill] sm:$0xff] %v17348_v7  ;;  %v3699_v54 = vadd.f32 %v3405_v4, %v18827_v14  ;;  %v7314_v53 = vpop.f32.mrf.mxu0  ;;  %v18829_v7 = vld [vmem:[#allocation42_spill] sm:$0xff] }
 0x567   :  { %13818 = vmatmul.msk.f32.gmra.mxu1 %vm39_vm0, %v3969_v26 }
 0x568   :  { %v5001_v12 = vadd.f32 %v4707_v19, %v3699_v54  ;;  %13949 = vmatmul.msk.f32.gmra.mxu2 %vm39_vm0, %v3972_v52  ;;  %14079 = vmatmul.msk.f32.gmra.mxu3 %vm39_vm0, %v6574_v24  ;;  %v6577_v24 = vld [vmem:[#allocation2 + $0x699] sm:$0xff] }
 0x569   :  { %14209 = vmatmul.msk.f32.gmra.mxu0 %vm39_vm0, %v6576_v28  ;;  %v18831_v28 = vld [vmem:[#allocation45_spill] sm:$0xff] }
 0x56a   :  { %v6303_v63 = vadd.f32 %v6009_v0, %v5001_v12  ;;  %v9054_v12 = vld [vmem:[#allocation2 + $0x2] sm:$0xff] }
 0x56b   :  { %v4710_v3 = vpop.f32.mrf.mxu2  ;;  %v6012_v11 = vpop.f32.mrf.mxu3 }
 0x56c   :  { %v17355_v56 = vadd.f32 %v7311_v43, %v6303_v63 }
 0x56d   :  { %v3408_v22 = vpop.f32.mrf.mxu1 }
 0x56e   :  { %18828 = vst [vmem:[#allocation33_spill] sm:$0xff] %v17355_v56  ;;  %v3700_v14 = vadd.f32 %v3408_v22, %v18829_v7  ;;  %v7317_v4 = vpop.f32.mrf.mxu0  ;;  %v7812_v56 = vld [vmem:[#allocation2 + $0x331] sm:$0xff] }
 0x56f   :  { %13819 = vmatmul.msk.f32.gmra.mxu1 %vm39_vm0, %v3970_v18  ;;  %v10356_v18 = vld [vmem:[#allocation2 + $0x1a] sm:$0xff] }
 0x570   :  { %v5002_v26 = vadd.f32 %v4710_v3, %v3700_v14  ;;  %13950 = vmatmul.msk.f32.gmra.mxu2 %vm39_vm0, %v3973_v49  ;;  %14080 = vmatmul.msk.f32.gmra.mxu3 %vm39_vm0, %v6575_v16  ;;  %v11658_v16 = vld [vmem:[#allocation2 + $0x32] sm:$0xff] }
 0x571   :  { %14210 = vmatmul.msk.f32.gmra.mxu0 %vm39_vm0, %v6577_v24  ;;  %v18833_v24 = vld [vmem:[#allocation48_spill] sm:$0xff] }
 0x572   :  { %v6304_v19 = vadd.f32 %v6012_v11, %v5002_v26  ;;  %v9055_v26 = vld [vmem:[#allocation2 + $0xa] sm:$0xff] }
 0x573   :  { %v4713_v0 = vpop.f32.mrf.mxu2  ;;  %v6015_v52 = vpop.f32.mrf.mxu3 }
 0x574   :  { %v17362_v43 = vadd.f32 %v7314_v53, %v6304_v19 }
 0x575   :  { %v3411_v54 = vpop.f32.mrf.mxu1 }
 0x576   :  { %18830 = vst [vmem:[#allocation36_spill] sm:$0xff] %v17362_v43  ;;  %v3701_v7 = vadd.f32 %v3411_v54, %v18831_v28  ;;  %v7320_v63 = vpop.f32.mrf.mxu0  ;;  %v11659_v28 = vld [vmem:[#allocation2 + $0x3a] sm:$0xff] }
 0x577   :  { %13820 = vmatmul.msk.f32.gmra.mxu1 %vm39_vm0, %v3971_v50  ;;  %v7752_v50 = vld [vmem:[#allocation2 + $0x31] sm:$0xff]  ;;  %v7753_v43 = vld [vmem:[#allocation2 + $0x39] sm:$0xff] }
 0x578   :  { %v5003_v3 = vadd.f32 %v4713_v0, %v3701_v7  ;;  %14343 = vmatmul.msk.f32.vlgmr.msra.gmra.mxu2 %vm39_vm0, %v9054_v12  ;;  %14473 = vmatmul.msk.f32.vlgmr.msra.gmra.mxu3 %vm39_vm0, %v10356_v18  ;;  %v10357_v0 = vld [vmem:[#allocation2 + $0x22] sm:$0xff] }
 0x579   :  { %14603 = vmatmul.msk.f32.vlgmr.msra.gmra.mxu0 %vm39_vm0, %v11658_v16 }
 0x57a   :  { %v6305_v11 = vadd.f32 %v6015_v52, %v5003_v3 }
 0x57b   :  { %v4716_v22 = vpop.f32.mrf.mxu2  ;;  %v6018_v53 = vpop.f32.mrf.mxu3 }
 0x57c   :  { %v17369_v49 = vadd.f32 %v7317_v4, %v6305_v11 }
 0x57d   :  { %v3414_v14 = vpop.f32.mrf.mxu1 }
 0x57e   :  { %18832 = vst [vmem:[#allocation39_spill] sm:$0xff] %v17369_v49  ;;  %v3702_v19 = vadd.f32 %v3414_v14, %v18833_v24  ;;  %v7323_v54 = vpop.f32.mrf.mxu0  ;;  %v18835_v14 = vld [vmem:[#allocation51_spill] sm:$0xff] }
 0x57f   :  { %14213 = vmatmul.msk.f32.vlgmr.msra.gmra.mxu1 %vm39_vm0, %v7752_v50 }
 0x580   :  { %v5004_v12 = vadd.f32 %v4716_v22, %v3702_v19  ;;  %14344 = vmatmul.msk.f32.gmra.mxu2 %vm39_vm0, %v9055_v26  ;;  %14474 = vmatmul.msk.f32.gmra.mxu3 %vm39_vm0, %v10357_v0  ;;  %v11660_v26 = vld [vmem:[#allocation2 + $0x4a] sm:$0xff] }
 0x581   :  { %14604 = vmatmul.msk.f32.gmra.mxu0 %vm39_vm0, %v11659_v28 }
 0x582   :  { %v6306_v52 = vadd.f32 %v6018_v53, %v5004_v12 }
 0x583   :  { %v4719_v4 = vpop.f32.mrf.mxu2  ;;  %v6021_v7 = vpop.f32.mrf.mxu3 }
 0x584   :  { %v17376_v3 = vadd.f32 %v7320_v63, %v6306_v52  ;;  %v18837_v52 = vld [vmem:[#allocation54_spill] sm:$0xff] }
 0x585   :  { %v3417_v11 = vpop.f32.mrf.mxu1 }
 0x586   :  { %18834 = vst [vmem:[#allocation42_spill] sm:$0xff] %v17376_v3  ;;  %v3703_v24 = vadd.f32 %v3417_v11, %v18835_v14  ;;  %v7326_v49 = vpop.f32.mrf.mxu0  ;;  %v7754_v3 = vld [vmem:[#allocation2 + $0x49] sm:$0xff] }
 0x587   :  { %14214 = vmatmul.msk.f32.gmra.mxu1 %vm39_vm0, %v7753_v43 }
 0x588   :  { %v5005_v22 = vadd.f32 %v4719_v4, %v3703_v24  ;;  %14345 = vmatmul.msk.f32.gmra.mxu2 %vm39_vm0, %v10356_v18  ;;  %14475 = vmatmul.msk.f32.gmra.mxu3 %vm39_vm0, %v11658_v16  ;;  %v11661_v18 = vld [vmem:[#allocation2 + $0x52] sm:$0xff] }
 0x589   :  { %14605 = vmatmul.msk.f32.gmra.mxu0 %vm39_vm0, %v11660_v26 }
 0x58a   :  { %v6307_v53 = vadd.f32 %v6021_v7, %v5005_v22 }
 0x58b   :  { %v4722_v19 = vpop.f32.mrf.mxu2  ;;  %v6024_v50 = vpop.f32.mrf.mxu3 }
 0x58c   :  { %v17383_v63 = vadd.f32 %v7323_v54, %v6307_v53  ;;  %v18839_v53 = vld [vmem:[#allocation57_spill] sm:$0xff] }
 0x58d   :  { %v3420_v12 = vpop.f32.mrf.mxu1 }
 0x58e   :  { %18836 = vst [vmem:[#allocation45_spill] sm:$0xff] %v17383_v63  ;;  %v3704_v11 = vadd.f32 %v3420_v12, %v18837_v52  ;;  %v7329_v14 = vpop.f32.mrf.mxu0  ;;  %v7755_v63 = vld [vmem:[#allocation2 + $0x51] sm:$0xff] }
 0x58f   :  { %14215 = vmatmul.msk.f32.gmra.mxu1 %vm39_vm0, %v7754_v3 }
 0x590   :  { %v5006_v43 = vadd.f32 %v4722_v19, %v3704_v11  ;;  %14346 = vmatmul.msk.f32.gmra.mxu2 %vm39_vm0, %v10357_v0  ;;  %14476 = vmatmul.msk.f32.gmra.mxu3 %vm39_vm0, %v11659_v28  ;;  %v11662_v0 = vld [vmem:[#allocation2 + $0x62] sm:$0xff] }
 0x591   :  { %14606 = vmatmul.msk.f32.gmra.mxu0 %vm39_vm0, %v11661_v18 }
 0x592   :  { %v6308_v4 = vadd.f32 %v6024_v50, %v5006_v43 }
 0x593   :  { %v4725_v7 = vpop.f32.mrf.mxu2  ;;  %v6027_v24 = vpop.f32.mrf.mxu3 }
 0x594   :  { %v17390_v54 = vadd.f32 %v7326_v49, %v6308_v4  ;;  %v18841_v4 = vld [vmem:[#allocation60_spill] sm:$0xff] }
 0x595   :  { %v3423_v22 = vpop.f32.mrf.mxu1 }
 0x596   :  { %18838 = vst [vmem:[#allocation48_spill] sm:$0xff] %v17390_v54  ;;  %v3705_v12 = vadd.f32 %v3423_v22, %v18839_v53  ;;  %v7332_v52 = vpop.f32.mrf.mxu0  ;;  %v7756_v54 = vld [vmem:[#allocation2 + $0x61] sm:$0xff] }
 0x597   :  { %14216 = vmatmul.msk.f32.gmra.mxu1 %vm39_vm0, %v7755_v63 }
 0x598   :  { %v5007_v3 = vadd.f32 %v4725_v7, %v3705_v12  ;;  %14347 = vmatmul.msk.f32.gmra.mxu2 %vm39_vm0, %v11658_v16  ;;  %14477 = vmatmul.msk.f32.gmra.mxu3 %vm39_vm0, %v11660_v26  ;;  %v11663_v16 = vld [vmem:[#allocation2 + $0x6a] sm:$0xff] }
 0x599   :  { %14607 = vmatmul.msk.f32.gmra.mxu0 %vm39_vm0, %v11662_v0 }
 0x59a   :  { %v6309_v19 = vadd.f32 %v6027_v24, %v5007_v3 }
 0x59b   :  { %v4728_v50 = vpop.f32.mrf.mxu2  ;;  %v6030_v11 = vpop.f32.mrf.mxu3 }
 0x59c   :  { %v17397_v49 = vadd.f32 %v7329_v14, %v6309_v19  ;;  %v18843_v19 = vld [vmem:[#allocation63_spill] sm:$0xff] }
 0x59d   :  { %v3426_v43 = vpop.f32.mrf.mxu1 }
 0x59e   :  { %18840 = vst [vmem:[#allocation51_spill] sm:$0xff] %v17397_v49  ;;  %v3706_v22 = vadd.f32 %v3426_v43, %v18841_v4  ;;  %v7335_v53 = vpop.f32.mrf.mxu0  ;;  %v7757_v49 = vld [vmem:[#allocation2 + $0x69] sm:$0xff] }
 0x59f   :  { %14217 = vmatmul.msk.f32.gmra.mxu1 %vm39_vm0, %v7756_v54 }
 0x5a0   :  { %v5008_v63 = vadd.f32 %v4728_v50, %v3706_v22  ;;  %14348 = vmatmul.msk.f32.gmra.mxu2 %vm39_vm0, %v11659_v28  ;;  %14478 = vmatmul.msk.f32.gmra.mxu3 %vm39_vm0, %v11661_v18  ;;  %v11664_v28 = vld [vmem:[#allocation2 + $0x7a] sm:$0xff] }
 0x5a1   :  { %14608 = vmatmul.msk.f32.gmra.mxu0 %vm39_vm0, %v11663_v16 }
 0x5a2   :  { %v6310_v7 = vadd.f32 %v6030_v11, %v5008_v63 }
 0x5a3   :  { %v4731_v24 = vpop.f32.mrf.mxu2  ;;  %v6033_v12 = vpop.f32.mrf.mxu3 }
 0x5a4   :  { %v17404_v14 = vadd.f32 %v7332_v52, %v6310_v7  ;;  %v18845_v7 = vld [vmem:[#allocation66_spill] sm:$0xff] }
 0x5a5   :  { %v3429_v3 = vpop.f32.mrf.mxu1 }
 0x5a6   :  { %18842 = vst [vmem:[#allocation54_spill] sm:$0xff] %v17404_v14  ;;  %v3707_v43 = vadd.f32 %v3429_v3, %v18843_v19  ;;  %v7338_v4 = vpop.f32.mrf.mxu0  ;;  %v7758_v14 = vld [vmem:[#allocation2 + $0x79] sm:$0xff] }
 0x5a7   :  { %14218 = vmatmul.msk.f32.gmra.mxu1 %vm39_vm0, %v7757_v49 }
 0x5a8   :  { %v5009_v54 = vadd.f32 %v4731_v24, %v3707_v43  ;;  %14349 = vmatmul.msk.f32.gmra.mxu2 %vm39_vm0, %v11660_v26  ;;  %14479 = vmatmul.msk.f32.gmra.mxu3 %vm39_vm0, %v11662_v0  ;;  %v11665_v26 = vld [vmem:[#allocation2 + $0x82] sm:$0xff] }
 0x5a9   :  { %14609 = vmatmul.msk.f32.gmra.mxu0 %vm39_vm0, %v11664_v28 }
 0x5aa   :  { %v6311_v50 = vadd.f32 %v6033_v12, %v5009_v54 }
 0x5ab   :  { %v4734_v11 = vpop.f32.mrf.mxu2  ;;  %v6036_v22 = vpop.f32.mrf.mxu3 }
 0x5ac   :  { %v17411_v52 = vadd.f32 %v7335_v53, %v6311_v50  ;;  %v18847_v50 = vld [vmem:[#allocation69_spill] sm:$0xff] }
 0x5ad   :  { %v3432_v63 = vpop.f32.mrf.mxu1 }
 0x5ae   :  { %18844 = vst [vmem:[#allocation57_spill] sm:$0xff] %v17411_v52  ;;  %v3708_v3 = vadd.f32 %v3432_v63, %v18845_v7  ;;  %v7341_v19 = vpop.f32.mrf.mxu0  ;;  %v7759_v52 = vld [vmem:[#allocation2 + $0x81] sm:$0xff] }
 0x5af   :  { %14219 = vmatmul.msk.f32.gmra.mxu1 %vm39_vm0, %v7758_v14 }
 0x5b0   :  { %v5010_v49 = vadd.f32 %v4734_v11, %v3708_v3  ;;  %14350 = vmatmul.msk.f32.gmra.mxu2 %vm39_vm0, %v11661_v18  ;;  %14480 = vmatmul.msk.f32.gmra.mxu3 %vm39_vm0, %v11663_v16  ;;  %v11666_v18 = vld [vmem:[#allocation2 + $0x92] sm:$0xff] }
 0x5b1   :  { %14610 = vmatmul.msk.f32.gmra.mxu0 %vm39_vm0, %v11665_v26 }
 0x5b2   :  { %v6312_v24 = vadd.f32 %v6036_v22, %v5010_v49 }
 0x5b3   :  { %v4737_v12 = vpop.f32.mrf.mxu2  ;;  %v6039_v43 = vpop.f32.mrf.mxu3 }
 0x5b4   :  { %v17418_v53 = vadd.f32 %v7338_v4, %v6312_v24  ;;  %v18849_v24 = vld [vmem:[#allocation72_spill] sm:$0xff] }
 0x5b5   :  { %v3435_v54 = vpop.f32.mrf.mxu1 }
 0x5b6   :  { %18846 = vst [vmem:[#allocation60_spill] sm:$0xff] %v17418_v53  ;;  %v3709_v63 = vadd.f32 %v3435_v54, %v18847_v50  ;;  %v7344_v7 = vpop.f32.mrf.mxu0  ;;  %v7760_v53 = vld [vmem:[#allocation2 + $0x91] sm:$0xff] }
 0x5b7   :  { %14220 = vmatmul.msk.f32.gmra.mxu1 %vm39_vm0, %v7759_v52 }
 0x5b8   :  { %v5011_v14 = vadd.f32 %v4737_v12, %v3709_v63  ;;  %14351 = vmatmul.msk.f32.gmra.mxu2 %vm39_vm0, %v11662_v0  ;;  %14481 = vmatmul.msk.f32.gmra.mxu3 %vm39_vm0, %v11664_v28  ;;  %v11667_v0 = vld [vmem:[#allocation2 + $0x9a] sm:$0xff] }
 0x5b9   :  { %14611 = vmatmul.msk.f32.gmra.mxu0 %vm39_vm0, %v11666_v18 }
 0x5ba   :  { %v6313_v11 = vadd.f32 %v6039_v43, %v5011_v14 }
 0x5bb   :  { %v4740_v22 = vpop.f32.mrf.mxu2  ;;  %v6042_v3 = vpop.f32.mrf.mxu3 }
 0x5bc   :  { %v17425_v4 = vadd.f32 %v7341_v19, %v6313_v11  ;;  %v18851_v11 = vld [vmem:[#allocation75_spill] sm:$0xff] }
 0x5bd   :  { %v3438_v49 = vpop.f32.mrf.mxu1 }
 0x5be   :  { %18848 = vst [vmem:[#allocation63_spill] sm:$0xff] %v17425_v4  ;;  %v3710_v54 = vadd.f32 %v3438_v49, %v18849_v24  ;;  %v7347_v50 = vpop.f32.mrf.mxu0  ;;  %v7761_v4 = vld [vmem:[#allocation2 + $0x99] sm:$0xff] }
 0x5bf   :  { %14221 = vmatmul.msk.f32.gmra.mxu1 %vm39_vm0, %v7760_v53 }
 0x5c0   :  { %v5012_v52 = vadd.f32 %v4740_v22, %v3710_v54  ;;  %14352 = vmatmul.msk.f32.gmra.mxu2 %vm39_vm0, %v11663_v16  ;;  %14482 = vmatmul.msk.f32.gmra.mxu3 %vm39_vm0, %v11665_v26  ;;  %v11668_v16 = vld [vmem:[#allocation2 + $0xaa] sm:$0xff] }
 0x5c1   :  { %14612 = vmatmul.msk.f32.gmra.mxu0 %vm39_vm0, %v11667_v0 }
 0x5c2   :  { %v6314_v12 = vadd.f32 %v6042_v3, %v5012_v52 }
 0x5c3   :  { %v4743_v43 = vpop.f32.mrf.mxu2  ;;  %v6045_v63 = vpop.f32.mrf.mxu3 }
 0x5c4   :  { %v17432_v19 = vadd.f32 %v7344_v7, %v6314_v12  ;;  %v18853_v12 = vld [vmem:[#allocation78_spill] sm:$0xff] }
 0x5c5   :  { %v3441_v14 = vpop.f32.mrf.mxu1 }
 0x5c6   :  { %18850 = vst [vmem:[#allocation66_spill] sm:$0xff] %v17432_v19  ;;  %v3711_v49 = vadd.f32 %v3441_v14, %v18851_v11  ;;  %v7350_v24 = vpop.f32.mrf.mxu0  ;;  %v7762_v19 = vld [vmem:[#allocation2 + $0xa9] sm:$0xff] }
 0x5c7   :  { %14222 = vmatmul.msk.f32.gmra.mxu1 %vm39_vm0, %v7761_v4 }
 0x5c8   :  { %v5013_v53 = vadd.f32 %v4743_v43, %v3711_v49  ;;  %14353 = vmatmul.msk.f32.gmra.mxu2 %vm39_vm0, %v11664_v28  ;;  %14483 = vmatmul.msk.f32.gmra.mxu3 %vm39_vm0, %v11666_v18  ;;  %v11669_v28 = vld [vmem:[#allocation2 + $0xb2] sm:$0xff] }
 0x5c9   :  { %14613 = vmatmul.msk.f32.gmra.mxu0 %vm39_vm0, %v11668_v16 }
 0x5ca   :  { %v6315_v22 = vadd.f32 %v6045_v63, %v5013_v53 }
 0x5cb   :  { %v4746_v3 = vpop.f32.mrf.mxu2  ;;  %v6048_v54 = vpop.f32.mrf.mxu3 }
 0x5cc   :  { %v17439_v7 = vadd.f32 %v7347_v50, %v6315_v22  ;;  %v18855_v22 = vld [vmem:[#allocation81_spill] sm:$0xff] }
 0x5cd   :  { %v3444_v52 = vpop.f32.mrf.mxu1 }
 0x5ce   :  { %18852 = vst [vmem:[#allocation69_spill] sm:$0xff] %v17439_v7  ;;  %v3712_v14 = vadd.f32 %v3444_v52, %v18853_v12  ;;  %v7353_v11 = vpop.f32.mrf.mxu0  ;;  %v7763_v7 = vld [vmem:[#allocation2 + $0xb1] sm:$0xff] }
 0x5cf   :  { %14223 = vmatmul.msk.f32.gmra.mxu1 %vm39_vm0, %v7762_v19 }
 0x5d0   :  { %v5014_v4 = vadd.f32 %v4746_v3, %v3712_v14  ;;  %14354 = vmatmul.msk.f32.gmra.mxu2 %vm39_vm0, %v11665_v26  ;;  %14484 = vmatmul.msk.f32.gmra.mxu3 %vm39_vm0, %v11667_v0  ;;  %v11670_v26 = vld [vmem:[#allocation2 + $0xc2] sm:$0xff] }
 0x5d1   :  { %14614 = vmatmul.msk.f32.gmra.mxu0 %vm39_vm0, %v11669_v28 }
 0x5d2   :  { %v6316_v43 = vadd.f32 %v6048_v54, %v5014_v4 }
 0x5d3   :  { %v4749_v63 = vpop.f32.mrf.mxu2  ;;  %v6051_v49 = vpop.f32.mrf.mxu3 }
 0x5d4   :  { %v17446_v50 = vadd.f32 %v7350_v24, %v6316_v43  ;;  %v18857_v43 = vld [vmem:[#allocation84_spill] sm:$0xff] }
 0x5d5   :  { %v3447_v53 = vpop.f32.mrf.mxu1 }
 0x5d6   :  { %18854 = vst [vmem:[#allocation72_spill] sm:$0xff] %v17446_v50  ;;  %v3713_v52 = vadd.f32 %v3447_v53, %v18855_v22  ;;  %v7356_v12 = vpop.f32.mrf.mxu0  ;;  %v7764_v50 = vld [vmem:[#allocation2 + $0xc1] sm:$0xff] }
 0x5d7   :  { %14224 = vmatmul.msk.f32.gmra.mxu1 %vm39_vm0, %v7763_v7 }
 0x5d8   :  { %v5015_v19 = vadd.f32 %v4749_v63, %v3713_v52  ;;  %14355 = vmatmul.msk.f32.gmra.mxu2 %vm39_vm0, %v11666_v18  ;;  %14485 = vmatmul.msk.f32.gmra.mxu3 %vm39_vm0, %v11668_v16  ;;  %v11671_v18 = vld [vmem:[#allocation2 + $0xca] sm:$0xff] }
 0x5d9   :  { %14615 = vmatmul.msk.f32.gmra.mxu0 %vm39_vm0, %v11670_v26 }
 0x5da   :  { %v6317_v3 = vadd.f32 %v6051_v49, %v5015_v19 }
 0x5db   :  { %v4752_v54 = vpop.f32.mrf.mxu2  ;;  %v6054_v14 = vpop.f32.mrf.mxu3 }
 0x5dc   :  { %v17453_v24 = vadd.f32 %v7353_v11, %v6317_v3  ;;  %v18859_v3 = vld [vmem:[#allocation87_spill] sm:$0xff] }
 0x5dd   :  { %v3450_v4 = vpop.f32.mrf.mxu1 }
 0x5de   :  { %18856 = vst [vmem:[#allocation75_spill] sm:$0xff] %v17453_v24  ;;  %v3714_v53 = vadd.f32 %v3450_v4, %v18857_v43  ;;  %v7359_v22 = vpop.f32.mrf.mxu0  ;;  %v7765_v24 = vld [vmem:[#allocation2 + $0xc9] sm:$0xff] }
 0x5df   :  { %14225 = vmatmul.msk.f32.gmra.mxu1 %vm39_vm0, %v7764_v50 }
 0x5e0   :  { %v5016_v7 = vadd.f32 %v4752_v54, %v3714_v53  ;;  %14356 = vmatmul.msk.f32.gmra.mxu2 %vm39_vm0, %v11667_v0  ;;  %14486 = vmatmul.msk.f32.gmra.mxu3 %vm39_vm0, %v11669_v28  ;;  %v11672_v0 = vld [vmem:[#allocation2 + $0xda] sm:$0xff] }
 0x5e1   :  { %14616 = vmatmul.msk.f32.gmra.mxu0 %vm39_vm0, %v11671_v18 }
 0x5e2   :  { %v6318_v63 = vadd.f32 %v6054_v14, %v5016_v7 }
 0x5e3   :  { %v4755_v49 = vpop.f32.mrf.mxu2  ;;  %v6057_v52 = vpop.f32.mrf.mxu3 }
 0x5e4   :  { %v17460_v11 = vadd.f32 %v7356_v12, %v6318_v63  ;;  %v18861_v63 = vld [vmem:[#allocation90_spill] sm:$0xff] }
 0x5e5   :  { %v3453_v19 = vpop.f32.mrf.mxu1 }
 0x5e6   :  { %18858 = vst [vmem:[#allocation78_spill] sm:$0xff] %v17460_v11  ;;  %v3715_v4 = vadd.f32 %v3453_v19, %v18859_v3  ;;  %v7362_v43 = vpop.f32.mrf.mxu0  ;;  %v7766_v11 = vld [vmem:[#allocation2 + $0xd9] sm:$0xff] }
 0x5e7   :  { %14226 = vmatmul.msk.f32.gmra.mxu1 %vm39_vm0, %v7765_v24 }
 0x5e8   :  { %v5017_v50 = vadd.f32 %v4755_v49, %v3715_v4  ;;  %14357 = vmatmul.msk.f32.gmra.mxu2 %vm39_vm0, %v11668_v16  ;;  %14487 = vmatmul.msk.f32.gmra.mxu3 %vm39_vm0, %v11670_v26  ;;  %v11673_v16 = vld [vmem:[#allocation2 + $0xe2] sm:$0xff] }
 0x5e9   :  { %14617 = vmatmul.msk.f32.gmra.mxu0 %vm39_vm0, %v11672_v0 }
 0x5ea   :  { %v6319_v54 = vadd.f32 %v6057_v52, %v5017_v50 }
 0x5eb   :  { %v4758_v14 = vpop.f32.mrf.mxu2  ;;  %v6060_v53 = vpop.f32.mrf.mxu3 }
 0x5ec   :  { %v17467_v12 = vadd.f32 %v7359_v22, %v6319_v54  ;;  %v18863_v54 = vld [vmem:[#allocation93_spill] sm:$0xff] }
 0x5ed   :  { %v3456_v7 = vpop.f32.mrf.mxu1 }
 0x5ee   :  { %18860 = vst [vmem:[#allocation81_spill] sm:$0xff] %v17467_v12  ;;  %v3716_v19 = vadd.f32 %v3456_v7, %v18861_v63  ;;  %v7365_v3 = vpop.f32.mrf.mxu0  ;;  %v7767_v12 = vld [vmem:[#allocation2 + $0xe1] sm:$0xff] }
 0x5ef   :  { %14227 = vmatmul.msk.f32.gmra.mxu1 %vm39_vm0, %v7766_v11 }
 0x5f0   :  { %v5018_v24 = vadd.f32 %v4758_v14, %v3716_v19  ;;  %14358 = vmatmul.msk.f32.gmra.mxu2 %vm39_vm0, %v11669_v28  ;;  %14488 = vmatmul.msk.f32.gmra.mxu3 %vm39_vm0, %v11671_v18  ;;  %v11674_v28 = vld [vmem:[#allocation2 + $0xf2] sm:$0xff] }
 0x5f1   :  { %14618 = vmatmul.msk.f32.gmra.mxu0 %vm39_vm0, %v11673_v16 }
 0x5f2   :  { %v6320_v49 = vadd.f32 %v6060_v53, %v5018_v24 }
 0x5f3   :  { %v4761_v52 = vpop.f32.mrf.mxu2  ;;  %v6063_v4 = vpop.f32.mrf.mxu3 }
 0x5f4   :  { %v17474_v22 = vadd.f32 %v7362_v43, %v6320_v49 }
 0x5f5   :  { %v3459_v50 = vpop.f32.mrf.mxu1 }
 0x5f6   :  { %18862 = vst [vmem:[#allocation84_spill] sm:$0xff] %v17474_v22  ;;  %v3717_v7 = vadd.f32 %v3459_v50, %v18863_v54  ;;  %v12192_v63 = vpop.f32.mrf.mxu0  ;;  %v7768_v54 = vld [vmem:[#allocation2 + $0xf1] sm:$0xff]  ;;  %v7811_v22 = vld [vmem:[#allocation2 + $0x321] sm:$0xff] }
 0x5f7   :  { %14228 = vmatmul.msk.f32.gmra.mxu1 %vm39_vm0, %v7767_v12 }
 0x5f8   :  { %v5019_v11 = vadd.f32 %v4761_v52, %v3717_v7  ;;  %14359 = vmatmul.msk.f32.gmra.mxu2 %vm39_vm0, %v11670_v26  ;;  %14489 = vmatmul.msk.f32.gmra.mxu3 %vm39_vm0, %v11672_v0  ;;  %v11675_v26 = vld [vmem:[#allocation2 + $0xfa] sm:$0xff] }
 0x5f9   :  { %14619 = vmatmul.msk.f32.gmra.mxu0 %vm39_vm0, %v11674_v28 }
 0x5fa   :  { %v6321_v14 = vadd.f32 %v6063_v4, %v5019_v11 }
 0x5fb   :  { %v9588_v53 = vpop.f32.mrf.mxu2  ;;  %v10890_v19 = vpop.f32.mrf.mxu3 }
 0x5fc   :  { %v17481_v43 = vadd.f32 %v7365_v3, %v6321_v14 }
 0x5fd   :  { %v8286_v24 = vpop.f32.mrf.mxu1 }
 0x5fe   :  { %18864 = vst [vmem:[#allocation87_spill] sm:$0xff] %v17481_v43  ;;  %v8798_v49 = vadd.f32 %v8286_v24, %v16532_v48  ;;  %v12195_v50 = vpop.f32.mrf.mxu0  ;;  %v7769_v24 = vld [vmem:[#allocation2 + $0xf9] sm:$0xff] }
 0x5ff   :  { %14229 = vmatmul.msk.f32.gmra.mxu1 %vm39_vm0, %v7768_v54  ;;  %v7810_v43 = vld [vmem:[#allocation2 + $0x319] sm:$0xff] }
 0x600   :  { %v10100_v12 = vadd.f32 %v9588_v53, %v8798_v49  ;;  %14360 = vmatmul.msk.f32.gmra.mxu2 %vm39_vm0, %v11671_v18  ;;  %14490 = vmatmul.msk.f32.gmra.mxu3 %vm39_vm0, %v11673_v16  ;;  %v11676_v18 = vld [vmem:[#allocation2 + $0x10a] sm:$0xff] }
 0x601   :  { %14620 = vmatmul.msk.f32.gmra.mxu0 %vm39_vm0, %v11675_v26 }
 0x602   :  { %v11402_v52 = vadd.f32 %v10890_v19, %v10100_v12 }
 0x603   :  { %v9591_v4 = vpop.f32.mrf.mxu2  ;;  %v10893_v7 = vpop.f32.mrf.mxu3 }
 0x604   :  { %v17488_v3 = vadd.f32 %v12192_v63, %v11402_v52 }
 0x605   :  { %v8289_v11 = vpop.f32.mrf.mxu1 }
 0x606   :  { %v8799_v48 = vadd.f32 %v8289_v11, %v16539_v20  ;;  %v12198_v14 = vpop.f32.mrf.mxu0  ;;  %v7770_v11 = vld [vmem:[#allocation2 + $0x109] sm:$0xff] }
 0x607   :  { %14230 = vmatmul.msk.f32.gmra.mxu1 %vm39_vm0, %v7769_v24 }
 0x608   :  { %v10101_v53 = vadd.f32 %v9591_v4, %v8799_v48  ;;  %14361 = vmatmul.msk.f32.gmra.mxu2 %vm39_vm0, %v11672_v0  ;;  %14491 = vmatmul.msk.f32.gmra.mxu3 %vm39_vm0, %v11674_v28  ;;  %v11677_v0 = vld [vmem:[#allocation2 + $0x112] sm:$0xff] }
 0x609   :  { %14621 = vmatmul.msk.f32.gmra.mxu0 %vm39_vm0, %v11676_v18 }
 0x60a   :  { %v11403_v19 = vadd.f32 %v10893_v7, %v10101_v53 }
 0x60b   :  { %v9594_v49 = vpop.f32.mrf.mxu2  ;;  %v10896_v54 = vpop.f32.mrf.mxu3 }
 0x60c   :  { %v17495_v63 = vadd.f32 %v12195_v50, %v11403_v19 }
 0x60d   :  { %v8292_v12 = vpop.f32.mrf.mxu1 }
 0x60e   :  { %v8800_v20 = vadd.f32 %v8292_v12, %v16546_v45  ;;  %v12201_v52 = vpop.f32.mrf.mxu0  ;;  %v7771_v12 = vld [vmem:[#allocation2 + $0x111] sm:$0xff] }
 0x60f   :  { %14231 = vmatmul.msk.f32.gmra.mxu1 %vm39_vm0, %v7770_v11 }
 0x610   :  { %v10102_v4 = vadd.f32 %v9594_v49, %v8800_v20  ;;  %14362 = vmatmul.msk.f32.gmra.mxu2 %vm39_vm0, %v11673_v16  ;;  %14492 = vmatmul.msk.f32.gmra.mxu3 %vm39_vm0, %v11675_v26  ;;  %v11678_v16 = vld [vmem:[#allocation2 + $0x122] sm:$0xff] }
 0x611   :  { %14622 = vmatmul.msk.f32.gmra.mxu0 %vm39_vm0, %v11677_v0 }
 0x612   :  { %v11404_v7 = vadd.f32 %v10896_v54, %v10102_v4 }
 0x613   :  { %v9597_v48 = vpop.f32.mrf.mxu2  ;;  %v10899_v24 = vpop.f32.mrf.mxu3 }
 0x614   :  { %v17502_v50 = vadd.f32 %v12198_v14, %v11404_v7 }
 0x615   :  { %v8295_v53 = vpop.f32.mrf.mxu1 }
 0x616   :  { %v8801_v45 = vadd.f32 %v8295_v53, %v16553_v41  ;;  %v12204_v19 = vpop.f32.mrf.mxu0  ;;  %v7772_v53 = vld [vmem:[#allocation2 + $0x121] sm:$0xff] }
 0x617   :  { %14232 = vmatmul.msk.f32.gmra.mxu1 %vm39_vm0, %v7771_v12 }
 0x618   :  { %v10103_v49 = vadd.f32 %v9597_v48, %v8801_v45  ;;  %14363 = vmatmul.msk.f32.gmra.mxu2 %vm39_vm0, %v11674_v28  ;;  %14493 = vmatmul.msk.f32.gmra.mxu3 %vm39_vm0, %v11676_v18  ;;  %v11679_v28 = vld [vmem:[#allocation2 + $0x12a] sm:$0xff] }
 0x619   :  { %14623 = vmatmul.msk.f32.gmra.mxu0 %vm39_vm0, %v11678_v16 }
 0x61a   :  { %v11405_v54 = vadd.f32 %v10899_v24, %v10103_v49 }
 0x61b   :  { %v9600_v20 = vpop.f32.mrf.mxu2  ;;  %v10902_v11 = vpop.f32.mrf.mxu3 }
 0x61c   :  { %v17509_v14 = vadd.f32 %v12201_v52, %v11405_v54 }
 0x61d   :  { %v8298_v4 = vpop.f32.mrf.mxu1 }
 0x61e   :  { %v8802_v41 = vadd.f32 %v8298_v4, %v16560_v21  ;;  %v12207_v7 = vpop.f32.mrf.mxu0  ;;  %v7773_v4 = vld [vmem:[#allocation2 + $0x129] sm:$0xff] }
 0x61f   :  { %14233 = vmatmul.msk.f32.gmra.mxu1 %vm39_vm0, %v7772_v53 }
 0x620   :  { %v10104_v48 = vadd.f32 %v9600_v20, %v8802_v41  ;;  %14364 = vmatmul.msk.f32.gmra.mxu2 %vm39_vm0, %v11675_v26  ;;  %14494 = vmatmul.msk.f32.gmra.mxu3 %vm39_vm0, %v11677_v0  ;;  %v11680_v26 = vld [vmem:[#allocation2 + $0x13a] sm:$0xff] }
 0x621   :  { %14624 = vmatmul.msk.f32.gmra.mxu0 %vm39_vm0, %v11679_v28 }
 0x622   :  { %v11406_v24 = vadd.f32 %v10902_v11, %v10104_v48 }
 0x623   :  { %v9603_v45 = vpop.f32.mrf.mxu2  ;;  %v10905_v12 = vpop.f32.mrf.mxu3 }
 0x624   :  { %v17516_v52 = vadd.f32 %v12204_v19, %v11406_v24 }
 0x625   :  { %v8301_v49 = vpop.f32.mrf.mxu1 }
 0x626   :  { %v8803_v21 = vadd.f32 %v8301_v49, %v16567_v9  ;;  %v12210_v54 = vpop.f32.mrf.mxu0  ;;  %v7774_v49 = vld [vmem:[#allocation2 + $0x139] sm:$0xff] }
 0x627   :  { %14234 = vmatmul.msk.f32.gmra.mxu1 %vm39_vm0, %v7773_v4 }
 0x628   :  { %v10105_v20 = vadd.f32 %v9603_v45, %v8803_v21  ;;  %14365 = vmatmul.msk.f32.gmra.mxu2 %vm39_vm0, %v11676_v18  ;;  %14495 = vmatmul.msk.f32.gmra.mxu3 %vm39_vm0, %v11678_v16  ;;  %v11681_v18 = vld [vmem:[#allocation2 + $0x142] sm:$0xff] }
 0x629   :  { %14625 = vmatmul.msk.f32.gmra.mxu0 %vm39_vm0, %v11680_v26 }
 0x62a   :  { %v11407_v11 = vadd.f32 %v10905_v12, %v10105_v20 }
 0x62b   :  { %v9606_v41 = vpop.f32.mrf.mxu2  ;;  %v10908_v53 = vpop.f32.mrf.mxu3 }
 0x62c   :  { %v17523_v19 = vadd.f32 %v12207_v7, %v11407_v11 }
 0x62d   :  { %v8304_v48 = vpop.f32.mrf.mxu1 }
 0x62e   :  { %v8804_v9 = vadd.f32 %v8304_v48, %v16575_v51  ;;  %v12213_v24 = vpop.f32.mrf.mxu0  ;;  %v7775_v48 = vld [vmem:[#allocation2 + $0x141] sm:$0xff] }
 0x62f   :  { %14235 = vmatmul.msk.f32.gmra.mxu1 %vm39_vm0, %v7774_v49 }
 0x630   :  { %v10106_v45 = vadd.f32 %v9606_v41, %v8804_v9  ;;  %14366 = vmatmul.msk.f32.gmra.mxu2 %vm39_vm0, %v11677_v0  ;;  %14496 = vmatmul.msk.f32.gmra.mxu3 %vm39_vm0, %v11679_v28  ;;  %v11682_v0 = vld [vmem:[#allocation2 + $0x152] sm:$0xff] }
 0x631   :  { %14626 = vmatmul.msk.f32.gmra.mxu0 %vm39_vm0, %v11681_v18 }
 0x632   :  { %v11408_v12 = vadd.f32 %v10908_v53, %v10106_v45 }
 0x633   :  { %v9609_v21 = vpop.f32.mrf.mxu2  ;;  %v10911_v4 = vpop.f32.mrf.mxu3 }
 0x634   :  { %v17530_v7 = vadd.f32 %v12210_v54, %v11408_v12 }
 0x635   :  { %v8307_v20 = vpop.f32.mrf.mxu1 }
 0x636   :  { %v8805_v51 = vadd.f32 %v8307_v20, %v16583_v27  ;;  %v12216_v11 = vpop.f32.mrf.mxu0  ;;  %v7776_v20 = vld [vmem:[#allocation2 + $0x151] sm:$0xff] }
 0x637   :  { %14236 = vmatmul.msk.f32.gmra.mxu1 %vm39_vm0, %v7775_v48 }
 0x638   :  { %v10107_v41 = vadd.f32 %v9609_v21, %v8805_v51  ;;  %14367 = vmatmul.msk.f32.gmra.mxu2 %vm39_vm0, %v11678_v16  ;;  %14497 = vmatmul.msk.f32.gmra.mxu3 %vm39_vm0, %v11680_v26  ;;  %v11683_v16 = vld [vmem:[#allocation2 + $0x15a] sm:$0xff] }
 0x639   :  { %14627 = vmatmul.msk.f32.gmra.mxu0 %vm39_vm0, %v11682_v0 }
 0x63a   :  { %v11409_v53 = vadd.f32 %v10911_v4, %v10107_v41 }
 0x63b   :  { %v9612_v9 = vpop.f32.mrf.mxu2  ;;  %v10914_v49 = vpop.f32.mrf.mxu3 }
 0x63c   :  { %v17537_v54 = vadd.f32 %v12213_v24, %v11409_v53 }
 0x63d   :  { %v8310_v45 = vpop.f32.mrf.mxu1 }
 0x63e   :  { %v8806_v27 = vadd.f32 %v8310_v45, %v16591_v31  ;;  %v12219_v12 = vpop.f32.mrf.mxu0  ;;  %v7777_v45 = vld [vmem:[#allocation2 + $0x159] sm:$0xff] }
 0x63f   :  { %14237 = vmatmul.msk.f32.gmra.mxu1 %vm39_vm0, %v7776_v20 }
 0x640   :  { %v10108_v21 = vadd.f32 %v9612_v9, %v8806_v27  ;;  %14368 = vmatmul.msk.f32.gmra.mxu2 %vm39_vm0, %v11679_v28  ;;  %14498 = vmatmul.msk.f32.gmra.mxu3 %vm39_vm0, %v11681_v18  ;;  %v11684_v28 = vld [vmem:[#allocation2 + $0x16a] sm:$0xff] }
 0x641   :  { %14628 = vmatmul.msk.f32.gmra.mxu0 %vm39_vm0, %v11683_v16 }
 0x642   :  { %v11410_v4 = vadd.f32 %v10914_v49, %v10108_v21 }
 0x643   :  { %v9615_v51 = vpop.f32.mrf.mxu2  ;;  %v10917_v48 = vpop.f32.mrf.mxu3 }
 0x644   :  { %v17544_v24 = vadd.f32 %v12216_v11, %v11410_v4 }
 0x645   :  { %v8313_v41 = vpop.f32.mrf.mxu1 }
 0x646   :  { %v8807_v31 = vadd.f32 %v8313_v41, %v16599_v5  ;;  %v12222_v53 = vpop.f32.mrf.mxu0  ;;  %v7778_v41 = vld [vmem:[#allocation2 + $0x169] sm:$0xff] }
 0x647   :  { %14238 = vmatmul.msk.f32.gmra.mxu1 %vm39_vm0, %v7777_v45 }
 0x648   :  { %v10109_v9 = vadd.f32 %v9615_v51, %v8807_v31  ;;  %14369 = vmatmul.msk.f32.gmra.mxu2 %vm39_vm0, %v11680_v26  ;;  %14499 = vmatmul.msk.f32.gmra.mxu3 %vm39_vm0, %v11682_v0  ;;  %v11685_v26 = vld [vmem:[#allocation2 + $0x172] sm:$0xff] }
 0x649   :  { %14629 = vmatmul.msk.f32.gmra.mxu0 %vm39_vm0, %v11684_v28 }
 0x64a   :  { %v11411_v49 = vadd.f32 %v10917_v48, %v10109_v9 }
 0x64b   :  { %v9618_v27 = vpop.f32.mrf.mxu2  ;;  %v10920_v20 = vpop.f32.mrf.mxu3 }
 0x64c   :  { %v17551_v11 = vadd.f32 %v12219_v12, %v11411_v49 }
 0x64d   :  { %v8316_v21 = vpop.f32.mrf.mxu1 }
 0x64e   :  { %v8808_v5 = vadd.f32 %v8316_v21, %v16608_v38  ;;  %v12225_v4 = vpop.f32.mrf.mxu0  ;;  %v7779_v21 = vld [vmem:[#allocation2 + $0x171] sm:$0xff] }
 0x64f   :  { %14239 = vmatmul.msk.f32.gmra.mxu1 %vm39_vm0, %v7778_v41 }
 0x650   :  { %v10110_v51 = vadd.f32 %v9618_v27, %v8808_v5  ;;  %14370 = vmatmul.msk.f32.gmra.mxu2 %vm39_vm0, %v11681_v18  ;;  %14500 = vmatmul.msk.f32.gmra.mxu3 %vm39_vm0, %v11683_v16  ;;  %v11686_v18 = vld [vmem:[#allocation2 + $0x182] sm:$0xff] }
 0x651   :  { %14630 = vmatmul.msk.f32.gmra.mxu0 %vm39_vm0, %v11685_v26 }
 0x652   :  { %v11412_v48 = vadd.f32 %v10920_v20, %v10110_v51 }
 0x653   :  { %v9621_v31 = vpop.f32.mrf.mxu2  ;;  %v10923_v45 = vpop.f32.mrf.mxu3 }
 0x654   :  { %v17558_v12 = vadd.f32 %v12222_v53, %v11412_v48 }
 0x655   :  { %v8319_v9 = vpop.f32.mrf.mxu1 }
 0x656   :  { %v8809_v38 = vadd.f32 %v8319_v9, %v16619_v8  ;;  %v12228_v49 = vpop.f32.mrf.mxu0  ;;  %v7780_v9 = vld [vmem:[#allocation2 + $0x181] sm:$0xff] }
 0x657   :  { %14240 = vmatmul.msk.f32.gmra.mxu1 %vm39_vm0, %v7779_v21 }
 0x658   :  { %v10111_v27 = vadd.f32 %v9621_v31, %v8809_v38  ;;  %14371 = vmatmul.msk.f32.gmra.mxu2 %vm39_vm0, %v11682_v0  ;;  %14501 = vmatmul.msk.f32.gmra.mxu3 %vm39_vm0, %v11684_v28  ;;  %v11687_v0 = vld [vmem:[#allocation2 + $0x18a] sm:$0xff] }
 0x659   :  { %14631 = vmatmul.msk.f32.gmra.mxu0 %vm39_vm0, %v11686_v18 }
 0x65a   :  { %v11413_v20 = vadd.f32 %v10923_v45, %v10111_v27 }
 0x65b   :  { %v9624_v5 = vpop.f32.mrf.mxu2  ;;  %v10926_v41 = vpop.f32.mrf.mxu3 }
 0x65c   :  { %v17565_v53 = vadd.f32 %v12225_v4, %v11413_v20 }
 0x65d   :  { %v8322_v51 = vpop.f32.mrf.mxu1 }
 0x65e   :  { %v8810_v8 = vadd.f32 %v8322_v51, %v16627_v59  ;;  %v12231_v48 = vpop.f32.mrf.mxu0  ;;  %v7781_v51 = vld [vmem:[#allocation2 + $0x189] sm:$0xff] }
 0x65f   :  { %14241 = vmatmul.msk.f32.gmra.mxu1 %vm39_vm0, %v7780_v9 }
 0x660   :  { %v10112_v31 = vadd.f32 %v9624_v5, %v8810_v8  ;;  %14372 = vmatmul.msk.f32.gmra.mxu2 %vm39_vm0, %v11683_v16  ;;  %14502 = vmatmul.msk.f32.gmra.mxu3 %vm39_vm0, %v11685_v26  ;;  %v11688_v16 = vld [vmem:[#allocation2 + $0x19a] sm:$0xff] }
 0x661   :  { %14632 = vmatmul.msk.f32.gmra.mxu0 %vm39_vm0, %v11687_v0 }
 0x662   :  { %v11414_v45 = vadd.f32 %v10926_v41, %v10112_v31 }
 0x663   :  { %v9627_v38 = vpop.f32.mrf.mxu2  ;;  %v10929_v21 = vpop.f32.mrf.mxu3 }
 0x664   :  { %v17572_v4 = vadd.f32 %v12228_v49, %v11414_v45 }
 0x665   :  { %v8325_v27 = vpop.f32.mrf.mxu1 }
 0x666   :  { %v8811_v59 = vadd.f32 %v8325_v27, %v16635_v36  ;;  %v12234_v20 = vpop.f32.mrf.mxu0  ;;  %v7782_v27 = vld [vmem:[#allocation2 + $0x199] sm:$0xff] }
 0x667   :  { %14242 = vmatmul.msk.f32.gmra.mxu1 %vm39_vm0, %v7781_v51 }
 0x668   :  { %v10113_v5 = vadd.f32 %v9627_v38, %v8811_v59  ;;  %14373 = vmatmul.msk.f32.gmra.mxu2 %vm39_vm0, %v11684_v28  ;;  %14503 = vmatmul.msk.f32.gmra.mxu3 %vm39_vm0, %v11686_v18  ;;  %v11689_v28 = vld [vmem:[#allocation2 + $0x1a2] sm:$0xff] }
 0x669   :  { %14633 = vmatmul.msk.f32.gmra.mxu0 %vm39_vm0, %v11688_v16 }
 0x66a   :  { %v11415_v41 = vadd.f32 %v10929_v21, %v10113_v5  ;;  %v9086_v5 = vld [vmem:[#allocation2 + $0x1b2] sm:$0xff] }
 0x66b   :  { %v9630_v8 = vpop.f32.mrf.mxu2  ;;  %v10932_v9 = vpop.f32.mrf.mxu3 }
 0x66c   :  { %v17579_v49 = vadd.f32 %v12231_v48, %v11415_v41  ;;  %v7783_v41 = vld [vmem:[#allocation2 + $0x1a1] sm:$0xff] }
 0x66d   :  { %v8328_v31 = vpop.f32.mrf.mxu1 }
 0x66e   :  { %v8812_v36 = vadd.f32 %v8328_v31, %v16642_v37  ;;  %v12237_v45 = vpop.f32.mrf.mxu0 }
 0x66f   :  { %14243 = vmatmul.msk.f32.gmra.mxu1 %vm39_vm0, %v7782_v27 }
 0x670   :  { %v10114_v38 = vadd.f32 %v9630_v8, %v8812_v36  ;;  %14374 = vmatmul.msk.f32.gmra.mxu2 %vm39_vm0, %v11685_v26  ;;  %14504 = vmatmul.msk.f32.gmra.mxu3 %vm39_vm0, %v11687_v0  ;;  %v10388_v8 = vld [vmem:[#allocation2 + $0x1ca] sm:$0xff]  ;;  %v11690_v0 = vld [vmem:[#allocation2 + $0x1e2] sm:$0xff] }
 0x671   :  { %14634 = vmatmul.msk.f32.gmra.mxu0 %vm39_vm0, %v11689_v28 }
 0x672   :  { %v11416_v18 = vadd.f32 %v10932_v9, %v10114_v38 }
 0x673   :  { %v9633_v21 = vpop.f32.mrf.mxu2  ;;  %v10935_v59 = vpop.f32.mrf.mxu3 }
 0x674   :  { %v17586_v48 = vadd.f32 %v12234_v20, %v11416_v18  ;;  %v7784_v18 = vld [vmem:[#allocation2 + $0x1e1] sm:$0xff] }
 0x675   :  { %v8331_v51 = vpop.f32.mrf.mxu1 }
 0x676   :  { %v8813_v37 = vadd.f32 %v8331_v51, %v16649_v42  ;;  %v12240_v16 = vpop.f32.mrf.mxu0  ;;  %v9087_v42 = vld [vmem:[#allocation2 + $0x1ba] sm:$0xff] }
 0x677   :  { %14244 = vmatmul.msk.f32.gmra.mxu1 %vm39_vm0, %v7783_v41 }
 0x678   :  { %v10115_v26 = vadd.f32 %v9633_v21, %v8813_v37  ;;  %14375 = vmatmul.msk.f32.gmra.mxu2 %vm39_vm0, %v9086_v5  ;;  %14505 = vmatmul.msk.f32.gmra.mxu3 %vm39_vm0, %v10388_v8  ;;  %v10389_v21 = vld [vmem:[#allocation2 + $0x1d2] sm:$0xff]  ;;  %v11691_v5 = vld [vmem:[#allocation2 + $0x1ea] sm:$0xff] }
 0x679   :  { %14635 = vmatmul.msk.f32.gmra.mxu0 %vm39_vm0, %v11690_v0 }
 0x67a   :  { %v11417_v9 = vadd.f32 %v10935_v59, %v10115_v26 }
 0x67b   :  { %v9636_v20 = vpop.f32.mrf.mxu2  ;;  %v10938_v31 = vpop.f32.mrf.mxu3 }
 0x67c   :  { %v17593_v36 = vadd.f32 %v12237_v45, %v11417_v9 }
 0x67d   :  { %v8334_v27 = vpop.f32.mrf.mxu1 }
 0x67e   :  { %v8814_v38 = vadd.f32 %v8334_v27, %v16656_v33  ;;  %v12243_v28 = vpop.f32.mrf.mxu0  ;;  %v7785_v27 = vld [vmem:[#allocation2 + $0x1e9] sm:$0xff] }
 0x67f   :  { %14245 = vmatmul.msk.f32.gmra.mxu1 %vm39_vm0, %v7784_v18 }
 0x680   :  { %v10116_v51 = vadd.f32 %v9636_v20, %v8814_v38  ;;  %14376 = vmatmul.msk.f32.gmra.mxu2 %vm39_vm0, %v9087_v42  ;;  %14506 = vmatmul.msk.f32.gmra.mxu3 %vm39_vm0, %v10389_v21  ;;  %v11692_v42 = vld [vmem:[#allocation2 + $0x1fa] sm:$0xff] }
 0x681   :  { %14636 = vmatmul.msk.f32.gmra.mxu0 %vm39_vm0, %v11691_v5 }
 0x682   :  { %v11418_v59 = vadd.f32 %v10938_v31, %v10116_v51 }
 0x683   :  { %v9639_v45 = vpop.f32.mrf.mxu2  ;;  %v10941_v37 = vpop.f32.mrf.mxu3 }
 0x684   :  { %v17600_v41 = vadd.f32 %v12240_v16, %v11418_v59 }
 0x685   :  { %v8337_v26 = vpop.f32.mrf.mxu1 }
 0x686   :  { %v8815_v33 = vadd.f32 %v8337_v26, %v16663_v40  ;;  %v12246_v9 = vpop.f32.mrf.mxu0  ;;  %v7786_v26 = vld [vmem:[#allocation2 + $0x1f9] sm:$0xff] }
 0x687   :  { %14246 = vmatmul.msk.f32.gmra.mxu1 %vm39_vm0, %v7785_v27 }
 0x688   :  { %v10117_v20 = vadd.f32 %v9639_v45, %v8815_v33  ;;  %14377 = vmatmul.msk.f32.gmra.mxu2 %vm39_vm0, %v10388_v8  ;;  %14507 = vmatmul.msk.f32.gmra.mxu3 %vm39_vm0, %v11690_v0  ;;  %v11693_v8 = vld [vmem:[#allocation2 + $0x202] sm:$0xff] }
 0x689   :  { %14637 = vmatmul.msk.f32.gmra.mxu0 %vm39_vm0, %v11692_v42 }
 0x68a   :  { %v11419_v31 = vadd.f32 %v10941_v37, %v10117_v20 }
 0x68b   :  { %v9642_v38 = vpop.f32.mrf.mxu2  ;;  %v10944_v18 = vpop.f32.mrf.mxu3 }
 0x68c   :  { %v17607_v16 = vadd.f32 %v12243_v28, %v11419_v31 }
 0x68d   :  { %v8340_v51 = vpop.f32.mrf.mxu1 }
 0x68e   :  { %v8816_v40 = vadd.f32 %v8340_v51, %v16670_v61  ;;  %v12249_v59 = vpop.f32.mrf.mxu0  ;;  %v7787_v51 = vld [vmem:[#allocation2 + $0x201] sm:$0xff] }
 0x68f   :  { %14247 = vmatmul.msk.f32.gmra.mxu1 %vm39_vm0, %v7786_v26 }
 0x690   :  { %v10118_v45 = vadd.f32 %v9642_v38, %v8816_v40  ;;  %14378 = vmatmul.msk.f32.gmra.mxu2 %vm39_vm0, %v10389_v21  ;;  %14508 = vmatmul.msk.f32.gmra.mxu3 %vm39_vm0, %v11691_v5  ;;  %v11694_v21 = vld [vmem:[#allocation2 + $0x212] sm:$0xff] }
 0x691   :  { %14638 = vmatmul.msk.f32.gmra.mxu0 %vm39_vm0, %v11693_v8 }
 0x692   :  { %v11420_v37 = vadd.f32 %v10944_v18, %v10118_v45 }
 0x693   :  { %v9645_v33 = vpop.f32.mrf.mxu2  ;;  %v10947_v27 = vpop.f32.mrf.mxu3 }
 0x694   :  { %v17614_v28 = vadd.f32 %v12246_v9, %v11420_v37 }
 0x695   :  { %v8343_v20 = vpop.f32.mrf.mxu1 }
 0x696   :  { %v8817_v61 = vadd.f32 %v8343_v20, %v16677_v2  ;;  %v12252_v31 = vpop.f32.mrf.mxu0  ;;  %v7788_v20 = vld [vmem:[#allocation2 + $0x211] sm:$0xff] }
 0x697   :  { %14248 = vmatmul.msk.f32.gmra.mxu1 %vm39_vm0, %v7787_v51 }
 0x698   :  { %v10119_v38 = vadd.f32 %v9645_v33, %v8817_v61  ;;  %14379 = vmatmul.msk.f32.gmra.mxu2 %vm39_vm0, %v11690_v0  ;;  %14509 = vmatmul.msk.f32.gmra.mxu3 %vm39_vm0, %v11692_v42  ;;  %v11695_v0 = vld [vmem:[#allocation2 + $0x21a] sm:$0xff] }
 0x699   :  { %14639 = vmatmul.msk.f32.gmra.mxu0 %vm39_vm0, %v11694_v21 }
 0x69a   :  { %v11421_v18 = vadd.f32 %v10947_v27, %v10119_v38 }
 0x69b   :  { %v9648_v40 = vpop.f32.mrf.mxu2  ;;  %v10950_v26 = vpop.f32.mrf.mxu3 }
 0x69c   :  { %v17621_v9 = vadd.f32 %v12249_v59, %v11421_v18 }
 0x69d   :  { %v8346_v45 = vpop.f32.mrf.mxu1 }
 0x69e   :  { %v8818_v2 = vadd.f32 %v8346_v45, %v16684_v29  ;;  %v12255_v37 = vpop.f32.mrf.mxu0  ;;  %v7789_v45 = vld [vmem:[#allocation2 + $0x219] sm:$0xff] }
 0x69f   :  { %14249 = vmatmul.msk.f32.gmra.mxu1 %vm39_vm0, %v7788_v20 }
 0x6a0   :  { %v10120_v33 = vadd.f32 %v9648_v40, %v8818_v2  ;;  %14380 = vmatmul.msk.f32.gmra.mxu2 %vm39_vm0, %v11691_v5  ;;  %14510 = vmatmul.msk.f32.gmra.mxu3 %vm39_vm0, %v11693_v8  ;;  %v11696_v5 = vld [vmem:[#allocation2 + $0x22a] sm:$0xff] }
 0x6a1   :  { %14640 = vmatmul.msk.f32.gmra.mxu0 %vm39_vm0, %v11695_v0 }
 0x6a2   :  { %v11422_v27 = vadd.f32 %v10950_v26, %v10120_v33 }
 0x6a3   :  { %v9651_v61 = vpop.f32.mrf.mxu2  ;;  %v10953_v51 = vpop.f32.mrf.mxu3 }
 0x6a4   :  { %v17628_v59 = vadd.f32 %v12252_v31, %v11422_v27 }
 0x6a5   :  { %v8349_v38 = vpop.f32.mrf.mxu1 }
 0x6a6   :  { %v8819_v29 = vadd.f32 %v8349_v38, %v16691_v13  ;;  %v12258_v18 = vpop.f32.mrf.mxu0  ;;  %v7790_v38 = vld [vmem:[#allocation2 + $0x229] sm:$0xff] }
 0x6a7   :  { %14250 = vmatmul.msk.f32.gmra.mxu1 %vm39_vm0, %v7789_v45 }
 0x6a8   :  { %v10121_v40 = vadd.f32 %v9651_v61, %v8819_v29  ;;  %14381 = vmatmul.msk.f32.gmra.mxu2 %vm39_vm0, %v11692_v42  ;;  %14511 = vmatmul.msk.f32.gmra.mxu3 %vm39_vm0, %v11694_v21  ;;  %v11697_v42 = vld [vmem:[#allocation2 + $0x232] sm:$0xff] }
 0x6a9   :  { %14641 = vmatmul.msk.f32.gmra.mxu0 %vm39_vm0, %v11696_v5 }
 0x6aa   :  { %v11423_v26 = vadd.f32 %v10953_v51, %v10121_v40 }
 0x6ab   :  { %v9654_v2 = vpop.f32.mrf.mxu2  ;;  %v10956_v20 = vpop.f32.mrf.mxu3 }
 0x6ac   :  { %v17635_v31 = vadd.f32 %v12255_v37, %v11423_v26 }
 0x6ad   :  { %v8352_v33 = vpop.f32.mrf.mxu1 }
 0x6ae   :  { %v8820_v13 = vadd.f32 %v8352_v33, %v16698_v60  ;;  %v12261_v27 = vpop.f32.mrf.mxu0  ;;  %v7791_v33 = vld [vmem:[#allocation2 + $0x231] sm:$0xff] }
 0x6af   :  { %14251 = vmatmul.msk.f32.gmra.mxu1 %vm39_vm0, %v7790_v38 }
 0x6b0   :  { %v10122_v61 = vadd.f32 %v9654_v2, %v8820_v13  ;;  %14382 = vmatmul.msk.f32.gmra.mxu2 %vm39_vm0, %v11693_v8  ;;  %14512 = vmatmul.msk.f32.gmra.mxu3 %vm39_vm0, %v11695_v0  ;;  %v11698_v8 = vld [vmem:[#allocation2 + $0x242] sm:$0xff] }
 0x6b1   :  { %14642 = vmatmul.msk.f32.gmra.mxu0 %vm39_vm0, %v11697_v42 }
 0x6b2   :  { %v11424_v51 = vadd.f32 %v10956_v20, %v10122_v61 }
 0x6b3   :  { %v9657_v29 = vpop.f32.mrf.mxu2  ;;  %v10959_v45 = vpop.f32.mrf.mxu3 }
 0x6b4   :  { %v17642_v37 = vadd.f32 %v12258_v18, %v11424_v51 }
 0x6b5   :  { %v8355_v40 = vpop.f32.mrf.mxu1 }
 0x6b6   :  { %v8821_v60 = vadd.f32 %v8355_v40, %v16705_v25  ;;  %v12264_v26 = vpop.f32.mrf.mxu0  ;;  %v7792_v40 = vld [vmem:[#allocation2 + $0x241] sm:$0xff] }
 0x6b7   :  { %14252 = vmatmul.msk.f32.gmra.mxu1 %vm39_vm0, %v7791_v33 }
 0x6b8   :  { %v10123_v2 = vadd.f32 %v9657_v29, %v8821_v60  ;;  %14383 = vmatmul.msk.f32.gmra.mxu2 %vm39_vm0, %v11694_v21  ;;  %14513 = vmatmul.msk.f32.gmra.mxu3 %vm39_vm0, %v11696_v5  ;;  %v11699_v21 = vld [vmem:[#allocation2 + $0x24a] sm:$0xff] }
 0x6b9   :  { %14643 = vmatmul.msk.f32.gmra.mxu0 %vm39_vm0, %v11698_v8 }
 0x6ba   :  { %v11425_v20 = vadd.f32 %v10959_v45, %v10123_v2 }
 0x6bb   :  { %v9660_v13 = vpop.f32.mrf.mxu2  ;;  %v10962_v38 = vpop.f32.mrf.mxu3 }
 0x6bc   :  { %v17649_v18 = vadd.f32 %v12261_v27, %v11425_v20 }
 0x6bd   :  { %v8358_v61 = vpop.f32.mrf.mxu1 }
 0x6be   :  { %v8822_v25 = vadd.f32 %v8358_v61, %v16712_v30  ;;  %v12267_v51 = vpop.f32.mrf.mxu0  ;;  %v7793_v61 = vld [vmem:[#allocation2 + $0x249] sm:$0xff] }
 0x6bf   :  { %14253 = vmatmul.msk.f32.gmra.mxu1 %vm39_vm0, %v7792_v40 }
 0x6c0   :  { %v10124_v29 = vadd.f32 %v9660_v13, %v8822_v25  ;;  %14384 = vmatmul.msk.f32.gmra.mxu2 %vm39_vm0, %v11695_v0  ;;  %14514 = vmatmul.msk.f32.gmra.mxu3 %vm39_vm0, %v11697_v42  ;;  %v11700_v0 = vld [vmem:[#allocation2 + $0x25a] sm:$0xff] }
 0x6c1   :  { %14644 = vmatmul.msk.f32.gmra.mxu0 %vm39_vm0, %v11699_v21 }
 0x6c2   :  { %v11426_v45 = vadd.f32 %v10962_v38, %v10124_v29 }
 0x6c3   :  { %v9663_v60 = vpop.f32.mrf.mxu2  ;;  %v10965_v33 = vpop.f32.mrf.mxu3 }
 0x6c4   :  { %v17656_v27 = vadd.f32 %v12264_v26, %v11426_v45 }
 0x6c5   :  { %v8361_v2 = vpop.f32.mrf.mxu1 }
 0x6c6   :  { %v8823_v30 = vadd.f32 %v8361_v2, %v16723_v58  ;;  %v12270_v20 = vpop.f32.mrf.mxu0  ;;  %v7794_v2 = vld [vmem:[#allocation2 + $0x259] sm:$0xff] }
 0x6c7   :  { %14254 = vmatmul.msk.f32.gmra.mxu1 %vm39_vm0, %v7793_v61 }
 0x6c8   :  { %v10125_v13 = vadd.f32 %v9663_v60, %v8823_v30  ;;  %14385 = vmatmul.msk.f32.gmra.mxu2 %vm39_vm0, %v11696_v5  ;;  %14515 = vmatmul.msk.f32.gmra.mxu3 %vm39_vm0, %v11698_v8  ;;  %v11701_v5 = vld [vmem:[#allocation2 + $0x262] sm:$0xff] }
 0x6c9   :  { %14645 = vmatmul.msk.f32.gmra.mxu0 %vm39_vm0, %v11700_v0 }
 0x6ca   :  { %v11427_v38 = vadd.f32 %v10965_v33, %v10125_v13 }
 0x6cb   :  { %v9666_v25 = vpop.f32.mrf.mxu2  ;;  %v10968_v40 = vpop.f32.mrf.mxu3 }
 0x6cc   :  { %v17663_v26 = vadd.f32 %v12267_v51, %v11427_v38 }
 0x6cd   :  { %v8364_v29 = vpop.f32.mrf.mxu1 }
 0x6ce   :  { %v8824_v58 = vadd.f32 %v8364_v29, %v16734_v46  ;;  %v12273_v45 = vpop.f32.mrf.mxu0  ;;  %v7795_v29 = vld [vmem:[#allocation2 + $0x261] sm:$0xff] }
 0x6cf   :  { %14255 = vmatmul.msk.f32.gmra.mxu1 %vm39_vm0, %v7794_v2 }
 0x6d0   :  { %v10126_v60 = vadd.f32 %v9666_v25, %v8824_v58  ;;  %14386 = vmatmul.msk.f32.gmra.mxu2 %vm39_vm0, %v11697_v42  ;;  %14516 = vmatmul.msk.f32.gmra.mxu3 %vm39_vm0, %v11699_v21  ;;  %v11702_v42 = vld [vmem:[#allocation2 + $0x272] sm:$0xff] }
 0x6d1   :  { %14646 = vmatmul.msk.f32.gmra.mxu0 %vm39_vm0, %v11701_v5 }
 0x6d2   :  { %v11428_v33 = vadd.f32 %v10968_v40, %v10126_v60 }
 0x6d3   :  { %v9669_v30 = vpop.f32.mrf.mxu2  ;;  %v10971_v61 = vpop.f32.mrf.mxu3 }
 0x6d4   :  { %v17670_v51 = vadd.f32 %v12270_v20, %v11428_v33 }
 0x6d5   :  { %v8367_v13 = vpop.f32.mrf.mxu1 }
 0x6d6   :  { %v8825_v46 = vadd.f32 %v8367_v13, %v16745_v6  ;;  %v12276_v38 = vpop.f32.mrf.mxu0  ;;  %v7796_v13 = vld [vmem:[#allocation2 + $0x271] sm:$0xff] }
 0x6d7   :  { %14256 = vmatmul.msk.f32.gmra.mxu1 %vm39_vm0, %v7795_v29 }
 0x6d8   :  { %v10127_v25 = vadd.f32 %v9669_v30, %v8825_v46  ;;  %14387 = vmatmul.msk.f32.gmra.mxu2 %vm39_vm0, %v11698_v8  ;;  %14517 = vmatmul.msk.f32.gmra.mxu3 %vm39_vm0, %v11700_v0  ;;  %v11703_v8 = vld [vmem:[#allocation2 + $0x27a] sm:$0xff] }
 0x6d9   :  { %14647 = vmatmul.msk.f32.gmra.mxu0 %vm39_vm0, %v11702_v42 }
 0x6da   :  { %v11429_v40 = vadd.f32 %v10971_v61, %v10127_v25 }
 0x6db   :  { %v9672_v58 = vpop.f32.mrf.mxu2  ;;  %v10974_v2 = vpop.f32.mrf.mxu3 }
 0x6dc   :  { %v17677_v20 = vadd.f32 %v12273_v45, %v11429_v40 }
 0x6dd   :  { %v8370_v60 = vpop.f32.mrf.mxu1 }
 0x6de   :  { %v8826_v6 = vadd.f32 %v8370_v60, %v16752_v39  ;;  %v12279_v33 = vpop.f32.mrf.mxu0  ;;  %v7797_v60 = vld [vmem:[#allocation2 + $0x279] sm:$0xff] }
 0x6df   :  { %14257 = vmatmul.msk.f32.gmra.mxu1 %vm39_vm0, %v7796_v13 }
 0x6e0   :  { %v10128_v30 = vadd.f32 %v9672_v58, %v8826_v6  ;;  %14388 = vmatmul.msk.f32.gmra.mxu2 %vm39_vm0, %v11699_v21  ;;  %14518 = vmatmul.msk.f32.gmra.mxu3 %vm39_vm0, %v11701_v5  ;;  %v11704_v21 = vld [vmem:[#allocation2 + $0x28a] sm:$0xff] }
 0x6e1   :  { %14648 = vmatmul.msk.f32.gmra.mxu0 %vm39_vm0, %v11703_v8 }
 0x6e2   :  { %v11430_v61 = vadd.f32 %v10974_v2, %v10128_v30 }
 0x6e3   :  { %v9675_v46 = vpop.f32.mrf.mxu2  ;;  %v10977_v29 = vpop.f32.mrf.mxu3 }
 0x6e4   :  { %v17684_v45 = vadd.f32 %v12276_v38, %v11430_v61 }
 0x6e5   :  { %v8373_v25 = vpop.f32.mrf.mxu1 }
 0x6e6   :  { %v8827_v39 = vadd.f32 %v8373_v25, %v16759_v1  ;;  %v12282_v40 = vpop.f32.mrf.mxu0  ;;  %v7798_v25 = vld [vmem:[#allocation2 + $0x289] sm:$0xff] }
 0x6e7   :  { %14258 = vmatmul.msk.f32.gmra.mxu1 %vm39_vm0, %v7797_v60 }
 0x6e8   :  { %v10129_v58 = vadd.f32 %v9675_v46, %v8827_v39  ;;  %14389 = vmatmul.msk.f32.gmra.mxu2 %vm39_vm0, %v11700_v0  ;;  %14519 = vmatmul.msk.f32.gmra.mxu3 %vm39_vm0, %v11702_v42  ;;  %v11705_v0 = vld [vmem:[#allocation2 + $0x292] sm:$0xff] }
 0x6e9   :  { %14649 = vmatmul.msk.f32.gmra.mxu0 %vm39_vm0, %v11704_v21 }
 0x6ea   :  { %v11431_v2 = vadd.f32 %v10977_v29, %v10129_v58 }
 0x6eb   :  { %v9678_v6 = vpop.f32.mrf.mxu2  ;;  %v10980_v13 = vpop.f32.mrf.mxu3 }
 0x6ec   :  { %v17691_v38 = vadd.f32 %v12279_v33, %v11431_v2 }
 0x6ed   :  { %v8376_v30 = vpop.f32.mrf.mxu1 }
 0x6ee   :  { %v8828_v1 = vadd.f32 %v8376_v30, %v16766_v32  ;;  %v12285_v61 = vpop.f32.mrf.mxu0  ;;  %v7799_v30 = vld [vmem:[#allocation2 + $0x291] sm:$0xff] }
 0x6ef   :  { %14259 = vmatmul.msk.f32.gmra.mxu1 %vm39_vm0, %v7798_v25 }
 0x6f0   :  { %v10130_v46 = vadd.f32 %v9678_v6, %v8828_v1  ;;  %14390 = vmatmul.msk.f32.gmra.mxu2 %vm39_vm0, %v11701_v5  ;;  %14520 = vmatmul.msk.f32.gmra.mxu3 %vm39_vm0, %v11703_v8  ;;  %v11706_v5 = vld [vmem:[#allocation2 + $0x2a2] sm:$0xff] }
 0x6f1   :  { %14650 = vmatmul.msk.f32.gmra.mxu0 %vm39_vm0, %v11705_v0 }
 0x6f2   :  { %v11432_v29 = vadd.f32 %v10980_v13, %v10130_v46 }
 0x6f3   :  { %v9681_v39 = vpop.f32.mrf.mxu2  ;;  %v10983_v60 = vpop.f32.mrf.mxu3 }
 0x6f4   :  { %v17698_v33 = vadd.f32 %v12282_v40, %v11432_v29 }
 0x6f5   :  { %v8379_v58 = vpop.f32.mrf.mxu1 }
 0x6f6   :  { %v8829_v32 = vadd.f32 %v8379_v58, %v16773_v47  ;;  %v12288_v2 = vpop.f32.mrf.mxu0  ;;  %v7800_v58 = vld [vmem:[#allocation2 + $0x2a1] sm:$0xff] }
 0x6f7   :  { %14260 = vmatmul.msk.f32.gmra.mxu1 %vm39_vm0, %v7799_v30 }
 0x6f8   :  { %v10131_v6 = vadd.f32 %v9681_v39, %v8829_v32  ;;  %14391 = vmatmul.msk.f32.gmra.mxu2 %vm39_vm0, %v11702_v42  ;;  %14521 = vmatmul.msk.f32.gmra.mxu3 %vm39_vm0, %v11704_v21  ;;  %v11707_v42 = vld [vmem:[#allocation2 + $0x2aa] sm:$0xff] }
 0x6f9   :  { %14651 = vmatmul.msk.f32.gmra.mxu0 %vm39_vm0, %v11706_v5 }
 0x6fa   :  { %v11433_v13 = vadd.f32 %v10983_v60, %v10131_v6 }
 0x6fb   :  { %v9684_v1 = vpop.f32.mrf.mxu2  ;;  %v10986_v25 = vpop.f32.mrf.mxu3 }
 0x6fc   :  { %v17705_v40 = vadd.f32 %v12285_v61, %v11433_v13 }
 0x6fd   :  { %v8382_v46 = vpop.f32.mrf.mxu1 }
 0x6fe   :  { %v8830_v47 = vadd.f32 %v8382_v46, %v16780_v17  ;;  %v12291_v29 = vpop.f32.mrf.mxu0  ;;  %v7801_v46 = vld [vmem:[#allocation2 + $0x2a9] sm:$0xff] }
 0x6ff   :  { %14261 = vmatmul.msk.f32.gmra.mxu1 %vm39_vm0, %v7800_v58 }
 0x700   :  { %v10132_v39 = vadd.f32 %v9684_v1, %v8830_v47  ;;  %14392 = vmatmul.msk.f32.gmra.mxu2 %vm39_vm0, %v11703_v8  ;;  %14522 = vmatmul.msk.f32.gmra.mxu3 %vm39_vm0, %v11705_v0  ;;  %v11708_v8 = vld [vmem:[#allocation2 + $0x2ba] sm:$0xff] }
 0x701   :  { %14652 = vmatmul.msk.f32.gmra.mxu0 %vm39_vm0, %v11707_v42 }
 0x702   :  { %v11434_v60 = vadd.f32 %v10986_v25, %v10132_v39 }
 0x703   :  { %v9687_v32 = vpop.f32.mrf.mxu2  ;;  %v10989_v30 = vpop.f32.mrf.mxu3 }
 0x704   :  { %v17712_v61 = vadd.f32 %v12288_v2, %v11434_v60 }
 0x705   :  { %v8385_v6 = vpop.f32.mrf.mxu1 }
 0x706   :  { %v8831_v17 = vadd.f32 %v8385_v6, %v16787_v57  ;;  %v12294_v13 = vpop.f32.mrf.mxu0  ;;  %v7802_v6 = vld [vmem:[#allocation2 + $0x2b9] sm:$0xff] }
 0x707   :  { %14262 = vmatmul.msk.f32.gmra.mxu1 %vm39_vm0, %v7801_v46 }
 0x708   :  { %v10133_v1 = vadd.f32 %v9687_v32, %v8831_v17  ;;  %14393 = vmatmul.msk.f32.gmra.mxu2 %vm39_vm0, %v11704_v21  ;;  %14523 = vmatmul.msk.f32.gmra.mxu3 %vm39_vm0, %v11706_v5  ;;  %v11709_v21 = vld [vmem:[#allocation2 + $0x2c2] sm:$0xff] }
 0x709   :  { %14653 = vmatmul.msk.f32.gmra.mxu0 %vm39_vm0, %v11708_v8 }
 0x70a   :  { %v11435_v25 = vadd.f32 %v10989_v30, %v10133_v1 }
 0x70b   :  { %v9690_v47 = vpop.f32.mrf.mxu2  ;;  %v10992_v58 = vpop.f32.mrf.mxu3 }
 0x70c   :  { %v17719_v2 = vadd.f32 %v12291_v29, %v11435_v25 }
 0x70d   :  { %v8388_v39 = vpop.f32.mrf.mxu1 }
 0x70e   :  { %v8832_v57 = vadd.f32 %v8388_v39, %v16794_v34  ;;  %v12297_v60 = vpop.f32.mrf.mxu0  ;;  %v7803_v39 = vld [vmem:[#allocation2 + $0x2c1] sm:$0xff] }
 0x70f   :  { %14263 = vmatmul.msk.f32.gmra.mxu1 %vm39_vm0, %v7802_v6 }
 0x710   :  { %v10134_v32 = vadd.f32 %v9690_v47, %v8832_v57  ;;  %14394 = vmatmul.msk.f32.gmra.mxu2 %vm39_vm0, %v11705_v0  ;;  %14524 = vmatmul.msk.f32.gmra.mxu3 %vm39_vm0, %v11707_v42  ;;  %v11710_v0 = vld [vmem:[#allocation2 + $0x2d2] sm:$0xff] }
 0x711   :  { %14654 = vmatmul.msk.f32.gmra.mxu0 %vm39_vm0, %v11709_v21 }
 0x712   :  { %v11436_v30 = vadd.f32 %v10992_v58, %v10134_v32 }
 0x713   :  { %v9693_v17 = vpop.f32.mrf.mxu2  ;;  %v10995_v46 = vpop.f32.mrf.mxu3 }
 0x714   :  { %v17726_v29 = vadd.f32 %v12294_v13, %v11436_v30 }
 0x715   :  { %v8391_v1 = vpop.f32.mrf.mxu1 }
 0x716   :  { %v8833_v34 = vadd.f32 %v8391_v1, %v16801_v44  ;;  %v12300_v25 = vpop.f32.mrf.mxu0  ;;  %v7804_v1 = vld [vmem:[#allocation2 + $0x2d1] sm:$0xff] }
 0x717   :  { %14264 = vmatmul.msk.f32.gmra.mxu1 %vm39_vm0, %v7803_v39 }
 0x718   :  { %v10135_v47 = vadd.f32 %v9693_v17, %v8833_v34  ;;  %14395 = vmatmul.msk.f32.gmra.mxu2 %vm39_vm0, %v11706_v5  ;;  %14525 = vmatmul.msk.f32.gmra.mxu3 %vm39_vm0, %v11708_v8  ;;  %v11711_v5 = vld [vmem:[#allocation2 + $0x2da] sm:$0xff] }
 0x719   :  { %14655 = vmatmul.msk.f32.gmra.mxu0 %vm39_vm0, %v11710_v0 }
 0x71a   :  { %v11437_v58 = vadd.f32 %v10995_v46, %v10135_v47 }
 0x71b   :  { %v9696_v57 = vpop.f32.mrf.mxu2  ;;  %v10998_v6 = vpop.f32.mrf.mxu3 }
 0x71c   :  { %v17733_v13 = vadd.f32 %v12297_v60, %v11437_v58 }
 0x71d   :  { %v8394_v32 = vpop.f32.mrf.mxu1 }
 0x71e   :  { %v8834_v44 = vadd.f32 %v8394_v32, %v16808_v62  ;;  %v12303_v30 = vpop.f32.mrf.mxu0  ;;  %v7805_v32 = vld [vmem:[#allocation2 + $0x2d9] sm:$0xff] }
 0x71f   :  { %14265 = vmatmul.msk.f32.gmra.mxu1 %vm39_vm0, %v7804_v1 }
 0x720   :  { %v10136_v17 = vadd.f32 %v9696_v57, %v8834_v44  ;;  %14396 = vmatmul.msk.f32.gmra.mxu2 %vm39_vm0, %v11707_v42  ;;  %14526 = vmatmul.msk.f32.gmra.mxu3 %vm39_vm0, %v11709_v21  ;;  %v11712_v42 = vld [vmem:[#allocation2 + $0x2ea] sm:$0xff] }
 0x721   :  { %14656 = vmatmul.msk.f32.gmra.mxu0 %vm39_vm0, %v11711_v5 }
 0x722   :  { %v11438_v46 = vadd.f32 %v10998_v6, %v10136_v17 }
 0x723   :  { %v9699_v34 = vpop.f32.mrf.mxu2  ;;  %v11001_v39 = vpop.f32.mrf.mxu3 }
 0x724   :  { %v17740_v60 = vadd.f32 %v12300_v25, %v11438_v46 }
 0x725   :  { %v8397_v47 = vpop.f32.mrf.mxu1 }
 0x726   :  { %v8835_v62 = vadd.f32 %v8397_v47, %v16815_v23  ;;  %v12306_v58 = vpop.f32.mrf.mxu0  ;;  %v7806_v47 = vld [vmem:[#allocation2 + $0x2e9] sm:$0xff] }
 0x727   :  { %14266 = vmatmul.msk.f32.gmra.mxu1 %vm39_vm0, %v7805_v32 }
 0x728   :  { %v10137_v57 = vadd.f32 %v9699_v34, %v8835_v62  ;;  %14397 = vmatmul.msk.f32.gmra.mxu2 %vm39_vm0, %v11708_v8  ;;  %14527 = vmatmul.msk.f32.gmra.mxu3 %vm39_vm0, %v11710_v0  ;;  %v11713_v8 = vld [vmem:[#allocation2 + $0x2f2] sm:$0xff] }
 0x729   :  { %14657 = vmatmul.msk.f32.gmra.mxu0 %vm39_vm0, %v11712_v42 }
 0x72a   :  { %v11439_v6 = vadd.f32 %v11001_v39, %v10137_v57 }
 0x72b   :  { %v9702_v44 = vpop.f32.mrf.mxu2  ;;  %v11004_v1 = vpop.f32.mrf.mxu3 }
 0x72c   :  { %v17747_v25 = vadd.f32 %v12303_v30, %v11439_v6 }
 0x72d   :  { %v8400_v17 = vpop.f32.mrf.mxu1 }
 0x72e   :  { %v8836_v23 = vadd.f32 %v8400_v17, %v16822_v15  ;;  %v12309_v46 = vpop.f32.mrf.mxu0  ;;  %v7807_v17 = vld [vmem:[#allocation2 + $0x2f1] sm:$0xff] }
 0x72f   :  { %14267 = vmatmul.msk.f32.gmra.mxu1 %vm39_vm0, %v7806_v47 }
 0x730   :  { %v10138_v34 = vadd.f32 %v9702_v44, %v8836_v23  ;;  %14398 = vmatmul.msk.f32.gmra.mxu2 %vm39_vm0, %v11709_v21  ;;  %14528 = vmatmul.msk.f32.gmra.mxu3 %vm39_vm0, %v11711_v5  ;;  %v11714_v21 = vld [vmem:[#allocation2 + $0x302] sm:$0xff] }
 0x731   :  { %14658 = vmatmul.msk.f32.gmra.mxu0 %vm39_vm0, %v11713_v8 }
 0x732   :  { %v11440_v39 = vadd.f32 %v11004_v1, %v10138_v34 }
 0x733   :  { %v9705_v62 = vpop.f32.mrf.mxu2  ;;  %v11007_v32 = vpop.f32.mrf.mxu3 }
 0x734   :  { %v17754_v30 = vadd.f32 %v12306_v58, %v11440_v39 }
 0x735   :  { %v8403_v57 = vpop.f32.mrf.mxu1 }
 0x736   :  { %v8837_v15 = vadd.f32 %v8403_v57, %v16829_v10  ;;  %v12312_v6 = vpop.f32.mrf.mxu0  ;;  %v7808_v57 = vld [vmem:[#allocation2 + $0x301] sm:$0xff] }
 0x737   :  { %14268 = vmatmul.msk.f32.gmra.mxu1 %vm39_vm0, %v7807_v17 }
 0x738   :  { %v10139_v44 = vadd.f32 %v9705_v62, %v8837_v15  ;;  %14399 = vmatmul.msk.f32.gmra.mxu2 %vm39_vm0, %v11710_v0  ;;  %14529 = vmatmul.msk.f32.gmra.mxu3 %vm39_vm0, %v11712_v42  ;;  %v11715_v0 = vld [vmem:[#allocation2 + $0x30a] sm:$0xff] }
 0x739   :  { %14659 = vmatmul.msk.f32.gmra.mxu0 %vm39_vm0, %v11714_v21 }
 0x73a   :  { %v11441_v1 = vadd.f32 %v11007_v32, %v10139_v44 }
 0x73b   :  { %v9708_v23 = vpop.f32.mrf.mxu2  ;;  %v11010_v47 = vpop.f32.mrf.mxu3 }
 0x73c   :  { %v17761_v58 = vadd.f32 %v12309_v46, %v11441_v1 }
 0x73d   :  { %v8406_v34 = vpop.f32.mrf.mxu1 }
 0x73e   :  { %18865 = vst [vmem:[#allocation90_spill] sm:$0xff] %v17761_v58  ;;  %v8838_v10 = vadd.f32 %v8406_v34, %v16837_v35  ;;  %v12315_v39 = vpop.f32.mrf.mxu0  ;;  %v7809_v34 = vld [vmem:[#allocation2 + $0x309] sm:$0xff] }
 0x73f   :  { %14269 = vmatmul.msk.f32.gmra.mxu1 %vm39_vm0, %v7808_v57 }
 0x740   :  { %v10140_v62 = vadd.f32 %v9708_v23, %v8838_v10  ;;  %14400 = vmatmul.msk.f32.gmra.mxu2 %vm39_vm0, %v11711_v5  ;;  %14530 = vmatmul.msk.f32.gmra.mxu3 %vm39_vm0, %v11713_v8  ;;  %v11716_v5 = vld [vmem:[#allocation2 + $0x31a] sm:$0xff] }
 0x741   :  { %14660 = vmatmul.msk.f32.gmra.mxu0 %vm39_vm0, %v11715_v0 }
 0x742   :  { %v11442_v32 = vadd.f32 %v11010_v47, %v10140_v62 }
 0x743   :  { %v9711_v15 = vpop.f32.mrf.mxu2  ;;  %v11013_v17 = vpop.f32.mrf.mxu3 }
 0x744   :  { %v17768_v46 = vadd.f32 %v12312_v6, %v11442_v32  ;;  %v18868_v32 = vld [vmem:[#allocation25_spill] sm:$0xff] }
 0x745   :  { %v8409_v44 = vpop.f32.mrf.mxu1 }
 0x746   :  { %18866 = vst [vmem:[#allocation93_spill] sm:$0xff] %v17768_v46  ;;  %v8839_v35 = vadd.f32 %v8409_v44, %v16845_v55  ;;  %v12318_v1 = vpop.f32.mrf.mxu0 }
 0x747   :  { %14270 = vmatmul.msk.f32.gmra.mxu1 %vm39_vm0, %v7809_v34 }
 0x748   :  { %v10141_v23 = vadd.f32 %v9711_v15, %v8839_v35  ;;  %14401 = vmatmul.msk.f32.gmra.mxu2 %vm39_vm0, %v11712_v42  ;;  %14531 = vmatmul.msk.f32.gmra.mxu3 %vm39_vm0, %v11714_v21  ;;  %v11717_v42 = vld [vmem:[#allocation2 + $0x322] sm:$0xff] }
 0x749   :  { %14661 = vmatmul.msk.f32.gmra.mxu0 %vm39_vm0, %v11716_v5 }
 0x74a   :  { %v11443_v47 = vadd.f32 %v11013_v17, %v10141_v23 }
 0x74b   :  { %v9714_v10 = vpop.f32.mrf.mxu2  ;;  %v11016_v57 = vpop.f32.mrf.mxu3 }
 0x74c   :  { %v17775_v6 = vadd.f32 %v12315_v39, %v11443_v47  ;;  %v18870_v47 = vld [vmem:[#allocation28_spill] sm:$0xff] }
 0x74d   :  { %v8412_v62 = vpop.f32.mrf.mxu1 }
 0x74e   :  { %18867 = vst [vmem:[#allocation95_spill] sm:$0xff] %v17775_v6  ;;  %v8840_v55 = vadd.f32 %v8412_v62, %v18868_v32  ;;  %v12321_v44 = vpop.f32.mrf.mxu0 }
 0x74f   :  { %14271 = vmatmul.msk.f32.gmra.mxu1 %vm39_vm0, %v7810_v43 }
 0x750   :  { %v10142_v15 = vadd.f32 %v9714_v10, %v8840_v55  ;;  %14402 = vmatmul.msk.f32.gmra.mxu2 %vm39_vm0, %v11713_v8  ;;  %14532 = vmatmul.msk.f32.gmra.mxu3 %vm39_vm0, %v11715_v0  ;;  %v11718_v8 = vld [vmem:[#allocation2 + $0x332] sm:$0xff] }
 0x751   :  { %14662 = vmatmul.msk.f32.gmra.mxu0 %vm39_vm0, %v11717_v42 }
 0x752   :  { %v11444_v17 = vadd.f32 %v11016_v57, %v10142_v15 }
 0x753   :  { %v9717_v35 = vpop.f32.mrf.mxu2  ;;  %v11019_v34 = vpop.f32.mrf.mxu3 }
 0x754   :  { %v17782_v39 = vadd.f32 %v12318_v1, %v11444_v17  ;;  %v18872_v17 = vld [vmem:[#allocation31_spill] sm:$0xff] }
 0x755   :  { %v8415_v23 = vpop.f32.mrf.mxu1 }
 0x756   :  { %18869 = vst [vmem:[#allocation25_spill] sm:$0xff] %v17782_v39  ;;  %v8841_v62 = vadd.f32 %v8415_v23, %v18870_v47  ;;  %v12324_v32 = vpop.f32.mrf.mxu0 }
 0x757   :  { %14272 = vmatmul.msk.f32.gmra.mxu1 %vm39_vm0, %v7811_v22 }
 0x758   :  { %v10143_v43 = vadd.f32 %v9717_v35, %v8841_v62  ;;  %14403 = vmatmul.msk.f32.gmra.mxu2 %vm39_vm0, %v11714_v21  ;;  %14533 = vmatmul.msk.f32.gmra.mxu3 %vm39_vm0, %v11716_v5  ;;  %v11719_v21 = vld [vmem:[#allocation2 + $0x33a] sm:$0xff] }
 0x759   :  { %14663 = vmatmul.msk.f32.gmra.mxu0 %vm39_vm0, %v11718_v8 }
 0x75a   :  { %v11445_v10 = vadd.f32 %v11019_v34, %v10143_v43 }
 0x75b   :  { %v9720_v57 = vpop.f32.mrf.mxu2  ;;  %v11022_v55 = vpop.f32.mrf.mxu3 }
 0x75c   :  { %v17789_v1 = vadd.f32 %v12321_v44, %v11445_v10  ;;  %v18874_v10 = vld [vmem:[#allocation34_spill] sm:$0xff] }
 0x75d   :  { %v8418_v15 = vpop.f32.mrf.mxu1 }
 0x75e   :  { %18871 = vst [vmem:[#allocation28_spill] sm:$0xff] %v17789_v1  ;;  %v8842_v23 = vadd.f32 %v8418_v15, %v18872_v17  ;;  %v12327_v47 = vpop.f32.mrf.mxu0  ;;  %v7813_v1 = vld [vmem:[#allocation2 + $0x339] sm:$0xff] }
 0x75f   :  { %14273 = vmatmul.msk.f32.gmra.mxu1 %vm39_vm0, %v7812_v56 }
 0x760   :  { %v10144_v22 = vadd.f32 %v9720_v57, %v8842_v23  ;;  %14404 = vmatmul.msk.f32.gmra.mxu2 %vm39_vm0, %v11715_v0  ;;  %14534 = vmatmul.msk.f32.gmra.mxu3 %vm39_vm0, %v11717_v42  ;;  %v11720_v0 = vld [vmem:[#allocation2 + $0x34a] sm:$0xff] }
 0x761   :  { %14664 = vmatmul.msk.f32.gmra.mxu0 %vm39_vm0, %v11719_v21 }
 0x762   :  { %v11446_v35 = vadd.f32 %v11022_v55, %v10144_v22 }
 0x763   :  { %v9723_v34 = vpop.f32.mrf.mxu2  ;;  %v11025_v62 = vpop.f32.mrf.mxu3 }
 0x764   :  { %v17796_v44 = vadd.f32 %v12324_v32, %v11446_v35  ;;  %v18876_v35 = vld [vmem:[#allocation37_spill] sm:$0xff] }
 0x765   :  { %v8421_v43 = vpop.f32.mrf.mxu1 }
 0x766   :  { %18873 = vst [vmem:[#allocation31_spill] sm:$0xff] %v17796_v44  ;;  %v8843_v15 = vadd.f32 %v8421_v43, %v18874_v10  ;;  %v12330_v17 = vpop.f32.mrf.mxu0  ;;  %v7814_v44 = vld [vmem:[#allocation2 + $0x349] sm:$0xff] }
 0x767   :  { %14274 = vmatmul.msk.f32.gmra.mxu1 %vm39_vm0, %v7813_v1 }
 0x768   :  { %v10145_v56 = vadd.f32 %v9723_v34, %v8843_v15  ;;  %14405 = vmatmul.msk.f32.gmra.mxu2 %vm39_vm0, %v11716_v5  ;;  %14535 = vmatmul.msk.f32.gmra.mxu3 %vm39_vm0, %v11718_v8  ;;  %v11721_v5 = vld [vmem:[#allocation2 + $0x352] sm:$0xff] }
 0x769   :  { %14665 = vmatmul.msk.f32.gmra.mxu0 %vm39_vm0, %v11720_v0  ;;  %v18878_v0 = vld [vmem:[#allocation40_spill] sm:$0xff] }
 0x76a   :  { %v11447_v57 = vadd.f32 %v11025_v62, %v10145_v56  ;;  %v9118_v56 = vld [vmem:[#allocation2 + $0x362] sm:$0xff] }
 0x76b   :  { %v9726_v55 = vpop.f32.mrf.mxu2  ;;  %v11028_v23 = vpop.f32.mrf.mxu3 }
 0x76c   :  { %v17803_v32 = vadd.f32 %v12327_v47, %v11447_v57 }
 0x76d   :  { %v8424_v22 = vpop.f32.mrf.mxu1 }
 0x76e   :  { %18875 = vst [vmem:[#allocation34_spill] sm:$0xff] %v17803_v32  ;;  %v8844_v43 = vadd.f32 %v8424_v22, %v18876_v35  ;;  %v12333_v10 = vpop.f32.mrf.mxu0  ;;  %v7815_v35 = vld [vmem:[#allocation2 + $0x351] sm:$0xff]  ;;  %v7817_v32 = vld [vmem:[#allocation2 + $0x399] sm:$0xff] }
 0x76f   :  { %14275 = vmatmul.msk.f32.gmra.mxu1 %vm39_vm0, %v7814_v44  ;;  %v10420_v44 = vld [vmem:[#allocation2 + $0x37a] sm:$0xff] }
 0x770   :  { %v10146_v1 = vadd.f32 %v9726_v55, %v8844_v43  ;;  %14406 = vmatmul.msk.f32.gmra.mxu2 %vm39_vm0, %v11717_v42  ;;  %14536 = vmatmul.msk.f32.gmra.mxu3 %vm39_vm0, %v11719_v21  ;;  %v11722_v21 = vld [vmem:[#allocation2 + $0x392] sm:$0xff] }
 0x771   :  { %14666 = vmatmul.msk.f32.gmra.mxu0 %vm39_vm0, %v11721_v5  ;;  %v9119_v5 = vld [vmem:[#allocation2 + $0x36a] sm:$0xff] }
 0x772   :  { %v11448_v8 = vadd.f32 %v11028_v23, %v10146_v1 }
 0x773   :  { %v9729_v34 = vpop.f32.mrf.mxu2  ;;  %v11031_v62 = vpop.f32.mrf.mxu3 }
 0x774   :  { %v17810_v47 = vadd.f32 %v12330_v17, %v11448_v8  ;;  %v18880_v8 = vld [vmem:[#allocation43_spill] sm:$0xff] }
 0x775   :  { %v8427_v15 = vpop.f32.mrf.mxu1 }
 0x776   :  { %18877 = vst [vmem:[#allocation37_spill] sm:$0xff] %v17810_v47  ;;  %v8845_v57 = vadd.f32 %v8427_v15, %v18878_v0  ;;  %v12336_v22 = vpop.f32.mrf.mxu0 }
 0x777   :  { %14276 = vmatmul.msk.f32.gmra.mxu1 %vm39_vm0, %v7815_v35  ;;  %v7816_v35 = vld [vmem:[#allocation2 + $0x391] sm:$0xff] }
 0x778   :  { %v10147_v42 = vadd.f32 %v9729_v34, %v8845_v57  ;;  %14407 = vmatmul.msk.f32.gmra.mxu2 %vm39_vm0, %v9118_v56  ;;  %14537 = vmatmul.msk.f32.gmra.mxu3 %vm39_vm0, %v10420_v44  ;;  %v10421_v34 = vld [vmem:[#allocation2 + $0x382] sm:$0xff]  ;;  %v11723_v57 = vld [vmem:[#allocation2 + $0x39a] sm:$0xff] }
 0x779   :  { %14667 = vmatmul.msk.f32.gmra.mxu0 %vm39_vm0, %v11722_v21 }
 0x77a   :  { %v11449_v55 = vadd.f32 %v11031_v62, %v10147_v42 }
 0x77b   :  { %v9732_v17 = vpop.f32.mrf.mxu2  ;;  %v11034_v23 = vpop.f32.mrf.mxu3 }
 0x77c   :  { %v17817_v43 = vadd.f32 %v12333_v10, %v11449_v55 }
 0x77d   :  { %v8430_v1 = vpop.f32.mrf.mxu1 }
 0x77e   :  { %18879 = vst [vmem:[#allocation40_spill] sm:$0xff] %v17817_v43  ;;  %v8846_v15 = vadd.f32 %v8430_v1, %v18880_v8  ;;  %v12339_v0 = vpop.f32.mrf.mxu0  ;;  %v18882_v1 = vld [vmem:[#allocation46_spill] sm:$0xff] }
 0x77f   :  { %14277 = vmatmul.msk.f32.gmra.mxu1 %vm39_vm0, %v7816_v35 }
 0x780   :  { %v10148_v56 = vadd.f32 %v9732_v17, %v8846_v15  ;;  %14408 = vmatmul.msk.f32.gmra.mxu2 %vm39_vm0, %v9119_v5  ;;  %14538 = vmatmul.msk.f32.gmra.mxu3 %vm39_vm0, %v10421_v34  ;;  %v11724_v5 = vld [vmem:[#allocation2 + $0x3aa] sm:$0xff] }
 0x781   :  { %14668 = vmatmul.msk.f32.gmra.mxu0 %vm39_vm0, %v11723_v57 }
 0x782   :  { %v11450_v62 = vadd.f32 %v11034_v23, %v10148_v56 }
 0x783   :  { %v9735_v10 = vpop.f32.mrf.mxu2  ;;  %v11037_v42 = vpop.f32.mrf.mxu3 }
 0x784   :  { %v17824_v55 = vadd.f32 %v12336_v22, %v11450_v62  ;;  %v18884_v62 = vld [vmem:[#allocation49_spill] sm:$0xff] }
 0x785   :  { %v8433_v43 = vpop.f32.mrf.mxu1 }
 0x786   :  { %18881 = vst [vmem:[#allocation43_spill] sm:$0xff] %v17824_v55  ;;  %v8847_v8 = vadd.f32 %v8433_v43, %v18882_v1  ;;  %v12342_v47 = vpop.f32.mrf.mxu0  ;;  %v7818_v55 = vld [vmem:[#allocation2 + $0x3a9] sm:$0xff] }
 0x787   :  { %14278 = vmatmul.msk.f32.gmra.mxu1 %vm39_vm0, %v7817_v32 }
 0x788   :  { %v10149_v17 = vadd.f32 %v9735_v10, %v8847_v8  ;;  %14409 = vmatmul.msk.f32.gmra.mxu2 %vm39_vm0, %v10420_v44  ;;  %14539 = vmatmul.msk.f32.gmra.mxu3 %vm39_vm0, %v11722_v21  ;;  %v11725_v44 = vld [vmem:[#allocation2 + $0x3b2] sm:$0xff] }
 0x789   :  { %14669 = vmatmul.msk.f32.gmra.mxu0 %vm39_vm0, %v11724_v5 }
 0x78a   :  { %v11451_v23 = vadd.f32 %v11037_v42, %v10149_v17 }
 0x78b   :  { %v9738_v15 = vpop.f32.mrf.mxu2  ;;  %v11040_v35 = vpop.f32.mrf.mxu3 }
 0x78c   :  { %v17831_v22 = vadd.f32 %v12339_v0, %v11451_v23  ;;  %v18886_v23 = vld [vmem:[#allocation52_spill] sm:$0xff] }
 0x78d   :  { %v8436_v56 = vpop.f32.mrf.mxu1 }
 0x78e   :  { %18883 = vst [vmem:[#allocation46_spill] sm:$0xff] %v17831_v22  ;;  %v8848_v43 = vadd.f32 %v8436_v56, %v18884_v62  ;;  %v12345_v1 = vpop.f32.mrf.mxu0  ;;  %v7819_v22 = vld [vmem:[#allocation2 + $0x3b1] sm:$0xff] }
 0x78f   :  { %14279 = vmatmul.msk.f32.gmra.mxu1 %vm39_vm0, %v7818_v55 }
 0x790   :  { %v10150_v32 = vadd.f32 %v9738_v15, %v8848_v43  ;;  %14410 = vmatmul.msk.f32.gmra.mxu2 %vm39_vm0, %v10421_v34  ;;  %14540 = vmatmul.msk.f32.gmra.mxu3 %vm39_vm0, %v11723_v57  ;;  %v11726_v34 = vld [vmem:[#allocation2 + $0x3c2] sm:$0xff] }
 0x791   :  { %14670 = vmatmul.msk.f32.gmra.mxu0 %vm39_vm0, %v11725_v44 }
 0x792   :  { %v11452_v10 = vadd.f32 %v11040_v35, %v10150_v32 }
 0x793   :  { %v9741_v42 = vpop.f32.mrf.mxu2  ;;  %v11043_v8 = vpop.f32.mrf.mxu3 }
 0x794   :  { %v17838_v0 = vadd.f32 %v12342_v47, %v11452_v10  ;;  %v18888_v10 = vld [vmem:[#allocation55_spill] sm:$0xff] }
 0x795   :  { %v8439_v17 = vpop.f32.mrf.mxu1 }
 0x796   :  { %18885 = vst [vmem:[#allocation49_spill] sm:$0xff] %v17838_v0  ;;  %v8849_v56 = vadd.f32 %v8439_v17, %v18886_v23  ;;  %v12348_v62 = vpop.f32.mrf.mxu0  ;;  %v7820_v0 = vld [vmem:[#allocation2 + $0x3c1] sm:$0xff] }
 0x797   :  { %14280 = vmatmul.msk.f32.gmra.mxu1 %vm39_vm0, %v7819_v22 }
 0x798   :  { %v10151_v55 = vadd.f32 %v9741_v42, %v8849_v56  ;;  %14411 = vmatmul.msk.f32.gmra.mxu2 %vm39_vm0, %v11722_v21  ;;  %14541 = vmatmul.msk.f32.gmra.mxu3 %vm39_vm0, %v11724_v5  ;;  %v11727_v21 = vld [vmem:[#allocation2 + $0x3ca] sm:$0xff] }
 0x799   :  { %14671 = vmatmul.msk.f32.gmra.mxu0 %vm39_vm0, %v11726_v34 }
 0x79a   :  { %v11453_v15 = vadd.f32 %v11043_v8, %v10151_v55 }
 0x79b   :  { %v9744_v35 = vpop.f32.mrf.mxu2  ;;  %v11046_v43 = vpop.f32.mrf.mxu3 }
 0x79c   :  { %v17845_v47 = vadd.f32 %v12345_v1, %v11453_v15  ;;  %v18890_v15 = vld [vmem:[#allocation58_spill] sm:$0xff] }
 0x79d   :  { %v8442_v32 = vpop.f32.mrf.mxu1 }
 0x79e   :  { %18887 = vst [vmem:[#allocation52_spill] sm:$0xff] %v17845_v47  ;;  %v8850_v17 = vadd.f32 %v8442_v32, %v18888_v10  ;;  %v12351_v23 = vpop.f32.mrf.mxu0  ;;  %v7821_v47 = vld [vmem:[#allocation2 + $0x3c9] sm:$0xff] }
 0x79f   :  { %14281 = vmatmul.msk.f32.gmra.mxu1 %vm39_vm0, %v7820_v0 }
 0x7a0   :  { %v10152_v22 = vadd.f32 %v9744_v35, %v8850_v17  ;;  %14412 = vmatmul.msk.f32.gmra.mxu2 %vm39_vm0, %v11723_v57  ;;  %14542 = vmatmul.msk.f32.gmra.mxu3 %vm39_vm0, %v11725_v44  ;;  %v11728_v57 = vld [vmem:[#allocation2 + $0x3da] sm:$0xff] }
 0x7a1   :  { %14672 = vmatmul.msk.f32.gmra.mxu0 %vm39_vm0, %v11727_v21 }
 0x7a2   :  { %v11454_v42 = vadd.f32 %v11046_v43, %v10152_v22 }
 0x7a3   :  { %v9747_v8 = vpop.f32.mrf.mxu2  ;;  %v11049_v56 = vpop.f32.mrf.mxu3 }
 0x7a4   :  { %v17852_v1 = vadd.f32 %v12348_v62, %v11454_v42  ;;  %v18892_v42 = vld [vmem:[#allocation61_spill] sm:$0xff] }
 0x7a5   :  { %v8445_v55 = vpop.f32.mrf.mxu1 }
 0x7a6   :  { %18889 = vst [vmem:[#allocation55_spill] sm:$0xff] %v17852_v1  ;;  %v8851_v32 = vadd.f32 %v8445_v55, %v18890_v15  ;;  %v12354_v10 = vpop.f32.mrf.mxu0  ;;  %v7822_v1 = vld [vmem:[#allocation2 + $0x3d9] sm:$0xff] }
 0x7a7   :  { %14282 = vmatmul.msk.f32.gmra.mxu1 %vm39_vm0, %v7821_v47 }
 0x7a8   :  { %v10153_v0 = vadd.f32 %v9747_v8, %v8851_v32  ;;  %14413 = vmatmul.msk.f32.gmra.mxu2 %vm39_vm0, %v11724_v5  ;;  %14543 = vmatmul.msk.f32.gmra.mxu3 %vm39_vm0, %v11726_v34  ;;  %v11729_v5 = vld [vmem:[#allocation2 + $0x3e2] sm:$0xff] }
 0x7a9   :  { %14673 = vmatmul.msk.f32.gmra.mxu0 %vm39_vm0, %v11728_v57 }
 0x7aa   :  { %v11455_v35 = vadd.f32 %v11049_v56, %v10153_v0 }
 0x7ab   :  { %v9750_v43 = vpop.f32.mrf.mxu2  ;;  %v11052_v17 = vpop.f32.mrf.mxu3 }
 0x7ac   :  { %v17859_v62 = vadd.f32 %v12351_v23, %v11455_v35  ;;  %v18894_v35 = vld [vmem:[#allocation64_spill] sm:$0xff] }
 0x7ad   :  { %v8448_v22 = vpop.f32.mrf.mxu1 }
 0x7ae   :  { %18891 = vst [vmem:[#allocation58_spill] sm:$0xff] %v17859_v62  ;;  %v8852_v55 = vadd.f32 %v8448_v22, %v18892_v42  ;;  %v12357_v15 = vpop.f32.mrf.mxu0  ;;  %v7823_v62 = vld [vmem:[#allocation2 + $0x3e1] sm:$0xff] }
 0x7af   :  { %14283 = vmatmul.msk.f32.gmra.mxu1 %vm39_vm0, %v7822_v1 }
 0x7b0   :  { %v10154_v47 = vadd.f32 %v9750_v43, %v8852_v55  ;;  %14414 = vmatmul.msk.f32.gmra.mxu2 %vm39_vm0, %v11725_v44  ;;  %14544 = vmatmul.msk.f32.gmra.mxu3 %vm39_vm0, %v11727_v21  ;;  %v11730_v44 = vld [vmem:[#allocation2 + $0x3f2] sm:$0xff] }
 0x7b1   :  { %14674 = vmatmul.msk.f32.gmra.mxu0 %vm39_vm0, %v11729_v5 }
 0x7b2   :  { %v11456_v8 = vadd.f32 %v11052_v17, %v10154_v47 }
 0x7b3   :  { %v9753_v56 = vpop.f32.mrf.mxu2  ;;  %v11055_v32 = vpop.f32.mrf.mxu3 }
 0x7b4   :  { %v17866_v23 = vadd.f32 %v12354_v10, %v11456_v8  ;;  %v18896_v8 = vld [vmem:[#allocation67_spill] sm:$0xff] }
 0x7b5   :  { %v8451_v0 = vpop.f32.mrf.mxu1 }
 0x7b6   :  { %18893 = vst [vmem:[#allocation61_spill] sm:$0xff] %v17866_v23  ;;  %v8853_v22 = vadd.f32 %v8451_v0, %v18894_v35  ;;  %v12360_v42 = vpop.f32.mrf.mxu0  ;;  %v7824_v23 = vld [vmem:[#allocation2 + $0x3f1] sm:$0xff] }
 0x7b7   :  { %14284 = vmatmul.msk.f32.gmra.mxu1 %vm39_vm0, %v7823_v62 }
 0x7b8   :  { %v10155_v1 = vadd.f32 %v9753_v56, %v8853_v22  ;;  %14415 = vmatmul.msk.f32.gmra.mxu2 %vm39_vm0, %v11726_v34  ;;  %14545 = vmatmul.msk.f32.gmra.mxu3 %vm39_vm0, %v11728_v57  ;;  %v11731_v34 = vld [vmem:[#allocation2 + $0x3fa] sm:$0xff] }
 0x7b9   :  { %14675 = vmatmul.msk.f32.gmra.mxu0 %vm39_vm0, %v11730_v44 }
 0x7ba   :  { %v11457_v43 = vadd.f32 %v11055_v32, %v10155_v1 }
 0x7bb   :  { %v9756_v17 = vpop.f32.mrf.mxu2  ;;  %v11058_v55 = vpop.f32.mrf.mxu3 }
 0x7bc   :  { %v17873_v10 = vadd.f32 %v12357_v15, %v11457_v43  ;;  %v18898_v43 = vld [vmem:[#allocation70_spill] sm:$0xff] }
 0x7bd   :  { %v8454_v47 = vpop.f32.mrf.mxu1 }
 0x7be   :  { %18895 = vst [vmem:[#allocation64_spill] sm:$0xff] %v17873_v10  ;;  %v8854_v0 = vadd.f32 %v8454_v47, %v18896_v8  ;;  %v12363_v35 = vpop.f32.mrf.mxu0  ;;  %v7825_v10 = vld [vmem:[#allocation2 + $0x3f9] sm:$0xff] }
 0x7bf   :  { %14285 = vmatmul.msk.f32.gmra.mxu1 %vm39_vm0, %v7824_v23 }
 0x7c0   :  { %v10156_v62 = vadd.f32 %v9756_v17, %v8854_v0  ;;  %14416 = vmatmul.msk.f32.gmra.mxu2 %vm39_vm0, %v11727_v21  ;;  %14546 = vmatmul.msk.f32.gmra.mxu3 %vm39_vm0, %v11729_v5  ;;  %v11732_v21 = vld [vmem:[#allocation2 + $0x40a] sm:$0xff] }
 0x7c1   :  { %14676 = vmatmul.msk.f32.gmra.mxu0 %vm39_vm0, %v11731_v34 }
 0x7c2   :  { %v11458_v56 = vadd.f32 %v11058_v55, %v10156_v62 }
 0x7c3   :  { %v9759_v32 = vpop.f32.mrf.mxu2  ;;  %v11061_v22 = vpop.f32.mrf.mxu3 }
 0x7c4   :  { %v17880_v15 = vadd.f32 %v12360_v42, %v11458_v56  ;;  %v18900_v56 = vld [vmem:[#allocation73_spill] sm:$0xff] }
 0x7c5   :  { %v8457_v1 = vpop.f32.mrf.mxu1 }
 0x7c6   :  { %18897 = vst [vmem:[#allocation67_spill] sm:$0xff] %v17880_v15  ;;  %v8855_v47 = vadd.f32 %v8457_v1, %v18898_v43  ;;  %v12366_v8 = vpop.f32.mrf.mxu0  ;;  %v7826_v15 = vld [vmem:[#allocation2 + $0x409] sm:$0xff] }
 0x7c7   :  { %14286 = vmatmul.msk.f32.gmra.mxu1 %vm39_vm0, %v7825_v10 }
 0x7c8   :  { %v10157_v23 = vadd.f32 %v9759_v32, %v8855_v47  ;;  %14417 = vmatmul.msk.f32.gmra.mxu2 %vm39_vm0, %v11728_v57  ;;  %14547 = vmatmul.msk.f32.gmra.mxu3 %vm39_vm0, %v11730_v44  ;;  %v11733_v57 = vld [vmem:[#allocation2 + $0x412] sm:$0xff] }
 0x7c9   :  { %14677 = vmatmul.msk.f32.gmra.mxu0 %vm39_vm0, %v11732_v21 }
 0x7ca   :  { %v11459_v17 = vadd.f32 %v11061_v22, %v10157_v23 }
 0x7cb   :  { %v9762_v55 = vpop.f32.mrf.mxu2  ;;  %v11064_v0 = vpop.f32.mrf.mxu3 }
 0x7cc   :  { %v17887_v42 = vadd.f32 %v12363_v35, %v11459_v17  ;;  %v18902_v17 = vld [vmem:[#allocation76_spill] sm:$0xff] }
 0x7cd   :  { %v8460_v62 = vpop.f32.mrf.mxu1 }
 0x7ce   :  { %18899 = vst [vmem:[#allocation70_spill] sm:$0xff] %v17887_v42  ;;  %v8856_v1 = vadd.f32 %v8460_v62, %v18900_v56  ;;  %v12369_v43 = vpop.f32.mrf.mxu0  ;;  %v7827_v42 = vld [vmem:[#allocation2 + $0x411] sm:$0xff] }
 0x7cf   :  { %14287 = vmatmul.msk.f32.gmra.mxu1 %vm39_vm0, %v7826_v15 }
 0x7d0   :  { %v10158_v10 = vadd.f32 %v9762_v55, %v8856_v1  ;;  %14418 = vmatmul.msk.f32.gmra.mxu2 %vm39_vm0, %v11729_v5  ;;  %14548 = vmatmul.msk.f32.gmra.mxu3 %vm39_vm0, %v11731_v34  ;;  %v11734_v5 = vld [vmem:[#allocation2 + $0x422] sm:$0xff] }
 0x7d1   :  { %14678 = vmatmul.msk.f32.gmra.mxu0 %vm39_vm0, %v11733_v57 }
 0x7d2   :  { %v11460_v32 = vadd.f32 %v11064_v0, %v10158_v10 }
 0x7d3   :  { %v9765_v22 = vpop.f32.mrf.mxu2  ;;  %v11067_v47 = vpop.f32.mrf.mxu3 }
 0x7d4   :  { %v17894_v35 = vadd.f32 %v12366_v8, %v11460_v32  ;;  %v18904_v32 = vld [vmem:[#allocation79_spill] sm:$0xff] }
 0x7d5   :  { %v8463_v23 = vpop.f32.mrf.mxu1 }
 0x7d6   :  { %18901 = vst [vmem:[#allocation73_spill] sm:$0xff] %v17894_v35  ;;  %v8857_v62 = vadd.f32 %v8463_v23, %v18902_v17  ;;  %v12372_v56 = vpop.f32.mrf.mxu0  ;;  %v7828_v35 = vld [vmem:[#allocation2 + $0x421] sm:$0xff] }
 0x7d7   :  { %14288 = vmatmul.msk.f32.gmra.mxu1 %vm39_vm0, %v7827_v42 }
 0x7d8   :  { %v10159_v15 = vadd.f32 %v9765_v22, %v8857_v62  ;;  %14419 = vmatmul.msk.f32.gmra.mxu2 %vm39_vm0, %v11730_v44  ;;  %14549 = vmatmul.msk.f32.gmra.mxu3 %vm39_vm0, %v11732_v21  ;;  %v11735_v44 = vld [vmem:[#allocation2 + $0x42a] sm:$0xff] }
 0x7d9   :  { %14679 = vmatmul.msk.f32.gmra.mxu0 %vm39_vm0, %v11734_v5 }
 0x7da   :  { %v11461_v55 = vadd.f32 %v11067_v47, %v10159_v15 }
 0x7db   :  { %v9768_v0 = vpop.f32.mrf.mxu2  ;;  %v11070_v1 = vpop.f32.mrf.mxu3 }
 0x7dc   :  { %v17901_v8 = vadd.f32 %v12369_v43, %v11461_v55  ;;  %v18906_v55 = vld [vmem:[#allocation82_spill] sm:$0xff] }
 0x7dd   :  { %v8466_v10 = vpop.f32.mrf.mxu1 }
 0x7de   :  { %18903 = vst [vmem:[#allocation76_spill] sm:$0xff] %v17901_v8  ;;  %v8858_v23 = vadd.f32 %v8466_v10, %v18904_v32  ;;  %v12375_v17 = vpop.f32.mrf.mxu0  ;;  %v7829_v8 = vld [vmem:[#allocation2 + $0x429] sm:$0xff] }
 0x7df   :  { %14289 = vmatmul.msk.f32.gmra.mxu1 %vm39_vm0, %v7828_v35 }
 0x7e0   :  { %v10160_v42 = vadd.f32 %v9768_v0, %v8858_v23  ;;  %14420 = vmatmul.msk.f32.gmra.mxu2 %vm39_vm0, %v11731_v34  ;;  %14550 = vmatmul.msk.f32.gmra.mxu3 %vm39_vm0, %v11733_v57  ;;  %v11736_v34 = vld [vmem:[#allocation2 + $0x43a] sm:$0xff] }
 0x7e1   :  { %14680 = vmatmul.msk.f32.gmra.mxu0 %vm39_vm0, %v11735_v44 }
 0x7e2   :  { %v11462_v22 = vadd.f32 %v11070_v1, %v10160_v42 }
 0x7e3   :  { %v9771_v47 = vpop.f32.mrf.mxu2  ;;  %v11073_v62 = vpop.f32.mrf.mxu3 }
 0x7e4   :  { %v17908_v43 = vadd.f32 %v12372_v56, %v11462_v22  ;;  %v18908_v22 = vld [vmem:[#allocation85_spill] sm:$0xff] }
 0x7e5   :  { %v8469_v15 = vpop.f32.mrf.mxu1 }
 0x7e6   :  { %18905 = vst [vmem:[#allocation79_spill] sm:$0xff] %v17908_v43  ;;  %v8859_v10 = vadd.f32 %v8469_v15, %v18906_v55  ;;  %v12378_v32 = vpop.f32.mrf.mxu0  ;;  %v7830_v43 = vld [vmem:[#allocation2 + $0x439] sm:$0xff] }
 0x7e7   :  { %14290 = vmatmul.msk.f32.gmra.mxu1 %vm39_vm0, %v7829_v8 }
 0x7e8   :  { %v10161_v35 = vadd.f32 %v9771_v47, %v8859_v10  ;;  %14421 = vmatmul.msk.f32.gmra.mxu2 %vm39_vm0, %v11732_v21  ;;  %14551 = vmatmul.msk.f32.gmra.mxu3 %vm39_vm0, %v11734_v5  ;;  %v17921_v21 = vld [vmem:[#allocation2 + $0x442] sm:$0xff] }
 0x7e9   :  { %14681 = vmatmul.msk.f32.gmra.mxu0 %vm39_vm0, %v11736_v34 }
 0x7ea   :  { %v11463_v0 = vadd.f32 %v11073_v62, %v10161_v35 }
 0x7eb   :  { %v9774_v1 = vpop.f32.mrf.mxu2  ;;  %v11076_v23 = vpop.f32.mrf.mxu3 }
 0x7ec   :  { %v17915_v56 = vadd.f32 %v12375_v17, %v11463_v0  ;;  %v18910_v0 = vld [vmem:[#allocation88_spill] sm:$0xff] }
 0x7ed   :  { %v8472_v42 = vpop.f32.mrf.mxu1 }
 0x7ee   :  { %18907 = vst [vmem:[#allocation82_spill] sm:$0xff] %v17915_v56  ;;  %v8860_v15 = vadd.f32 %v8472_v42, %v18908_v22  ;;  %v12381_v55 = vpop.f32.mrf.mxu0 }
 0x7ef   :  { %14291 = vmatmul.msk.f32.gmra.mxu1 %vm39_vm0, %v7830_v43  ;;  %v7831_v43 = vld [vmem:[#allocation2 + $0x441] sm:$0xff] }
 0x7f0   :  { %v10162_v8 = vadd.f32 %v9774_v1, %v8860_v15  ;;  %14422 = vmatmul.msk.f32.gmra.mxu2 %vm39_vm0, %v11733_v57  ;;  %14552 = vmatmul.msk.f32.gmra.mxu3 %vm39_vm0, %v11735_v44  ;;  %v17931_v1 = vld [vmem:[#allocation2 + $0x452] sm:$0xff] }
 0x7f1   :  { %14682 = vmatmul.msk.f32.gmra.mxu0 %vm39_vm0, %v17921_v21 }
 0x7f2   :  { %v11464_v47 = vadd.f32 %v11076_v23, %v10162_v8 }
 0x7f3   :  { %v9777_v17 = vpop.f32.mrf.mxu2  ;;  %v11079_v62 = vpop.f32.mrf.mxu3 }
 0x7f4   :  { %v17925_v10 = vadd.f32 %v12378_v32, %v11464_v47 }
 0x7f5   :  { %v8475_v35 = vpop.f32.mrf.mxu1 }
 0x7f6   :  { %18909 = vst [vmem:[#allocation85_spill] sm:$0xff] %v17925_v10  ;;  %v8861_v42 = vadd.f32 %v8475_v35, %v18910_v0  ;;  %v12384_v22 = vpop.f32.mrf.mxu0  ;;  %v18912_v35 = vld [vmem:[#allocation91_spill] sm:$0xff] }
 0x7f7   :  { %14292 = vmatmul.msk.f32.gmra.mxu1 %vm39_vm0, %v7831_v43  ;;  %v7832_v43 = vld [vmem:[#allocation2 + $0x451] sm:$0xff] }
 0x7f8   :  { %v10163_v57 = vadd.f32 %v9777_v17, %v8861_v42  ;;  %14423 = vmatmul.msk.f32.gmra.mxu2 %vm39_vm0, %v11734_v5  ;;  %14553 = vmatmul.msk.f32.gmra.mxu3 %vm39_vm0, %v11736_v34  ;;  %v17942_v5 = vld [vmem:[%s18601_s2] ss:$0 sm:$0xff] }
 0x7f9   :  { %14683 = vmatmul.msk.f32.gmra.mxu0 %vm39_vm0, %v17931_v1 }
 0x7fa   :  { %v11465_v23 = vadd.f32 %v11079_v62, %v10163_v57 }
 0x7fb   :  { %v9780_v32 = vpop.f32.mrf.mxu2  ;;  %v11082_v15 = vpop.f32.mrf.mxu3 }
 0x7fc   :  { %v17935_v8 = vadd.f32 %v12381_v55, %v11465_v23  ;;  %v17947_v55 = vld [vmem:[#allocation2 + $0x45a] sm:$0xff]  ;;  %v13092_v23 = vadd.f32 %v17942_v5, %v17488_v3 }
 0x7fd   :  { %v8478_v47 = vpop.f32.mrf.mxu1 }
 0x7fe   :  { %18911 = vst [vmem:[#allocation88_spill] sm:$0xff] %v17935_v8  ;;  %v8862_v0 = vadd.f32 %v8478_v47, %v18912_v35  ;;  %v12387_v10 = vpop.f32.mrf.mxu0  ;;  %v7833_v8 = vld [vmem:[#allocation2 + $0x459] sm:$0xff]  ;;  %v13220_v56 = vmax.f32 %v13092_v23, 0.0 }
 0x7ff   :  { %14293 = vmatmul.msk.f32.gmra.mxu1 %vm39_vm0, %v7832_v43 }
 0x800   :  { %v10164_v17 = vadd.f32 %v9780_v32, %v8862_v0  ;;  %14424 = vmatmul.msk.f32.gmra.mxu2 %vm39_vm0, %v11735_v44  ;;  %14554 = vmatmul.msk.f32.gmra.mxu3 %vm39_vm0, %v17921_v21  ;;  %v18913_v0 = vld [vmem:[#allocation94_spill] sm:$0xff] }
 0x801   :  { %14684 = vmatmul.msk.f32.gmra.mxu0 %vm39_vm0, %v17947_v55 }
 0x802   :  { %v11466_v62 = vadd.f32 %v11082_v15, %v10164_v17  ;;  %v17959_v15 = vld [vmem:[#allocation2 + $0x46a] sm:$0xff] }
 0x803   :  { %v9783_v42 = vpop.f32.mrf.mxu2  ;;  %v11085_v57 = vpop.f32.mrf.mxu3 }
 0x804   :  { %v12768_v47 = vadd.f32 %v12384_v22, %v11466_v62 }
 0x805   :  { %v8481_v35 = vpop.f32.mrf.mxu1 }
 0x806   :  { %v13156_v32 = vadd.f32 %v17942_v5, %v12768_v47  ;;  %v8863_v44 = vadd.f32 %v8481_v35, %v18913_v0  ;;  %v12390_v43 = vpop.f32.mrf.mxu0  ;;  %v7834_v0 = vld [vmem:[#allocation2 + $0x469] sm:$0xff] }
 0x807   :  { %14294 = vmatmul.msk.f32.gmra.mxu1 %vm39_vm0, %v7833_v8  ;;  %v13093_v8 = vadd.f32 %v17942_v5, %v17495_v63  ;;  %v17972_v63 = vld [vmem:[#allocation2 + $0x472] sm:$0xff] }
 0x808   :  { %v13284_v39 = vmax.f32 %v13156_v32, 0.0  ;;  %v10165_v6 = vadd.f32 %v9783_v42, %v8863_v44  ;;  %14425 = vmatmul.msk.f32.gmra.mxu2 %vm39_vm0, %v11736_v34  ;;  %14555 = vmatmul.msk.f32.gmra.mxu3 %vm39_vm0, %v17931_v1  ;;  %v18914_v34 = vld [vmem:[#allocation7_spill] sm:$0xff] }
 0x809   :  { %14685 = vmatmul.msk.f32.gmra.mxu0 %vm39_vm0, %v17959_v15  ;;  %v13221_v44 = vmax.f32 %v13093_v8, 0.0 }
 0x80a   :  { %v13348_v3 = vsub.f32 %v13220_v56, %v13284_v39  ;;  %v11467_v22 = vadd.f32 %v11085_v57, %v10165_v6  ;;  %v13094_v57 = vadd.f32 %v17942_v5, %v17502_v50  ;;  %v17985_v50 = vld [vmem:[#allocation2 + $0x482] sm:$0xff] }
 0x80b   :  { %v9786_v17 = vpop.f32.mrf.mxu2  ;;  %v11088_v62 = vpop.f32.mrf.mxu3 }
 0x80c   :  { %v12769_v23 = vadd.f32 %v12387_v10, %v11467_v22  ;;  %v13412_v22 = vand.u32 2147483647, %v13348_v3 }
 0x80d   :  { %v8484_v47 = vpop.f32.mrf.mxu1 }
 0x80e   :  { %v13157_v42 = vadd.f32 %v17942_v5, %v12769_v23  ;;  %v8864_v35 = vadd.f32 %v8484_v47, %v18914_v34  ;;  %v12393_v32 = vpop.f32.mrf.mxu0 }
 0x80f   :  { %14295 = vmatmul.msk.f32.gmra.mxu1 %vm39_vm0, %v7834_v0  ;;  %v7835_v0 = vld [vmem:[#allocation2 + $0x471] sm:$0xff] }
 0x810   :  { %v13285_v46 = vmax.f32 %v13157_v42, 0.0  ;;  %v10166_v58 = vadd.f32 %v9786_v17, %v8864_v35  ;;  %14426 = vmatmul.msk.f32.gmra.mxu2 %vm39_vm0, %v17921_v21  ;;  %14556 = vmatmul.msk.f32.gmra.mxu3 %vm39_vm0, %v17947_v55  ;;  %v18915_v42 = vld [vmem:[#allocation9_spill] sm:$0xff] }
 0x811   :  { %14686 = vmatmul.msk.f32.gmra.mxu0 %vm39_vm0, %v17972_v63 }
 0x812   :  { %v13349_v6 = vsub.f32 %v13221_v44, %v13285_v46  ;;  %v11468_v39 = vadd.f32 %v11088_v62, %v10166_v58  ;;  %v13222_v46 = vmax.f32 %v13094_v57, 0.0 }
 0x813   :  { %v9789_v56 = vpop.f32.mrf.mxu2  ;;  %v11091_v10 = vpop.f32.mrf.mxu3 }
 0x814   :  { %v13413_v17 = vand.u32 2147483647, %v13349_v6  ;;  %v12770_v8 = vadd.f32 %v12390_v43, %v11468_v39  ;;  %v13095_v39 = vadd.f32 %v17942_v5, %v17509_v14  ;;  %v17998_v14 = vld [vmem:[#allocation2 + $0x48a] sm:$0xff] }
 0x815   :  { %v8487_v23 = vpop.f32.mrf.mxu1 }
 0x816   :  { %v13476_v21 = vadd.f32 %v13413_v17, %v13412_v22  ;;  %v13158_v47 = vadd.f32 %v17942_v5, %v12770_v8  ;;  %v8865_v34 = vadd.f32 %v8487_v23, %v18915_v42  ;;  %v12396_v35 = vpop.f32.mrf.mxu0  ;;  %v18916_v8 = vld [vmem:[#allocation11_spill] sm:$0xff] }
 0x817   :  { %14296 = vmatmul.msk.f32.gmra.mxu1 %vm39_vm0, %v7835_v0  ;;  %v7836_v42 = vld [vmem:[#allocation2 + $0x481] sm:$0xff] }
 0x818   :  { %v13286_v58 = vmax.f32 %v13158_v47, 0.0  ;;  %v10167_v62 = vadd.f32 %v9789_v56, %v8865_v34  ;;  %14427 = vmatmul.msk.f32.gmra.mxu2 %vm39_vm0, %v17931_v1  ;;  %14557 = vmatmul.msk.f32.gmra.mxu3 %vm39_vm0, %v17959_v15  ;;  %v13223_v34 = vmax.f32 %v13095_v39, 0.0 }
 0x819   :  { %14687 = vmatmul.msk.f32.gmra.mxu0 %vm39_vm0, %v17985_v50 }
 0x81a   :  { %v13350_v43 = vsub.f32 %v13222_v46, %v13286_v58  ;;  %v11469_v3 = vadd.f32 %v11091_v10, %v10167_v62  ;;  %v13096_v62 = vadd.f32 %v17942_v5, %v17516_v52  ;;  %v18011_v52 = vld [vmem:[#allocation2 + $0x49a] sm:$0xff] }
 0x81b   :  { %v9792_v44 = vpop.f32.mrf.mxu2  ;;  %v11094_v6 = vpop.f32.mrf.mxu3 }
 0x81c   :  { %v13414_v57 = vand.u32 2147483647, %v13350_v43  ;;  %v12771_v56 = vadd.f32 %v12393_v32, %v11469_v3 }
 0x81d   :  { %v8490_v22 = vpop.f32.mrf.mxu1 }
 0x81e   :  { %v13477_v17 = vadd.f32 %v13476_v21, %v13414_v57  ;;  %v13159_v1 = vadd.f32 %v17942_v5, %v12771_v56  ;;  %v8866_v23 = vadd.f32 %v8490_v22, %v18916_v8  ;;  %v12399_v47 = vpop.f32.mrf.mxu0  ;;  %v18917_v57 = vld [vmem:[#allocation13_spill] sm:$0xff]  ;;  %v13224_v8 = vmax.f32 %v13096_v62, 0.0  ;;  %v18918_v62 = vld [vmem:[#allocation15_spill] sm:$0xff] }
 0x81f   :  { %14297 = vmatmul.msk.f32.gmra.mxu1 %vm39_vm0, %v7836_v42 }
 0x820   :  { %v13287_v0 = vmax.f32 %v13159_v1, 0.0  ;;  %v10168_v10 = vadd.f32 %v9792_v44, %v8866_v23  ;;  %14428 = vmatmul.msk.f32.gmra.mxu2 %vm39_vm0, %v17947_v55  ;;  %14558 = vmatmul.msk.f32.gmra.mxu3 %vm39_vm0, %v17972_v63  ;;  %v7837_v1 = vld [vmem:[#allocation2 + $0x489] sm:$0xff] }
 0x821   :  { %14688 = vmatmul.msk.f32.gmra.mxu0 %vm39_vm0, %v17998_v14 }
 0x822   :  { %v13351_v32 = vsub.f32 %v13223_v34, %v13287_v0  ;;  %v11470_v21 = vadd.f32 %v11094_v6, %v10168_v10  ;;  %v13097_v0 = vadd.f32 %v17942_v5, %v17523_v19  ;;  %v18024_v19 = vld [vmem:[#allocation2 + $0x4a2] sm:$0xff] }
 0x823   :  { %v9795_v46 = vpop.f32.mrf.mxu2  ;;  %v11097_v58 = vpop.f32.mrf.mxu3 }
 0x824   :  { %v13415_v43 = vand.u32 2147483647, %v13351_v32  ;;  %v12772_v3 = vadd.f32 %v12396_v35, %v11470_v21 }
 0x825   :  { %v8493_v44 = vpop.f32.mrf.mxu1 }
 0x826   :  { %v13478_v39 = vadd.f32 %v13477_v17, %v13415_v43  ;;  %v13160_v55 = vadd.f32 %v17942_v5, %v12772_v3  ;;  %v8867_v56 = vadd.f32 %v8493_v44, %v18917_v57  ;;  %v12402_v22 = vpop.f32.mrf.mxu0  ;;  %v7838_v44 = vld [vmem:[#allocation2 + $0x499] sm:$0xff] }
 0x827   :  { %14298 = vmatmul.msk.f32.gmra.mxu1 %vm39_vm0, %v7837_v1 }
 0x828   :  { %v13288_v23 = vmax.f32 %v13160_v55, 0.0  ;;  %v10169_v6 = vadd.f32 %v9795_v46, %v8867_v56  ;;  %14429 = vmatmul.msk.f32.gmra.mxu2 %vm39_vm0, %v17959_v15  ;;  %14559 = vmatmul.msk.f32.gmra.mxu3 %vm39_vm0, %v17985_v50  ;;  %v13225_v55 = vmax.f32 %v13097_v0, 0.0 }
 0x829   :  { %14689 = vmatmul.msk.f32.gmra.mxu0 %vm39_vm0, %v18011_v52 }
 0x82a   :  { %v13352_v35 = vsub.f32 %v13224_v8, %v13288_v23  ;;  %v11471_v17 = vadd.f32 %v11097_v58, %v10169_v6  ;;  %v13098_v8 = vadd.f32 %v17942_v5, %v17530_v7  ;;  %v18037_v7 = vld [vmem:[#allocation2 + $0x4b2] sm:$0xff] }
 0x82b   :  { %v9798_v42 = vpop.f32.mrf.mxu2  ;;  %v11100_v34 = vpop.f32.mrf.mxu3 }
 0x82c   :  { %v13416_v10 = vand.u32 2147483647, %v13352_v35  ;;  %v12773_v32 = vadd.f32 %v12399_v47, %v11471_v17 }
 0x82d   :  { %v8496_v21 = vpop.f32.mrf.mxu1 }
 0x82e   :  { %v13479_v46 = vadd.f32 %v13478_v39, %v13416_v10  ;;  %v13161_v15 = vadd.f32 %v17942_v5, %v12773_v32  ;;  %v8868_v43 = vadd.f32 %v8496_v21, %v18918_v62  ;;  %v12405_v3 = vpop.f32.mrf.mxu0  ;;  %v7839_v32 = vld [vmem:[#allocation2 + $0x4a1] sm:$0xff]  ;;  %v13226_v21 = vmax.f32 %v13098_v8, 0.0 }
 0x82f   :  { %14299 = vmatmul.msk.f32.gmra.mxu1 %vm39_vm0, %v7838_v44  ;;  %v13099_v44 = vadd.f32 %v17942_v5, %v17537_v54  ;;  %v18050_v54 = vld [vmem:[#allocation2 + $0x4ba] sm:$0xff] }
 0x830   :  { %v13289_v57 = vmax.f32 %v13161_v15, 0.0  ;;  %v10170_v58 = vadd.f32 %v9798_v42, %v8868_v43  ;;  %14430 = vmatmul.msk.f32.gmra.mxu2 %vm39_vm0, %v17972_v63  ;;  %14560 = vmatmul.msk.f32.gmra.mxu3 %vm39_vm0, %v17998_v14  ;;  %v18919_v42 = vld [vmem:[#allocation17_spill] sm:$0xff] }
 0x831   :  { %14690 = vmatmul.msk.f32.gmra.mxu0 %vm39_vm0, %v18024_v19 }
 0x832   :  { %v13353_v47 = vsub.f32 %v13225_v55, %v13289_v57  ;;  %v11472_v39 = vadd.f32 %v11100_v34, %v10170_v58 }
 0x833   :  { %v9801_v56 = vpop.f32.mrf.mxu2  ;;  %v11103_v1 = vpop.f32.mrf.mxu3 }
 0x834   :  { %v13417_v23 = vand.u32 2147483647, %v13353_v47  ;;  %v12774_v6 = vadd.f32 %v12402_v22, %v11472_v39  ;;  %v18920_v39 = vld [vmem:[#allocation19_spill] sm:$0xff] }
 0x835   :  { %v8499_v35 = vpop.f32.mrf.mxu1 }
 0x836   :  { %v13480_v17 = vadd.f32 %v13479_v46, %v13417_v23  ;;  %v13162_v63 = vadd.f32 %v17942_v5, %v12774_v6  ;;  %v8869_v0 = vadd.f32 %v8499_v35, %v18919_v42  ;;  %v12408_v10 = vpop.f32.mrf.mxu0  ;;  %v7840_v23 = vld [vmem:[#allocation2 + $0x4b1] sm:$0xff]  ;;  %v13227_v6 = vmax.f32 %v13099_v44, 0.0  ;;  %v7841_v44 = vld [vmem:[#allocation2 + $0x4b9] sm:$0xff] }
 0x837   :  { %14300 = vmatmul.msk.f32.gmra.mxu1 %vm39_vm0, %v7839_v32 }
 0x838   :  { %v13290_v15 = vmax.f32 %v13162_v63, 0.0  ;;  %v10171_v34 = vadd.f32 %v9801_v56, %v8869_v0  ;;  %14431 = vmatmul.msk.f32.gmra.mxu2 %vm39_vm0, %v17985_v50  ;;  %14561 = vmatmul.msk.f32.gmra.mxu3 %vm39_vm0, %v18011_v52  ;;  %v13100_v0 = vadd.f32 %v17942_v5, %v17544_v24  ;;  %v18063_v24 = vld [vmem:[#allocation2 + $0x4ca] sm:$0xff] }
 0x839   :  { %14691 = vmatmul.msk.f32.gmra.mxu0 %vm39_vm0, %v18037_v7 }
 0x83a   :  { %v13354_v22 = vsub.f32 %v13226_v21, %v13290_v15  ;;  %v11473_v46 = vadd.f32 %v11103_v1, %v10171_v34 }
 0x83b   :  { %v9804_v62 = vpop.f32.mrf.mxu2  ;;  %v11106_v43 = vpop.f32.mrf.mxu3 }
 0x83c   :  { %v13418_v55 = vand.u32 2147483647, %v13354_v22  ;;  %v12775_v57 = vadd.f32 %v12405_v3, %v11473_v46  ;;  %v18921_v22 = vld [vmem:[#allocation21_spill] sm:$0xff] }
 0x83d   :  { %v8502_v58 = vpop.f32.mrf.mxu1 }
 0x83e   :  { %v13481_v47 = vadd.f32 %v13480_v17, %v13418_v55  ;;  %v13163_v50 = vadd.f32 %v17942_v5, %v12775_v57  ;;  %v8870_v56 = vadd.f32 %v8502_v58, %v18920_v39  ;;  %v12411_v8 = vpop.f32.mrf.mxu0  ;;  %v13228_v55 = vmax.f32 %v13100_v0, 0.0 }
 0x83f   :  { %14301 = vmatmul.msk.f32.gmra.mxu1 %vm39_vm0, %v7840_v23  ;;  %v13101_v39 = vadd.f32 %v17942_v5, %v17551_v11  ;;  %v18076_v11 = vld [vmem:[#allocation2 + $0x4d2] sm:$0xff] }
 0x840   :  { %v13291_v35 = vmax.f32 %v13163_v50, 0.0  ;;  %v10172_v1 = vadd.f32 %v9804_v62, %v8870_v56  ;;  %14432 = vmatmul.msk.f32.gmra.mxu2 %vm39_vm0, %v17998_v14  ;;  %14562 = vmatmul.msk.f32.gmra.mxu3 %vm39_vm0, %v18024_v19 }
 0x841   :  { %14692 = vmatmul.msk.f32.gmra.mxu0 %vm39_vm0, %v18050_v54  ;;  %v13229_v0 = vmax.f32 %v13101_v39, 0.0 }
 0x842   :  { %v13355_v3 = vsub.f32 %v13227_v6, %v13291_v35  ;;  %v11474_v17 = vadd.f32 %v11106_v43, %v10172_v1  ;;  %v18922_v1 = vld [vmem:[#allocation23_spill] sm:$0xff] }
 0x843   :  { %v9807_v63 = vpop.f32.mrf.mxu2  ;;  %v11109_v42 = vpop.f32.mrf.mxu3 }
 0x844   :  { %v13419_v32 = vand.u32 2147483647, %v13355_v3  ;;  %v12776_v21 = vadd.f32 %v12408_v10, %v11474_v17 }
 0x845   :  { %v8505_v15 = vpop.f32.mrf.mxu1 }
 0x846   :  { %v13482_v34 = vadd.f32 %v13481_v47, %v13419_v32  ;;  %v13164_v14 = vadd.f32 %v17942_v5, %v12776_v21  ;;  %v8871_v46 = vadd.f32 %v8505_v15, %v18921_v22  ;;  %v12414_v62 = vpop.f32.mrf.mxu0 }
 0x847   :  { %14302 = vmatmul.msk.f32.gmra.mxu1 %vm39_vm0, %v7841_v44 }
 0x848   :  { %v13292_v57 = vmax.f32 %v13164_v14, 0.0  ;;  %v10173_v43 = vadd.f32 %v9807_v63, %v8871_v46  ;;  %14433 = vmatmul.msk.f32.gmra.mxu2 %vm39_vm0, %v18011_v52  ;;  %14563 = vmatmul.msk.f32.gmra.mxu3 %vm39_vm0, %v18037_v7  ;;  %v7842_v63 = vld [vmem:[#allocation2 + $0x4c9] sm:$0xff]  ;;  %v13102_v14 = vadd.f32 %v17942_v5, %v17558_v12 }
 0x849   :  { %14693 = vmatmul.msk.f32.gmra.mxu0 %vm39_vm0, %v18063_v24  ;;  %v11750_v12 = vld [vmem:[#allocation2 + $0x4e2] sm:$0xff] }
 0x84a   :  { %v13356_v10 = vsub.f32 %v13228_v55, %v13292_v57  ;;  %v11475_v58 = vadd.f32 %v11109_v42, %v10173_v43  ;;  %v18923_v57 = vld [vmem:[#allocation26_spill] sm:$0xff] }
 0x84b   :  { %v9810_v47 = vpop.f32.mrf.mxu2  ;;  %v11112_v50 = vpop.f32.mrf.mxu3 }
 0x84c   :  { %v13420_v56 = vand.u32 2147483647, %v13356_v10  ;;  %v12777_v23 = vadd.f32 %v12411_v8, %v11475_v58  ;;  %v7843_v58 = vld [vmem:[#allocation2 + $0x4d1] sm:$0xff] }
 0x84d   :  { %v8508_v6 = vpop.f32.mrf.mxu1 }
 0x84e   :  { %v13483_v35 = vadd.f32 %v13482_v34, %v13420_v56  ;;  %v13165_v52 = vadd.f32 %v17942_v5, %v12777_v23  ;;  %v8872_v3 = vadd.f32 %v8508_v6, %v18922_v1  ;;  %v12417_v17 = vpop.f32.mrf.mxu0 }
 0x84f   :  { %14303 = vmatmul.msk.f32.gmra.mxu1 %vm39_vm0, %v7842_v63 }
 0x850   :  { %v13293_v32 = vmax.f32 %v13165_v52, 0.0  ;;  %v10174_v42 = vadd.f32 %v9810_v47, %v8872_v3  ;;  %14434 = vmatmul.msk.f32.gmra.mxu2 %vm39_vm0, %v18024_v19  ;;  %14564 = vmatmul.msk.f32.gmra.mxu3 %vm39_vm0, %v18050_v54  ;;  %v13230_v47 = vmax.f32 %v13102_v14, 0.0 }
 0x851   :  { %14694 = vmatmul.msk.f32.gmra.mxu0 %vm39_vm0, %v18076_v11 }
 0x852   :  { %v13357_v8 = vsub.f32 %v13229_v0, %v13293_v32  ;;  %v11476_v21 = vadd.f32 %v11112_v50, %v10174_v42 }
 0x853   :  { %v9813_v15 = vpop.f32.mrf.mxu2  ;;  %v11115_v34 = vpop.f32.mrf.mxu3 }
 0x854   :  { %v13421_v22 = vand.u32 2147483647, %v13357_v8  ;;  %v12778_v46 = vadd.f32 %v12414_v62, %v11476_v21  ;;  %v7844_v8 = vld [vmem:[#allocation2 + $0x4e1] sm:$0xff] }
 0x855   :  { %v8511_v44 = vpop.f32.mrf.mxu1 }
 0x856   :  { %v13484_v55 = vadd.f32 %v13483_v35, %v13421_v22  ;;  %v13166_v19 = vadd.f32 %v17942_v5, %v12778_v46  ;;  %v8873_v43 = vadd.f32 %v8511_v44, %v18923_v57  ;;  %v12420_v10 = vpop.f32.mrf.mxu0  ;;  %v13103_v35 = vadd.f32 %v17942_v5, %v17565_v53  ;;  %v11751_v53 = vld [vmem:[#allocation2 + $0x4ea] sm:$0xff] }
 0x857   :  { %14304 = vmatmul.msk.f32.gmra.mxu1 %vm39_vm0, %v7843_v58  ;;  %v13104_v44 = vadd.f32 %v17942_v5, %v17572_v4  ;;  %v11752_v4 = vld [vmem:[#allocation2 + $0x4fa] sm:$0xff] }
 0x858   :  { %v13294_v39 = vmax.f32 %v13166_v19, 0.0  ;;  %v10175_v50 = vadd.f32 %v9813_v15, %v8873_v43  ;;  %14435 = vmatmul.msk.f32.gmra.mxu2 %vm39_vm0, %v18037_v7  ;;  %14565 = vmatmul.msk.f32.gmra.mxu3 %vm39_vm0, %v18063_v24  ;;  %v18924_v7 = vld [vmem:[#allocation29_spill] sm:$0xff]  ;;  %v13231_v21 = vmax.f32 %v13103_v35, 0.0 }
 0x859   :  { %14695 = vmatmul.msk.f32.gmra.mxu0 %vm39_vm0, %v11750_v12 }
 0x85a   :  { %v13358_v62 = vsub.f32 %v13230_v47, %v13294_v39  ;;  %v11477_v56 = vadd.f32 %v11115_v34, %v10175_v50  ;;  %v7845_v50 = vld [vmem:[#allocation2 + $0x4e9] sm:$0xff] }
 0x85b   :  { %v9816_v23 = vpop.f32.mrf.mxu2  ;;  %v11118_v6 = vpop.f32.mrf.mxu3 }
 0x85c   :  { %v13422_v52 = vand.u32 2147483647, %v13358_v62  ;;  %v12779_v1 = vadd.f32 %v12417_v17, %v11477_v56  ;;  %v13232_v62 = vmax.f32 %v13104_v44, 0.0  ;;  %v13106_v44 = vadd.f32 %v17942_v5, %v17586_v48  ;;  %v18125_v48 = vld [vmem:[#allocation2 + $0x542] sm:$0xff] }
 0x85d   :  { %v8514_v3 = vpop.f32.mrf.mxu1 }
 0x85e   :  { %v13485_v63 = vadd.f32 %v13484_v55, %v13422_v52  ;;  %v13167_v0 = vadd.f32 %v17942_v5, %v12779_v1  ;;  %v8874_v32 = vadd.f32 %v8514_v3, %v18924_v7  ;;  %v12423_v42 = vpop.f32.mrf.mxu0  ;;  %v13105_v1 = vadd.f32 %v17942_v5, %v17579_v49  ;;  %v11753_v49 = vld [vmem:[#allocation2 + $0x502] sm:$0xff] }
 0x85f   :  { %14305 = vmatmul.msk.f32.gmra.mxu1 %vm39_vm0, %v7844_v8  ;;  %v18926_v8 = vld [vmem:[#allocation35_spill] sm:$0xff] }
 0x860   :  { %v13295_v15 = vmax.f32 %v13167_v0, 0.0  ;;  %v10176_v34 = vadd.f32 %v9816_v23, %v8874_v32  ;;  %14436 = vmatmul.msk.f32.gmra.mxu2 %vm39_vm0, %v18050_v54  ;;  %14566 = vmatmul.msk.f32.gmra.mxu3 %vm39_vm0, %v18076_v11  ;;  %v18925_v54 = vld [vmem:[#allocation32_spill] sm:$0xff] }
 0x861   :  { %14696 = vmatmul.msk.f32.gmra.mxu0 %vm39_vm0, %v11751_v53 }
 0x862   :  { %v13359_v17 = vsub.f32 %v13231_v21, %v13295_v15  ;;  %v11478_v14 = vadd.f32 %v11118_v6, %v10176_v34  ;;  %v13233_v15 = vmax.f32 %v13105_v1, 0.0 }
 0x863   :  { %v9819_v22 = vpop.f32.mrf.mxu2  ;;  %v11121_v46 = vpop.f32.mrf.mxu3 }
 0x864   :  { %v13423_v55 = vand.u32 2147483647, %v13359_v17  ;;  %v12780_v19 = vadd.f32 %v12420_v10, %v11478_v14 }
 0x865   :  { %v8517_v57 = vpop.f32.mrf.mxu1 }
 0x866   :  { %v13486_v43 = vadd.f32 %v13485_v63, %v13423_v55  ;;  %v13168_v58 = vadd.f32 %v17942_v5, %v12780_v19  ;;  %v8875_v47 = vadd.f32 %v8517_v57, %v18925_v54  ;;  %v12426_v39 = vpop.f32.mrf.mxu0 }
 0x867   :  { %14306 = vmatmul.msk.f32.gmra.mxu1 %vm39_vm0, %v7845_v50  ;;  %v7847_v50 = vld [vmem:[#allocation2 + $0x501] sm:$0xff] }
 0x868   :  { %v13296_v56 = vmax.f32 %v13168_v58, 0.0  ;;  %v10177_v23 = vadd.f32 %v9819_v22, %v8875_v47  ;;  %14437 = vmatmul.msk.f32.gmra.mxu2 %vm39_vm0, %v18063_v24  ;;  %14567 = vmatmul.msk.f32.gmra.mxu3 %vm39_vm0, %v11750_v12  ;;  %v7846_v12 = vld [vmem:[#allocation2 + $0x4f9] sm:$0xff] }
 0x869   :  { %14697 = vmatmul.msk.f32.gmra.mxu0 %vm39_vm0, %v11752_v4 }
 0x86a   :  { %v13360_v10 = vsub.f32 %v13232_v62, %v13296_v56  ;;  %v11479_v6 = vadd.f32 %v11121_v46, %v10177_v23  ;;  %v10452_v62 = vld [vmem:[#allocation2 + $0x52a] sm:$0xff]  ;;  %v13234_v56 = vmax.f32 %v13106_v44, 0.0  ;;  %v13108_v44 = vadd.f32 %v17942_v5, %v17600_v41  ;;  %v18148_v41 = vld [vmem:[#allocation2 + $0x55a] sm:$0xff] }
 0x86b   :  { %v9822_v35 = vpop.f32.mrf.mxu2  ;;  %v11124_v52 = vpop.f32.mrf.mxu3 }
 0x86c   :  { %v13424_v3 = vand.u32 2147483647, %v13360_v10  ;;  %v12781_v63 = vadd.f32 %v12423_v42, %v11479_v6 }
 0x86d   :  { %v8520_v0 = vpop.f32.mrf.mxu1 }
 0x86e   :  { %v13487_v7 = vadd.f32 %v13486_v43, %v13424_v3  ;;  %v13169_v32 = vadd.f32 %v17942_v5, %v12781_v63  ;;  %v8876_v24 = vadd.f32 %v8520_v0, %v18926_v8  ;;  %v12429_v21 = vpop.f32.mrf.mxu0  ;;  %v9150_v43 = vld [vmem:[#allocation2 + $0x512] sm:$0xff]  ;;  %v9151_v0 = vld [vmem:[#allocation2 + $0x51a] sm:$0xff] }
 0x86f   :  { %14307 = vmatmul.msk.f32.gmra.mxu1 %vm39_vm0, %v7846_v12  ;;  %v18928_v8 = vld [vmem:[#allocation41_spill] sm:$0xff] }
 0x870   :  { %v13297_v34 = vmax.f32 %v13169_v32, 0.0  ;;  %v10178_v17 = vadd.f32 %v9822_v35, %v8876_v24  ;;  %14438 = vmatmul.msk.f32.gmra.mxu2 %vm39_vm0, %v18076_v11  ;;  %14568 = vmatmul.msk.f32.gmra.mxu3 %vm39_vm0, %v11751_v53  ;;  %v18927_v11 = vld [vmem:[#allocation38_spill] sm:$0xff] }
 0x871   :  { %14698 = vmatmul.msk.f32.gmra.mxu0 %vm39_vm0, %v11753_v49 }
 0x872   :  { %v13361_v42 = vsub.f32 %v13233_v15, %v13297_v34  ;;  %v11480_v14 = vadd.f32 %v11124_v52, %v10178_v17  ;;  %v13107_v52 = vadd.f32 %v17942_v5, %v17593_v36  ;;  %v7848_v15 = vld [vmem:[#allocation2 + $0x541] sm:$0xff]  ;;  %v10453_v34 = vld [vmem:[#allocation2 + $0x532] sm:$0xff]  ;;  %v18136_v36 = vld [vmem:[#allocation2 + $0x54a] sm:$0xff] }
 0x873   :  { %v9825_v22 = vpop.f32.mrf.mxu2  ;;  %v11127_v46 = vpop.f32.mrf.mxu3 }
 0x874   :  { %v13425_v55 = vand.u32 2147483647, %v13361_v42  ;;  %v12782_v19 = vadd.f32 %v12426_v39, %v11480_v14  ;;  %v13235_v17 = vmax.f32 %v13107_v52, 0.0 }
 0x875   :  { %v8523_v57 = vpop.f32.mrf.mxu1 }
 0x876   :  { %v13488_v58 = vadd.f32 %v13487_v7, %v13425_v55  ;;  %v13170_v54 = vadd.f32 %v17942_v5, %v12782_v19  ;;  %v8877_v47 = vadd.f32 %v8523_v57, %v18927_v11  ;;  %v12432_v53 = vpop.f32.mrf.mxu0 }
 0x877   :  { %14308 = vmatmul.msk.f32.gmra.mxu1 %vm39_vm0, %v7847_v50  ;;  %v7849_v50 = vld [vmem:[#allocation2 + $0x549] sm:$0xff] }
 0x878   :  { %v13298_v23 = vmax.f32 %v13170_v54, 0.0  ;;  %v10179_v4 = vadd.f32 %v9825_v22, %v8877_v47  ;;  %14439 = vmatmul.msk.f32.gmra.mxu2 %vm39_vm0, %v9150_v43  ;;  %14569 = vmatmul.msk.f32.gmra.mxu3 %vm39_vm0, %v10452_v62  ;;  %v18929_v54 = vld [vmem:[#allocation44_spill] sm:$0xff] }
 0x879   :  { %14699 = vmatmul.msk.f32.gmra.mxu0 %vm39_vm0, %v18125_v48 }
 0x87a   :  { %v13362_v39 = vsub.f32 %v13234_v56, %v13298_v23  ;;  %v11481_v10 = vadd.f32 %v11127_v46, %v10179_v4  ;;  %v13236_v56 = vmax.f32 %v13108_v44, 0.0 }
 0x87b   :  { %v9828_v6 = vpop.f32.mrf.mxu2  ;;  %v11130_v35 = vpop.f32.mrf.mxu3 }
 0x87c   :  { %v13426_v1 = vand.u32 2147483647, %v13362_v39  ;;  %v12783_v3 = vadd.f32 %v12429_v21, %v11481_v10 }
 0x87d   :  { %v8526_v63 = vpop.f32.mrf.mxu1 }
 0x87e   :  { %v13489_v7 = vadd.f32 %v13488_v58, %v13426_v1  ;;  %v13171_v32 = vadd.f32 %v17942_v5, %v12783_v3  ;;  %v8878_v24 = vadd.f32 %v8526_v63, %v18928_v8  ;;  %v12435_v12 = vpop.f32.mrf.mxu0  ;;  %v7850_v8 = vld [vmem:[#allocation2 + $0x559] sm:$0xff] }
 0x87f   :  { %14309 = vmatmul.msk.f32.gmra.mxu1 %vm39_vm0, %v7848_v15 }
 0x880   :  { %v13299_v49 = vmax.f32 %v13171_v32, 0.0  ;;  %v10180_v42 = vadd.f32 %v9828_v6, %v8878_v24  ;;  %14440 = vmatmul.msk.f32.gmra.mxu2 %vm39_vm0, %v9151_v0  ;;  %14570 = vmatmul.msk.f32.gmra.mxu3 %vm39_vm0, %v10453_v34  ;;  %v18930_v0 = vld [vmem:[#allocation47_spill] sm:$0xff] }
 0x881   :  { %14700 = vmatmul.msk.f32.gmra.mxu0 %vm39_vm0, %v18136_v36 }
 0x882   :  { %v13363_v21 = vsub.f32 %v13235_v17, %v13299_v49  ;;  %v11482_v14 = vadd.f32 %v11130_v35, %v10180_v42  ;;  %v13109_v35 = vadd.f32 %v17942_v5, %v17607_v16  ;;  %v18160_v16 = vld [vmem:[#allocation2 + $0x562] sm:$0xff] }
 0x883   :  { %v9831_v22 = vpop.f32.mrf.mxu2  ;;  %v11133_v46 = vpop.f32.mrf.mxu3 }
 0x884   :  { %v13427_v55 = vand.u32 2147483647, %v13363_v21  ;;  %v12784_v19 = vadd.f32 %v12432_v53, %v11482_v14  ;;  %v13237_v24 = vmax.f32 %v13109_v35, 0.0  ;;  %v13110_v14 = vadd.f32 %v17942_v5, %v17614_v28  ;;  %v18173_v28 = vld [vmem:[#allocation2 + $0x572] sm:$0xff] }
 0x885   :  { %v8529_v57 = vpop.f32.mrf.mxu1 }
 0x886   :  { %v13490_v43 = vadd.f32 %v13489_v7, %v13427_v55  ;;  %v13172_v58 = vadd.f32 %v17942_v5, %v12784_v19  ;;  %v8879_v11 = vadd.f32 %v8529_v57, %v18929_v54  ;;  %v12438_v47 = vpop.f32.mrf.mxu0  ;;  %v18931_v19 = vld [vmem:[#allocation50_spill] sm:$0xff]  ;;  %v13238_v54 = vmax.f32 %v13110_v14, 0.0  ;;  %v18933_v14 = vld [vmem:[#allocation56_spill] sm:$0xff] }
 0x887   :  { %14310 = vmatmul.msk.f32.gmra.mxu1 %vm39_vm0, %v7849_v50 }
 0x888   :  { %v13300_v23 = vmax.f32 %v13172_v58, 0.0  ;;  %v10181_v4 = vadd.f32 %v9831_v22, %v8879_v11  ;;  %14441 = vmatmul.msk.f32.gmra.mxu2 %vm39_vm0, %v10452_v62  ;;  %14571 = vmatmul.msk.f32.gmra.mxu3 %vm39_vm0, %v18125_v48  ;;  %v7851_v58 = vld [vmem:[#allocation2 + $0x561] sm:$0xff] }
 0x889   :  { %14701 = vmatmul.msk.f32.gmra.mxu0 %vm39_vm0, %v18148_v41 }
 0x88a   :  { %v13364_v53 = vsub.f32 %v13236_v56, %v13300_v23  ;;  %v11483_v39 = vadd.f32 %v11133_v46, %v10181_v4 }
 0x88b   :  { %v9834_v10 = vpop.f32.mrf.mxu2  ;;  %v11136_v6 = vpop.f32.mrf.mxu3 }
 0x88c   :  { %v13428_v52 = vand.u32 2147483647, %v13364_v53  ;;  %v12785_v1 = vadd.f32 %v12435_v12, %v11483_v39  ;;  %v13111_v53 = vadd.f32 %v17942_v5, %v17621_v9  ;;  %v18186_v9 = vld [vmem:[#allocation2 + $0x57a] sm:$0xff] }
 0x88d   :  { %v8532_v3 = vpop.f32.mrf.mxu1 }
 0x88e   :  { %v13491_v63 = vadd.f32 %v13490_v43, %v13428_v52  ;;  %v13173_v62 = vadd.f32 %v17942_v5, %v12785_v1  ;;  %v8880_v7 = vadd.f32 %v8532_v3, %v18930_v0  ;;  %v12441_v32 = vpop.f32.mrf.mxu0  ;;  %v18932_v52 = vld [vmem:[#allocation53_spill] sm:$0xff] }
 0x88f   :  { %14311 = vmatmul.msk.f32.gmra.mxu1 %vm39_vm0, %v7850_v8 }
 0x890   :  { %v13301_v15 = vmax.f32 %v13173_v62, 0.0  ;;  %v10182_v17 = vadd.f32 %v9834_v10, %v8880_v7  ;;  %14442 = vmatmul.msk.f32.gmra.mxu2 %vm39_vm0, %v10453_v34  ;;  %14572 = vmatmul.msk.f32.gmra.mxu3 %vm39_vm0, %v18136_v36  ;;  %v13239_v62 = vmax.f32 %v13111_v53, 0.0 }
 0x891   :  { %14702 = vmatmul.msk.f32.gmra.mxu0 %vm39_vm0, %v18160_v16 }
 0x892   :  { %v13365_v12 = vsub.f32 %v13237_v24, %v13301_v15  ;;  %v11484_v49 = vadd.f32 %v11136_v6, %v10182_v17  ;;  %v13112_v17 = vadd.f32 %v17942_v5, %v17628_v59  ;;  %v18199_v59 = vld [vmem:[#allocation2 + $0x58a] sm:$0xff] }
 0x893   :  { %v9837_v42 = vpop.f32.mrf.mxu2  ;;  %v11139_v21 = vpop.f32.mrf.mxu3 }
 0x894   :  { %v13429_v22 = vand.u32 2147483647, %v13365_v12  ;;  %v12786_v46 = vadd.f32 %v12438_v47, %v11484_v49 }
 0x895   :  { %v8535_v44 = vpop.f32.mrf.mxu1 }
 0x896   :  { %v13492_v55 = vadd.f32 %v13491_v63, %v13429_v22  ;;  %v13174_v34 = vadd.f32 %v17942_v5, %v12786_v46  ;;  %v8881_v57 = vadd.f32 %v8535_v44, %v18931_v19  ;;  %v12444_v43 = vpop.f32.mrf.mxu0  ;;  %v7852_v63 = vld [vmem:[#allocation2 + $0x571] sm:$0xff]  ;;  %v7853_v44 = vld [vmem:[#allocation2 + $0x579] sm:$0xff] }
 0x897   :  { %14312 = vmatmul.msk.f32.gmra.mxu1 %vm39_vm0, %v7851_v58 }
 0x898   :  { %v13302_v11 = vmax.f32 %v13174_v34, 0.0  ;;  %v10183_v50 = vadd.f32 %v9837_v42, %v8881_v57  ;;  %14443 = vmatmul.msk.f32.gmra.mxu2 %vm39_vm0, %v18125_v48  ;;  %14573 = vmatmul.msk.f32.gmra.mxu3 %vm39_vm0, %v18148_v41 }
 0x899   :  { %14703 = vmatmul.msk.f32.gmra.mxu0 %vm39_vm0, %v18173_v28 }
 0x89a   :  { %v13366_v47 = vsub.f32 %v13238_v54, %v13302_v11  ;;  %v11485_v56 = vadd.f32 %v11139_v21, %v10183_v50  ;;  %v13113_v11 = vadd.f32 %v17942_v5, %v17635_v31  ;;  %v18212_v31 = vld [vmem:[#allocation2 + $0x592] sm:$0xff] }
 0x89b   :  { %v9840_v23 = vpop.f32.mrf.mxu2  ;;  %v11142_v4 = vpop.f32.mrf.mxu3 }
 0x89c   :  { %v13430_v39 = vand.u32 2147483647, %v13366_v47  ;;  %v12787_v10 = vadd.f32 %v12441_v32, %v11485_v56 }
 0x89d   :  { %v8538_v6 = vpop.f32.mrf.mxu1 }
 0x89e   :  { %v13493_v35 = vadd.f32 %v13492_v55, %v13430_v39  ;;  %v13175_v48 = vadd.f32 %v17942_v5, %v12787_v10  ;;  %v8882_v1 = vadd.f32 %v8538_v6, %v18932_v52  ;;  %v12447_v3 = vpop.f32.mrf.mxu0  ;;  %v13240_v55 = vmax.f32 %v13112_v17, 0.0  ;;  %v7854_v10 = vld [vmem:[#allocation2 + $0x589] sm:$0xff] }
 0x89f   :  { %14313 = vmatmul.msk.f32.gmra.mxu1 %vm39_vm0, %v7852_v63  ;;  %v13241_v6 = vmax.f32 %v13113_v11, 0.0  ;;  %v7856_v11 = vld [vmem:[#allocation2 + $0x5a1] sm:$0xff] }
 0x8a0   :  { %v13303_v0 = vmax.f32 %v13175_v48, 0.0  ;;  %v10184_v7 = vadd.f32 %v9840_v23, %v8882_v1  ;;  %14444 = vmatmul.msk.f32.gmra.mxu2 %vm39_vm0, %v18136_v36  ;;  %14574 = vmatmul.msk.f32.gmra.mxu3 %vm39_vm0, %v18160_v16 }
 0x8a1   :  { %14704 = vmatmul.msk.f32.gmra.mxu0 %vm39_vm0, %v18186_v9 }
 0x8a2   :  { %v13367_v32 = vsub.f32 %v13239_v62, %v13303_v0  ;;  %v11486_v8 = vadd.f32 %v11142_v4, %v10184_v7  ;;  %v18934_v4 = vld [vmem:[#allocation59_spill] sm:$0xff]  ;;  %v13114_v62 = vadd.f32 %v17942_v5, %v17642_v37 }
 0x8a3   :  { %v9843_v24 = vpop.f32.mrf.mxu2  ;;  %v11145_v15 = vpop.f32.mrf.mxu3  ;;  %v18225_v37 = vld [vmem:[#allocation2 + $0x5a2] sm:$0xff] }
 0x8a4   :  { %v13431_v12 = vand.u32 2147483647, %v13367_v32  ;;  %v12788_v49 = vadd.f32 %v12444_v43, %v11486_v8 }
 0x8a5   :  { %v8541_v42 = vpop.f32.mrf.mxu1 }
 0x8a6   :  { %v13494_v21 = vadd.f32 %v13493_v35, %v13431_v12  ;;  %v13176_v36 = vadd.f32 %v17942_v5, %v12788_v49  ;;  %v8883_v22 = vadd.f32 %v8541_v42, %v18933_v14  ;;  %v12450_v46 = vpop.f32.mrf.mxu0  ;;  %v7855_v12 = vld [vmem:[#allocation2 + $0x591] sm:$0xff]  ;;  %v13242_v49 = vmax.f32 %v13114_v62, 0.0 }
 0x8a7   :  { %14314 = vmatmul.msk.f32.gmra.mxu1 %vm39_vm0, %v7853_v44  ;;  %v13115_v44 = vadd.f32 %v17942_v5, %v17649_v18  ;;  %v18238_v18 = vld [vmem:[#allocation2 + $0x5aa] sm:$0xff] }
 0x8a8   :  { %v13304_v34 = vmax.f32 %v13176_v36, 0.0  ;;  %v10185_v19 = vadd.f32 %v9843_v24, %v8883_v22  ;;  %14445 = vmatmul.msk.f32.gmra.mxu2 %vm39_vm0, %v18148_v41  ;;  %14575 = vmatmul.msk.f32.gmra.mxu3 %vm39_vm0, %v18173_v28  ;;  %v18935_v24 = vld [vmem:[#allocation62_spill] sm:$0xff] }
 0x8a9   :  { %14705 = vmatmul.msk.f32.gmra.mxu0 %vm39_vm0, %v18199_v59 }
 0x8aa   :  { %v13368_v57 = vsub.f32 %v13240_v55, %v13304_v34  ;;  %v11487_v43 = vadd.f32 %v11145_v15, %v10185_v19 }
 0x8ab   :  { %v9846_v58 = vpop.f32.mrf.mxu2  ;;  %v11148_v54 = vpop.f32.mrf.mxu3 }
 0x8ac   :  { %v13432_v50 = vand.u32 2147483647, %v13368_v57  ;;  %v12789_v47 = vadd.f32 %v12447_v3, %v11487_v43  ;;  %v18936_v43 = vld [vmem:[#allocation65_spill] sm:$0xff] }
 0x8ad   :  { %v8544_v56 = vpop.f32.mrf.mxu1 }
 0x8ae   :  { %v13495_v23 = vadd.f32 %v13494_v21, %v13432_v50  ;;  %v13177_v41 = vadd.f32 %v17942_v5, %v12789_v47  ;;  %v8884_v53 = vadd.f32 %v8544_v56, %v18934_v4  ;;  %v12453_v39 = vpop.f32.mrf.mxu0  ;;  %v13243_v50 = vmax.f32 %v13115_v44, 0.0 }
 0x8af   :  { %14315 = vmatmul.msk.f32.gmra.mxu1 %vm39_vm0, %v7854_v10 }
 0x8b0   :  { %v13305_v35 = vmax.f32 %v13177_v41, 0.0  ;;  %v10186_v48 = vadd.f32 %v9846_v58, %v8884_v53  ;;  %14446 = vmatmul.msk.f32.gmra.mxu2 %vm39_vm0, %v18160_v16  ;;  %14576 = vmatmul.msk.f32.gmra.mxu3 %vm39_vm0, %v18186_v9  ;;  %v18245_v53 = vld [vmem:[%s18601_s2] ss:$0 sm:$0xff] }
 0x8b1   :  { %14706 = vmatmul.msk.f32.gmra.mxu0 %vm39_vm0, %v18212_v31 }
 0x8b2   :  { %v13369_v52 = vsub.f32 %v13241_v6, %v13305_v35  ;;  %v11488_v1 = vadd.f32 %v11148_v54, %v10186_v48 }
 0x8b3   :  { %v9849_v3 = vpop.f32.mrf.mxu2  ;;  %v11151_v63 = vpop.f32.mrf.mxu3 }
 0x8b4   :  { %v13433_v0 = vand.u32 2147483647, %v13369_v52  ;;  %v12790_v7 = vadd.f32 %v12450_v46, %v11488_v1  ;;  %v18937_v52 = vld [vmem:[#allocation68_spill] sm:$0xff] }
 0x8b5   :  { %v8547_v32 = vpop.f32.mrf.mxu1 }
 0x8b6   :  { %v13496_v8 = vadd.f32 %v13495_v23, %v13433_v0  ;;  %v13178_v16 = vadd.f32 %v17942_v5, %v12790_v7  ;;  %v8885_v15 = vadd.f32 %v8547_v32, %v18935_v24  ;;  %v12456_v17 = vpop.f32.mrf.mxu0 }
 0x8b7   :  { %14316 = vmatmul.msk.f32.gmra.mxu1 %vm39_vm0, %v7855_v12 }
 0x8b8   :  { %v13306_v42 = vmax.f32 %v13178_v16, 0.0  ;;  %v10187_v21 = vadd.f32 %v9849_v3, %v8885_v15  ;;  %14447 = vmatmul.msk.f32.gmra.mxu2 %vm39_vm0, %v18173_v28  ;;  %14577 = vmatmul.msk.f32.gmra.mxu3 %vm39_vm0, %v18199_v59  ;;  %v13117_v15 = vadd.f32 %v18245_v53, %v17663_v26  ;;  %v18269_v26 = vld [vmem:[#allocation2 + $0x5c2] sm:$0xff] }
 0x8b9   :  { %14707 = vmatmul.msk.f32.gmra.mxu0 %vm39_vm0, %v18225_v37 }
 0x8ba   :  { %v13370_v36 = vsub.f32 %v13242_v49, %v13306_v42  ;;  %v11489_v14 = vadd.f32 %v11151_v63, %v10187_v21  ;;  %v7857_v63 = vld [vmem:[#allocation2 + $0x5a9] sm:$0xff] }
 0x8bb   :  { %v9852_v22 = vpop.f32.mrf.mxu2  ;;  %v11154_v46 = vpop.f32.mrf.mxu3  ;;  %v18938_v21 = vld [vmem:[#allocation71_spill] sm:$0xff] }
 0x8bc   :  { %v13434_v55 = vand.u32 2147483647, %v13370_v36  ;;  %v12791_v34 = vadd.f32 %v12453_v39, %v11489_v14 }
 0x8bd   :  { %v8550_v19 = vpop.f32.mrf.mxu1 }
 0x8be   :  { %v13497_v57 = vadd.f32 %v13496_v8, %v13434_v55  ;;  %v13179_v28 = vadd.f32 %v17942_v5, %v12791_v34  ;;  %v8886_v58 = vadd.f32 %v8550_v19, %v18936_v43  ;;  %v12459_v54 = vpop.f32.mrf.mxu0  ;;  %v13118_v43 = vadd.f32 %v18245_v53, %v17670_v51  ;;  %v18282_v51 = vld [vmem:[#allocation2 + $0x5d2] sm:$0xff] }
 0x8bf   :  { %14317 = vmatmul.msk.f32.gmra.mxu1 %vm39_vm0, %v7856_v11 }
 0x8c0   :  { %v13307_v47 = vmax.f32 %v13179_v28, 0.0  ;;  %v10188_v56 = vadd.f32 %v9852_v22, %v8886_v58  ;;  %14448 = vmatmul.msk.f32.gmra.mxu2 %vm39_vm0, %v18186_v9  ;;  %14578 = vmatmul.msk.f32.gmra.mxu3 %vm39_vm0, %v18212_v31  ;;  %v13116_v9 = vadd.f32 %v18245_v53, %v17656_v27  ;;  %v18256_v27 = vld [vmem:[#allocation2 + $0x5ba] sm:$0xff] }
 0x8c1   :  { %14708 = vmatmul.msk.f32.gmra.mxu0 %vm39_vm0, %v18238_v18  ;;  %v7858_v22 = vld [vmem:[#allocation2 + $0x5b9] sm:$0xff] }
 0x8c2   :  { %v13371_v5 = vsub.f32 %v13243_v50, %v13307_v47  ;;  %v11490_v23 = vadd.f32 %v11154_v46, %v10188_v56  ;;  %v13244_v62 = vmax.f32 %v13116_v9, 0.0  ;;  %v13245_v46 = vmax.f32 %v13117_v15, 0.0  ;;  %v18939_v47 = vld [vmem:[#allocation74_spill] sm:$0xff] }
 0x8c3   :  { %v9855_v41 = vpop.f32.mrf.mxu2  ;;  %v11157_v4 = vpop.f32.mrf.mxu3 }
 0x8c4   :  { %v13435_v39 = vand.u32 2147483647, %v13371_v5  ;;  %v12792_v10 = vadd.f32 %v12456_v17, %v11490_v23  ;;  %v7859_v23 = vld [vmem:[#allocation2 + $0x5c1] sm:$0xff] }
 0x8c5   :  { %v8553_v6 = vpop.f32.mrf.mxu1 }
 0x8c6   :  { %v13498_v35 = vadd.f32 %v13497_v57, %v13435_v39  ;;  %v13180_v48 = vadd.f32 %v18245_v53, %v12792_v10  ;;  %v8887_v1 = vadd.f32 %v8553_v6, %v18937_v52  ;;  %v12462_v3 = vpop.f32.mrf.mxu0 }
 0x8c7   :  { %14318 = vmatmul.msk.f32.gmra.mxu1 %vm39_vm0, %v7857_v63 }
 0x8c8   :  { %v13308_v0 = vmax.f32 %v13180_v48, 0.0  ;;  %v10189_v7 = vadd.f32 %v9855_v41, %v8887_v1  ;;  %14449 = vmatmul.msk.f32.gmra.mxu2 %vm39_vm0, %v18199_v59  ;;  %14579 = vmatmul.msk.f32.gmra.mxu3 %vm39_vm0, %v18225_v37  ;;  %v13246_v41 = vmax.f32 %v13118_v43, 0.0  ;;  %v13119_v48 = vadd.f32 %v18245_v53, %v17677_v20  ;;  %v18295_v20 = vld [vmem:[#allocation2 + $0x5da] sm:$0xff] }
 0x8c9   :  { %14709 = vmatmul.msk.f32.gmra.mxu0 %vm39_vm0, %v18256_v27 }
 0x8ca   :  { %v13372_v32 = vsub.f32 %v13244_v62, %v13308_v0  ;;  %v11491_v8 = vadd.f32 %v11157_v4, %v10189_v7  ;;  %v18940_v62 = vld [vmem:[#allocation77_spill] sm:$0xff] }
 0x8cb   :  { %v9858_v16 = vpop.f32.mrf.mxu2  ;;  %v11160_v24 = vpop.f32.mrf.mxu3 }
 0x8cc   :  { %v13436_v17 = vand.u32 2147483647, %v13372_v32  ;;  %v12793_v12 = vadd.f32 %v12459_v54, %v11491_v8  ;;  %v7860_v32 = vld [vmem:[#allocation2 + $0x5d1] sm:$0xff]  ;;  %v13247_v8 = vmax.f32 %v13119_v48, 0.0 }
 0x8cd   :  { %v8556_v49 = vpop.f32.mrf.mxu1 }
 0x8ce   :  { %v13499_v42 = vadd.f32 %v13498_v35, %v13436_v17  ;;  %v13181_v59 = vadd.f32 %v18245_v53, %v12793_v12  ;;  %v8888_v36 = vadd.f32 %v8556_v49, %v18938_v21  ;;  %v12465_v14 = vpop.f32.mrf.mxu0 }
 0x8cf   :  { %14319 = vmatmul.msk.f32.gmra.mxu1 %vm39_vm0, %v7858_v22  ;;  %v18941_v22 = vld [vmem:[#allocation80_spill] sm:$0xff] }
 0x8d0   :  { %v13309_v44 = vmax.f32 %v13181_v59, 0.0  ;;  %v10190_v55 = vadd.f32 %v9858_v16, %v8888_v36  ;;  %14450 = vmatmul.msk.f32.gmra.mxu2 %vm39_vm0, %v18212_v31  ;;  %14580 = vmatmul.msk.f32.gmra.mxu3 %vm39_vm0, %v18238_v18 }
 0x8d1   :  { %14710 = vmatmul.msk.f32.gmra.mxu0 %vm39_vm0, %v18269_v26 }
 0x8d2   :  { %v13373_v34 = vsub.f32 %v13245_v46, %v13309_v44  ;;  %v11492_v19 = vadd.f32 %v11160_v24, %v10190_v55  ;;  %v7861_v55 = vld [vmem:[#allocation2 + $0x5d9] sm:$0xff] }
 0x8d3   :  { %v9861_v57 = vpop.f32.mrf.mxu2  ;;  %v11163_v28 = vpop.f32.mrf.mxu3 }
 0x8d4   :  { %v13437_v58 = vand.u32 2147483647, %v13373_v34  ;;  %v12794_v54 = vadd.f32 %v12462_v3, %v11492_v19 }
 0x8d5   :  { %v8559_v11 = vpop.f32.mrf.mxu1 }
 0x8d6   :  { %v13500_v50 = vadd.f32 %v13499_v42, %v13437_v58  ;;  %v13182_v31 = vadd.f32 %v18245_v53, %v12794_v54  ;;  %v8889_v56 = vadd.f32 %v8559_v11, %v18939_v47  ;;  %v12468_v5 = vpop.f32.mrf.mxu0  ;;  %v13120_v42 = vadd.f32 %v18245_v53, %v17684_v45  ;;  %v18308_v45 = vld [vmem:[#allocation2 + $0x5ea] sm:$0xff] }
 0x8d7   :  { %14320 = vmatmul.msk.f32.gmra.mxu1 %vm39_vm0, %v7859_v23  ;;  %v13121_v11 = vadd.f32 %v18245_v53, %v17691_v38  ;;  %v18321_v38 = vld [vmem:[#allocation2 + $0x5f2] sm:$0xff] }
 0x8d8   :  { %v13310_v4 = vmax.f32 %v13182_v31, 0.0  ;;  %v10191_v9 = vadd.f32 %v9861_v57, %v8889_v56  ;;  %14451 = vmatmul.msk.f32.gmra.mxu2 %vm39_vm0, %v18225_v37  ;;  %14581 = vmatmul.msk.f32.gmra.mxu3 %vm39_vm0, %v18256_v27  ;;  %v13248_v34 = vmax.f32 %v13120_v42, 0.0 }
 0x8d9   :  { %14711 = vmatmul.msk.f32.gmra.mxu0 %vm39_vm0, %v18282_v51 }
 0x8da   :  { %v13374_v39 = vsub.f32 %v13246_v41, %v13310_v4  ;;  %v11493_v10 = vadd.f32 %v11163_v28, %v10191_v9  ;;  %v7862_v4 = vld [vmem:[#allocation2 + $0x5e9] sm:$0xff]  ;;  %v13249_v9 = vmax.f32 %v13121_v11, 0.0  ;;  %v13124_v11 = vadd.f32 %v18245_v53, %v17712_v61  ;;  %v18360_v61 = vld [vmem:[#allocation2 + $0x61a] sm:$0xff] }
 0x8db   :  { %v9864_v6 = vpop.f32.mrf.mxu2  ;;  %v11166_v35 = vpop.f32.mrf.mxu3 }
 0x8dc   :  { %v13438_v52 = vand.u32 2147483647, %v13374_v39  ;;  %v12795_v1 = vadd.f32 %v12465_v14, %v11493_v10 }
 0x8dd   :  { %v8562_v3 = vpop.f32.mrf.mxu1 }
 0x8de   :  { %v13501_v63 = vadd.f32 %v13500_v50, %v13438_v52  ;;  %v13183_v37 = vadd.f32 %v18245_v53, %v12795_v1  ;;  %v8890_v0 = vadd.f32 %v8562_v3, %v18940_v62  ;;  %v12471_v7 = vpop.f32.mrf.mxu0  ;;  %v13122_v1 = vadd.f32 %v18245_v53, %v17698_v33  ;;  %v18334_v33 = vld [vmem:[#allocation2 + $0x602] sm:$0xff] }
 0x8df   :  { %14321 = vmatmul.msk.f32.gmra.mxu1 %vm39_vm0, %v7860_v32 }
 0x8e0   :  { %v13311_v16 = vmax.f32 %v13183_v37, 0.0  ;;  %v10192_v24 = vadd.f32 %v9864_v6, %v8890_v0  ;;  %14452 = vmatmul.msk.f32.gmra.mxu2 %vm39_vm0, %v18238_v18  ;;  %14582 = vmatmul.msk.f32.gmra.mxu3 %vm39_vm0, %v18269_v26  ;;  %v18943_v0 = vld [vmem:[#allocation86_spill] sm:$0xff] }
 0x8e1   :  { %14712 = vmatmul.msk.f32.gmra.mxu0 %vm39_vm0, %v18295_v20 }
 0x8e2   :  { %v13375_v15 = vsub.f32 %v13247_v8, %v13311_v16  ;;  %v11494_v17 = vadd.f32 %v11166_v35, %v10192_v24  ;;  %v7863_v8 = vld [vmem:[#allocation2 + $0x5f1] sm:$0xff]  ;;  %v13250_v16 = vmax.f32 %v13122_v1, 0.0 }
 0x8e3   :  { %v9867_v12 = vpop.f32.mrf.mxu2  ;;  %v11169_v49 = vpop.f32.mrf.mxu3 }
 0x8e4   :  { %v13439_v59 = vand.u32 2147483647, %v13375_v15  ;;  %v12796_v21 = vadd.f32 %v12468_v5, %v11494_v17  ;;  %v18942_v5 = vld [vmem:[#allocation83_spill] sm:$0xff] }
 0x8e5   :  { %v8565_v36 = vpop.f32.mrf.mxu1 }
 0x8e6   :  { %v13502_v14 = vadd.f32 %v13501_v63, %v13439_v59  ;;  %v13184_v18 = vadd.f32 %v18245_v53, %v12796_v21  ;;  %v8891_v46 = vadd.f32 %v8565_v36, %v18941_v22  ;;  %v12474_v44 = vpop.f32.mrf.mxu0  ;;  %v13123_v59 = vadd.f32 %v18245_v53, %v17705_v40  ;;  %v18944_v22 = vld [vmem:[#allocation89_spill] sm:$0xff]  ;;  %v18347_v40 = vld [vmem:[#allocation2 + $0x60a] sm:$0xff] }
 0x8e7   :  { %14322 = vmatmul.msk.f32.gmra.mxu1 %vm39_vm0, %v7861_v55  ;;  %v7864_v55 = vld [vmem:[#allocation2 + $0x601] sm:$0xff] }
 0x8e8   :  { %v13312_v19 = vmax.f32 %v13184_v18, 0.0  ;;  %v10193_v57 = vadd.f32 %v9867_v12, %v8891_v46  ;;  %14453 = vmatmul.msk.f32.gmra.mxu2 %vm39_vm0, %v18256_v27  ;;  %14583 = vmatmul.msk.f32.gmra.mxu3 %vm39_vm0, %v18282_v51 }
 0x8e9   :  { %14713 = vmatmul.msk.f32.gmra.mxu0 %vm39_vm0, %v18308_v45 }
 0x8ea   :  { %v13376_v28 = vsub.f32 %v13248_v34, %v13312_v19  ;;  %v11495_v43 = vadd.f32 %v11169_v49, %v10193_v57  ;;  %v13251_v34 = vmax.f32 %v13123_v59, 0.0 }
 0x8eb   :  { %v9870_v58 = vpop.f32.mrf.mxu2  ;;  %v11172_v54 = vpop.f32.mrf.mxu3 }
 0x8ec   :  { %v13440_v50 = vand.u32 2147483647, %v13376_v28  ;;  %v12797_v31 = vadd.f32 %v12471_v7, %v11495_v43 }
 0x8ed   :  { %v8568_v47 = vpop.f32.mrf.mxu1 }
 0x8ee   :  { %v13503_v56 = vadd.f32 %v13502_v14, %v13440_v50  ;;  %v13185_v27 = vadd.f32 %v18245_v53, %v12797_v31  ;;  %v8892_v23 = vadd.f32 %v8568_v47, %v18942_v5  ;;  %v12477_v41 = vpop.f32.mrf.mxu0 }
 0x8ef   :  { %14323 = vmatmul.msk.f32.gmra.mxu1 %vm39_vm0, %v7862_v4  ;;  %v13252_v4 = vmax.f32 %v13124_v11, 0.0 }
 0x8f0   :  { %v13313_v39 = vmax.f32 %v13185_v27, 0.0  ;;  %v10194_v10 = vadd.f32 %v9870_v58, %v8892_v23  ;;  %14454 = vmatmul.msk.f32.gmra.mxu2 %vm39_vm0, %v18269_v26  ;;  %14584 = vmatmul.msk.f32.gmra.mxu3 %vm39_vm0, %v18295_v20  ;;  %v18945_v27 = vld [vmem:[#allocation92_spill] sm:$0xff] }
 0x8f1   :  { %14714 = vmatmul.msk.f32.gmra.mxu0 %vm39_vm0, %v18321_v38 }
 0x8f2   :  { %v13377_v6 = vsub.f32 %v13249_v9, %v13313_v39  ;;  %v11496_v35 = vadd.f32 %v11172_v54, %v10194_v10 }
 0x8f3   :  { %v9873_v48 = vpop.f32.mrf.mxu2  ;;  %v11175_v52 = vpop.f32.mrf.mxu3 }
 0x8f4   :  { %v13441_v3 = vand.u32 2147483647, %v13377_v6  ;;  %v12798_v63 = vadd.f32 %v12474_v44, %v11496_v35 }
 0x8f5   :  { %v8571_v37 = vpop.f32.mrf.mxu1 }
 0x8f6   :  { %v13504_v62 = vadd.f32 %v13503_v56, %v13441_v3  ;;  %v13186_v26 = vadd.f32 %v18245_v53, %v12798_v63  ;;  %v8893_v7 = vadd.f32 %v8571_v37, %v18943_v0  ;;  %v12480_v32 = vpop.f32.mrf.mxu0 }
 0x8f7   :  { %14324 = vmatmul.msk.f32.gmra.mxu1 %vm39_vm0, %v7863_v8 }
 0x8f8   :  { %v13314_v24 = vmax.f32 %v13186_v26, 0.0  ;;  %v10195_v15 = vadd.f32 %v9873_v48, %v8893_v7  ;;  %14455 = vmatmul.msk.f32.gmra.mxu2 %vm39_vm0, %v18282_v51  ;;  %14585 = vmatmul.msk.f32.gmra.mxu3 %vm39_vm0, %v18308_v45  ;;  %v7866_v7 = vld [vmem:[#allocation2 + $0x619] sm:$0xff] }
 0x8f9   :  { %14715 = vmatmul.msk.f32.gmra.mxu0 %vm39_vm0, %v18334_v33 }
 0x8fa   :  { %v13378_v17 = vsub.f32 %v13250_v16, %v13314_v24  ;;  %v11497_v12 = vadd.f32 %v11175_v52, %v10195_v15  ;;  %v13125_v52 = vadd.f32 %v18245_v53, %v17719_v2  ;;  %v18373_v2 = vld [vmem:[#allocation2 + $0x622] sm:$0xff] }
 0x8fb   :  { %v9876_v49 = vpop.f32.mrf.mxu2  ;;  %v11178_v42 = vpop.f32.mrf.mxu3 }
 0x8fc   :  { %v13442_v21 = vand.u32 2147483647, %v13378_v17  ;;  %v12799_v36 = vadd.f32 %v12477_v41, %v11497_v12  ;;  %v7865_v41 = vld [vmem:[#allocation2 + $0x609] sm:$0xff] }
 0x8fd   :  { %v8574_v14 = vpop.f32.mrf.mxu1 }
 0x8fe   :  { %v13505_v18 = vadd.f32 %v13504_v62, %v13442_v21  ;;  %v13187_v51 = vadd.f32 %v18245_v53, %v12799_v36  ;;  %v8894_v46 = vadd.f32 %v8574_v14, %v18944_v22  ;;  %v12483_v44 = vpop.f32.mrf.mxu0  ;;  %v18946_v62 = vld [vmem:[#allocation8_spill] sm:$0xff]  ;;  %v18947_v14 = vld [vmem:[#allocation10_spill] sm:$0xff] }
 0x8ff   :  { %14325 = vmatmul.msk.f32.gmra.mxu1 %vm39_vm0, %v7864_v55  ;;  %v7867_v22 = vld [vmem:[#allocation2 + $0x621] sm:$0xff] }
 0x900   :  { %v13315_v19 = vmax.f32 %v13187_v51, 0.0  ;;  %v10196_v57 = vadd.f32 %v9876_v49, %v8894_v46  ;;  %14456 = vmatmul.msk.f32.gmra.mxu2 %vm39_vm0, %v18295_v20  ;;  %14586 = vmatmul.msk.f32.gmra.mxu3 %vm39_vm0, %v18321_v38  ;;  %v13126_v49 = vadd.f32 %v18245_v53, %v17726_v29  ;;  %v18386_v29 = vld [vmem:[#allocation2 + $0x632] sm:$0xff] }
 0x901   :  { %14716 = vmatmul.msk.f32.gmra.mxu0 %vm39_vm0, %v18347_v40 }
 0x902   :  { %v13379_v28 = vsub.f32 %v13251_v34, %v13315_v19  ;;  %v11498_v43 = vadd.f32 %v11178_v42, %v10196_v57  ;;  %v13254_v46 = vmax.f32 %v13126_v49, 0.0  ;;  %v18950_v49 = vld [vmem:[#allocation16_spill] sm:$0xff] }
 0x903   :  { %v9879_v58 = vpop.f32.mrf.mxu2  ;;  %v11181_v54 = vpop.f32.mrf.mxu3 }
 0x904   :  { %v13443_v50 = vand.u32 2147483647, %v13379_v28  ;;  %v12800_v31 = vadd.f32 %v12480_v32, %v11498_v43  ;;  %v13253_v32 = vmax.f32 %v13125_v52, 0.0  ;;  %v13127_v43 = vadd.f32 %v18245_v53, %v17733_v13  ;;  %v18399_v13 = vld [vmem:[#allocation2 + $0x63a] sm:$0xff] }
 0x905   :  { %v8577_v47 = vpop.f32.mrf.mxu1 }
 0x906   :  { %v13506_v56 = vadd.f32 %v13505_v18, %v13443_v50  ;;  %v13188_v20 = vadd.f32 %v18245_v53, %v12800_v31  ;;  %v8895_v5 = vadd.f32 %v8577_v47, %v18945_v27  ;;  %v12486_v23 = vpop.f32.mrf.mxu0  ;;  %v18948_v31 = vld [vmem:[#allocation12_spill] sm:$0xff]  ;;  %v13255_v27 = vmax.f32 %v13127_v43, 0.0 }
 0x907   :  { %14326 = vmatmul.msk.f32.gmra.mxu1 %vm39_vm0, %v7865_v41 }
 0x908   :  { %v13316_v9 = vmax.f32 %v13188_v20, 0.0  ;;  %v10197_v39 = vadd.f32 %v9879_v58, %v8895_v5  ;;  %14457 = vmatmul.msk.f32.gmra.mxu2 %vm39_vm0, %v18308_v45  ;;  %14587 = vmatmul.msk.f32.gmra.mxu3 %vm39_vm0, %v18334_v33  ;;  %v7868_v20 = vld [vmem:[#allocation2 + $0x631] sm:$0xff] }
 0x909   :  { %14717 = vmatmul.msk.f32.gmra.mxu0 %vm39_vm0, %v18360_v61 }
 0x90a   :  { %v13380_v10 = vsub.f32 %v13252_v4, %v13316_v9  ;;  %v11499_v6 = vadd.f32 %v11181_v54, %v10197_v39 }
 0x90b   :  { %v9882_v35 = vpop.f32.mrf.mxu2  ;;  %v11184_v48 = vpop.f32.mrf.mxu3 }
 0x90c   :  { %v13444_v1 = vand.u32 2147483647, %v13380_v10  ;;  %v12801_v3 = vadd.f32 %v12483_v44, %v11499_v6  ;;  %v13128_v10 = vadd.f32 %v18245_v53, %v17740_v60  ;;  %v18412_v60 = vld [vmem:[#allocation2 + $0x64a] sm:$0xff] }
 0x90d   :  { %v8580_v63 = vpop.f32.mrf.mxu1 }
 0x90e   :  { %v13507_v37 = vadd.f32 %v13506_v56, %v13444_v1  ;;  %v13189_v45 = vadd.f32 %v18245_v53, %v12801_v3  ;;  %v8896_v26 = vadd.f32 %v8580_v63, %v18946_v62  ;;  %v12489_v0 = vpop.f32.mrf.mxu0  ;;  %v18949_v1 = vld [vmem:[#allocation14_spill] sm:$0xff] }
 0x90f   :  { %14327 = vmatmul.msk.f32.gmra.mxu1 %vm39_vm0, %v7866_v7 }
 0x910   :  { %v13317_v8 = vmax.f32 %v13189_v45, 0.0  ;;  %v10198_v16 = vadd.f32 %v9882_v35, %v8896_v26  ;;  %14458 = vmatmul.msk.f32.gmra.mxu2 %vm39_vm0, %v18321_v38  ;;  %14588 = vmatmul.msk.f32.gmra.mxu3 %vm39_vm0, %v18347_v40  ;;  %v13256_v45 = vmax.f32 %v13128_v10, 0.0 }
 0x911   :  { %14718 = vmatmul.msk.f32.gmra.mxu0 %vm39_vm0, %v18373_v2 }
 0x912   :  { %v13381_v24 = vsub.f32 %v13253_v32, %v13317_v8  ;;  %v11500_v15 = vadd.f32 %v11184_v48, %v10198_v16  ;;  %v13129_v16 = vadd.f32 %v18245_v53, %v17747_v25  ;;  %v18425_v25 = vld [vmem:[#allocation2 + $0x652] sm:$0xff] }
 0x913   :  { %v9885_v17 = vpop.f32.mrf.mxu2  ;;  %v11187_v12 = vpop.f32.mrf.mxu3 }
 0x914   :  { %v13445_v42 = vand.u32 2147483647, %v13381_v24  ;;  %v12802_v59 = vadd.f32 %v12486_v23, %v11500_v15 }
 0x915   :  { %v8583_v21 = vpop.f32.mrf.mxu1 }
 0x916   :  { %v13508_v36 = vadd.f32 %v13507_v37, %v13445_v42  ;;  %v13190_v38 = vadd.f32 %v18245_v53, %v12802_v59  ;;  %v8897_v18 = vadd.f32 %v8583_v21, %v18947_v14  ;;  %v12492_v51 = vpop.f32.mrf.mxu0  ;;  %v7869_v37 = vld [vmem:[#allocation2 + $0x639] sm:$0xff]  ;;  %v7870_v21 = vld [vmem:[#allocation2 + $0x649] sm:$0xff] }
 0x917   :  { %14328 = vmatmul.msk.f32.gmra.mxu1 %vm39_vm0, %v7867_v22 }
 0x918   :  { %v13318_v44 = vmax.f32 %v13190_v38, 0.0  ;;  %v10199_v55 = vadd.f32 %v9885_v17, %v8897_v18  ;;  %14459 = vmatmul.msk.f32.gmra.mxu2 %vm39_vm0, %v18334_v33  ;;  %14589 = vmatmul.msk.f32.gmra.mxu3 %vm39_vm0, %v18360_v61 }
 0x919   :  { %14719 = vmatmul.msk.f32.gmra.mxu0 %vm39_vm0, %v18386_v29 }
 0x91a   :  { %v13382_v34 = vsub.f32 %v13254_v46, %v13318_v44  ;;  %v11501_v19 = vadd.f32 %v11187_v12, %v10199_v55  ;;  %v13130_v44 = vadd.f32 %v18245_v53, %v17754_v30  ;;  %v18438_v30 = vld [vmem:[#allocation2 + $0x662] sm:$0xff] }
 0x91b   :  { %v9888_v57 = vpop.f32.mrf.mxu2  ;;  %v11190_v28 = vpop.f32.mrf.mxu3 }
 0x91c   :  { %v13446_v58 = vand.u32 2147483647, %v13382_v34  ;;  %v12803_v54 = vadd.f32 %v12489_v0, %v11501_v19 }
 0x91d   :  { %v8586_v11 = vpop.f32.mrf.mxu1 }
 0x91e   :  { %v13509_v50 = vadd.f32 %v13508_v36, %v13446_v58  ;;  %v13191_v33 = vadd.f32 %v18245_v53, %v12803_v54  ;;  %v8898_v47 = vadd.f32 %v8586_v11, %v18948_v31  ;;  %v12495_v56 = vpop.f32.mrf.mxu0  ;;  %v13257_v36 = vmax.f32 %v13129_v16, 0.0  ;;  %v7871_v54 = vld [vmem:[#allocation2 + $0x651] sm:$0xff]  ;;  %v18955_v16 = vld [vmem:[#allocation22_spill] sm:$0xff] }
 0x91f   :  { %14329 = vmatmul.msk.f32.gmra.mxu1 %vm39_vm0, %v7868_v20  ;;  %v13258_v11 = vmax.f32 %v13130_v44, 0.0 }
 0x920   :  { %v13319_v5 = vmax.f32 %v13191_v33, 0.0  ;;  %v10200_v23 = vadd.f32 %v9888_v57, %v8898_v47  ;;  %14460 = vmatmul.msk.f32.gmra.mxu2 %vm39_vm0, %v18347_v40  ;;  %14590 = vmatmul.msk.f32.gmra.mxu3 %vm39_vm0, %v18373_v2 }
 0x921   :  { %14720 = vmatmul.msk.f32.gmra.mxu0 %vm39_vm0, %v18399_v13 }
 0x922   :  { %v13383_v41 = vsub.f32 %v13255_v27, %v13319_v5  ;;  %v11502_v4 = vadd.f32 %v11190_v28, %v10200_v23  ;;  %v18951_v28 = vld [vmem:[#allocation18_spill] sm:$0xff] }
 0x923   :  { %v9891_v9 = vpop.f32.mrf.mxu2  ;;  %v11193_v39 = vpop.f32.mrf.mxu3  ;;  %v18952_v27 = vld [vmem:[#allocation90_spill] sm:$0xff] }
 0x924   :  { %v13447_v6 = vand.u32 2147483647, %v13383_v41  ;;  %v12804_v35 = vadd.f32 %v12492_v51, %v11502_v4  ;;  %v13131_v5 = vadd.f32 %v18245_v53, %v18952_v27 }
 0x925   :  { %v8589_v48 = vpop.f32.mrf.mxu1 }
 0x926   :  { %v13510_v52 = vadd.f32 %v13509_v50, %v13447_v6  ;;  %v13192_v40 = vadd.f32 %v18245_v53, %v12804_v35  ;;  %v8899_v3 = vadd.f32 %v8589_v48, %v18949_v1  ;;  %v12498_v63 = vpop.f32.mrf.mxu0  ;;  %v7872_v35 = vld [vmem:[#allocation2 + $0x661] sm:$0xff]  ;;  %v13259_v48 = vmax.f32 %v13131_v5, 0.0  ;;  %v18451_v1 = vld [vmem:[#allocation2 + $0x66a] sm:$0xff] }
 0x927   :  { %14330 = vmatmul.msk.f32.gmra.mxu1 %vm39_vm0, %v7869_v37 }
 0x928   :  { %v13320_v62 = vmax.f32 %v13192_v40, 0.0  ;;  %v10201_v26 = vadd.f32 %v9891_v9, %v8899_v3  ;;  %14461 = vmatmul.msk.f32.gmra.mxu2 %vm39_vm0, %v18360_v61  ;;  %14591 = vmatmul.msk.f32.gmra.mxu3 %vm39_vm0, %v18386_v29 }
 0x929   :  { %14721 = vmatmul.msk.f32.gmra.mxu0 %vm39_vm0, %v18412_v60 }
 0x92a   :  { %v13384_v0 = vsub.f32 %v13256_v45, %v13320_v62  ;;  %v11503_v7 = vadd.f32 %v11193_v39, %v10201_v26  ;;  %v18953_v39 = vld [vmem:[#allocation20_spill] sm:$0xff]  ;;  %v18954_v62 = vld [vmem:[#allocation93_spill] sm:$0xff] }
 0x92b   :  { %v9894_v32 = vpop.f32.mrf.mxu2  ;;  %v11196_v8 = vpop.f32.mrf.mxu3  ;;  %v13132_v26 = vadd.f32 %v18245_v53, %v18954_v62 }
 0x92c   :  { %v13448_v24 = vand.u32 2147483647, %v13384_v0  ;;  %v12805_v15 = vadd.f32 %v12495_v56, %v11503_v7 }
 0x92d   :  { %v8592_v17 = vpop.f32.mrf.mxu1 }
 0x92e   :  { %v13511_v12 = vadd.f32 %v13510_v52, %v13448_v24  ;;  %v13193_v61 = vadd.f32 %v18245_v53, %v12805_v15  ;;  %v8900_v42 = vadd.f32 %v8592_v17, %v18950_v49  ;;  %v12501_v59 = vpop.f32.mrf.mxu0  ;;  %v7873_v17 = vld [vmem:[#allocation2 + $0x669] sm:$0xff] }
 0x92f   :  { %14331 = vmatmul.msk.f32.gmra.mxu1 %vm39_vm0, %v7870_v21 }
 0x930   :  { %v13321_v38 = vmax.f32 %v13193_v61, 0.0  ;;  %v10202_v14 = vadd.f32 %v9894_v32, %v8900_v42  ;;  %14462 = vmatmul.msk.f32.gmra.mxu2 %vm39_vm0, %v18373_v2  ;;  %14592 = vmatmul.msk.f32.gmra.mxu3 %vm39_vm0, %v18399_v13  ;;  %v18464_v42 = vld [vmem:[#allocation2 + $0x67a] sm:$0xff] }
 0x931   :  { %14722 = vmatmul.msk.f32.gmra.mxu0 %vm39_vm0, %v18425_v25 }
 0x932   :  { %v13385_v18 = vsub.f32 %v13257_v36, %v13321_v38  ;;  %v11504_v51 = vadd.f32 %v11196_v8, %v10202_v14  ;;  %v18956_v14 = vld [vmem:[#allocation95_spill] sm:$0xff] }
 0x933   :  { %v9897_v22 = vpop.f32.mrf.mxu2  ;;  %v11199_v46 = vpop.f32.mrf.mxu3 }
 0x934   :  { %v13449_v55 = vand.u32 2147483647, %v13385_v18  ;;  %v12806_v34 = vadd.f32 %v12498_v63, %v11504_v51  ;;  %v13133_v18 = vadd.f32 %v18245_v53, %v18956_v14 }
 0x935   :  { %v8595_v19 = vpop.f32.mrf.mxu1 }
 0x936   :  { %v13512_v57 = vadd.f32 %v13511_v12, %v13449_v55  ;;  %v13194_v2 = vadd.f32 %v18245_v53, %v12806_v34  ;;  %v8901_v43 = vadd.f32 %v8595_v19, %v18951_v28  ;;  %v12504_v58 = vpop.f32.mrf.mxu0  ;;  %v13260_v12 = vmax.f32 %v13132_v26, 0.0  ;;  %v18957_v55 = vld [vmem:[#allocation24_spill] sm:$0xff] }
 0x937   :  { %14332 = vmatmul.msk.f32.gmra.mxu1 %vm39_vm0, %v7871_v54 }
 0x938   :  { %v13322_v50 = vmax.f32 %v13194_v2, 0.0  ;;  %v10203_v33 = vadd.f32 %v9897_v22, %v8901_v43  ;;  %14463 = vmatmul.msk.f32.gmra.mxu2 %vm39_vm0, %v18386_v29  ;;  %14593 = vmatmul.msk.f32.gmra.mxu3 %vm39_vm0, %v18412_v60  ;;  %v13261_v2 = vmax.f32 %v13133_v18, 0.0 }
 0x939   :  { %14723 = vmatmul.msk.f32.gmra.mxu0 %vm39_vm0, %v18438_v30 }
 0x93a   :  { %v13386_v31 = vsub.f32 %v13258_v11, %v13322_v50  ;;  %v11505_v47 = vadd.f32 %v11199_v46, %v10203_v33 }
 0x93b   :  { %v9900_v56 = vpop.f32.mrf.mxu2  ;;  %v11202_v20 = vpop.f32.mrf.mxu3 }
 0x93c   :  { %v13450_v23 = vand.u32 2147483647, %v13386_v31  ;;  %v12807_v41 = vadd.f32 %v12501_v59, %v11505_v47  ;;  %v18958_v31 = vld [vmem:[#allocation25_spill] sm:$0xff] }
 0x93d   :  { %v8598_v4 = vpop.f32.mrf.mxu1  ;;  %v13134_v47 = vadd.f32 %v18245_v53, %v18958_v31 }
 0x93e   :  { %v13513_v9 = vadd.f32 %v13512_v57, %v13450_v23  ;;  %v13195_v29 = vadd.f32 %v18245_v53, %v12807_v41  ;;  %v8902_v10 = vadd.f32 %v8598_v4, %v18953_v39  ;;  %v12507_v6 = vpop.f32.mrf.mxu0  ;;  %v7874_v57 = vld [vmem:[#allocation2 + $0x679] sm:$0xff]  ;;  %v18959_v23 = vld [vmem:[#allocation27_spill] sm:$0xff] }
 0x93f   :  { %14333 = vmatmul.msk.f32.gmra.mxu1 %vm39_vm0, %v7872_v35 }
 0x940   :  { %v13323_v52 = vmax.f32 %v13195_v29, 0.0  ;;  %v10204_v40 = vadd.f32 %v9900_v56, %v8902_v10  ;;  %14464 = vmatmul.msk.f32.gmra.mxu2 %vm39_vm0, %v18399_v13  ;;  %14594 = vmatmul.msk.f32.gmra.mxu3 %vm39_vm0, %v18425_v25  ;;  %v13262_v29 = vmax.f32 %v13134_v47, 0.0 }
 0x941   :  { %14724 = vmatmul.msk.f32.gmra.mxu0 %vm39_vm0, %v18451_v1 }
 0x942   :  { %v13387_v3 = vsub.f32 %v13259_v48, %v13323_v52  ;;  %v11506_v63 = vadd.f32 %v11202_v20, %v10204_v40 }
 0x943   :  { %v9903_v37 = vpop.f32.mrf.mxu2  ;;  %v11205_v45 = vpop.f32.mrf.mxu3 }
 0x944   :  { %v13451_v0 = vand.u32 2147483647, %v13387_v3  ;;  %v12808_v7 = vadd.f32 %v12504_v58, %v11506_v63  ;;  %v18477_v58 = vld [vmem:[#allocation2 + $0x682] sm:$0xff]  ;;  %v18960_v3 = vld [vmem:[#allocation28_spill] sm:$0xff] }
 0x945   :  { %v8601_v32 = vpop.f32.mrf.mxu1  ;;  %v13135_v63 = vadd.f32 %v18245_v53, %v18960_v3 }
 0x946   :  { %v13514_v8 = vadd.f32 %v13513_v9, %v13451_v0  ;;  %v13196_v13 = vadd.f32 %v18245_v53, %v12808_v7  ;;  %v8903_v24 = vadd.f32 %v8601_v32, %v18955_v16  ;;  %v12510_v15 = vpop.f32.mrf.mxu0  ;;  %v7875_v9 = vld [vmem:[#allocation2 + $0x681] sm:$0xff] }
 0x947   :  { %14334 = vmatmul.msk.f32.gmra.mxu1 %vm39_vm0, %v7873_v17 }
 0x948   :  { %v13324_v61 = vmax.f32 %v13196_v13, 0.0  ;;  %v10205_v49 = vadd.f32 %v9903_v37, %v8903_v24  ;;  %14465 = vmatmul.msk.f32.gmra.mxu2 %vm39_vm0, %v18412_v60  ;;  %14595 = vmatmul.msk.f32.gmra.mxu3 %vm39_vm0, %v18438_v30  ;;  %v13263_v13 = vmax.f32 %v13135_v63, 0.0 }
 0x949   :  { %14725 = vmatmul.msk.f32.gmra.mxu0 %vm39_vm0, %v18464_v42 }
 0x94a   :  { %v13388_v59 = vsub.f32 %v13260_v12, %v13324_v61  ;;  %v11507_v21 = vadd.f32 %v11205_v45, %v10205_v49 }
 0x94b   :  { %v9906_v36 = vpop.f32.mrf.mxu2  ;;  %v11208_v38 = vpop.f32.mrf.mxu3 }
 0x94c   :  { %v13452_v51 = vand.u32 2147483647, %v13388_v59  ;;  %v12809_v22 = vadd.f32 %v12507_v6, %v11507_v21  ;;  %v11782_v6 = vld [vmem:[#allocation2 + $0x692] sm:$0xff]  ;;  %v18962_v59 = vld [vmem:[#allocation31_spill] sm:$0xff] }
 0x94d   :  { %v8604_v46 = vpop.f32.mrf.mxu1  ;;  %v13136_v21 = vadd.f32 %v18245_v53, %v18962_v59  ;;  %v18969_v59 = vld [vmem:[#allocation42_spill] sm:$0xff] }
 0x94e   :  { %v13515_v44 = vadd.f32 %v13514_v8, %v13452_v51  ;;  %v13197_v60 = vadd.f32 %v18245_v53, %v12809_v22  ;;  %v8904_v34 = vadd.f32 %v8604_v46, %v18957_v55  ;;  %v12513_v19 = vpop.f32.mrf.mxu0  ;;  %v7876_v8 = vld [vmem:[#allocation2 + $0x691] sm:$0xff] }
 0x94f   :  { %14335 = vmatmul.msk.f32.gmra.mxu1 %vm39_vm0, %v7874_v57 }
 0x950   :  { %v13325_v28 = vmax.f32 %v13197_v60, 0.0  ;;  %v10206_v43 = vadd.f32 %v9906_v36, %v8904_v34  ;;  %14466 = vmatmul.msk.f32.gmra.mxu2 %vm39_vm0, %v18425_v25  ;;  %14596 = vmatmul.msk.f32.gmra.mxu3 %vm39_vm0, %v18451_v1  ;;  %v13264_v60 = vmax.f32 %v13136_v21, 0.0 }
 0x951   :  { %14726 = vmatmul.msk.f32.gmra.mxu0 %vm39_vm0, %v18477_v58 }
 0x952   :  { %v13389_v54 = vsub.f32 %v13261_v2, %v13325_v28  ;;  %v11508_v11 = vadd.f32 %v11208_v38, %v10206_v43 }
 0x953   :  { %v9909_v50 = vpop.f32.mrf.mxu2  ;;  %v11211_v33 = vpop.f32.mrf.mxu3 }
 0x954   :  { %v13453_v56 = vand.u32 2147483647, %v13389_v54  ;;  %v12810_v20 = vadd.f32 %v12510_v15, %v11508_v11  ;;  %v11783_v15 = vld [vmem:[#allocation2 + $0x69a] sm:$0xff] }
 0x955   :  { %v8607_v27 = vpop.f32.mrf.mxu1  ;;  %v18964_v54 = vld [vmem:[#allocation34_spill] sm:$0xff] }
 0x956   :  { %v13516_v5 = vadd.f32 %v13515_v44, %v13453_v56  ;;  %v13198_v25 = vadd.f32 %v18245_v53, %v12810_v20  ;;  %v8905_v41 = vadd.f32 %v8607_v27, %v18959_v23  ;;  %v12516_v4 = vpop.f32.mrf.mxu0  ;;  %v7877_v44 = vld [vmem:[#allocation2 + $0x699] sm:$0xff]  ;;  %v13137_v11 = vadd.f32 %v18245_v53, %v18964_v54  ;;  %v18965_v20 = vld [vmem:[#allocation36_spill] sm:$0xff] }
 0x957   :  { %14336 = vmatmul.msk.f32.gmra.mxu1 %vm39_vm0, %v7875_v9 }
 0x958   :  { %v13326_v39 = vmax.f32 %v13198_v25, 0.0  ;;  %v10207_v10 = vadd.f32 %v9909_v50, %v8905_v41  ;;  %14467 = vmatmul.msk.f32.gmra.mxu2 %vm39_vm0, %v18438_v30  ;;  %14597 = vmatmul.msk.f32.gmra.mxu3 %vm39_vm0, %v18464_v42  ;;  %v18961_v30 = vld [vmem:[#allocation30_spill] sm:$0xff]  ;;  %v13265_v25 = vmax.f32 %v13137_v11, 0.0 }
 0x959   :  { %14727 = vmatmul.msk.f32.gmra.mxu0 %vm39_vm0, %v11782_v6 }
 0x95a   :  { %v13390_v35 = vsub.f32 %v13262_v29, %v13326_v39  ;;  %v11509_v48 = vadd.f32 %v11211_v33, %v10207_v10 }
 0x95b   :  { %v9912_v52 = vpop.f32.mrf.mxu2  ;;  %v11214_v40 = vpop.f32.mrf.mxu3 }
 0x95c   :  { %v13454_v37 = vand.u32 2147483647, %v13390_v35  ;;  %v12811_v45 = vadd.f32 %v12513_v19, %v11509_v48  ;;  %v11784_v19 = vld [vmem:[#allocation2 + $0x6aa] sm:$0xff] }
 0x95d   :  { %v8610_v62 = vpop.f32.mrf.mxu1 }
 0x95e   :  { %v13517_v26 = vadd.f32 %v13516_v5, %v13454_v37  ;;  %v13199_v0 = vadd.f32 %v18245_v53, %v12811_v45  ;;  %v8906_v7 = vadd.f32 %v8610_v62, %v18961_v30  ;;  %v12519_v32 = vpop.f32.mrf.mxu0  ;;  %v7878_v5 = vld [vmem:[#allocation2 + $0x6a9] sm:$0xff]  ;;  %v7879_v62 = vld [vmem:[#allocation2 + $0x6b1] sm:$0xff] }
 0x95f   :  { %14337 = vmatmul.msk.f32.gmra.mxu1 %vm39_vm0, %v7876_v8  ;;  %v18967_v37 = vld [vmem:[#allocation39_spill] sm:$0xff] }
 0x960   :  { %v13327_v16 = vmax.f32 %v13199_v0, 0.0  ;;  %v10208_v24 = vadd.f32 %v9912_v52, %v8906_v7  ;;  %14468 = vmatmul.msk.f32.gmra.mxu2 %vm39_vm0, %v18451_v1  ;;  %14598 = vmatmul.msk.f32.gmra.mxu3 %vm39_vm0, %v18477_v58  ;;  %v18963_v1 = vld [vmem:[#allocation33_spill] sm:$0xff] }
 0x961   :  { %14728 = vmatmul.msk.f32.gmra.mxu0 %vm39_vm0, %v11783_v15 }
 0x962   :  { %v13391_v17 = vsub.f32 %v13263_v13, %v13327_v16  ;;  %v11510_v12 = vadd.f32 %v11214_v40, %v10208_v24  ;;  %v18968_v16 = vld [vmem:[#allocation40_spill] sm:$0xff] }
 0x963   :  { %v9915_v61 = vpop.f32.mrf.mxu2  ;;  %v11217_v49 = vpop.f32.mrf.mxu3  ;;  %v13139_v24 = vadd.f32 %v18245_v53, %v18968_v16 }
 0x964   :  { %v13455_v36 = vand.u32 2147483647, %v13391_v17  ;;  %v12812_v38 = vadd.f32 %v12516_v4, %v11510_v12  ;;  %v11785_v4 = vld [vmem:[#allocation2 + $0x6b2] sm:$0xff] }
 0x965   :  { %v8613_v14 = vpop.f32.mrf.mxu1 }
 0x966   :  { %v13518_v18 = vadd.f32 %v13517_v26, %v13455_v36  ;;  %v13200_v51 = vadd.f32 %v18245_v53, %v12812_v38  ;;  %v8907_v22 = vadd.f32 %v8613_v14, %v18963_v1  ;;  %v12522_v46 = vpop.f32.mrf.mxu0  ;;  %v13267_v38 = vmax.f32 %v13139_v24, 0.0 }
 0x967   :  { %14338 = vmatmul.msk.f32.gmra.mxu1 %vm39_vm0, %v7877_v44  ;;  %v18970_v44 = vld [vmem:[#allocation43_spill] sm:$0xff] }
 0x968   :  { %v13328_v55 = vmax.f32 %v13200_v51, 0.0  ;;  %v10209_v34 = vadd.f32 %v9915_v61, %v8907_v22  ;;  %14469 = vmatmul.msk.f32.gmra.mxu2 %vm39_vm0, %v18464_v42  ;;  %14599 = vmatmul.msk.f32.gmra.mxu3 %vm39_vm0, %v11782_v6  ;;  %v18966_v6 = vld [vmem:[#allocation37_spill] sm:$0xff] }
 0x969   :  { %14729 = vmatmul.msk.f32.gmra.mxu0 %vm39_vm0, %v11784_v19  ;;  %v13138_v35 = vadd.f32 %v18245_v53, %v18966_v6 }
 0x96a   :  { %v13392_v57 = vsub.f32 %v13264_v60, %v13328_v55  ;;  %v11511_v2 = vadd.f32 %v11217_v49, %v10209_v34  ;;  %v13140_v60 = vadd.f32 %v18245_v53, %v18970_v44 }
 0x96b   :  { %v9918_v28 = vpop.f32.mrf.mxu2  ;;  %v11220_v43 = vpop.f32.mrf.mxu3  ;;  %v13266_v26 = vmax.f32 %v13138_v35, 0.0 }
 0x96c   :  { %v13456_v50 = vand.u32 2147483647, %v13392_v57  ;;  %v12813_v33 = vadd.f32 %v12519_v32, %v11511_v2  ;;  %v13268_v11 = vmax.f32 %v13140_v60, 0.0 }
 0x96d   :  { %v8616_v31 = vpop.f32.mrf.mxu1 }
 0x96e   :  { %v13519_v47 = vadd.f32 %v13518_v18, %v13456_v50  ;;  %v13201_v56 = vadd.f32 %v18245_v53, %v12813_v33  ;;  %v8908_v42 = vadd.f32 %v8616_v31, %v18965_v20  ;;  %v12525_v27 = vpop.f32.mrf.mxu0 }
 0x96f   :  { %14339 = vmatmul.msk.f32.gmra.mxu1 %vm39_vm0, %v7878_v5 }
 0x970   :  { %v13329_v23 = vmax.f32 %v13201_v56, 0.0  ;;  %v10210_v41 = vadd.f32 %v9918_v28, %v8908_v42  ;;  %14470 = vmatmul.msk.f32.gmra.mxu2 %vm39_vm0, %v18477_v58  ;;  %14600 = vmatmul.msk.f32.gmra.mxu3 %vm39_vm0, %v11783_v15  ;;  %v18971_v28 = vld [vmem:[#allocation45_spill] sm:$0xff]  ;;  %v18972_v42 = vld [vmem:[#allocation46_spill] sm:$0xff] }
 0x971   :  { %14730 = vmatmul.msk.f32.gmra.mxu0 %vm39_vm0, %v11785_v4  ;;  %v18537_v4 = vld [vmem:[%s18601_s2] ss:$0 sm:$0xff]  ;;  %s15255_s2 = smov [#allocation4]  }
 0x972   :  { %v13393_v9 = vsub.f32 %v13265_v25, %v13329_v23  ;;  %v11512_v29 = vadd.f32 %v11220_v43, %v10210_v41  ;;  %s13551_s16 = sshll.u32 %s15255_s2, 4  ;;  %s13552_s16 = int_to_ptr.vmem [resolvable:$true] %s13551_s16 }
 0x973   :  { %v9921_v39 = vpop.f32.mrf.mxu2  ;;  %v11223_v10 = vpop.f32.mrf.mxu3 }
 0x974   :  { %v13457_v48 = vand.u32 2147483647, %v13393_v9  ;;  %v12814_v52 = vadd.f32 %v12522_v46, %v11512_v29  ;;  %v18973_v29 = vld [vmem:[#allocation48_spill] sm:$0xff] }
 0x975   :  { %v8619_v40 = vpop.f32.mrf.mxu1 }
 0x976   :  { %v13520_v3 = vadd.f32 %v13519_v47, %v13457_v48  ;;  %v13202_v63 = vadd.f32 %v18245_v53, %v12814_v52  ;;  %v8909_v58 = vadd.f32 %v8619_v40, %v18967_v37  ;;  %v12528_v45 = vpop.f32.mrf.mxu0 }
 0x977   :  { %14340 = vmatmul.msk.f32.gmra.mxu1 %vm39_vm0, %v7879_v62 }
 0x978   :  { %v13330_v0 = vmax.f32 %v13202_v63, 0.0  ;;  %v10211_v30 = vadd.f32 %v9921_v39, %v8909_v58  ;;  %v18974_v63 = vld [vmem:[#allocation49_spill] sm:$0xff] }
 0x979   :  { %v13142_v37 = vadd.f32 %v18537_v4, %v18974_v63 }
 0x97a   :  { %v13394_v7 = vsub.f32 %v13266_v26, %v13330_v0  ;;  %v11513_v32 = vadd.f32 %v11223_v10, %v10211_v30  ;;  %v18975_v30 = vld [vmem:[#allocation51_spill] sm:$0xff] }
 0x97b   :  { %v9924_v8 = vpop.f32.mrf.mxu2  ;;  %v11226_v13 = vpop.f32.mrf.mxu3 }
 0x97c   :  { %v13458_v15 = vand.u32 2147483647, %v13394_v7  ;;  %v12815_v17 = vadd.f32 %v12525_v27, %v11513_v32  ;;  %v13141_v27 = vadd.f32 %v18245_v53, %v18972_v42 }
 0x97d   :  { %v8622_v12 = vpop.f32.mrf.mxu1 }
 0x97e   :  { %v13521_v61 = vadd.f32 %v13520_v3, %v13458_v15  ;;  %v13203_v49 = vadd.f32 %v18245_v53, %v12815_v17  ;;  %v8910_v21 = vadd.f32 %v8622_v12, %v18969_v59  ;;  %v12531_v36 = vpop.f32.mrf.mxu0  ;;  %v13269_v6 = vmax.f32 %v13141_v27, 0.0 }
 0x980   :  { %v13331_v14 = vmax.f32 %v13203_v49, 0.0  ;;  %v10212_v18 = vadd.f32 %v9924_v8, %v8910_v21  ;;  %v13270_v8 = vmax.f32 %v13142_v37, 0.0 }
 0x982   :  { %v13395_v51 = vsub.f32 %v13267_v38, %v13331_v14  ;;  %v11514_v1 = vadd.f32 %v11226_v13, %v10212_v18  ;;  %v18977_v18 = vld [vmem:[#allocation54_spill] sm:$0xff] }
 0x983   :  { %v9927_v22 = vpop.f32.mrf.mxu2  ;;  %v11229_v46 = vpop.f32.mrf.mxu3 }
 0x984   :  { %v13459_v55 = vand.u32 2147483647, %v13395_v51  ;;  %v12816_v34 = vadd.f32 %v12528_v45, %v11514_v1 }
 0x985   :  { %v8625_v19 = vpop.f32.mrf.mxu1 }
 0x986   :  { %v13522_v57 = vadd.f32 %v13521_v61, %v13459_v55  ;;  %v13204_v2 = vadd.f32 %v18245_v53, %v12816_v34  ;;  %v8911_v43 = vadd.f32 %v8625_v19, %v18971_v28  ;;  %v12534_v54 = vpop.f32.mrf.mxu0  ;;  %v18976_v61 = vld [vmem:[#allocation52_spill] sm:$0xff] }
 0x987   :  { %v13143_v49 = vadd.f32 %v18537_v4, %v18976_v61 }
 0x988   :  { %v13332_v50 = vmax.f32 %v13204_v2, 0.0  ;;  %v10213_v33 = vadd.f32 %v9927_v22, %v8911_v43 }
 0x989   :  { %v13271_v22 = vmax.f32 %v13143_v49, 0.0 }
 0x98a   :  { %v13396_v31 = vsub.f32 %v13268_v11, %v13332_v50  ;;  %v11515_v47 = vadd.f32 %v11229_v46, %v10213_v33  ;;  %v18979_v33 = vld [vmem:[#allocation57_spill] sm:$0xff] }
 0x98b   :  { %v9930_v56 = vpop.f32.mrf.mxu2  ;;  %v11232_v20 = vpop.f32.mrf.mxu3 }
 0x98c   :  { %v13460_v5 = vand.u32 2147483647, %v13396_v31  ;;  %v12817_v25 = vadd.f32 %v12531_v36, %v11515_v47 }
 0x98d   :  { %v8628_v23 = vpop.f32.mrf.mxu1 }
 0x98e   :  { %v13523_v41 = vadd.f32 %v13522_v57, %v13460_v5  ;;  %v13205_v9 = vadd.f32 %v18537_v4, %v12817_v25  ;;  %v8912_v39 = vadd.f32 %v8628_v23, %v18973_v29  ;;  %v12537_v10 = vpop.f32.mrf.mxu0  ;;  %v18978_v57 = vld [vmem:[#allocation55_spill] sm:$0xff] }
 0x98f   :  { %v13144_v2 = vadd.f32 %v18537_v4, %v18978_v57 }
 0x990   :  { %v13333_v35 = vmax.f32 %v13205_v9, 0.0  ;;  %v10214_v48 = vadd.f32 %v9930_v56, %v8912_v39 }
 0x991   :  { %v13272_v56 = vmax.f32 %v13144_v2, 0.0 }
 0x992   :  { %v13397_v52 = vsub.f32 %v13269_v6, %v13333_v35  ;;  %v11516_v40 = vadd.f32 %v11232_v20, %v10214_v48  ;;  %v18981_v48 = vld [vmem:[#allocation60_spill] sm:$0xff] }
 0x993   :  { %v9933_v53 = vpop.f32.mrf.mxu2  ;;  %v11235_v3 = vpop.f32.mrf.mxu3 }
 0x994   :  { %v13461_v58 = vand.u32 2147483647, %v13397_v52  ;;  %v12818_v45 = vadd.f32 %v12534_v54, %v11516_v40 }
 0x995   :  { %v8631_v62 = vpop.f32.mrf.mxu1 }
 0x996   :  { %v13524_v26 = vadd.f32 %v13523_v41, %v13461_v58  ;;  %v13206_v0 = vadd.f32 %v18537_v4, %v12818_v45  ;;  %v8913_v7 = vadd.f32 %v8631_v62, %v18975_v30  ;;  %v12540_v32 = vpop.f32.mrf.mxu0  ;;  %v18980_v41 = vld [vmem:[#allocation58_spill] sm:$0xff] }
 0x997   :  { %v13145_v9 = vadd.f32 %v18537_v4, %v18980_v41 }
 0x998   :  { %v13334_v13 = vmax.f32 %v13206_v0, 0.0  ;;  %v10215_v16 = vadd.f32 %v9933_v53, %v8913_v7 }
 0x999   :  { %v13273_v53 = vmax.f32 %v13145_v9, 0.0 }
 0x99a   :  { %v13398_v24 = vsub.f32 %v13270_v8, %v13334_v13  ;;  %v11517_v15 = vadd.f32 %v11235_v3, %v10215_v16  ;;  %v18983_v16 = vld [vmem:[#allocation63_spill] sm:$0xff] }
 0x99b   :  { %v9936_v17 = vpop.f32.mrf.mxu2  ;;  %v11238_v12 = vpop.f32.mrf.mxu3 }
 0x99c   :  { %v13462_v59 = vand.u32 2147483647, %v13398_v24  ;;  %v12819_v21 = vadd.f32 %v12537_v10, %v11517_v15 }
 0x99d   :  { %v8634_v36 = vpop.f32.mrf.mxu1 }
 0x99e   :  { %v13525_v38 = vadd.f32 %v13524_v26, %v13462_v59  ;;  %v13207_v14 = vadd.f32 %v18537_v4, %v12819_v21  ;;  %v8914_v51 = vadd.f32 %v8634_v36, %v18977_v18  ;;  %v12543_v1 = vpop.f32.mrf.mxu0  ;;  %v18982_v26 = vld [vmem:[#allocation61_spill] sm:$0xff] }
 0x99f   :  { %v13146_v0 = vadd.f32 %v18537_v4, %v18982_v26 }
 0x9a0   :  { %v13335_v46 = vmax.f32 %v13207_v14, 0.0  ;;  %v10216_v44 = vadd.f32 %v9936_v17, %v8914_v51 }
 0x9a1   :  { %v13274_v17 = vmax.f32 %v13146_v0, 0.0 }
 0x9a2   :  { %v13399_v60 = vsub.f32 %v13271_v22, %v13335_v46  ;;  %v11518_v55 = vadd.f32 %v11238_v12, %v10216_v44  ;;  %v18985_v44 = vld [vmem:[#allocation66_spill] sm:$0xff] }
 0x9a3   :  { %v9939_v34 = vpop.f32.mrf.mxu2  ;;  %v11241_v19 = vpop.f32.mrf.mxu3 }
 0x9a4   :  { %v13463_v28 = vand.u32 2147483647, %v13399_v60  ;;  %v12820_v43 = vadd.f32 %v12540_v32, %v11518_v55 }
 0x9a5   :  { %v8637_v54 = vpop.f32.mrf.mxu1 }
 0x9a6   :  { %v13526_v11 = vadd.f32 %v13525_v38, %v13463_v28  ;;  %v13208_v50 = vadd.f32 %v18537_v4, %v12820_v43  ;;  %v8915_v31 = vadd.f32 %v8637_v54, %v18979_v33  ;;  %v12546_v47 = vpop.f32.mrf.mxu0  ;;  %v18984_v38 = vld [vmem:[#allocation64_spill] sm:$0xff] }
 0x9a7   :  { %v13147_v14 = vadd.f32 %v18537_v4, %v18984_v38 }
 0x9a8   :  { %v13336_v20 = vmax.f32 %v13208_v50, 0.0  ;;  %v10217_v42 = vadd.f32 %v9939_v34, %v8915_v31 }
 0x9a9   :  { %v13275_v34 = vmax.f32 %v13147_v14, 0.0 }
 0x9aa   :  { %v13400_v27 = vsub.f32 %v13272_v56, %v13336_v20  ;;  %v11519_v5 = vadd.f32 %v11241_v19, %v10217_v42  ;;  %v18987_v42 = vld [vmem:[#allocation69_spill] sm:$0xff] }
 0x9ab   :  { %v9942_v25 = vpop.f32.mrf.mxu2  ;;  %v11244_v23 = vpop.f32.mrf.mxu3 }
 0x9ac   :  { %v13464_v29 = vand.u32 2147483647, %v13400_v27  ;;  %v12821_v39 = vadd.f32 %v12543_v1, %v11519_v5 }
 0x9ad   :  { %v8640_v10 = vpop.f32.mrf.mxu1 }
 0x9ae   :  { %v13527_v6 = vadd.f32 %v13526_v11, %v13464_v29  ;;  %v13209_v35 = vadd.f32 %v18537_v4, %v12821_v39  ;;  %v8916_v52 = vadd.f32 %v8640_v10, %v18981_v48  ;;  %v12549_v40 = vpop.f32.mrf.mxu0  ;;  %v18986_v11 = vld [vmem:[#allocation67_spill] sm:$0xff] }
 0x9af   :  { %v13148_v50 = vadd.f32 %v18537_v4, %v18986_v11 }
 0x9b0   :  { %v13337_v3 = vmax.f32 %v13209_v35, 0.0  ;;  %v10218_v63 = vadd.f32 %v9942_v25, %v8916_v52 }
 0x9b1   :  { %v13276_v5 = vmax.f32 %v13148_v50, 0.0 }
 0x9b2   :  { %v13401_v37 = vsub.f32 %v13273_v53, %v13337_v3  ;;  %v11520_v58 = vadd.f32 %v11244_v23, %v10218_v63  ;;  %v18989_v63 = vld [vmem:[#allocation72_spill] sm:$0xff] }
 0x9b3   :  { %v9945_v45 = vpop.f32.mrf.mxu2  ;;  %v11247_v62 = vpop.f32.mrf.mxu3 }
 0x9b4   :  { %v13465_v30 = vand.u32 2147483647, %v13401_v37  ;;  %v12822_v7 = vadd.f32 %v12546_v47, %v11520_v58 }
 0x9b5   :  { %v8643_v32 = vpop.f32.mrf.mxu1 }
 0x9b6   :  { %v13528_v8 = vadd.f32 %v13527_v6, %v13465_v30  ;;  %v13210_v13 = vadd.f32 %v18537_v4, %v12822_v7  ;;  %v8917_v24 = vadd.f32 %v8643_v32, %v18983_v16  ;;  %v12552_v15 = vpop.f32.mrf.mxu0  ;;  %v18988_v6 = vld [vmem:[#allocation70_spill] sm:$0xff] }
 0x9b7   :  { %v13149_v35 = vadd.f32 %v18537_v4, %v18988_v6 }
 0x9b8   :  { %v13338_v12 = vmax.f32 %v13210_v13, 0.0  ;;  %v10219_v61 = vadd.f32 %v9945_v45, %v8917_v24 }
 0x9b9   :  { %v13277_v58 = vmax.f32 %v13149_v35, 0.0 }
 0x9ba   :  { %v13402_v49 = vsub.f32 %v13274_v17, %v13338_v12  ;;  %v11521_v59 = vadd.f32 %v11247_v62, %v10219_v61  ;;  %v18991_v61 = vld [vmem:[#allocation75_spill] sm:$0xff] }
 0x9bb   :  { %v9948_v21 = vpop.f32.mrf.mxu2  ;;  %v11250_v36 = vpop.f32.mrf.mxu3 }
 0x9bc   :  { %v13466_v18 = vand.u32 2147483647, %v13402_v49  ;;  %v12823_v51 = vadd.f32 %v12549_v40, %v11521_v59 }
 0x9bd   :  { %v8646_v1 = vpop.f32.mrf.mxu1 }
 0x9be   :  { %v13529_v22 = vadd.f32 %v13528_v8, %v13466_v18  ;;  %v13211_v46 = vadd.f32 %v18537_v4, %v12823_v51  ;;  %v8918_v60 = vadd.f32 %v8646_v1, %v18985_v44  ;;  %v12555_v55 = vpop.f32.mrf.mxu0  ;;  %v18990_v8 = vld [vmem:[#allocation73_spill] sm:$0xff]  ;;  %v18992_v1 = vld [vmem:[#allocation76_spill] sm:$0xff] }
 0x9bf   :  { %v13150_v13 = vadd.f32 %v18537_v4, %v18990_v8 }
 0x9c0   :  { %v13339_v19 = vmax.f32 %v13211_v46, 0.0  ;;  %v10220_v57 = vadd.f32 %v9948_v21, %v8918_v60 }
 0x9c1   :  { %v13278_v59 = vmax.f32 %v13150_v13, 0.0 }
 0x9c2   :  { %v13403_v2 = vsub.f32 %v13275_v34, %v13339_v19  ;;  %v11522_v28 = vadd.f32 %v11250_v36, %v10220_v57  ;;  %v18993_v57 = vld [vmem:[#allocation78_spill] sm:$0xff] }
 0x9c3   :  { %v9951_v43 = vpop.f32.mrf.mxu2  ;;  %v11253_v54 = vpop.f32.mrf.mxu3 }
 0x9c4   :  { %v13467_v33 = vand.u32 2147483647, %v13403_v2  ;;  %v12824_v31 = vadd.f32 %v12552_v15, %v11522_v28 }
 0x9c5   :  { %v8649_v47 = vpop.f32.mrf.mxu1 }
 0x9c6   :  { %v13530_v56 = vadd.f32 %v13529_v22, %v13467_v33  ;;  %v13212_v20 = vadd.f32 %v18537_v4, %v12824_v31  ;;  %v8919_v27 = vadd.f32 %v8649_v47, %v18987_v42  ;;  %v12558_v41 = vpop.f32.mrf.mxu0  ;;  %v13151_v22 = vadd.f32 %v18537_v4, %v18992_v1  ;;  %v18994_v31 = vld [vmem:[#allocation79_spill] sm:$0xff] }
 0x9c7   :  { %v13152_v47 = vadd.f32 %v18537_v4, %v18994_v31 }
 0x9c8   :  { %v13340_v25 = vmax.f32 %v13212_v20, 0.0  ;;  %v10221_v23 = vadd.f32 %v9951_v43, %v8919_v27  ;;  %v13279_v28 = vmax.f32 %v13151_v22, 0.0 }
 0x9ca   :  { %v13404_v9 = vsub.f32 %v13276_v5, %v13340_v25  ;;  %v11523_v29 = vadd.f32 %v11253_v54, %v10221_v23  ;;  %v18995_v23 = vld [vmem:[#allocation81_spill] sm:$0xff] }
 0x9cb   :  { %v9954_v39 = vpop.f32.mrf.mxu2  ;;  %v11256_v10 = vpop.f32.mrf.mxu3 }
 0x9cc   :  { %v13468_v48 = vand.u32 2147483647, %v13404_v9  ;;  %v12825_v52 = vadd.f32 %v12555_v55, %v11523_v29  ;;  %v13280_v29 = vmax.f32 %v13152_v47, 0.0 }
 0x9cd   :  { %v8652_v40 = vpop.f32.mrf.mxu1 }
 0x9ce   :  { %v13531_v53 = vadd.f32 %v13530_v56, %v13468_v48  ;;  %v13213_v3 = vadd.f32 %v18537_v4, %v12825_v52  ;;  %v8920_v37 = vadd.f32 %v8652_v40, %v18989_v63  ;;  %v12561_v30 = vpop.f32.mrf.mxu0  ;;  %v18996_v48 = vld [vmem:[#allocation82_spill] sm:$0xff] }
 0x9cf   :  { %v13153_v52 = vadd.f32 %v18537_v4, %v18996_v48 }
 0x9d0   :  { %v13341_v45 = vmax.f32 %v13213_v3, 0.0  ;;  %v10222_v62 = vadd.f32 %v9954_v39, %v8920_v37 }
 0x9d2   :  { %v13405_v26 = vsub.f32 %v13277_v58, %v13341_v45  ;;  %v11524_v0 = vadd.f32 %v11256_v10, %v10222_v62  ;;  %v18997_v45 = vld [vmem:[#allocation84_spill] sm:$0xff] }
 0x9d3   :  { %v9957_v7 = vpop.f32.mrf.mxu2  ;;  %v11259_v32 = vpop.f32.mrf.mxu3 }
 0x9d4   :  { %v13469_v16 = vand.u32 2147483647, %v13405_v26  ;;  %v12826_v24 = vadd.f32 %v12558_v41, %v11524_v0  ;;  %v13281_v0 = vmax.f32 %v13153_v52, 0.0 }
 0x9d5   :  { %v8655_v15 = vpop.f32.mrf.mxu1 }
 0x9d6   :  { %v13532_v17 = vadd.f32 %v13531_v53, %v13469_v16  ;;  %v13214_v12 = vadd.f32 %v18537_v4, %v12826_v24  ;;  %v8921_v49 = vadd.f32 %v8655_v15, %v18991_v61  ;;  %v12564_v60 = vpop.f32.mrf.mxu0  ;;  %v18998_v16 = vld [vmem:[#allocation85_spill] sm:$0xff] }
 0x9d7   :  { %v13154_v24 = vadd.f32 %v18537_v4, %v18998_v16 }
 0x9d8   :  { %v13342_v21 = vmax.f32 %v13214_v12, 0.0  ;;  %v10223_v36 = vadd.f32 %v9957_v7, %v8921_v49 }
 0x9da   :  { %v13406_v38 = vsub.f32 %v13278_v59, %v13342_v21  ;;  %v11525_v14 = vadd.f32 %v11259_v32, %v10223_v36  ;;  %v18999_v59 = vld [vmem:[#allocation87_spill] sm:$0xff] }
 0x9db   :  { %v9960_v18 = vpop.f32.mrf.mxu2  ;;  %v11262_v51 = vpop.f32.mrf.mxu3 }
 0x9dc   :  { %v13470_v46 = vand.u32 2147483647, %v13406_v38  ;;  %v12827_v44 = vadd.f32 %v12561_v30, %v11525_v14  ;;  %v13282_v38 = vmax.f32 %v13154_v24, 0.0 }
 0x9dd   :  { %v8658_v55 = vpop.f32.mrf.mxu1 }
 0x9de   :  { %v13533_v34 = vadd.f32 %v13532_v17, %v13470_v46  ;;  %v13215_v19 = vadd.f32 %v18537_v4, %v12827_v44  ;;  %v8922_v2 = vadd.f32 %v8658_v55, %v18993_v57  ;;  %v12567_v9 = vpop.f32.mrf.mxu0  ;;  %v19000_v44 = vld [vmem:[#allocation88_spill] sm:$0xff] }
 0x9e0   :  { %v13343_v43 = vmax.f32 %v13215_v19, 0.0  ;;  %v10224_v54 = vadd.f32 %v9960_v18, %v8922_v2 }
 0x9e2   :  { %v13407_v11 = vsub.f32 %v13279_v28, %v13343_v43  ;;  %v11526_v50 = vadd.f32 %v11262_v51, %v10224_v54 }
 0x9e3   :  { %v9963_v33 = vpop.f32.mrf.mxu2  ;;  %v11265_v42 = vpop.f32.mrf.mxu3 }
 0x9e4   :  { %v13471_v56 = vand.u32 2147483647, %v13407_v11  ;;  %v12828_v20 = vadd.f32 %v12564_v60, %v11526_v50  ;;  %v13155_v60 = vadd.f32 %v18537_v4, %v19000_v44 }
 0x9e5   :  { %v8661_v27 = vpop.f32.mrf.mxu1 }
 0x9e6   :  { %v13534_v5 = vadd.f32 %v13533_v34, %v13471_v56  ;;  %v13216_v25 = vadd.f32 %v18537_v4, %v12828_v20  ;;  %v8923_v41 = vadd.f32 %v8661_v27, %v18995_v23  ;;  %v12570_v32 = vpop.f32.mrf.mxu0  ;;  %v13283_v2 = vmax.f32 %v13155_v60, 0.0 }
 0x9e8   :  { %v13344_v39 = vmax.f32 %v13216_v25, 0.0  ;;  %v10225_v10 = vadd.f32 %v9963_v33, %v8923_v41 }
 0x9ea   :  { %v13408_v6 = vsub.f32 %v13280_v29, %v13344_v39  ;;  %v11527_v35 = vadd.f32 %v11265_v42, %v10225_v10 }
 0x9eb   :  { %v9966_v3 = vpop.f32.mrf.mxu2  ;;  %v11268_v26 = vpop.f32.mrf.mxu3 }
 0x9ec   :  { %v13472_v40 = vand.u32 2147483647, %v13408_v6  ;;  %v12829_v53 = vadd.f32 %v12567_v9, %v11527_v35 }
 0x9ed   :  { %v8664_v63 = vpop.f32.mrf.mxu1 }
 0x9ee   :  { %v13535_v37 = vadd.f32 %v13534_v5, %v13472_v40  ;;  %v13217_v58 = vadd.f32 %v18537_v4, %v12829_v53  ;;  %v8924_v62 = vadd.f32 %v8664_v63, %v18997_v45  ;;  %v12573_v46 = vpop.f32.mrf.mxu0 }
 0x9f0   :  { %v13345_v30 = vmax.f32 %v13217_v58, 0.0  ;;  %v10226_v7 = vadd.f32 %v9966_v3, %v8924_v62 }
 0x9f2   :  { %v13409_v8 = vsub.f32 %v13281_v0, %v13345_v30  ;;  %v11528_v13 = vadd.f32 %v11268_v26, %v10226_v7 }
 0x9f3   :  { %v9969_v36 = vpop.f32.mrf.mxu2  ;;  %v11271_v51 = vpop.f32.mrf.mxu3 }
 0x9f4   :  { %v13473_v15 = vand.u32 2147483647, %v13409_v8  ;;  %v12830_v17 = vadd.f32 %v12570_v32, %v11528_v13 }
 0x9f5   :  { %v8667_v12 = vpop.f32.mrf.mxu1 }
 0x9f6   :  { %v13536_v61 = vadd.f32 %v13535_v37, %v13473_v15  ;;  %v13218_v49 = vadd.f32 %v18537_v4, %v12830_v17  ;;  %v8925_v21 = vadd.f32 %v8667_v12, %v18999_v59 }
 0x9f8   :  { %v13346_v14 = vmax.f32 %v13218_v49, 0.0  ;;  %v10227_v18 = vadd.f32 %v9969_v36, %v8925_v21 }
 0x9fa   :  { %v13410_v1 = vsub.f32 %v13282_v38, %v13346_v14  ;;  %v11529_v22 = vadd.f32 %v11271_v51, %v10227_v18 }
 0x9fc   :  { %v13474_v55 = vand.u32 2147483647, %v13410_v1  ;;  %v12831_v34 = vadd.f32 %v12573_v46, %v11529_v22 }
 0x9fe   :  { %v13219_v19 = vadd.f32 %v18537_v4, %v12831_v34  ;;  %v13537_v57 = vadd.f32 %v13536_v61, %v13474_v55 }
 0xa00   :  { %v13347_v28 = vmax.f32 %v13219_v19, 0.0 }
 0xa02   :  { %v13411_v43 = vsub.f32 %v13283_v2, %v13347_v28 }
 0xa04   :  { %v13475_v54 = vand.u32 2147483647, %v13411_v43 }
 0xa06   :  { %v13538_v11 = vadd.f32 %v13537_v57, %v13475_v54 }
 0xa08   :  { %v13539_v50 = vrot.slane %v13538_v11, 4 }
 0xa0a   :  { %v13540_v33 = vadd.f32 %v13539_v50, %v13538_v11 }
 0xa0c   :  { %v13541_v31 = vrot.slane %v13540_v33, 2 }
 0xa0e   :  { %v13542_v47 = vadd.f32 %v13541_v31, %v13540_v33 }
 0xa10   :  { %v13543_v56 = vrot.slane %v13542_v47, 1 }
 0xa12   :  { %v13544_v20 = vadd.f32 %v13543_v56, %v13542_v47 }
 0xa14   :  { %13545 = vst [vmem:[#allocation4] sm:$0x1] %v13544_v20 }
 0xa15   :  { %13556 = dma.vmem_to_hbm [thread:$0]  %s13552_s16, 16, %s13554_s15, [#allocation5]  }
 0xa16   :  { %15236 = dma.done.wait [#allocation5], 16  }
 0xa17   :  { %15237 = vsyncadd [#allocation5], 4294967280 }
 0xa18   :  { %13561 = vsyncpa [#allocation5], 1 }

</bundles_post_ra>
